<compile_context>
chip_gen: v7x
topology: tpu7x:2x2x1
jax: 0.10.0
libtpu: 0.0.40
codegen_flags: <defaults>
</compile_context>

<pallas_src>
import functools
import math

import jax
import jax.numpy as jnp
from jax.experimental import pallas as pl
from jax.experimental.pallas import tpu as pltpu


# ---------------------------------------------------------------------------
# In-kernel helpers (traced inside the Pallas kernel)
# ---------------------------------------------------------------------------

def _layernorm(x, g, b, eps):
    mean = jnp.mean(x, axis=-1, keepdims=True)
    var = jnp.mean(jnp.square(x - mean), axis=-1, keepdims=True)
    return (x - mean) * jax.lax.rsqrt(var + eps) * g + b


def _attn_heads(q, k, v, wo, num_head):
    """All-head attention fused with the output projection.

    q: (M, D), k/v: (N, D).  sum_h softmax(q_h k_h^T) v_h @ W_o[h*dh:(h+1)*dh]
    == concat(heads) @ W_o, but every matmul result is D lanes wide (no dh-lane
    masked stores, no concatenate).  The 1/sqrt(dh) scale is folded into the Q
    projection weights outside the kernel.
    """
    D = q.shape[-1]
    dh = D // num_head
    out = None
    for h in range(num_head):
        sl = slice(h * dh, (h + 1) * dh)
        # q_h @ k_h^T without materializing a transpose.
        s = jax.lax.dot_general(q[:, sl], k[:, sl], (((1,), (1,)), ((), ())),
                                preferred_element_type=jnp.float32)           # (M, N)
        s = s - jnp.max(s, axis=-1, keepdims=True)
        p = jnp.exp(s)
        p = p * pl.reciprocal(jnp.sum(p, axis=-1, keepdims=True), approx=False)
        ctx = jnp.dot(p, v[:, sl], preferred_element_type=jnp.float32)        # (M, dh)
        proj = jnp.dot(ctx, wo[sl, :], preferred_element_type=jnp.float32)    # (M, D)
        out = proj if out is None else out + proj
    return out


# ---------------------------------------------------------------------------
# Fused whole-forward kernel: grid = (batch,), everything else in one step.
# ---------------------------------------------------------------------------

def _panel_encoder_kernel(cx_ref, cy_ref, tx_ref,
                          wx_ref, wy_ref, bin_ref, wq_ref, bq_ref,
                          wqkv_ref, bqkv_ref, wso_ref, bso_ref,
                          wcq_ref, bcq_ref, wckv_ref, bckv_ref, wco_ref, bco_ref,
                          w1_ref, b1_ref, w2_ref, b2_ref, lng_ref, lnb_ref,
                          o_ref, *, num_head, num_layer, num_panel, eps):
    f32 = jnp.float32
    ns = num_panel
    cx = cx_ref[...].astype(f32)          # (n, x_dim)
    cy = cy_ref[...].astype(f32)          # (n, ns, d) -- native layout, no HBM transpose
    tx = tx_ref[...].astype(f32)          # (m, x_dim)
    n = cx.shape[0]
    m = tx.shape[0]
    D = wq_ref.shape[1]

    # ---- prologue: input_map (context encoding) + query_map ----------------
    cx_proj = jnp.dot(cx, wx_ref[...], preferred_element_type=f32)            # (n, D)
    mem_panels = [
        cx_proj
        + jnp.dot(cy[:, s, :], wy_ref[...], preferred_element_type=f32)
        + bin_ref[...]
        for s in range(ns)
    ]
    mem_all = jnp.concatenate(mem_panels, axis=0)                             # (ns*n, D)

    x0 = jnp.dot(tx, wq_ref[...], preferred_element_type=f32) + bq_ref[...]   # (m, D)

    # ---- decoder building blocks (row-flattened over panels where exact) ---
    def self_block(x_rows, n_groups, li):
        qkv = jnp.dot(x_rows, wqkv_ref[li], preferred_element_type=f32) + bqkv_ref[li]
        outs = []
        for g in range(n_groups):
            r = slice(g * m, (g + 1) * m)
            outs.append(_attn_heads(qkv[r, 0:D], qkv[r, D:2 * D], qkv[r, 2 * D:3 * D],
                                    wso_ref[li], num_head))
        att = outs[0] if n_groups == 1 else jnp.concatenate(outs, axis=0)
        return att + bso_ref[li]

    def cross_block(x_rows, li):
        q_all = jnp.dot(x_rows, wcq_ref[li], preferred_element_type=f32) + bcq_ref[li]
        kv_all = jnp.dot(mem_all, wckv_ref[li], preferred_element_type=f32) + bckv_ref[li]
        outs = []
        for s in range(ns):
            q = q_all[s * m:(s + 1) * m, :]
            k = kv_all[s * n:(s + 1) * n, 0:D]
            v = kv_all[s * n:(s + 1) * n, D:2 * D]
            outs.append(_attn_heads(q, k, v, wco_ref[li], num_head))
        return jnp.concatenate(outs, axis=0) + bco_ref[li]

    def ffn_block(x_rows, li):
        h = jnp.dot(x_rows, w1_ref[li], preferred_element_type=f32) + b1_ref[li]
        h = jnp.maximum(h, 0.0)
        return jnp.dot(h, w2_ref[li], preferred_element_type=f32) + b2_ref[li]

    # Layer 0: the query stream is identical across panels before the first
    # cross-attention, so self-attention + LN run ONCE on (m, D).
    lg, lb = lng_ref[0], lnb_ref[0]
    x = _layernorm(self_block(x0, 1, 0) + x0, lg[0:1], lb[0:1], eps)
    x_all = jnp.concatenate([x] * ns, axis=0)                                 # (ns*m, D)
    x_all = _layernorm(cross_block(x_all, 0) + x_all, lg[1:2], lb[1:2], eps)
    x_all = _layernorm(ffn_block(x_all, 0) + x_all, lg[2:3], lb[2:3], eps)

    # Layers 1..L-1 (statically unrolled; residual stream stays in VMEM/vregs).
    for li in range(1, num_layer):
        lg, lb = lng_ref[li], lnb_ref[li]
        x_all = _layernorm(self_block(x_all, ns, li) + x_all, lg[0:1], lb[0:1], eps)
        x_all = _layernorm(cross_block(x_all, li) + x_all, lg[1:2], lb[1:2], eps)
        x_all = _layernorm(ffn_block(x_all, li) + x_all, lg[2:3], lb[2:3], eps)

    # ---- epilogue: emit directly in the final (m, ns, D) layout -------------
    out_val = jnp.stack([x_all[s * m:(s + 1) * m, :] for s in range(ns)], axis=1)
    o_ref[...] = out_val.astype(o_ref.dtype)


# ---------------------------------------------------------------------------
# pallas_call wrapper (single launch for the whole forward)
# ---------------------------------------------------------------------------

def _full_spec(a):
    nd = a.ndim
    return pl.BlockSpec(a.shape, lambda bi, _nd=nd: (0,) * _nd)


def panel_encoder_forward(params, context_x, context_y, target_x, *, num_head):
    """context_x: (b, n, x_dim), context_y: (b, n, ns, d), target_x: (b, m, x_dim)
    -> (b, m, ns, D)."""
    b, n, ns, d = context_y.shape
    m, x_dim = target_x.shape[-2], target_x.shape[-1]
    D = params["query_w"].shape[1]
    L = params["wqkv"].shape[0]

    weights = [params["input_wx"], params["input_wy"], params["input_b"],
               params["query_w"], params["query_b"],
               params["wqkv"], params["bqkv"], params["wso"], params["bso"],
               params["wcq"], params["bcq"], params["wckv"], params["bckv"],
               params["wco"], params["bco"],
               params["ffn_w1"], params["ffn_b1"], params["ffn_w2"], params["ffn_b2"],
               params["ln_g"], params["ln_b"]]

    kernel = functools.partial(_panel_encoder_kernel,
                               num_head=num_head, num_layer=L, num_panel=ns, eps=1e-5)

    return pl.pallas_call(
        kernel,
        out_shape=jax.ShapeDtypeStruct((b, m, ns, D), context_x.dtype),
        grid=(b,),
        in_specs=[
            pl.BlockSpec((None, n, x_dim), lambda bi: (bi, 0, 0)),
            pl.BlockSpec((None, n, ns, d), lambda bi: (bi, 0, 0, 0)),
            pl.BlockSpec((None, m, x_dim), lambda bi: (bi, 0, 0)),
        ] + [_full_spec(a) for a in weights],
        out_specs=pl.BlockSpec((None, m, ns, D), lambda bi: (bi, 0, 0, 0)),
        compiler_params=pltpu.CompilerParams(dimension_semantics=("parallel",)),
    )(context_x, context_y, target_x, *weights)


# ---------------------------------------------------------------------------
# Pure-JAX reference (same fused parameterization) for a correctness check
# ---------------------------------------------------------------------------

def panel_encoder_reference(params, context_x, context_y, target_x, *, num_head):
    b, n, ns, d = context_y.shape
    D = params["query_w"].shape[1]
    L = params["wqkv"].shape[0]
    eps = 1e-5

    def layernorm(x, g, bta):
        mu = jnp.mean(x, axis=-1, keepdims=True)
        var = jnp.mean(jnp.square(x - mu), axis=-1, keepdims=True)
        return (x - mu) / jnp.sqrt(var + eps) * g + bta

    def mha(q, k, v, wo, bo):
        dh = D // num_head
        outs = []
        for h in range(num_head):
            sl = slice(h * dh, (h + 1) * dh)
            s = q[..., sl] @ jnp.swapaxes(k[..., sl], -1, -2)
            p = jax.nn.softmax(s, axis=-1)
            outs.append(p @ v[..., sl])
        return jnp.concatenate(outs, axis=-1) @ wo + bo

    cy = jnp.transpose(context_y, (0, 2, 1, 3))                     # (b, ns, n, d)
    mem = (context_x[:, None] @ params["input_wx"]
           + cy @ params["input_wy"] + params["input_b"])           # (b, ns, n, D)
    x = target_x @ params["query_w"] + params["query_b"]            # (b, m, D)
    x = jnp.broadcast_to(x[:, None], (b, ns) + x.shape[1:])         # (b, ns, m, D)

    for li in range(L):
        qkv = x @ params["wqkv"][li] + params["bqkv"][li]
        sa = mha(qkv[..., :D], qkv[..., D:2 * D], qkv[..., 2 * D:],
                 params["wso"][li], params["bso"][li])
        x = layernorm(sa + x, params["ln_g"][li][0], params["ln_b"][li][0])
        q = x @ params["wcq"][li] + params["bcq"][li]
        kv = mem @ params["wckv"][li] + params["bckv"][li]
        ca = mha(q, kv[..., :D], kv[..., D:], params["wco"][li], params["bco"][li])
        x = layernorm(ca + x, params["ln_g"][li][1], params["ln_b"][li][1])
        h = jax.nn.relu(x @ params["ffn_w1"][li] + params["ffn_b1"][li])
        h = h @ params["ffn_w2"][li] + params["ffn_b2"][li]
        x = layernorm(h + x, params["ln_g"][li][2], params["ln_b"][li][2])

    return jnp.transpose(x, (0, 2, 1, 3))                           # (b, m, ns, D)


# ---------------------------------------------------------------------------
# Deterministic synthetic parameters + fusion/stacking prep
# ---------------------------------------------------------------------------

def _lin_init(key, din, dout):
    kw, kb = jax.random.split(key)
    w = jax.random.normal(kw, (din, dout), jnp.float32) / math.sqrt(din)
    b = jax.random.normal(kb, (1, dout), jnp.float32) * 0.01
    return w, b


def _mha_init(key, d):
    ks = jax.random.split(key, 4)
    p = {}
    for name, k in zip(("q", "k", "v", "o"), ks):
        p["w" + name], p["b" + name] = _lin_init(k, d, d)
    return p


def init_params(key, num_hidden, x_dim, num_layer, ffn_mult=4):
    keys = jax.random.split(key, 2 + num_layer)
    params = {}
    params["input_w"], params["input_b"] = _lin_init(keys[0], num_hidden + x_dim, num_hidden)
    params["query_w"], params["query_b"] = _lin_init(keys[1], x_dim, num_hidden)
    layers = []
    for li in range(num_layer):
        lk = jax.random.split(keys[2 + li], 4)
        layer = {"self": _mha_init(lk[0], num_hidden), "cross": _mha_init(lk[1], num_hidden)}
        layer["ffn_w1"], layer["ffn_b1"] = _lin_init(lk[2], num_hidden, ffn_mult * num_hidden)
        layer["ffn_w2"], layer["ffn_b2"] = _lin_init(lk[3], ffn_mult * num_hidden, num_hidden)
        for i in (1, 2, 3):
            layer[f"ln{i}_g"] = jnp.ones((1, num_hidden), jnp.float32)
            layer[f"ln{i}_b"] = jnp.zeros((1, num_hidden), jnp.float32)
        layers.append(layer)
    params["layers"] = layers
    return params


def prepare_params(nat, *, num_head, x_dim):
    """Pack natural params into the fused/stacked layout the kernel expects.

    - input_w split into context_x / context_y halves (no in-kernel concat).
    - wq/wk/wv merged into one (D, 3D) matmul; 1/sqrt(dh) folded into wq & bq.
    - Every per-layer tensor stacked along a new leading L axis (one DMA each).
    """
    D = nat["query_w"].shape[1]
    assert D % num_head == 0
    scale = 1.0 / math.sqrt(D // num_head)

    fused = {
        "input_wx": nat["input_w"][:x_dim],
        "input_wy": nat["input_w"][x_dim:],
        "input_b": nat["input_b"],
        "query_w": nat["query_w"],
        "query_b": nat["query_b"],
    }

    def stack(fn):
        return jnp.stack([fn(lp) for lp in nat["layers"]], axis=0)

    fused["wqkv"] = stack(lambda lp: jnp.concatenate(
        [lp["self"]["wq"] * scale, lp["self"]["wk"], lp["self"]["wv"]], axis=1))
    fused["bqkv"] = stack(lambda lp: jnp.concatenate(
        [lp["self"]["bq"] * scale, lp["self"]["bk"], lp["self"]["bv"]], axis=1))
    fused["wso"] = stack(lambda lp: lp["self"]["wo"])
    fused["bso"] = stack(lambda lp: lp["self"]["bo"])
    fused["wcq"] = stack(lambda lp: lp["cross"]["wq"] * scale)
    fused["bcq"] = stack(lambda lp: lp["cross"]["bq"] * scale)
    fused["wckv"] = stack(lambda lp: jnp.concatenate(
        [lp["cross"]["wk"], lp["cross"]["wv"]], axis=1))
    fused["bckv"] = stack(lambda lp: jnp.concatenate(
        [lp["cross"]["bk"], lp["cross"]["bv"]], axis=1))
    fused["wco"] = stack(lambda lp: lp["cross"]["wo"])
    fused["bco"] = stack(lambda lp: lp["cross"]["bo"])
    fused["ffn_w1"] = stack(lambda lp: lp["ffn_w1"])
    fused["ffn_b1"] = stack(lambda lp: lp["ffn_b1"])
    fused["ffn_w2"] = stack(lambda lp: lp["ffn_w2"])
    fused["ffn_b2"] = stack(lambda lp: lp["ffn_b2"])
    fused["ln_g"] = stack(lambda lp: jnp.concatenate(
        [lp["ln1_g"], lp["ln2_g"], lp["ln3_g"]], axis=0))
    fused["ln_b"] = stack(lambda lp: jnp.concatenate(
        [lp["ln1_b"], lp["ln2_b"], lp["ln3_b"]], axis=0))
    return fused


# ---------------------------------------------------------------------------
# Demo
# ---------------------------------------------------------------------------

if __name__ == "__main__":
    b, n, m, ns = 2, 8, 6, 3
    num_hidden, x_dim = 32, 4        # context_y feature dim d must equal num_hidden
    num_layer, num_head = 2, 4

    key = jax.random.PRNGKey(0)
    k1, k2, k3, kp = jax.random.split(key, 4)
    context_x = jax.random.normal(k1, (b, n, x_dim), jnp.float32)
    context_y = jax.random.normal(k2, (b, n, ns, num_hidden), jnp.float32)
    target_x = jax.random.normal(k3, (b, m, x_dim), jnp.float32)

    nat_params = init_params(kp, num_hidden, x_dim, num_layer)
    params = prepare_params(nat_params, num_head=num_head, x_dim=x_dim)

    fwd = jax.jit(functools.partial(panel_encoder_forward, num_head=num_head))
    out = jax.block_until_ready(fwd(params, context_x, context_y, target_x))

    assert out.shape == (b, m, ns, num_hidden), out.shape
    assert bool(jnp.all(jnp.isfinite(out)))

    ref = panel_encoder_reference(params, context_x, context_y, target_x, num_head=num_head)
    max_err = float(jnp.max(jnp.abs(out - ref)))
    assert max_err < 1e-2, f"kernel vs reference max abs error {max_err}"

    print("KERNEL_OK")
</pallas_src>

<mosaic_0001>
module attributes {stable_mosaic.version = 11 : i64} {
  func.func @_panel_encoder_kernel(%arg0: i32, %arg1: memref<1x8x4xf32, #tpu.memory_space<vmem>>, %arg2: memref<1x8x3x32xf32, #tpu.memory_space<vmem>>, %arg3: memref<1x6x4xf32, #tpu.memory_space<vmem>>, %arg4: memref<4x32xf32, #tpu.memory_space<vmem>>, %arg5: memref<32x32xf32, #tpu.memory_space<vmem>>, %arg6: memref<1x32xf32, #tpu.memory_space<vmem>>, %arg7: memref<4x32xf32, #tpu.memory_space<vmem>>, %arg8: memref<1x32xf32, #tpu.memory_space<vmem>>, %arg9: memref<2x32x96xf32, #tpu.memory_space<vmem>>, %arg10: memref<2x1x96xf32, #tpu.memory_space<vmem>>, %arg11: memref<2x32x32xf32, #tpu.memory_space<vmem>>, %arg12: memref<2x1x32xf32, #tpu.memory_space<vmem>>, %arg13: memref<2x32x32xf32, #tpu.memory_space<vmem>>, %arg14: memref<2x1x32xf32, #tpu.memory_space<vmem>>, %arg15: memref<2x32x64xf32, #tpu.memory_space<vmem>>, %arg16: memref<2x1x64xf32, #tpu.memory_space<vmem>>, %arg17: memref<2x32x32xf32, #tpu.memory_space<vmem>>, %arg18: memref<2x1x32xf32, #tpu.memory_space<vmem>>, %arg19: memref<2x32x128xf32, #tpu.memory_space<vmem>>, %arg20: memref<2x1x128xf32, #tpu.memory_space<vmem>>, %arg21: memref<2x128x32xf32, #tpu.memory_space<vmem>>, %arg22: memref<2x1x32xf32, #tpu.memory_space<vmem>>, %arg23: memref<2x3x32xf32, #tpu.memory_space<vmem>>, %arg24: memref<2x3x32xf32, #tpu.memory_space<vmem>>, %arg25: memref<1x6x3x32xf32, #tpu.memory_space<vmem>>) attributes {dimension_semantics = [#tpu.dimension_semantics<parallel>], iteration_bounds = array<i64: 2>, scalar_prefetch = 0 : i64, scratch_operands = 0 : i64, tpu.core_type = #tpu.core_type<tc>, window_params = [{transform_indices = @transform_0, window_bounds = array<i64: 1, 8, 4>}, {transform_indices = @transform_1, window_bounds = array<i64: 1, 8, 3, 32>}, {transform_indices = @transform_2, window_bounds = array<i64: 1, 6, 4>}, {pipeline_mode = #tpu.pipeline_mode<synchronous>, transform_indices = @transform_3, window_bounds = array<i64: 4, 32>}, {pipeline_mode = #tpu.pipeline_mode<synchronous>, transform_indices = @transform_4, window_bounds = array<i64: 32, 32>}, {pipeline_mode = #tpu.pipeline_mode<synchronous>, transform_indices = @transform_5, window_bounds = array<i64: 1, 32>}, {pipeline_mode = #tpu.pipeline_mode<synchronous>, transform_indices = @transform_6, window_bounds = array<i64: 4, 32>}, {pipeline_mode = #tpu.pipeline_mode<synchronous>, transform_indices = @transform_7, window_bounds = array<i64: 1, 32>}, {pipeline_mode = #tpu.pipeline_mode<synchronous>, transform_indices = @transform_8, window_bounds = array<i64: 2, 32, 96>}, {pipeline_mode = #tpu.pipeline_mode<synchronous>, transform_indices = @transform_9, window_bounds = array<i64: 2, 1, 96>}, {pipeline_mode = #tpu.pipeline_mode<synchronous>, transform_indices = @transform_10, window_bounds = array<i64: 2, 32, 32>}, {pipeline_mode = #tpu.pipeline_mode<synchronous>, transform_indices = @transform_11, window_bounds = array<i64: 2, 1, 32>}, {pipeline_mode = #tpu.pipeline_mode<synchronous>, transform_indices = @transform_12, window_bounds = array<i64: 2, 32, 32>}, {pipeline_mode = #tpu.pipeline_mode<synchronous>, transform_indices = @transform_13, window_bounds = array<i64: 2, 1, 32>}, {pipeline_mode = #tpu.pipeline_mode<synchronous>, transform_indices = @transform_14, window_bounds = array<i64: 2, 32, 64>}, {pipeline_mode = #tpu.pipeline_mode<synchronous>, transform_indices = @transform_15, window_bounds = array<i64: 2, 1, 64>}, {pipeline_mode = #tpu.pipeline_mode<synchronous>, transform_indices = @transform_16, window_bounds = array<i64: 2, 32, 32>}, {pipeline_mode = #tpu.pipeline_mode<synchronous>, transform_indices = @transform_17, window_bounds = array<i64: 2, 1, 32>}, {pipeline_mode = #tpu.pipeline_mode<synchronous>, transform_indices = @transform_18, window_bounds = array<i64: 2, 32, 128>}, {pipeline_mode = #tpu.pipeline_mode<synchronous>, transform_indices = @transform_19, window_bounds = array<i64: 2, 1, 128>}, {pipeline_mode = #tpu.pipeline_mode<synchronous>, transform_indices = @transform_20, window_bounds = array<i64: 2, 128, 32>}, {pipeline_mode = #tpu.pipeline_mode<synchronous>, transform_indices = @transform_21, window_bounds = array<i64: 2, 1, 32>}, {pipeline_mode = #tpu.pipeline_mode<synchronous>, transform_indices = @transform_22, window_bounds = array<i64: 2, 3, 32>}, {pipeline_mode = #tpu.pipeline_mode<synchronous>, transform_indices = @transform_23, window_bounds = array<i64: 2, 3, 32>}, {transform_indices = @transform_24, window_bounds = array<i64: 1, 6, 3, 32>}]} {
    %c0 = arith.constant 0 : index
    %c0_0 = arith.constant 0 : index
    %c0_1 = arith.constant 0 : index
    %0 = vector.load %arg1[%c0, %c0_0, %c0_1] : memref<1x8x4xf32, #tpu.memory_space<vmem>>, vector<1x8x4xf32>
    %1 = vector.shape_cast %0 : vector<1x8x4xf32> to vector<8x4xf32>
    %c0_2 = arith.constant 0 : index
    %c0_3 = arith.constant 0 : index
    %c0_4 = arith.constant 0 : index
    %c0_5 = arith.constant 0 : index
    %2 = vector.load %arg2[%c0_2, %c0_3, %c0_4, %c0_5] : memref<1x8x3x32xf32, #tpu.memory_space<vmem>>, vector<1x8x3x32xf32>
    %3 = vector.shape_cast %2 : vector<1x8x3x32xf32> to vector<8x3x32xf32>
    %c0_6 = arith.constant 0 : index
    %c0_7 = arith.constant 0 : index
    %c0_8 = arith.constant 0 : index
    %4 = vector.load %arg3[%c0_6, %c0_7, %c0_8] : memref<1x6x4xf32, #tpu.memory_space<vmem>>, vector<1x6x4xf32>
    %5 = vector.shape_cast %4 : vector<1x6x4xf32> to vector<6x4xf32>
    %c0_9 = arith.constant 0 : index
    %c0_10 = arith.constant 0 : index
    %6 = vector.load %arg4[%c0_9, %c0_10] : memref<4x32xf32, #tpu.memory_space<vmem>>, vector<4x32xf32>
    %cst = arith.constant dense<0.000000e+00> : vector<8x32xf32>
    %7 = tpu.matmul %1, %6, %cst {dimension_numbers = #tpu.dot_dimension_numbers<[1], [0], [0], [1], [0, 0, 1, 1], [], []>} : vector<8x4xf32>, vector<4x32xf32>, vector<8x32xf32> -> vector<8x32xf32>
    %8 = vector.extract_strided_slice %3 {offsets = [0, 0, 0], sizes = [8, 1, 32], strides = [1, 1, 1]} : vector<8x3x32xf32> to vector<8x1x32xf32>
    %9 = vector.shape_cast %8 : vector<8x1x32xf32> to vector<8x32xf32>
    %c0_11 = arith.constant 0 : index
    %c0_12 = arith.constant 0 : index
    %10 = vector.load %arg5[%c0_11, %c0_12] : memref<32x32xf32, #tpu.memory_space<vmem>>, vector<32x32xf32>
    %cst_13 = arith.constant dense<0.000000e+00> : vector<8x32xf32>
    %11 = tpu.matmul %9, %10, %cst_13 {dimension_numbers = #tpu.dot_dimension_numbers<[1], [0], [0], [1], [0, 0, 1, 1], [], []>} : vector<8x32xf32>, vector<32x32xf32>, vector<8x32xf32> -> vector<8x32xf32>
    %12 = arith.addf %7, %11 : vector<8x32xf32>
    %c0_14 = arith.constant 0 : index
    %c0_15 = arith.constant 0 : index
    %13 = vector.load %arg6[%c0_14, %c0_15] : memref<1x32xf32, #tpu.memory_space<vmem>>, vector<1x32xf32>
    %14 = vector.broadcast %13 : vector<1x32xf32> to vector<8x32xf32>
    %15 = arith.addf %12, %14 : vector<8x32xf32>
    %16 = vector.extract_strided_slice %3 {offsets = [0, 1, 0], sizes = [8, 1, 32], strides = [1, 1, 1]} : vector<8x3x32xf32> to vector<8x1x32xf32>
    %17 = vector.shape_cast %16 : vector<8x1x32xf32> to vector<8x32xf32>
    %c0_16 = arith.constant 0 : index
    %c0_17 = arith.constant 0 : index
    %18 = vector.load %arg5[%c0_16, %c0_17] : memref<32x32xf32, #tpu.memory_space<vmem>>, vector<32x32xf32>
    %cst_18 = arith.constant dense<0.000000e+00> : vector<8x32xf32>
    %19 = tpu.matmul %17, %18, %cst_18 {dimension_numbers = #tpu.dot_dimension_numbers<[1], [0], [0], [1], [0, 0, 1, 1], [], []>} : vector<8x32xf32>, vector<32x32xf32>, vector<8x32xf32> -> vector<8x32xf32>
    %20 = arith.addf %7, %19 : vector<8x32xf32>
    %c0_19 = arith.constant 0 : index
    %c0_20 = arith.constant 0 : index
    %21 = vector.load %arg6[%c0_19, %c0_20] : memref<1x32xf32, #tpu.memory_space<vmem>>, vector<1x32xf32>
    %22 = vector.broadcast %21 : vector<1x32xf32> to vector<8x32xf32>
    %23 = arith.addf %20, %22 : vector<8x32xf32>
    %24 = vector.extract_strided_slice %3 {offsets = [0, 2, 0], sizes = [8, 1, 32], strides = [1, 1, 1]} : vector<8x3x32xf32> to vector<8x1x32xf32>
    %25 = vector.shape_cast %24 : vector<8x1x32xf32> to vector<8x32xf32>
    %c0_21 = arith.constant 0 : index
    %c0_22 = arith.constant 0 : index
    %26 = vector.load %arg5[%c0_21, %c0_22] : memref<32x32xf32, #tpu.memory_space<vmem>>, vector<32x32xf32>
    %cst_23 = arith.constant dense<0.000000e+00> : vector<8x32xf32>
    %27 = tpu.matmul %25, %26, %cst_23 {dimension_numbers = #tpu.dot_dimension_numbers<[1], [0], [0], [1], [0, 0, 1, 1], [], []>} : vector<8x32xf32>, vector<32x32xf32>, vector<8x32xf32> -> vector<8x32xf32>
    %28 = arith.addf %7, %27 : vector<8x32xf32>
    %c0_24 = arith.constant 0 : index
    %c0_25 = arith.constant 0 : index
    %29 = vector.load %arg6[%c0_24, %c0_25] : memref<1x32xf32, #tpu.memory_space<vmem>>, vector<1x32xf32>
    %30 = vector.broadcast %29 : vector<1x32xf32> to vector<8x32xf32>
    %31 = arith.addf %28, %30 : vector<8x32xf32>
    %32 = tpu.concatenate %15, %23, %31 in 0 : vector<8x32xf32>, vector<8x32xf32>, vector<8x32xf32> -> vector<24x32xf32>
    %c0_26 = arith.constant 0 : index
    %c0_27 = arith.constant 0 : index
    %33 = vector.load %arg7[%c0_26, %c0_27] : memref<4x32xf32, #tpu.memory_space<vmem>>, vector<4x32xf32>
    %cst_28 = arith.constant dense<0.000000e+00> : vector<6x32xf32>
    %34 = tpu.matmul %5, %33, %cst_28 {dimension_numbers = #tpu.dot_dimension_numbers<[1], [0], [0], [1], [0, 0, 1, 1], [], []>} : vector<6x4xf32>, vector<4x32xf32>, vector<6x32xf32> -> vector<6x32xf32>
    %c0_29 = arith.constant 0 : index
    %c0_30 = arith.constant 0 : index
    %35 = vector.load %arg8[%c0_29, %c0_30] : memref<1x32xf32, #tpu.memory_space<vmem>>, vector<1x32xf32>
    %36 = vector.broadcast %35 : vector<1x32xf32> to vector<6x32xf32>
    %37 = arith.addf %34, %36 : vector<6x32xf32>
    %c0_31 = arith.constant 0 : index
    %c0_32 = arith.constant 0 : index
    %c0_33 = arith.constant 0 : index
    %38 = vector.load %arg23[%c0_31, %c0_32, %c0_33] : memref<2x3x32xf32, #tpu.memory_space<vmem>>, vector<1x3x32xf32>
    %39 = vector.shape_cast %38 : vector<1x3x32xf32> to vector<3x32xf32>
    %c0_34 = arith.constant 0 : index
    %c0_35 = arith.constant 0 : index
    %c0_36 = arith.constant 0 : index
    %40 = vector.load %arg24[%c0_34, %c0_35, %c0_36] : memref<2x3x32xf32, #tpu.memory_space<vmem>>, vector<1x3x32xf32>
    %41 = vector.shape_cast %40 : vector<1x3x32xf32> to vector<3x32xf32>
    %c0_37 = arith.constant 0 : index
    %c0_38 = arith.constant 0 : index
    %c0_39 = arith.constant 0 : index
    %42 = vector.load %arg9[%c0_37, %c0_38, %c0_39] : memref<2x32x96xf32, #tpu.memory_space<vmem>>, vector<1x32x96xf32>
    %43 = vector.shape_cast %42 : vector<1x32x96xf32> to vector<32x96xf32>
    %cst_40 = arith.constant dense<0.000000e+00> : vector<6x96xf32>
    %44 = tpu.matmul %37, %43, %cst_40 {dimension_numbers = #tpu.dot_dimension_numbers<[1], [0], [0], [1], [0, 0, 1, 1], [], []>} : vector<6x32xf32>, vector<32x96xf32>, vector<6x96xf32> -> vector<6x96xf32>
    %c0_41 = arith.constant 0 : index
    %c0_42 = arith.constant 0 : index
    %c0_43 = arith.constant 0 : index
    %45 = vector.load %arg10[%c0_41, %c0_42, %c0_43] : memref<2x1x96xf32, #tpu.memory_space<vmem>>, vector<1x1x96xf32>
    %46 = vector.shape_cast %45 : vector<1x1x96xf32> to vector<1x96xf32>
    %47 = vector.broadcast %46 : vector<1x96xf32> to vector<6x96xf32>
    %48 = arith.addf %44, %47 : vector<6x96xf32>
    %49 = vector.extract_strided_slice %48 {offsets = [0, 0], sizes = [6, 32], strides = [1, 1]} : vector<6x96xf32> to vector<6x32xf32>
    %50 = vector.extract_strided_slice %48 {offsets = [0, 32], sizes = [6, 32], strides = [1, 1]} : vector<6x96xf32> to vector<6x32xf32>
    %51 = vector.extract_strided_slice %48 {offsets = [0, 64], sizes = [6, 32], strides = [1, 1]} : vector<6x96xf32> to vector<6x32xf32>
    %c0_44 = arith.constant 0 : index
    %c0_45 = arith.constant 0 : index
    %c0_46 = arith.constant 0 : index
    %52 = vector.load %arg11[%c0_44, %c0_45, %c0_46] : memref<2x32x32xf32, #tpu.memory_space<vmem>>, vector<1x32x32xf32>
    %53 = vector.shape_cast %52 : vector<1x32x32xf32> to vector<32x32xf32>
    %54 = vector.extract_strided_slice %49 {offsets = [0, 0], sizes = [6, 8], strides = [1, 1]} : vector<6x32xf32> to vector<6x8xf32>
    %55 = vector.extract_strided_slice %50 {offsets = [0, 0], sizes = [6, 8], strides = [1, 1]} : vector<6x32xf32> to vector<6x8xf32>
    %cst_47 = arith.constant dense<0.000000e+00> : vector<6x6xf32>
    %56 = tpu.matmul %54, %55, %cst_47 {dimension_numbers = #tpu.dot_dimension_numbers<[1], [1], [0], [0], [0, 0, 1, 0], [], []>} : vector<6x8xf32>, vector<6x8xf32>, vector<6x6xf32> -> vector<6x6xf32>
    %cst_48 = arith.constant dense<0xFF800000> : vector<6xf32>
    %57 = vector.multi_reduction <maximumf>, %56, %cst_48 [1] : vector<6x6xf32> to vector<6xf32>
    %58 = vector.shape_cast %57 : vector<6xf32> to vector<6x1xf32>
    %59 = vector.broadcast %58 : vector<6x1xf32> to vector<6x6xf32>
    %60 = arith.subf %56, %59 : vector<6x6xf32>
    %61 = math.exp %60 : vector<6x6xf32>
    %cst_49 = arith.constant dense<0.000000e+00> : vector<6xf32>
    %62 = vector.multi_reduction <add>, %61, %cst_49 [1] : vector<6x6xf32> to vector<6xf32>
    %63 = vector.shape_cast %62 : vector<6xf32> to vector<6x1xf32>
    %64 = tpu.reciprocal %63 : vector<6x1xf32> -> vector<6x1xf32>
    %65 = vector.broadcast %64 : vector<6x1xf32> to vector<6x6xf32>
    %66 = arith.mulf %61, %65 : vector<6x6xf32>
    %67 = vector.extract_strided_slice %51 {offsets = [0, 0], sizes = [6, 8], strides = [1, 1]} : vector<6x32xf32> to vector<6x8xf32>
    %cst_50 = arith.constant dense<0.000000e+00> : vector<6x8xf32>
    %68 = tpu.matmul %66, %67, %cst_50 {dimension_numbers = #tpu.dot_dimension_numbers<[1], [0], [0], [1], [0, 0, 1, 1], [], []>} : vector<6x6xf32>, vector<6x8xf32>, vector<6x8xf32> -> vector<6x8xf32>
    %69 = vector.extract_strided_slice %53 {offsets = [0, 0], sizes = [8, 32], strides = [1, 1]} : vector<32x32xf32> to vector<8x32xf32>
    %cst_51 = arith.constant dense<0.000000e+00> : vector<6x32xf32>
    %70 = tpu.matmul %68, %69, %cst_51 {dimension_numbers = #tpu.dot_dimension_numbers<[1], [0], [0], [1], [0, 0, 1, 1], [], []>} : vector<6x8xf32>, vector<8x32xf32>, vector<6x32xf32> -> vector<6x32xf32>
    %71 = vector.extract_strided_slice %49 {offsets = [0, 8], sizes = [6, 8], strides = [1, 1]} : vector<6x32xf32> to vector<6x8xf32>
    %72 = vector.extract_strided_slice %50 {offsets = [0, 8], sizes = [6, 8], strides = [1, 1]} : vector<6x32xf32> to vector<6x8xf32>
    %cst_52 = arith.constant dense<0.000000e+00> : vector<6x6xf32>
    %73 = tpu.matmul %71, %72, %cst_52 {dimension_numbers = #tpu.dot_dimension_numbers<[1], [1], [0], [0], [0, 0, 1, 0], [], []>} : vector<6x8xf32>, vector<6x8xf32>, vector<6x6xf32> -> vector<6x6xf32>
    %cst_53 = arith.constant dense<0xFF800000> : vector<6xf32>
    %74 = vector.multi_reduction <maximumf>, %73, %cst_53 [1] : vector<6x6xf32> to vector<6xf32>
    %75 = vector.shape_cast %74 : vector<6xf32> to vector<6x1xf32>
    %76 = vector.broadcast %75 : vector<6x1xf32> to vector<6x6xf32>
    %77 = arith.subf %73, %76 : vector<6x6xf32>
    %78 = math.exp %77 : vector<6x6xf32>
    %cst_54 = arith.constant dense<0.000000e+00> : vector<6xf32>
    %79 = vector.multi_reduction <add>, %78, %cst_54 [1] : vector<6x6xf32> to vector<6xf32>
    %80 = vector.shape_cast %79 : vector<6xf32> to vector<6x1xf32>
    %81 = tpu.reciprocal %80 : vector<6x1xf32> -> vector<6x1xf32>
    %82 = vector.broadcast %81 : vector<6x1xf32> to vector<6x6xf32>
    %83 = arith.mulf %78, %82 : vector<6x6xf32>
    %84 = vector.extract_strided_slice %51 {offsets = [0, 8], sizes = [6, 8], strides = [1, 1]} : vector<6x32xf32> to vector<6x8xf32>
    %cst_55 = arith.constant dense<0.000000e+00> : vector<6x8xf32>
    %85 = tpu.matmul %83, %84, %cst_55 {dimension_numbers = #tpu.dot_dimension_numbers<[1], [0], [0], [1], [0, 0, 1, 1], [], []>} : vector<6x6xf32>, vector<6x8xf32>, vector<6x8xf32> -> vector<6x8xf32>
    %86 = vector.extract_strided_slice %53 {offsets = [8, 0], sizes = [8, 32], strides = [1, 1]} : vector<32x32xf32> to vector<8x32xf32>
    %cst_56 = arith.constant dense<0.000000e+00> : vector<6x32xf32>
    %87 = tpu.matmul %85, %86, %cst_56 {dimension_numbers = #tpu.dot_dimension_numbers<[1], [0], [0], [1], [0, 0, 1, 1], [], []>} : vector<6x8xf32>, vector<8x32xf32>, vector<6x32xf32> -> vector<6x32xf32>
    %88 = arith.addf %70, %87 : vector<6x32xf32>
    %89 = vector.extract_strided_slice %49 {offsets = [0, 16], sizes = [6, 8], strides = [1, 1]} : vector<6x32xf32> to vector<6x8xf32>
    %90 = vector.extract_strided_slice %50 {offsets = [0, 16], sizes = [6, 8], strides = [1, 1]} : vector<6x32xf32> to vector<6x8xf32>
    %cst_57 = arith.constant dense<0.000000e+00> : vector<6x6xf32>
    %91 = tpu.matmul %89, %90, %cst_57 {dimension_numbers = #tpu.dot_dimension_numbers<[1], [1], [0], [0], [0, 0, 1, 0], [], []>} : vector<6x8xf32>, vector<6x8xf32>, vector<6x6xf32> -> vector<6x6xf32>
    %cst_58 = arith.constant dense<0xFF800000> : vector<6xf32>
    %92 = vector.multi_reduction <maximumf>, %91, %cst_58 [1] : vector<6x6xf32> to vector<6xf32>
    %93 = vector.shape_cast %92 : vector<6xf32> to vector<6x1xf32>
    %94 = vector.broadcast %93 : vector<6x1xf32> to vector<6x6xf32>
    %95 = arith.subf %91, %94 : vector<6x6xf32>
    %96 = math.exp %95 : vector<6x6xf32>
    %cst_59 = arith.constant dense<0.000000e+00> : vector<6xf32>
    %97 = vector.multi_reduction <add>, %96, %cst_59 [1] : vector<6x6xf32> to vector<6xf32>
    %98 = vector.shape_cast %97 : vector<6xf32> to vector<6x1xf32>
    %99 = tpu.reciprocal %98 : vector<6x1xf32> -> vector<6x1xf32>
    %100 = vector.broadcast %99 : vector<6x1xf32> to vector<6x6xf32>
    %101 = arith.mulf %96, %100 : vector<6x6xf32>
    %102 = vector.extract_strided_slice %51 {offsets = [0, 16], sizes = [6, 8], strides = [1, 1]} : vector<6x32xf32> to vector<6x8xf32>
    %cst_60 = arith.constant dense<0.000000e+00> : vector<6x8xf32>
    %103 = tpu.matmul %101, %102, %cst_60 {dimension_numbers = #tpu.dot_dimension_numbers<[1], [0], [0], [1], [0, 0, 1, 1], [], []>} : vector<6x6xf32>, vector<6x8xf32>, vector<6x8xf32> -> vector<6x8xf32>
    %104 = vector.extract_strided_slice %53 {offsets = [16, 0], sizes = [8, 32], strides = [1, 1]} : vector<32x32xf32> to vector<8x32xf32>
    %cst_61 = arith.constant dense<0.000000e+00> : vector<6x32xf32>
    %105 = tpu.matmul %103, %104, %cst_61 {dimension_numbers = #tpu.dot_dimension_numbers<[1], [0], [0], [1], [0, 0, 1, 1], [], []>} : vector<6x8xf32>, vector<8x32xf32>, vector<6x32xf32> -> vector<6x32xf32>
    %106 = arith.addf %88, %105 : vector<6x32xf32>
    %107 = vector.extract_strided_slice %49 {offsets = [0, 24], sizes = [6, 8], strides = [1, 1]} : vector<6x32xf32> to vector<6x8xf32>
    %108 = vector.extract_strided_slice %50 {offsets = [0, 24], sizes = [6, 8], strides = [1, 1]} : vector<6x32xf32> to vector<6x8xf32>
    %cst_62 = arith.constant dense<0.000000e+00> : vector<6x6xf32>
    %109 = tpu.matmul %107, %108, %cst_62 {dimension_numbers = #tpu.dot_dimension_numbers<[1], [1], [0], [0], [0, 0, 1, 0], [], []>} : vector<6x8xf32>, vector<6x8xf32>, vector<6x6xf32> -> vector<6x6xf32>
    %cst_63 = arith.constant dense<0xFF800000> : vector<6xf32>
    %110 = vector.multi_reduction <maximumf>, %109, %cst_63 [1] : vector<6x6xf32> to vector<6xf32>
    %111 = vector.shape_cast %110 : vector<6xf32> to vector<6x1xf32>
    %112 = vector.broadcast %111 : vector<6x1xf32> to vector<6x6xf32>
    %113 = arith.subf %109, %112 : vector<6x6xf32>
    %114 = math.exp %113 : vector<6x6xf32>
    %cst_64 = arith.constant dense<0.000000e+00> : vector<6xf32>
    %115 = vector.multi_reduction <add>, %114, %cst_64 [1] : vector<6x6xf32> to vector<6xf32>
    %116 = vector.shape_cast %115 : vector<6xf32> to vector<6x1xf32>
    %117 = tpu.reciprocal %116 : vector<6x1xf32> -> vector<6x1xf32>
    %118 = vector.broadcast %117 : vector<6x1xf32> to vector<6x6xf32>
    %119 = arith.mulf %114, %118 : vector<6x6xf32>
    %120 = vector.extract_strided_slice %51 {offsets = [0, 24], sizes = [6, 8], strides = [1, 1]} : vector<6x32xf32> to vector<6x8xf32>
    %cst_65 = arith.constant dense<0.000000e+00> : vector<6x8xf32>
    %121 = tpu.matmul %119, %120, %cst_65 {dimension_numbers = #tpu.dot_dimension_numbers<[1], [0], [0], [1], [0, 0, 1, 1], [], []>} : vector<6x6xf32>, vector<6x8xf32>, vector<6x8xf32> -> vector<6x8xf32>
    %122 = vector.extract_strided_slice %53 {offsets = [24, 0], sizes = [8, 32], strides = [1, 1]} : vector<32x32xf32> to vector<8x32xf32>
    %cst_66 = arith.constant dense<0.000000e+00> : vector<6x32xf32>
    %123 = tpu.matmul %121, %122, %cst_66 {dimension_numbers = #tpu.dot_dimension_numbers<[1], [0], [0], [1], [0, 0, 1, 1], [], []>} : vector<6x8xf32>, vector<8x32xf32>, vector<6x32xf32> -> vector<6x32xf32>
    %124 = arith.addf %106, %123 : vector<6x32xf32>
    %c0_67 = arith.constant 0 : index
    %c0_68 = arith.constant 0 : index
    %c0_69 = arith.constant 0 : index
    %125 = vector.load %arg12[%c0_67, %c0_68, %c0_69] : memref<2x1x32xf32, #tpu.memory_space<vmem>>, vector<1x1x32xf32>
    %126 = vector.shape_cast %125 : vector<1x1x32xf32> to vector<1x32xf32>
    %127 = vector.broadcast %126 : vector<1x32xf32> to vector<6x32xf32>
    %128 = arith.addf %124, %127 : vector<6x32xf32>
    %129 = arith.addf %128, %37 : vector<6x32xf32>
    %130 = vector.extract_strided_slice %39 {offsets = [0, 0], sizes = [1, 32], strides = [1, 1]} : vector<3x32xf32> to vector<1x32xf32>
    %131 = vector.extract_strided_slice %41 {offsets = [0, 0], sizes = [1, 32], strides = [1, 1]} : vector<3x32xf32> to vector<1x32xf32>
    %cst_70 = arith.constant dense<0.000000e+00> : vector<6xf32>
    %132 = vector.multi_reduction <add>, %129, %cst_70 [1] : vector<6x32xf32> to vector<6xf32>
    %133 = vector.shape_cast %132 : vector<6xf32> to vector<6x1xf32>
    %cst_71 = arith.constant 3.200000e+01 : f32
    %134 = vector.broadcast %cst_71 : f32 to vector<6x1xf32>
    %135 = arith.divf %133, %134 : vector<6x1xf32>
    %136 = vector.broadcast %135 : vector<6x1xf32> to vector<6x32xf32>
    %137 = arith.subf %129, %136 : vector<6x32xf32>
    %138 = arith.mulf %137, %137 : vector<6x32xf32>
    %cst_72 = arith.constant dense<0.000000e+00> : vector<6xf32>
    %139 = vector.multi_reduction <add>, %138, %cst_72 [1] : vector<6x32xf32> to vector<6xf32>
    %140 = vector.shape_cast %139 : vector<6xf32> to vector<6x1xf32>
    %cst_73 = arith.constant 3.200000e+01 : f32
    %141 = vector.broadcast %cst_73 : f32 to vector<6x1xf32>
    %142 = arith.divf %140, %141 : vector<6x1xf32>
    %143 = vector.broadcast %135 : vector<6x1xf32> to vector<6x32xf32>
    %144 = arith.subf %129, %143 : vector<6x32xf32>
    %cst_74 = arith.constant 9.99999974E-6 : f32
    %145 = vector.broadcast %cst_74 : f32 to vector<6x1xf32>
    %146 = arith.addf %142, %145 : vector<6x1xf32>
    %147 = math.rsqrt %146 : vector<6x1xf32>
    %148 = vector.broadcast %147 : vector<6x1xf32> to vector<6x32xf32>
    %149 = arith.mulf %144, %148 : vector<6x32xf32>
    %150 = vector.broadcast %130 : vector<1x32xf32> to vector<6x32xf32>
    %151 = arith.mulf %149, %150 : vector<6x32xf32>
    %152 = vector.broadcast %131 : vector<1x32xf32> to vector<6x32xf32>
    %153 = arith.addf %151, %152 : vector<6x32xf32>
    %154 = tpu.concatenate %153, %153, %153 in 0 : vector<6x32xf32>, vector<6x32xf32>, vector<6x32xf32> -> vector<18x32xf32>
    %c0_75 = arith.constant 0 : index
    %c0_76 = arith.constant 0 : index
    %c0_77 = arith.constant 0 : index
    %155 = vector.load %arg13[%c0_75, %c0_76, %c0_77] : memref<2x32x32xf32, #tpu.memory_space<vmem>>, vector<1x32x32xf32>
    %156 = vector.shape_cast %155 : vector<1x32x32xf32> to vector<32x32xf32>
    %cst_78 = arith.constant dense<0.000000e+00> : vector<18x32xf32>
    %157 = tpu.matmul %154, %156, %cst_78 {dimension_numbers = #tpu.dot_dimension_numbers<[1], [0], [0], [1], [0, 0, 1, 1], [], []>} : vector<18x32xf32>, vector<32x32xf32>, vector<18x32xf32> -> vector<18x32xf32>
    %c0_79 = arith.constant 0 : index
    %c0_80 = arith.constant 0 : index
    %c0_81 = arith.constant 0 : index
    %158 = vector.load %arg14[%c0_79, %c0_80, %c0_81] : memref<2x1x32xf32, #tpu.memory_space<vmem>>, vector<1x1x32xf32>
    %159 = vector.shape_cast %158 : vector<1x1x32xf32> to vector<1x32xf32>
    %160 = vector.broadcast %159 : vector<1x32xf32> to vector<18x32xf32>
    %161 = arith.addf %157, %160 : vector<18x32xf32>
    %c0_82 = arith.constant 0 : index
    %c0_83 = arith.constant 0 : index
    %c0_84 = arith.constant 0 : index
    %162 = vector.load %arg15[%c0_82, %c0_83, %c0_84] : memref<2x32x64xf32, #tpu.memory_space<vmem>>, vector<1x32x64xf32>
    %163 = vector.shape_cast %162 : vector<1x32x64xf32> to vector<32x64xf32>
    %cst_85 = arith.constant dense<0.000000e+00> : vector<24x64xf32>
    %164 = tpu.matmul %32, %163, %cst_85 {dimension_numbers = #tpu.dot_dimension_numbers<[1], [0], [0], [1], [0, 0, 1, 1], [], []>} : vector<24x32xf32>, vector<32x64xf32>, vector<24x64xf32> -> vector<24x64xf32>
    %c0_86 = arith.constant 0 : index
    %c0_87 = arith.constant 0 : index
    %c0_88 = arith.constant 0 : index
    %165 = vector.load %arg16[%c0_86, %c0_87, %c0_88] : memref<2x1x64xf32, #tpu.memory_space<vmem>>, vector<1x1x64xf32>
    %166 = vector.shape_cast %165 : vector<1x1x64xf32> to vector<1x64xf32>
    %167 = vector.broadcast %166 : vector<1x64xf32> to vector<24x64xf32>
    %168 = arith.addf %164, %167 : vector<24x64xf32>
    %169 = vector.extract_strided_slice %161 {offsets = [0, 0], sizes = [6, 32], strides = [1, 1]} : vector<18x32xf32> to vector<6x32xf32>
    %170 = vector.extract_strided_slice %168 {offsets = [0, 0], sizes = [8, 32], strides = [1, 1]} : vector<24x64xf32> to vector<8x32xf32>
    %171 = vector.extract_strided_slice %168 {offsets = [0, 32], sizes = [8, 32], strides = [1, 1]} : vector<24x64xf32> to vector<8x32xf32>
    %c0_89 = arith.constant 0 : index
    %c0_90 = arith.constant 0 : index
    %c0_91 = arith.constant 0 : index
    %172 = vector.load %arg17[%c0_89, %c0_90, %c0_91] : memref<2x32x32xf32, #tpu.memory_space<vmem>>, vector<1x32x32xf32>
    %173 = vector.shape_cast %172 : vector<1x32x32xf32> to vector<32x32xf32>
    %174 = vector.extract_strided_slice %169 {offsets = [0, 0], sizes = [6, 8], strides = [1, 1]} : vector<6x32xf32> to vector<6x8xf32>
    %175 = vector.extract_strided_slice %170 {offsets = [0, 0], sizes = [8, 8], strides = [1, 1]} : vector<8x32xf32> to vector<8x8xf32>
    %cst_92 = arith.constant dense<0.000000e+00> : vector<6x8xf32>
    %176 = tpu.matmul %174, %175, %cst_92 {dimension_numbers = #tpu.dot_dimension_numbers<[1], [1], [0], [0], [0, 0, 1, 0], [], []>} : vector<6x8xf32>, vector<8x8xf32>, vector<6x8xf32> -> vector<6x8xf32>
    %cst_93 = arith.constant dense<0xFF800000> : vector<6xf32>
    %177 = vector.multi_reduction <maximumf>, %176, %cst_93 [1] : vector<6x8xf32> to vector<6xf32>
    %178 = vector.shape_cast %177 : vector<6xf32> to vector<6x1xf32>
    %179 = vector.broadcast %178 : vector<6x1xf32> to vector<6x8xf32>
    %180 = arith.subf %176, %179 : vector<6x8xf32>
    %181 = math.exp %180 : vector<6x8xf32>
    %cst_94 = arith.constant dense<0.000000e+00> : vector<6xf32>
    %182 = vector.multi_reduction <add>, %181, %cst_94 [1] : vector<6x8xf32> to vector<6xf32>
    %183 = vector.shape_cast %182 : vector<6xf32> to vector<6x1xf32>
    %184 = tpu.reciprocal %183 : vector<6x1xf32> -> vector<6x1xf32>
    %185 = vector.broadcast %184 : vector<6x1xf32> to vector<6x8xf32>
    %186 = arith.mulf %181, %185 : vector<6x8xf32>
    %187 = vector.extract_strided_slice %171 {offsets = [0, 0], sizes = [8, 8], strides = [1, 1]} : vector<8x32xf32> to vector<8x8xf32>
    %cst_95 = arith.constant dense<0.000000e+00> : vector<6x8xf32>
    %188 = tpu.matmul %186, %187, %cst_95 {dimension_numbers = #tpu.dot_dimension_numbers<[1], [0], [0], [1], [0, 0, 1, 1], [], []>} : vector<6x8xf32>, vector<8x8xf32>, vector<6x8xf32> -> vector<6x8xf32>
    %189 = vector.extract_strided_slice %173 {offsets = [0, 0], sizes = [8, 32], strides = [1, 1]} : vector<32x32xf32> to vector<8x32xf32>
    %cst_96 = arith.constant dense<0.000000e+00> : vector<6x32xf32>
    %190 = tpu.matmul %188, %189, %cst_96 {dimension_numbers = #tpu.dot_dimension_numbers<[1], [0], [0], [1], [0, 0, 1, 1], [], []>} : vector<6x8xf32>, vector<8x32xf32>, vector<6x32xf32> -> vector<6x32xf32>
    %191 = vector.extract_strided_slice %169 {offsets = [0, 8], sizes = [6, 8], strides = [1, 1]} : vector<6x32xf32> to vector<6x8xf32>
    %192 = vector.extract_strided_slice %170 {offsets = [0, 8], sizes = [8, 8], strides = [1, 1]} : vector<8x32xf32> to vector<8x8xf32>
    %cst_97 = arith.constant dense<0.000000e+00> : vector<6x8xf32>
    %193 = tpu.matmul %191, %192, %cst_97 {dimension_numbers = #tpu.dot_dimension_numbers<[1], [1], [0], [0], [0, 0, 1, 0], [], []>} : vector<6x8xf32>, vector<8x8xf32>, vector<6x8xf32> -> vector<6x8xf32>
    %cst_98 = arith.constant dense<0xFF800000> : vector<6xf32>
    %194 = vector.multi_reduction <maximumf>, %193, %cst_98 [1] : vector<6x8xf32> to vector<6xf32>
    %195 = vector.shape_cast %194 : vector<6xf32> to vector<6x1xf32>
    %196 = vector.broadcast %195 : vector<6x1xf32> to vector<6x8xf32>
    %197 = arith.subf %193, %196 : vector<6x8xf32>
    %198 = math.exp %197 : vector<6x8xf32>
    %cst_99 = arith.constant dense<0.000000e+00> : vector<6xf32>
    %199 = vector.multi_reduction <add>, %198, %cst_99 [1] : vector<6x8xf32> to vector<6xf32>
    %200 = vector.shape_cast %199 : vector<6xf32> to vector<6x1xf32>
    %201 = tpu.reciprocal %200 : vector<6x1xf32> -> vector<6x1xf32>
    %202 = vector.broadcast %201 : vector<6x1xf32> to vector<6x8xf32>
    %203 = arith.mulf %198, %202 : vector<6x8xf32>
    %204 = vector.extract_strided_slice %171 {offsets = [0, 8], sizes = [8, 8], strides = [1, 1]} : vector<8x32xf32> to vector<8x8xf32>
    %cst_100 = arith.constant dense<0.000000e+00> : vector<6x8xf32>
    %205 = tpu.matmul %203, %204, %cst_100 {dimension_numbers = #tpu.dot_dimension_numbers<[1], [0], [0], [1], [0, 0, 1, 1], [], []>} : vector<6x8xf32>, vector<8x8xf32>, vector<6x8xf32> -> vector<6x8xf32>
    %206 = vector.extract_strided_slice %173 {offsets = [8, 0], sizes = [8, 32], strides = [1, 1]} : vector<32x32xf32> to vector<8x32xf32>
    %cst_101 = arith.constant dense<0.000000e+00> : vector<6x32xf32>
    %207 = tpu.matmul %205, %206, %cst_101 {dimension_numbers = #tpu.dot_dimension_numbers<[1], [0], [0], [1], [0, 0, 1, 1], [], []>} : vector<6x8xf32>, vector<8x32xf32>, vector<6x32xf32> -> vector<6x32xf32>
    %208 = arith.addf %190, %207 : vector<6x32xf32>
    %209 = vector.extract_strided_slice %169 {offsets = [0, 16], sizes = [6, 8], strides = [1, 1]} : vector<6x32xf32> to vector<6x8xf32>
    %210 = vector.extract_strided_slice %170 {offsets = [0, 16], sizes = [8, 8], strides = [1, 1]} : vector<8x32xf32> to vector<8x8xf32>
    %cst_102 = arith.constant dense<0.000000e+00> : vector<6x8xf32>
    %211 = tpu.matmul %209, %210, %cst_102 {dimension_numbers = #tpu.dot_dimension_numbers<[1], [1], [0], [0], [0, 0, 1, 0], [], []>} : vector<6x8xf32>, vector<8x8xf32>, vector<6x8xf32> -> vector<6x8xf32>
    %cst_103 = arith.constant dense<0xFF800000> : vector<6xf32>
    %212 = vector.multi_reduction <maximumf>, %211, %cst_103 [1] : vector<6x8xf32> to vector<6xf32>
    %213 = vector.shape_cast %212 : vector<6xf32> to vector<6x1xf32>
    %214 = vector.broadcast %213 : vector<6x1xf32> to vector<6x8xf32>
    %215 = arith.subf %211, %214 : vector<6x8xf32>
    %216 = math.exp %215 : vector<6x8xf32>
    %cst_104 = arith.constant dense<0.000000e+00> : vector<6xf32>
    %217 = vector.multi_reduction <add>, %216, %cst_104 [1] : vector<6x8xf32> to vector<6xf32>
    %218 = vector.shape_cast %217 : vector<6xf32> to vector<6x1xf32>
    %219 = tpu.reciprocal %218 : vector<6x1xf32> -> vector<6x1xf32>
    %220 = vector.broadcast %219 : vector<6x1xf32> to vector<6x8xf32>
    %221 = arith.mulf %216, %220 : vector<6x8xf32>
    %222 = vector.extract_strided_slice %171 {offsets = [0, 16], sizes = [8, 8], strides = [1, 1]} : vector<8x32xf32> to vector<8x8xf32>
    %cst_105 = arith.constant dense<0.000000e+00> : vector<6x8xf32>
    %223 = tpu.matmul %221, %222, %cst_105 {dimension_numbers = #tpu.dot_dimension_numbers<[1], [0], [0], [1], [0, 0, 1, 1], [], []>} : vector<6x8xf32>, vector<8x8xf32>, vector<6x8xf32> -> vector<6x8xf32>
    %224 = vector.extract_strided_slice %173 {offsets = [16, 0], sizes = [8, 32], strides = [1, 1]} : vector<32x32xf32> to vector<8x32xf32>
    %cst_106 = arith.constant dense<0.000000e+00> : vector<6x32xf32>
    %225 = tpu.matmul %223, %224, %cst_106 {dimension_numbers = #tpu.dot_dimension_numbers<[1], [0], [0], [1], [0, 0, 1, 1], [], []>} : vector<6x8xf32>, vector<8x32xf32>, vector<6x32xf32> -> vector<6x32xf32>
    %226 = arith.addf %208, %225 : vector<6x32xf32>
    %227 = vector.extract_strided_slice %169 {offsets = [0, 24], sizes = [6, 8], strides = [1, 1]} : vector<6x32xf32> to vector<6x8xf32>
    %228 = vector.extract_strided_slice %170 {offsets = [0, 24], sizes = [8, 8], strides = [1, 1]} : vector<8x32xf32> to vector<8x8xf32>
    %cst_107 = arith.constant dense<0.000000e+00> : vector<6x8xf32>
    %229 = tpu.matmul %227, %228, %cst_107 {dimension_numbers = #tpu.dot_dimension_numbers<[1], [1], [0], [0], [0, 0, 1, 0], [], []>} : vector<6x8xf32>, vector<8x8xf32>, vector<6x8xf32> -> vector<6x8xf32>
    %cst_108 = arith.constant dense<0xFF800000> : vector<6xf32>
    %230 = vector.multi_reduction <maximumf>, %229, %cst_108 [1] : vector<6x8xf32> to vector<6xf32>
    %231 = vector.shape_cast %230 : vector<6xf32> to vector<6x1xf32>
    %232 = vector.broadcast %231 : vector<6x1xf32> to vector<6x8xf32>
    %233 = arith.subf %229, %232 : vector<6x8xf32>
    %234 = math.exp %233 : vector<6x8xf32>
    %cst_109 = arith.constant dense<0.000000e+00> : vector<6xf32>
    %235 = vector.multi_reduction <add>, %234, %cst_109 [1] : vector<6x8xf32> to vector<6xf32>
    %236 = vector.shape_cast %235 : vector<6xf32> to vector<6x1xf32>
    %237 = tpu.reciprocal %236 : vector<6x1xf32> -> vector<6x1xf32>
    %238 = vector.broadcast %237 : vector<6x1xf32> to vector<6x8xf32>
    %239 = arith.mulf %234, %238 : vector<6x8xf32>
    %240 = vector.extract_strided_slice %171 {offsets = [0, 24], sizes = [8, 8], strides = [1, 1]} : vector<8x32xf32> to vector<8x8xf32>
    %cst_110 = arith.constant dense<0.000000e+00> : vector<6x8xf32>
    %241 = tpu.matmul %239, %240, %cst_110 {dimension_numbers = #tpu.dot_dimension_numbers<[1], [0], [0], [1], [0, 0, 1, 1], [], []>} : vector<6x8xf32>, vector<8x8xf32>, vector<6x8xf32> -> vector<6x8xf32>
    %242 = vector.extract_strided_slice %173 {offsets = [24, 0], sizes = [8, 32], strides = [1, 1]} : vector<32x32xf32> to vector<8x32xf32>
    %cst_111 = arith.constant dense<0.000000e+00> : vector<6x32xf32>
    %243 = tpu.matmul %241, %242, %cst_111 {dimension_numbers = #tpu.dot_dimension_numbers<[1], [0], [0], [1], [0, 0, 1, 1], [], []>} : vector<6x8xf32>, vector<8x32xf32>, vector<6x32xf32> -> vector<6x32xf32>
    %244 = arith.addf %226, %243 : vector<6x32xf32>
    %245 = vector.extract_strided_slice %161 {offsets = [6, 0], sizes = [6, 32], strides = [1, 1]} : vector<18x32xf32> to vector<6x32xf32>
    %246 = vector.extract_strided_slice %168 {offsets = [8, 0], sizes = [8, 32], strides = [1, 1]} : vector<24x64xf32> to vector<8x32xf32>
    %247 = vector.extract_strided_slice %168 {offsets = [8, 32], sizes = [8, 32], strides = [1, 1]} : vector<24x64xf32> to vector<8x32xf32>
    %c0_112 = arith.constant 0 : index
    %c0_113 = arith.constant 0 : index
    %c0_114 = arith.constant 0 : index
    %248 = vector.load %arg17[%c0_112, %c0_113, %c0_114] : memref<2x32x32xf32, #tpu.memory_space<vmem>>, vector<1x32x32xf32>
    %249 = vector.shape_cast %248 : vector<1x32x32xf32> to vector<32x32xf32>
    %250 = vector.extract_strided_slice %245 {offsets = [0, 0], sizes = [6, 8], strides = [1, 1]} : vector<6x32xf32> to vector<6x8xf32>
    %251 = vector.extract_strided_slice %246 {offsets = [0, 0], sizes = [8, 8], strides = [1, 1]} : vector<8x32xf32> to vector<8x8xf32>
    %cst_115 = arith.constant dense<0.000000e+00> : vector<6x8xf32>
    %252 = tpu.matmul %250, %251, %cst_115 {dimension_numbers = #tpu.dot_dimension_numbers<[1], [1], [0], [0], [0, 0, 1, 0], [], []>} : vector<6x8xf32>, vector<8x8xf32>, vector<6x8xf32> -> vector<6x8xf32>
    %cst_116 = arith.constant dense<0xFF800000> : vector<6xf32>
    %253 = vector.multi_reduction <maximumf>, %252, %cst_116 [1] : vector<6x8xf32> to vector<6xf32>
    %254 = vector.shape_cast %253 : vector<6xf32> to vector<6x1xf32>
    %255 = vector.broadcast %254 : vector<6x1xf32> to vector<6x8xf32>
    %256 = arith.subf %252, %255 : vector<6x8xf32>
    %257 = math.exp %256 : vector<6x8xf32>
    %cst_117 = arith.constant dense<0.000000e+00> : vector<6xf32>
    %258 = vector.multi_reduction <add>, %257, %cst_117 [1] : vector<6x8xf32> to vector<6xf32>
    %259 = vector.shape_cast %258 : vector<6xf32> to vector<6x1xf32>
    %260 = tpu.reciprocal %259 : vector<6x1xf32> -> vector<6x1xf32>
    %261 = vector.broadcast %260 : vector<6x1xf32> to vector<6x8xf32>
    %262 = arith.mulf %257, %261 : vector<6x8xf32>
    %263 = vector.extract_strided_slice %247 {offsets = [0, 0], sizes = [8, 8], strides = [1, 1]} : vector<8x32xf32> to vector<8x8xf32>
    %cst_118 = arith.constant dense<0.000000e+00> : vector<6x8xf32>
    %264 = tpu.matmul %262, %263, %cst_118 {dimension_numbers = #tpu.dot_dimension_numbers<[1], [0], [0], [1], [0, 0, 1, 1], [], []>} : vector<6x8xf32>, vector<8x8xf32>, vector<6x8xf32> -> vector<6x8xf32>
    %265 = vector.extract_strided_slice %249 {offsets = [0, 0], sizes = [8, 32], strides = [1, 1]} : vector<32x32xf32> to vector<8x32xf32>
    %cst_119 = arith.constant dense<0.000000e+00> : vector<6x32xf32>
    %266 = tpu.matmul %264, %265, %cst_119 {dimension_numbers = #tpu.dot_dimension_numbers<[1], [0], [0], [1], [0, 0, 1, 1], [], []>} : vector<6x8xf32>, vector<8x32xf32>, vector<6x32xf32> -> vector<6x32xf32>
    %267 = vector.extract_strided_slice %245 {offsets = [0, 8], sizes = [6, 8], strides = [1, 1]} : vector<6x32xf32> to vector<6x8xf32>
    %268 = vector.extract_strided_slice %246 {offsets = [0, 8], sizes = [8, 8], strides = [1, 1]} : vector<8x32xf32> to vector<8x8xf32>
    %cst_120 = arith.constant dense<0.000000e+00> : vector<6x8xf32>
    %269 = tpu.matmul %267, %268, %cst_120 {dimension_numbers = #tpu.dot_dimension_numbers<[1], [1], [0], [0], [0, 0, 1, 0], [], []>} : vector<6x8xf32>, vector<8x8xf32>, vector<6x8xf32> -> vector<6x8xf32>
    %cst_121 = arith.constant dense<0xFF800000> : vector<6xf32>
    %270 = vector.multi_reduction <maximumf>, %269, %cst_121 [1] : vector<6x8xf32> to vector<6xf32>
    %271 = vector.shape_cast %270 : vector<6xf32> to vector<6x1xf32>
    %272 = vector.broadcast %271 : vector<6x1xf32> to vector<6x8xf32>
    %273 = arith.subf %269, %272 : vector<6x8xf32>
    %274 = math.exp %273 : vector<6x8xf32>
    %cst_122 = arith.constant dense<0.000000e+00> : vector<6xf32>
    %275 = vector.multi_reduction <add>, %274, %cst_122 [1] : vector<6x8xf32> to vector<6xf32>
    %276 = vector.shape_cast %275 : vector<6xf32> to vector<6x1xf32>
    %277 = tpu.reciprocal %276 : vector<6x1xf32> -> vector<6x1xf32>
    %278 = vector.broadcast %277 : vector<6x1xf32> to vector<6x8xf32>
    %279 = arith.mulf %274, %278 : vector<6x8xf32>
    %280 = vector.extract_strided_slice %247 {offsets = [0, 8], sizes = [8, 8], strides = [1, 1]} : vector<8x32xf32> to vector<8x8xf32>
    %cst_123 = arith.constant dense<0.000000e+00> : vector<6x8xf32>
    %281 = tpu.matmul %279, %280, %cst_123 {dimension_numbers = #tpu.dot_dimension_numbers<[1], [0], [0], [1], [0, 0, 1, 1], [], []>} : vector<6x8xf32>, vector<8x8xf32>, vector<6x8xf32> -> vector<6x8xf32>
    %282 = vector.extract_strided_slice %249 {offsets = [8, 0], sizes = [8, 32], strides = [1, 1]} : vector<32x32xf32> to vector<8x32xf32>
    %cst_124 = arith.constant dense<0.000000e+00> : vector<6x32xf32>
    %283 = tpu.matmul %281, %282, %cst_124 {dimension_numbers = #tpu.dot_dimension_numbers<[1], [0], [0], [1], [0, 0, 1, 1], [], []>} : vector<6x8xf32>, vector<8x32xf32>, vector<6x32xf32> -> vector<6x32xf32>
    %284 = arith.addf %266, %283 : vector<6x32xf32>
    %285 = vector.extract_strided_slice %245 {offsets = [0, 16], sizes = [6, 8], strides = [1, 1]} : vector<6x32xf32> to vector<6x8xf32>
    %286 = vector.extract_strided_slice %246 {offsets = [0, 16], sizes = [8, 8], strides = [1, 1]} : vector<8x32xf32> to vector<8x8xf32>
    %cst_125 = arith.constant dense<0.000000e+00> : vector<6x8xf32>
    %287 = tpu.matmul %285, %286, %cst_125 {dimension_numbers = #tpu.dot_dimension_numbers<[1], [1], [0], [0], [0, 0, 1, 0], [], []>} : vector<6x8xf32>, vector<8x8xf32>, vector<6x8xf32> -> vector<6x8xf32>
    %cst_126 = arith.constant dense<0xFF800000> : vector<6xf32>
    %288 = vector.multi_reduction <maximumf>, %287, %cst_126 [1] : vector<6x8xf32> to vector<6xf32>
    %289 = vector.shape_cast %288 : vector<6xf32> to vector<6x1xf32>
    %290 = vector.broadcast %289 : vector<6x1xf32> to vector<6x8xf32>
    %291 = arith.subf %287, %290 : vector<6x8xf32>
    %292 = math.exp %291 : vector<6x8xf32>
    %cst_127 = arith.constant dense<0.000000e+00> : vector<6xf32>
    %293 = vector.multi_reduction <add>, %292, %cst_127 [1] : vector<6x8xf32> to vector<6xf32>
    %294 = vector.shape_cast %293 : vector<6xf32> to vector<6x1xf32>
    %295 = tpu.reciprocal %294 : vector<6x1xf32> -> vector<6x1xf32>
    %296 = vector.broadcast %295 : vector<6x1xf32> to vector<6x8xf32>
    %297 = arith.mulf %292, %296 : vector<6x8xf32>
    %298 = vector.extract_strided_slice %247 {offsets = [0, 16], sizes = [8, 8], strides = [1, 1]} : vector<8x32xf32> to vector<8x8xf32>
    %cst_128 = arith.constant dense<0.000000e+00> : vector<6x8xf32>
    %299 = tpu.matmul %297, %298, %cst_128 {dimension_numbers = #tpu.dot_dimension_numbers<[1], [0], [0], [1], [0, 0, 1, 1], [], []>} : vector<6x8xf32>, vector<8x8xf32>, vector<6x8xf32> -> vector<6x8xf32>
    %300 = vector.extract_strided_slice %249 {offsets = [16, 0], sizes = [8, 32], strides = [1, 1]} : vector<32x32xf32> to vector<8x32xf32>
    %cst_129 = arith.constant dense<0.000000e+00> : vector<6x32xf32>
    %301 = tpu.matmul %299, %300, %cst_129 {dimension_numbers = #tpu.dot_dimension_numbers<[1], [0], [0], [1], [0, 0, 1, 1], [], []>} : vector<6x8xf32>, vector<8x32xf32>, vector<6x32xf32> -> vector<6x32xf32>
    %302 = arith.addf %284, %301 : vector<6x32xf32>
    %303 = vector.extract_strided_slice %245 {offsets = [0, 24], sizes = [6, 8], strides = [1, 1]} : vector<6x32xf32> to vector<6x8xf32>
    %304 = vector.extract_strided_slice %246 {offsets = [0, 24], sizes = [8, 8], strides = [1, 1]} : vector<8x32xf32> to vector<8x8xf32>
    %cst_130 = arith.constant dense<0.000000e+00> : vector<6x8xf32>
    %305 = tpu.matmul %303, %304, %cst_130 {dimension_numbers = #tpu.dot_dimension_numbers<[1], [1], [0], [0], [0, 0, 1, 0], [], []>} : vector<6x8xf32>, vector<8x8xf32>, vector<6x8xf32> -> vector<6x8xf32>
    %cst_131 = arith.constant dense<0xFF800000> : vector<6xf32>
    %306 = vector.multi_reduction <maximumf>, %305, %cst_131 [1] : vector<6x8xf32> to vector<6xf32>
    %307 = vector.shape_cast %306 : vector<6xf32> to vector<6x1xf32>
    %308 = vector.broadcast %307 : vector<6x1xf32> to vector<6x8xf32>
    %309 = arith.subf %305, %308 : vector<6x8xf32>
    %310 = math.exp %309 : vector<6x8xf32>
    %cst_132 = arith.constant dense<0.000000e+00> : vector<6xf32>
    %311 = vector.multi_reduction <add>, %310, %cst_132 [1] : vector<6x8xf32> to vector<6xf32>
    %312 = vector.shape_cast %311 : vector<6xf32> to vector<6x1xf32>
    %313 = tpu.reciprocal %312 : vector<6x1xf32> -> vector<6x1xf32>
    %314 = vector.broadcast %313 : vector<6x1xf32> to vector<6x8xf32>
    %315 = arith.mulf %310, %314 : vector<6x8xf32>
    %316 = vector.extract_strided_slice %247 {offsets = [0, 24], sizes = [8, 8], strides = [1, 1]} : vector<8x32xf32> to vector<8x8xf32>
    %cst_133 = arith.constant dense<0.000000e+00> : vector<6x8xf32>
    %317 = tpu.matmul %315, %316, %cst_133 {dimension_numbers = #tpu.dot_dimension_numbers<[1], [0], [0], [1], [0, 0, 1, 1], [], []>} : vector<6x8xf32>, vector<8x8xf32>, vector<6x8xf32> -> vector<6x8xf32>
    %318 = vector.extract_strided_slice %249 {offsets = [24, 0], sizes = [8, 32], strides = [1, 1]} : vector<32x32xf32> to vector<8x32xf32>
    %cst_134 = arith.constant dense<0.000000e+00> : vector<6x32xf32>
    %319 = tpu.matmul %317, %318, %cst_134 {dimension_numbers = #tpu.dot_dimension_numbers<[1], [0], [0], [1], [0, 0, 1, 1], [], []>} : vector<6x8xf32>, vector<8x32xf32>, vector<6x32xf32> -> vector<6x32xf32>
    %320 = arith.addf %302, %319 : vector<6x32xf32>
    %321 = vector.extract_strided_slice %161 {offsets = [12, 0], sizes = [6, 32], strides = [1, 1]} : vector<18x32xf32> to vector<6x32xf32>
    %322 = vector.extract_strided_slice %168 {offsets = [16, 0], sizes = [8, 32], strides = [1, 1]} : vector<24x64xf32> to vector<8x32xf32>
    %323 = vector.extract_strided_slice %168 {offsets = [16, 32], sizes = [8, 32], strides = [1, 1]} : vector<24x64xf32> to vector<8x32xf32>
    %c0_135 = arith.constant 0 : index
    %c0_136 = arith.constant 0 : index
    %c0_137 = arith.constant 0 : index
    %324 = vector.load %arg17[%c0_135, %c0_136, %c0_137] : memref<2x32x32xf32, #tpu.memory_space<vmem>>, vector<1x32x32xf32>
    %325 = vector.shape_cast %324 : vector<1x32x32xf32> to vector<32x32xf32>
    %326 = vector.extract_strided_slice %321 {offsets = [0, 0], sizes = [6, 8], strides = [1, 1]} : vector<6x32xf32> to vector<6x8xf32>
    %327 = vector.extract_strided_slice %322 {offsets = [0, 0], sizes = [8, 8], strides = [1, 1]} : vector<8x32xf32> to vector<8x8xf32>
    %cst_138 = arith.constant dense<0.000000e+00> : vector<6x8xf32>
    %328 = tpu.matmul %326, %327, %cst_138 {dimension_numbers = #tpu.dot_dimension_numbers<[1], [1], [0], [0], [0, 0, 1, 0], [], []>} : vector<6x8xf32>, vector<8x8xf32>, vector<6x8xf32> -> vector<6x8xf32>
    %cst_139 = arith.constant dense<0xFF800000> : vector<6xf32>
    %329 = vector.multi_reduction <maximumf>, %328, %cst_139 [1] : vector<6x8xf32> to vector<6xf32>
    %330 = vector.shape_cast %329 : vector<6xf32> to vector<6x1xf32>
    %331 = vector.broadcast %330 : vector<6x1xf32> to vector<6x8xf32>
    %332 = arith.subf %328, %331 : vector<6x8xf32>
    %333 = math.exp %332 : vector<6x8xf32>
    %cst_140 = arith.constant dense<0.000000e+00> : vector<6xf32>
    %334 = vector.multi_reduction <add>, %333, %cst_140 [1] : vector<6x8xf32> to vector<6xf32>
    %335 = vector.shape_cast %334 : vector<6xf32> to vector<6x1xf32>
    %336 = tpu.reciprocal %335 : vector<6x1xf32> -> vector<6x1xf32>
    %337 = vector.broadcast %336 : vector<6x1xf32> to vector<6x8xf32>
    %338 = arith.mulf %333, %337 : vector<6x8xf32>
    %339 = vector.extract_strided_slice %323 {offsets = [0, 0], sizes = [8, 8], strides = [1, 1]} : vector<8x32xf32> to vector<8x8xf32>
    %cst_141 = arith.constant dense<0.000000e+00> : vector<6x8xf32>
    %340 = tpu.matmul %338, %339, %cst_141 {dimension_numbers = #tpu.dot_dimension_numbers<[1], [0], [0], [1], [0, 0, 1, 1], [], []>} : vector<6x8xf32>, vector<8x8xf32>, vector<6x8xf32> -> vector<6x8xf32>
    %341 = vector.extract_strided_slice %325 {offsets = [0, 0], sizes = [8, 32], strides = [1, 1]} : vector<32x32xf32> to vector<8x32xf32>
    %cst_142 = arith.constant dense<0.000000e+00> : vector<6x32xf32>
    %342 = tpu.matmul %340, %341, %cst_142 {dimension_numbers = #tpu.dot_dimension_numbers<[1], [0], [0], [1], [0, 0, 1, 1], [], []>} : vector<6x8xf32>, vector<8x32xf32>, vector<6x32xf32> -> vector<6x32xf32>
    %343 = vector.extract_strided_slice %321 {offsets = [0, 8], sizes = [6, 8], strides = [1, 1]} : vector<6x32xf32> to vector<6x8xf32>
    %344 = vector.extract_strided_slice %322 {offsets = [0, 8], sizes = [8, 8], strides = [1, 1]} : vector<8x32xf32> to vector<8x8xf32>
    %cst_143 = arith.constant dense<0.000000e+00> : vector<6x8xf32>
    %345 = tpu.matmul %343, %344, %cst_143 {dimension_numbers = #tpu.dot_dimension_numbers<[1], [1], [0], [0], [0, 0, 1, 0], [], []>} : vector<6x8xf32>, vector<8x8xf32>, vector<6x8xf32> -> vector<6x8xf32>
    %cst_144 = arith.constant dense<0xFF800000> : vector<6xf32>
    %346 = vector.multi_reduction <maximumf>, %345, %cst_144 [1] : vector<6x8xf32> to vector<6xf32>
    %347 = vector.shape_cast %346 : vector<6xf32> to vector<6x1xf32>
    %348 = vector.broadcast %347 : vector<6x1xf32> to vector<6x8xf32>
    %349 = arith.subf %345, %348 : vector<6x8xf32>
    %350 = math.exp %349 : vector<6x8xf32>
    %cst_145 = arith.constant dense<0.000000e+00> : vector<6xf32>
    %351 = vector.multi_reduction <add>, %350, %cst_145 [1] : vector<6x8xf32> to vector<6xf32>
    %352 = vector.shape_cast %351 : vector<6xf32> to vector<6x1xf32>
    %353 = tpu.reciprocal %352 : vector<6x1xf32> -> vector<6x1xf32>
    %354 = vector.broadcast %353 : vector<6x1xf32> to vector<6x8xf32>
    %355 = arith.mulf %350, %354 : vector<6x8xf32>
    %356 = vector.extract_strided_slice %323 {offsets = [0, 8], sizes = [8, 8], strides = [1, 1]} : vector<8x32xf32> to vector<8x8xf32>
    %cst_146 = arith.constant dense<0.000000e+00> : vector<6x8xf32>
    %357 = tpu.matmul %355, %356, %cst_146 {dimension_numbers = #tpu.dot_dimension_numbers<[1], [0], [0], [1], [0, 0, 1, 1], [], []>} : vector<6x8xf32>, vector<8x8xf32>, vector<6x8xf32> -> vector<6x8xf32>
    %358 = vector.extract_strided_slice %325 {offsets = [8, 0], sizes = [8, 32], strides = [1, 1]} : vector<32x32xf32> to vector<8x32xf32>
    %cst_147 = arith.constant dense<0.000000e+00> : vector<6x32xf32>
    %359 = tpu.matmul %357, %358, %cst_147 {dimension_numbers = #tpu.dot_dimension_numbers<[1], [0], [0], [1], [0, 0, 1, 1], [], []>} : vector<6x8xf32>, vector<8x32xf32>, vector<6x32xf32> -> vector<6x32xf32>
    %360 = arith.addf %342, %359 : vector<6x32xf32>
    %361 = vector.extract_strided_slice %321 {offsets = [0, 16], sizes = [6, 8], strides = [1, 1]} : vector<6x32xf32> to vector<6x8xf32>
    %362 = vector.extract_strided_slice %322 {offsets = [0, 16], sizes = [8, 8], strides = [1, 1]} : vector<8x32xf32> to vector<8x8xf32>
    %cst_148 = arith.constant dense<0.000000e+00> : vector<6x8xf32>
    %363 = tpu.matmul %361, %362, %cst_148 {dimension_numbers = #tpu.dot_dimension_numbers<[1], [1], [0], [0], [0, 0, 1, 0], [], []>} : vector<6x8xf32>, vector<8x8xf32>, vector<6x8xf32> -> vector<6x8xf32>
    %cst_149 = arith.constant dense<0xFF800000> : vector<6xf32>
    %364 = vector.multi_reduction <maximumf>, %363, %cst_149 [1] : vector<6x8xf32> to vector<6xf32>
    %365 = vector.shape_cast %364 : vector<6xf32> to vector<6x1xf32>
    %366 = vector.broadcast %365 : vector<6x1xf32> to vector<6x8xf32>
    %367 = arith.subf %363, %366 : vector<6x8xf32>
    %368 = math.exp %367 : vector<6x8xf32>
    %cst_150 = arith.constant dense<0.000000e+00> : vector<6xf32>
    %369 = vector.multi_reduction <add>, %368, %cst_150 [1] : vector<6x8xf32> to vector<6xf32>
    %370 = vector.shape_cast %369 : vector<6xf32> to vector<6x1xf32>
    %371 = tpu.reciprocal %370 : vector<6x1xf32> -> vector<6x1xf32>
    %372 = vector.broadcast %371 : vector<6x1xf32> to vector<6x8xf32>
    %373 = arith.mulf %368, %372 : vector<6x8xf32>
    %374 = vector.extract_strided_slice %323 {offsets = [0, 16], sizes = [8, 8], strides = [1, 1]} : vector<8x32xf32> to vector<8x8xf32>
    %cst_151 = arith.constant dense<0.000000e+00> : vector<6x8xf32>
    %375 = tpu.matmul %373, %374, %cst_151 {dimension_numbers = #tpu.dot_dimension_numbers<[1], [0], [0], [1], [0, 0, 1, 1], [], []>} : vector<6x8xf32>, vector<8x8xf32>, vector<6x8xf32> -> vector<6x8xf32>
    %376 = vector.extract_strided_slice %325 {offsets = [16, 0], sizes = [8, 32], strides = [1, 1]} : vector<32x32xf32> to vector<8x32xf32>
    %cst_152 = arith.constant dense<0.000000e+00> : vector<6x32xf32>
    %377 = tpu.matmul %375, %376, %cst_152 {dimension_numbers = #tpu.dot_dimension_numbers<[1], [0], [0], [1], [0, 0, 1, 1], [], []>} : vector<6x8xf32>, vector<8x32xf32>, vector<6x32xf32> -> vector<6x32xf32>
    %378 = arith.addf %360, %377 : vector<6x32xf32>
    %379 = vector.extract_strided_slice %321 {offsets = [0, 24], sizes = [6, 8], strides = [1, 1]} : vector<6x32xf32> to vector<6x8xf32>
    %380 = vector.extract_strided_slice %322 {offsets = [0, 24], sizes = [8, 8], strides = [1, 1]} : vector<8x32xf32> to vector<8x8xf32>
    %cst_153 = arith.constant dense<0.000000e+00> : vector<6x8xf32>
    %381 = tpu.matmul %379, %380, %cst_153 {dimension_numbers = #tpu.dot_dimension_numbers<[1], [1], [0], [0], [0, 0, 1, 0], [], []>} : vector<6x8xf32>, vector<8x8xf32>, vector<6x8xf32> -> vector<6x8xf32>
    %cst_154 = arith.constant dense<0xFF800000> : vector<6xf32>
    %382 = vector.multi_reduction <maximumf>, %381, %cst_154 [1] : vector<6x8xf32> to vector<6xf32>
    %383 = vector.shape_cast %382 : vector<6xf32> to vector<6x1xf32>
    %384 = vector.broadcast %383 : vector<6x1xf32> to vector<6x8xf32>
    %385 = arith.subf %381, %384 : vector<6x8xf32>
    %386 = math.exp %385 : vector<6x8xf32>
    %cst_155 = arith.constant dense<0.000000e+00> : vector<6xf32>
    %387 = vector.multi_reduction <add>, %386, %cst_155 [1] : vector<6x8xf32> to vector<6xf32>
    %388 = vector.shape_cast %387 : vector<6xf32> to vector<6x1xf32>
    %389 = tpu.reciprocal %388 : vector<6x1xf32> -> vector<6x1xf32>
    %390 = vector.broadcast %389 : vector<6x1xf32> to vector<6x8xf32>
    %391 = arith.mulf %386, %390 : vector<6x8xf32>
    %392 = vector.extract_strided_slice %323 {offsets = [0, 24], sizes = [8, 8], strides = [1, 1]} : vector<8x32xf32> to vector<8x8xf32>
    %cst_156 = arith.constant dense<0.000000e+00> : vector<6x8xf32>
    %393 = tpu.matmul %391, %392, %cst_156 {dimension_numbers = #tpu.dot_dimension_numbers<[1], [0], [0], [1], [0, 0, 1, 1], [], []>} : vector<6x8xf32>, vector<8x8xf32>, vector<6x8xf32> -> vector<6x8xf32>
    %394 = vector.extract_strided_slice %325 {offsets = [24, 0], sizes = [8, 32], strides = [1, 1]} : vector<32x32xf32> to vector<8x32xf32>
    %cst_157 = arith.constant dense<0.000000e+00> : vector<6x32xf32>
    %395 = tpu.matmul %393, %394, %cst_157 {dimension_numbers = #tpu.dot_dimension_numbers<[1], [0], [0], [1], [0, 0, 1, 1], [], []>} : vector<6x8xf32>, vector<8x32xf32>, vector<6x32xf32> -> vector<6x32xf32>
    %396 = arith.addf %378, %395 : vector<6x32xf32>
    %397 = tpu.concatenate %244, %320, %396 in 0 : vector<6x32xf32>, vector<6x32xf32>, vector<6x32xf32> -> vector<18x32xf32>
    %c0_158 = arith.constant 0 : index
    %c0_159 = arith.constant 0 : index
    %c0_160 = arith.constant 0 : index
    %398 = vector.load %arg18[%c0_158, %c0_159, %c0_160] : memref<2x1x32xf32, #tpu.memory_space<vmem>>, vector<1x1x32xf32>
    %399 = vector.shape_cast %398 : vector<1x1x32xf32> to vector<1x32xf32>
    %400 = vector.broadcast %399 : vector<1x32xf32> to vector<18x32xf32>
    %401 = arith.addf %397, %400 : vector<18x32xf32>
    %402 = arith.addf %401, %154 : vector<18x32xf32>
    %403 = vector.extract_strided_slice %39 {offsets = [1, 0], sizes = [1, 32], strides = [1, 1]} : vector<3x32xf32> to vector<1x32xf32>
    %404 = vector.extract_strided_slice %41 {offsets = [1, 0], sizes = [1, 32], strides = [1, 1]} : vector<3x32xf32> to vector<1x32xf32>
    %cst_161 = arith.constant dense<0.000000e+00> : vector<18xf32>
    %405 = vector.multi_reduction <add>, %402, %cst_161 [1] : vector<18x32xf32> to vector<18xf32>
    %406 = vector.shape_cast %405 : vector<18xf32> to vector<18x1xf32>
    %cst_162 = arith.constant 3.200000e+01 : f32
    %407 = vector.broadcast %cst_162 : f32 to vector<18x1xf32>
    %408 = arith.divf %406, %407 : vector<18x1xf32>
    %409 = vector.broadcast %408 : vector<18x1xf32> to vector<18x32xf32>
    %410 = arith.subf %402, %409 : vector<18x32xf32>
    %411 = arith.mulf %410, %410 : vector<18x32xf32>
    %cst_163 = arith.constant dense<0.000000e+00> : vector<18xf32>
    %412 = vector.multi_reduction <add>, %411, %cst_163 [1] : vector<18x32xf32> to vector<18xf32>
    %413 = vector.shape_cast %412 : vector<18xf32> to vector<18x1xf32>
    %cst_164 = arith.constant 3.200000e+01 : f32
    %414 = vector.broadcast %cst_164 : f32 to vector<18x1xf32>
    %415 = arith.divf %413, %414 : vector<18x1xf32>
    %416 = vector.broadcast %408 : vector<18x1xf32> to vector<18x32xf32>
    %417 = arith.subf %402, %416 : vector<18x32xf32>
    %cst_165 = arith.constant 9.99999974E-6 : f32
    %418 = vector.broadcast %cst_165 : f32 to vector<18x1xf32>
    %419 = arith.addf %415, %418 : vector<18x1xf32>
    %420 = math.rsqrt %419 : vector<18x1xf32>
    %421 = vector.broadcast %420 : vector<18x1xf32> to vector<18x32xf32>
    %422 = arith.mulf %417, %421 : vector<18x32xf32>
    %423 = vector.broadcast %403 : vector<1x32xf32> to vector<18x32xf32>
    %424 = arith.mulf %422, %423 : vector<18x32xf32>
    %425 = vector.broadcast %404 : vector<1x32xf32> to vector<18x32xf32>
    %426 = arith.addf %424, %425 : vector<18x32xf32>
    %c0_166 = arith.constant 0 : index
    %c0_167 = arith.constant 0 : index
    %c0_168 = arith.constant 0 : index
    %427 = vector.load %arg19[%c0_166, %c0_167, %c0_168] : memref<2x32x128xf32, #tpu.memory_space<vmem>>, vector<1x32x128xf32>
    %428 = vector.shape_cast %427 : vector<1x32x128xf32> to vector<32x128xf32>
    %cst_169 = arith.constant dense<0.000000e+00> : vector<18x128xf32>
    %429 = tpu.matmul %426, %428, %cst_169 {dimension_numbers = #tpu.dot_dimension_numbers<[1], [0], [0], [1], [0, 0, 1, 1], [], []>} : vector<18x32xf32>, vector<32x128xf32>, vector<18x128xf32> -> vector<18x128xf32>
    %c0_170 = arith.constant 0 : index
    %c0_171 = arith.constant 0 : index
    %c0_172 = arith.constant 0 : index
    %430 = vector.load %arg20[%c0_170, %c0_171, %c0_172] : memref<2x1x128xf32, #tpu.memory_space<vmem>>, vector<1x1x128xf32>
    %431 = vector.shape_cast %430 : vector<1x1x128xf32> to vector<1x128xf32>
    %432 = vector.broadcast %431 : vector<1x128xf32> to vector<18x128xf32>
    %433 = arith.addf %429, %432 : vector<18x128xf32>
    %cst_173 = arith.constant 0.000000e+00 : f32
    %434 = vector.broadcast %cst_173 : f32 to vector<18x128xf32>
    %435 = arith.maximumf %433, %434 : vector<18x128xf32>
    %c0_174 = arith.constant 0 : index
    %c0_175 = arith.constant 0 : index
    %c0_176 = arith.constant 0 : index
    %436 = vector.load %arg21[%c0_174, %c0_175, %c0_176] : memref<2x128x32xf32, #tpu.memory_space<vmem>>, vector<1x128x32xf32>
    %437 = vector.shape_cast %436 : vector<1x128x32xf32> to vector<128x32xf32>
    %cst_177 = arith.constant dense<0.000000e+00> : vector<18x32xf32>
    %438 = tpu.matmul %435, %437, %cst_177 {dimension_numbers = #tpu.dot_dimension_numbers<[1], [0], [0], [1], [0, 0, 1, 1], [], []>} : vector<18x128xf32>, vector<128x32xf32>, vector<18x32xf32> -> vector<18x32xf32>
    %c0_178 = arith.constant 0 : index
    %c0_179 = arith.constant 0 : index
    %c0_180 = arith.constant 0 : index
    %439 = vector.load %arg22[%c0_178, %c0_179, %c0_180] : memref<2x1x32xf32, #tpu.memory_space<vmem>>, vector<1x1x32xf32>
    %440 = vector.shape_cast %439 : vector<1x1x32xf32> to vector<1x32xf32>
    %441 = vector.broadcast %440 : vector<1x32xf32> to vector<18x32xf32>
    %442 = arith.addf %438, %441 : vector<18x32xf32>
    %443 = arith.addf %442, %426 : vector<18x32xf32>
    %444 = vector.extract_strided_slice %39 {offsets = [2, 0], sizes = [1, 32], strides = [1, 1]} : vector<3x32xf32> to vector<1x32xf32>
    %445 = vector.extract_strided_slice %41 {offsets = [2, 0], sizes = [1, 32], strides = [1, 1]} : vector<3x32xf32> to vector<1x32xf32>
    %cst_181 = arith.constant dense<0.000000e+00> : vector<18xf32>
    %446 = vector.multi_reduction <add>, %443, %cst_181 [1] : vector<18x32xf32> to vector<18xf32>
    %447 = vector.shape_cast %446 : vector<18xf32> to vector<18x1xf32>
    %cst_182 = arith.constant 3.200000e+01 : f32
    %448 = vector.broadcast %cst_182 : f32 to vector<18x1xf32>
    %449 = arith.divf %447, %448 : vector<18x1xf32>
    %450 = vector.broadcast %449 : vector<18x1xf32> to vector<18x32xf32>
    %451 = arith.subf %443, %450 : vector<18x32xf32>
    %452 = arith.mulf %451, %451 : vector<18x32xf32>
    %cst_183 = arith.constant dense<0.000000e+00> : vector<18xf32>
    %453 = vector.multi_reduction <add>, %452, %cst_183 [1] : vector<18x32xf32> to vector<18xf32>
    %454 = vector.shape_cast %453 : vector<18xf32> to vector<18x1xf32>
    %cst_184 = arith.constant 3.200000e+01 : f32
    %455 = vector.broadcast %cst_184 : f32 to vector<18x1xf32>
    %456 = arith.divf %454, %455 : vector<18x1xf32>
    %457 = vector.broadcast %449 : vector<18x1xf32> to vector<18x32xf32>
    %458 = arith.subf %443, %457 : vector<18x32xf32>
    %cst_185 = arith.constant 9.99999974E-6 : f32
    %459 = vector.broadcast %cst_185 : f32 to vector<18x1xf32>
    %460 = arith.addf %456, %459 : vector<18x1xf32>
    %461 = math.rsqrt %460 : vector<18x1xf32>
    %462 = vector.broadcast %461 : vector<18x1xf32> to vector<18x32xf32>
    %463 = arith.mulf %458, %462 : vector<18x32xf32>
    %464 = vector.broadcast %444 : vector<1x32xf32> to vector<18x32xf32>
    %465 = arith.mulf %463, %464 : vector<18x32xf32>
    %466 = vector.broadcast %445 : vector<1x32xf32> to vector<18x32xf32>
    %467 = arith.addf %465, %466 : vector<18x32xf32>
    %c1 = arith.constant 1 : index
    %c0_186 = arith.constant 0 : index
    %c0_187 = arith.constant 0 : index
    %468 = vector.load %arg23[%c1, %c0_186, %c0_187] : memref<2x3x32xf32, #tpu.memory_space<vmem>>, vector<1x3x32xf32>
    %469 = vector.shape_cast %468 : vector<1x3x32xf32> to vector<3x32xf32>
    %c1_188 = arith.constant 1 : index
    %c0_189 = arith.constant 0 : index
    %c0_190 = arith.constant 0 : index
    %470 = vector.load %arg24[%c1_188, %c0_189, %c0_190] : memref<2x3x32xf32, #tpu.memory_space<vmem>>, vector<1x3x32xf32>
    %471 = vector.shape_cast %470 : vector<1x3x32xf32> to vector<3x32xf32>
    %c1_191 = arith.constant 1 : index
    %c0_192 = arith.constant 0 : index
    %c0_193 = arith.constant 0 : index
    %472 = vector.load %arg9[%c1_191, %c0_192, %c0_193] : memref<2x32x96xf32, #tpu.memory_space<vmem>>, vector<1x32x96xf32>
    %473 = vector.shape_cast %472 : vector<1x32x96xf32> to vector<32x96xf32>
    %cst_194 = arith.constant dense<0.000000e+00> : vector<18x96xf32>
    %474 = tpu.matmul %467, %473, %cst_194 {dimension_numbers = #tpu.dot_dimension_numbers<[1], [0], [0], [1], [0, 0, 1, 1], [], []>} : vector<18x32xf32>, vector<32x96xf32>, vector<18x96xf32> -> vector<18x96xf32>
    %c1_195 = arith.constant 1 : index
    %c0_196 = arith.constant 0 : index
    %c0_197 = arith.constant 0 : index
    %475 = vector.load %arg10[%c1_195, %c0_196, %c0_197] : memref<2x1x96xf32, #tpu.memory_space<vmem>>, vector<1x1x96xf32>
    %476 = vector.shape_cast %475 : vector<1x1x96xf32> to vector<1x96xf32>
    %477 = vector.broadcast %476 : vector<1x96xf32> to vector<18x96xf32>
    %478 = arith.addf %474, %477 : vector<18x96xf32>
    %479 = vector.extract_strided_slice %478 {offsets = [0, 0], sizes = [6, 32], strides = [1, 1]} : vector<18x96xf32> to vector<6x32xf32>
    %480 = vector.extract_strided_slice %478 {offsets = [0, 32], sizes = [6, 32], strides = [1, 1]} : vector<18x96xf32> to vector<6x32xf32>
    %481 = vector.extract_strided_slice %478 {offsets = [0, 64], sizes = [6, 32], strides = [1, 1]} : vector<18x96xf32> to vector<6x32xf32>
    %c1_198 = arith.constant 1 : index
    %c0_199 = arith.constant 0 : index
    %c0_200 = arith.constant 0 : index
    %482 = vector.load %arg11[%c1_198, %c0_199, %c0_200] : memref<2x32x32xf32, #tpu.memory_space<vmem>>, vector<1x32x32xf32>
    %483 = vector.shape_cast %482 : vector<1x32x32xf32> to vector<32x32xf32>
    %484 = vector.extract_strided_slice %479 {offsets = [0, 0], sizes = [6, 8], strides = [1, 1]} : vector<6x32xf32> to vector<6x8xf32>
    %485 = vector.extract_strided_slice %480 {offsets = [0, 0], sizes = [6, 8], strides = [1, 1]} : vector<6x32xf32> to vector<6x8xf32>
    %cst_201 = arith.constant dense<0.000000e+00> : vector<6x6xf32>
    %486 = tpu.matmul %484, %485, %cst_201 {dimension_numbers = #tpu.dot_dimension_numbers<[1], [1], [0], [0], [0, 0, 1, 0], [], []>} : vector<6x8xf32>, vector<6x8xf32>, vector<6x6xf32> -> vector<6x6xf32>
    %cst_202 = arith.constant dense<0xFF800000> : vector<6xf32>
    %487 = vector.multi_reduction <maximumf>, %486, %cst_202 [1] : vector<6x6xf32> to vector<6xf32>
    %488 = vector.shape_cast %487 : vector<6xf32> to vector<6x1xf32>
    %489 = vector.broadcast %488 : vector<6x1xf32> to vector<6x6xf32>
    %490 = arith.subf %486, %489 : vector<6x6xf32>
    %491 = math.exp %490 : vector<6x6xf32>
    %cst_203 = arith.constant dense<0.000000e+00> : vector<6xf32>
    %492 = vector.multi_reduction <add>, %491, %cst_203 [1] : vector<6x6xf32> to vector<6xf32>
    %493 = vector.shape_cast %492 : vector<6xf32> to vector<6x1xf32>
    %494 = tpu.reciprocal %493 : vector<6x1xf32> -> vector<6x1xf32>
    %495 = vector.broadcast %494 : vector<6x1xf32> to vector<6x6xf32>
    %496 = arith.mulf %491, %495 : vector<6x6xf32>
    %497 = vector.extract_strided_slice %481 {offsets = [0, 0], sizes = [6, 8], strides = [1, 1]} : vector<6x32xf32> to vector<6x8xf32>
    %cst_204 = arith.constant dense<0.000000e+00> : vector<6x8xf32>
    %498 = tpu.matmul %496, %497, %cst_204 {dimension_numbers = #tpu.dot_dimension_numbers<[1], [0], [0], [1], [0, 0, 1, 1], [], []>} : vector<6x6xf32>, vector<6x8xf32>, vector<6x8xf32> -> vector<6x8xf32>
    %499 = vector.extract_strided_slice %483 {offsets = [0, 0], sizes = [8, 32], strides = [1, 1]} : vector<32x32xf32> to vector<8x32xf32>
    %cst_205 = arith.constant dense<0.000000e+00> : vector<6x32xf32>
    %500 = tpu.matmul %498, %499, %cst_205 {dimension_numbers = #tpu.dot_dimension_numbers<[1], [0], [0], [1], [0, 0, 1, 1], [], []>} : vector<6x8xf32>, vector<8x32xf32>, vector<6x32xf32> -> vector<6x32xf32>
    %501 = vector.extract_strided_slice %479 {offsets = [0, 8], sizes = [6, 8], strides = [1, 1]} : vector<6x32xf32> to vector<6x8xf32>
    %502 = vector.extract_strided_slice %480 {offsets = [0, 8], sizes = [6, 8], strides = [1, 1]} : vector<6x32xf32> to vector<6x8xf32>
    %cst_206 = arith.constant dense<0.000000e+00> : vector<6x6xf32>
    %503 = tpu.matmul %501, %502, %cst_206 {dimension_numbers = #tpu.dot_dimension_numbers<[1], [1], [0], [0], [0, 0, 1, 0], [], []>} : vector<6x8xf32>, vector<6x8xf32>, vector<6x6xf32> -> vector<6x6xf32>
    %cst_207 = arith.constant dense<0xFF800000> : vector<6xf32>
    %504 = vector.multi_reduction <maximumf>, %503, %cst_207 [1] : vector<6x6xf32> to vector<6xf32>
    %505 = vector.shape_cast %504 : vector<6xf32> to vector<6x1xf32>
    %506 = vector.broadcast %505 : vector<6x1xf32> to vector<6x6xf32>
    %507 = arith.subf %503, %506 : vector<6x6xf32>
    %508 = math.exp %507 : vector<6x6xf32>
    %cst_208 = arith.constant dense<0.000000e+00> : vector<6xf32>
    %509 = vector.multi_reduction <add>, %508, %cst_208 [1] : vector<6x6xf32> to vector<6xf32>
    %510 = vector.shape_cast %509 : vector<6xf32> to vector<6x1xf32>
    %511 = tpu.reciprocal %510 : vector<6x1xf32> -> vector<6x1xf32>
    %512 = vector.broadcast %511 : vector<6x1xf32> to vector<6x6xf32>
    %513 = arith.mulf %508, %512 : vector<6x6xf32>
    %514 = vector.extract_strided_slice %481 {offsets = [0, 8], sizes = [6, 8], strides = [1, 1]} : vector<6x32xf32> to vector<6x8xf32>
    %cst_209 = arith.constant dense<0.000000e+00> : vector<6x8xf32>
    %515 = tpu.matmul %513, %514, %cst_209 {dimension_numbers = #tpu.dot_dimension_numbers<[1], [0], [0], [1], [0, 0, 1, 1], [], []>} : vector<6x6xf32>, vector<6x8xf32>, vector<6x8xf32> -> vector<6x8xf32>
    %516 = vector.extract_strided_slice %483 {offsets = [8, 0], sizes = [8, 32], strides = [1, 1]} : vector<32x32xf32> to vector<8x32xf32>
    %cst_210 = arith.constant dense<0.000000e+00> : vector<6x32xf32>
    %517 = tpu.matmul %515, %516, %cst_210 {dimension_numbers = #tpu.dot_dimension_numbers<[1], [0], [0], [1], [0, 0, 1, 1], [], []>} : vector<6x8xf32>, vector<8x32xf32>, vector<6x32xf32> -> vector<6x32xf32>
    %518 = arith.addf %500, %517 : vector<6x32xf32>
    %519 = vector.extract_strided_slice %479 {offsets = [0, 16], sizes = [6, 8], strides = [1, 1]} : vector<6x32xf32> to vector<6x8xf32>
    %520 = vector.extract_strided_slice %480 {offsets = [0, 16], sizes = [6, 8], strides = [1, 1]} : vector<6x32xf32> to vector<6x8xf32>
    %cst_211 = arith.constant dense<0.000000e+00> : vector<6x6xf32>
    %521 = tpu.matmul %519, %520, %cst_211 {dimension_numbers = #tpu.dot_dimension_numbers<[1], [1], [0], [0], [0, 0, 1, 0], [], []>} : vector<6x8xf32>, vector<6x8xf32>, vector<6x6xf32> -> vector<6x6xf32>
    %cst_212 = arith.constant dense<0xFF800000> : vector<6xf32>
    %522 = vector.multi_reduction <maximumf>, %521, %cst_212 [1] : vector<6x6xf32> to vector<6xf32>
    %523 = vector.shape_cast %522 : vector<6xf32> to vector<6x1xf32>
    %524 = vector.broadcast %523 : vector<6x1xf32> to vector<6x6xf32>
    %525 = arith.subf %521, %524 : vector<6x6xf32>
    %526 = math.exp %525 : vector<6x6xf32>
    %cst_213 = arith.constant dense<0.000000e+00> : vector<6xf32>
    %527 = vector.multi_reduction <add>, %526, %cst_213 [1] : vector<6x6xf32> to vector<6xf32>
    %528 = vector.shape_cast %527 : vector<6xf32> to vector<6x1xf32>
    %529 = tpu.reciprocal %528 : vector<6x1xf32> -> vector<6x1xf32>
    %530 = vector.broadcast %529 : vector<6x1xf32> to vector<6x6xf32>
    %531 = arith.mulf %526, %530 : vector<6x6xf32>
    %532 = vector.extract_strided_slice %481 {offsets = [0, 16], sizes = [6, 8], strides = [1, 1]} : vector<6x32xf32> to vector<6x8xf32>
    %cst_214 = arith.constant dense<0.000000e+00> : vector<6x8xf32>
    %533 = tpu.matmul %531, %532, %cst_214 {dimension_numbers = #tpu.dot_dimension_numbers<[1], [0], [0], [1], [0, 0, 1, 1], [], []>} : vector<6x6xf32>, vector<6x8xf32>, vector<6x8xf32> -> vector<6x8xf32>
    %534 = vector.extract_strided_slice %483 {offsets = [16, 0], sizes = [8, 32], strides = [1, 1]} : vector<32x32xf32> to vector<8x32xf32>
    %cst_215 = arith.constant dense<0.000000e+00> : vector<6x32xf32>
    %535 = tpu.matmul %533, %534, %cst_215 {dimension_numbers = #tpu.dot_dimension_numbers<[1], [0], [0], [1], [0, 0, 1, 1], [], []>} : vector<6x8xf32>, vector<8x32xf32>, vector<6x32xf32> -> vector<6x32xf32>
    %536 = arith.addf %518, %535 : vector<6x32xf32>
    %537 = vector.extract_strided_slice %479 {offsets = [0, 24], sizes = [6, 8], strides = [1, 1]} : vector<6x32xf32> to vector<6x8xf32>
    %538 = vector.extract_strided_slice %480 {offsets = [0, 24], sizes = [6, 8], strides = [1, 1]} : vector<6x32xf32> to vector<6x8xf32>
    %cst_216 = arith.constant dense<0.000000e+00> : vector<6x6xf32>
    %539 = tpu.matmul %537, %538, %cst_216 {dimension_numbers = #tpu.dot_dimension_numbers<[1], [1], [0], [0], [0, 0, 1, 0], [], []>} : vector<6x8xf32>, vector<6x8xf32>, vector<6x6xf32> -> vector<6x6xf32>
    %cst_217 = arith.constant dense<0xFF800000> : vector<6xf32>
    %540 = vector.multi_reduction <maximumf>, %539, %cst_217 [1] : vector<6x6xf32> to vector<6xf32>
    %541 = vector.shape_cast %540 : vector<6xf32> to vector<6x1xf32>
    %542 = vector.broadcast %541 : vector<6x1xf32> to vector<6x6xf32>
    %543 = arith.subf %539, %542 : vector<6x6xf32>
    %544 = math.exp %543 : vector<6x6xf32>
    %cst_218 = arith.constant dense<0.000000e+00> : vector<6xf32>
    %545 = vector.multi_reduction <add>, %544, %cst_218 [1] : vector<6x6xf32> to vector<6xf32>
    %546 = vector.shape_cast %545 : vector<6xf32> to vector<6x1xf32>
    %547 = tpu.reciprocal %546 : vector<6x1xf32> -> vector<6x1xf32>
    %548 = vector.broadcast %547 : vector<6x1xf32> to vector<6x6xf32>
    %549 = arith.mulf %544, %548 : vector<6x6xf32>
    %550 = vector.extract_strided_slice %481 {offsets = [0, 24], sizes = [6, 8], strides = [1, 1]} : vector<6x32xf32> to vector<6x8xf32>
    %cst_219 = arith.constant dense<0.000000e+00> : vector<6x8xf32>
    %551 = tpu.matmul %549, %550, %cst_219 {dimension_numbers = #tpu.dot_dimension_numbers<[1], [0], [0], [1], [0, 0, 1, 1], [], []>} : vector<6x6xf32>, vector<6x8xf32>, vector<6x8xf32> -> vector<6x8xf32>
    %552 = vector.extract_strided_slice %483 {offsets = [24, 0], sizes = [8, 32], strides = [1, 1]} : vector<32x32xf32> to vector<8x32xf32>
    %cst_220 = arith.constant dense<0.000000e+00> : vector<6x32xf32>
    %553 = tpu.matmul %551, %552, %cst_220 {dimension_numbers = #tpu.dot_dimension_numbers<[1], [0], [0], [1], [0, 0, 1, 1], [], []>} : vector<6x8xf32>, vector<8x32xf32>, vector<6x32xf32> -> vector<6x32xf32>
    %554 = arith.addf %536, %553 : vector<6x32xf32>
    %555 = vector.extract_strided_slice %478 {offsets = [6, 0], sizes = [6, 32], strides = [1, 1]} : vector<18x96xf32> to vector<6x32xf32>
    %556 = vector.extract_strided_slice %478 {offsets = [6, 32], sizes = [6, 32], strides = [1, 1]} : vector<18x96xf32> to vector<6x32xf32>
    %557 = vector.extract_strided_slice %478 {offsets = [6, 64], sizes = [6, 32], strides = [1, 1]} : vector<18x96xf32> to vector<6x32xf32>
    %c1_221 = arith.constant 1 : index
    %c0_222 = arith.constant 0 : index
    %c0_223 = arith.constant 0 : index
    %558 = vector.load %arg11[%c1_221, %c0_222, %c0_223] : memref<2x32x32xf32, #tpu.memory_space<vmem>>, vector<1x32x32xf32>
    %559 = vector.shape_cast %558 : vector<1x32x32xf32> to vector<32x32xf32>
    %560 = vector.extract_strided_slice %555 {offsets = [0, 0], sizes = [6, 8], strides = [1, 1]} : vector<6x32xf32> to vector<6x8xf32>
    %561 = vector.extract_strided_slice %556 {offsets = [0, 0], sizes = [6, 8], strides = [1, 1]} : vector<6x32xf32> to vector<6x8xf32>
    %cst_224 = arith.constant dense<0.000000e+00> : vector<6x6xf32>
    %562 = tpu.matmul %560, %561, %cst_224 {dimension_numbers = #tpu.dot_dimension_numbers<[1], [1], [0], [0], [0, 0, 1, 0], [], []>} : vector<6x8xf32>, vector<6x8xf32>, vector<6x6xf32> -> vector<6x6xf32>
    %cst_225 = arith.constant dense<0xFF800000> : vector<6xf32>
    %563 = vector.multi_reduction <maximumf>, %562, %cst_225 [1] : vector<6x6xf32> to vector<6xf32>
    %564 = vector.shape_cast %563 : vector<6xf32> to vector<6x1xf32>
    %565 = vector.broadcast %564 : vector<6x1xf32> to vector<6x6xf32>
    %566 = arith.subf %562, %565 : vector<6x6xf32>
    %567 = math.exp %566 : vector<6x6xf32>
    %cst_226 = arith.constant dense<0.000000e+00> : vector<6xf32>
    %568 = vector.multi_reduction <add>, %567, %cst_226 [1] : vector<6x6xf32> to vector<6xf32>
    %569 = vector.shape_cast %568 : vector<6xf32> to vector<6x1xf32>
    %570 = tpu.reciprocal %569 : vector<6x1xf32> -> vector<6x1xf32>
    %571 = vector.broadcast %570 : vector<6x1xf32> to vector<6x6xf32>
    %572 = arith.mulf %567, %571 : vector<6x6xf32>
    %573 = vector.extract_strided_slice %557 {offsets = [0, 0], sizes = [6, 8], strides = [1, 1]} : vector<6x32xf32> to vector<6x8xf32>
    %cst_227 = arith.constant dense<0.000000e+00> : vector<6x8xf32>
    %574 = tpu.matmul %572, %573, %cst_227 {dimension_numbers = #tpu.dot_dimension_numbers<[1], [0], [0], [1], [0, 0, 1, 1], [], []>} : vector<6x6xf32>, vector<6x8xf32>, vector<6x8xf32> -> vector<6x8xf32>
    %575 = vector.extract_strided_slice %559 {offsets = [0, 0], sizes = [8, 32], strides = [1, 1]} : vector<32x32xf32> to vector<8x32xf32>
    %cst_228 = arith.constant dense<0.000000e+00> : vector<6x32xf32>
    %576 = tpu.matmul %574, %575, %cst_228 {dimension_numbers = #tpu.dot_dimension_numbers<[1], [0], [0], [1], [0, 0, 1, 1], [], []>} : vector<6x8xf32>, vector<8x32xf32>, vector<6x32xf32> -> vector<6x32xf32>
    %577 = vector.extract_strided_slice %555 {offsets = [0, 8], sizes = [6, 8], strides = [1, 1]} : vector<6x32xf32> to vector<6x8xf32>
    %578 = vector.extract_strided_slice %556 {offsets = [0, 8], sizes = [6, 8], strides = [1, 1]} : vector<6x32xf32> to vector<6x8xf32>
    %cst_229 = arith.constant dense<0.000000e+00> : vector<6x6xf32>
    %579 = tpu.matmul %577, %578, %cst_229 {dimension_numbers = #tpu.dot_dimension_numbers<[1], [1], [0], [0], [0, 0, 1, 0], [], []>} : vector<6x8xf32>, vector<6x8xf32>, vector<6x6xf32> -> vector<6x6xf32>
    %cst_230 = arith.constant dense<0xFF800000> : vector<6xf32>
    %580 = vector.multi_reduction <maximumf>, %579, %cst_230 [1] : vector<6x6xf32> to vector<6xf32>
    %581 = vector.shape_cast %580 : vector<6xf32> to vector<6x1xf32>
    %582 = vector.broadcast %581 : vector<6x1xf32> to vector<6x6xf32>
    %583 = arith.subf %579, %582 : vector<6x6xf32>
    %584 = math.exp %583 : vector<6x6xf32>
    %cst_231 = arith.constant dense<0.000000e+00> : vector<6xf32>
    %585 = vector.multi_reduction <add>, %584, %cst_231 [1] : vector<6x6xf32> to vector<6xf32>
    %586 = vector.shape_cast %585 : vector<6xf32> to vector<6x1xf32>
    %587 = tpu.reciprocal %586 : vector<6x1xf32> -> vector<6x1xf32>
    %588 = vector.broadcast %587 : vector<6x1xf32> to vector<6x6xf32>
    %589 = arith.mulf %584, %588 : vector<6x6xf32>
    %590 = vector.extract_strided_slice %557 {offsets = [0, 8], sizes = [6, 8], strides = [1, 1]} : vector<6x32xf32> to vector<6x8xf32>
    %cst_232 = arith.constant dense<0.000000e+00> : vector<6x8xf32>
    %591 = tpu.matmul %589, %590, %cst_232 {dimension_numbers = #tpu.dot_dimension_numbers<[1], [0], [0], [1], [0, 0, 1, 1], [], []>} : vector<6x6xf32>, vector<6x8xf32>, vector<6x8xf32> -> vector<6x8xf32>
    %592 = vector.extract_strided_slice %559 {offsets = [8, 0], sizes = [8, 32], strides = [1, 1]} : vector<32x32xf32> to vector<8x32xf32>
    %cst_233 = arith.constant dense<0.000000e+00> : vector<6x32xf32>
    %593 = tpu.matmul %591, %592, %cst_233 {dimension_numbers = #tpu.dot_dimension_numbers<[1], [0], [0], [1], [0, 0, 1, 1], [], []>} : vector<6x8xf32>, vector<8x32xf32>, vector<6x32xf32> -> vector<6x32xf32>
    %594 = arith.addf %576, %593 : vector<6x32xf32>
    %595 = vector.extract_strided_slice %555 {offsets = [0, 16], sizes = [6, 8], strides = [1, 1]} : vector<6x32xf32> to vector<6x8xf32>
    %596 = vector.extract_strided_slice %556 {offsets = [0, 16], sizes = [6, 8], strides = [1, 1]} : vector<6x32xf32> to vector<6x8xf32>
    %cst_234 = arith.constant dense<0.000000e+00> : vector<6x6xf32>
    %597 = tpu.matmul %595, %596, %cst_234 {dimension_numbers = #tpu.dot_dimension_numbers<[1], [1], [0], [0], [0, 0, 1, 0], [], []>} : vector<6x8xf32>, vector<6x8xf32>, vector<6x6xf32> -> vector<6x6xf32>
    %cst_235 = arith.constant dense<0xFF800000> : vector<6xf32>
    %598 = vector.multi_reduction <maximumf>, %597, %cst_235 [1] : vector<6x6xf32> to vector<6xf32>
    %599 = vector.shape_cast %598 : vector<6xf32> to vector<6x1xf32>
    %600 = vector.broadcast %599 : vector<6x1xf32> to vector<6x6xf32>
    %601 = arith.subf %597, %600 : vector<6x6xf32>
    %602 = math.exp %601 : vector<6x6xf32>
    %cst_236 = arith.constant dense<0.000000e+00> : vector<6xf32>
    %603 = vector.multi_reduction <add>, %602, %cst_236 [1] : vector<6x6xf32> to vector<6xf32>
    %604 = vector.shape_cast %603 : vector<6xf32> to vector<6x1xf32>
    %605 = tpu.reciprocal %604 : vector<6x1xf32> -> vector<6x1xf32>
    %606 = vector.broadcast %605 : vector<6x1xf32> to vector<6x6xf32>
    %607 = arith.mulf %602, %606 : vector<6x6xf32>
    %608 = vector.extract_strided_slice %557 {offsets = [0, 16], sizes = [6, 8], strides = [1, 1]} : vector<6x32xf32> to vector<6x8xf32>
    %cst_237 = arith.constant dense<0.000000e+00> : vector<6x8xf32>
    %609 = tpu.matmul %607, %608, %cst_237 {dimension_numbers = #tpu.dot_dimension_numbers<[1], [0], [0], [1], [0, 0, 1, 1], [], []>} : vector<6x6xf32>, vector<6x8xf32>, vector<6x8xf32> -> vector<6x8xf32>
    %610 = vector.extract_strided_slice %559 {offsets = [16, 0], sizes = [8, 32], strides = [1, 1]} : vector<32x32xf32> to vector<8x32xf32>
    %cst_238 = arith.constant dense<0.000000e+00> : vector<6x32xf32>
    %611 = tpu.matmul %609, %610, %cst_238 {dimension_numbers = #tpu.dot_dimension_numbers<[1], [0], [0], [1], [0, 0, 1, 1], [], []>} : vector<6x8xf32>, vector<8x32xf32>, vector<6x32xf32> -> vector<6x32xf32>
    %612 = arith.addf %594, %611 : vector<6x32xf32>
    %613 = vector.extract_strided_slice %555 {offsets = [0, 24], sizes = [6, 8], strides = [1, 1]} : vector<6x32xf32> to vector<6x8xf32>
    %614 = vector.extract_strided_slice %556 {offsets = [0, 24], sizes = [6, 8], strides = [1, 1]} : vector<6x32xf32> to vector<6x8xf32>
    %cst_239 = arith.constant dense<0.000000e+00> : vector<6x6xf32>
    %615 = tpu.matmul %613, %614, %cst_239 {dimension_numbers = #tpu.dot_dimension_numbers<[1], [1], [0], [0], [0, 0, 1, 0], [], []>} : vector<6x8xf32>, vector<6x8xf32>, vector<6x6xf32> -> vector<6x6xf32>
    %cst_240 = arith.constant dense<0xFF800000> : vector<6xf32>
    %616 = vector.multi_reduction <maximumf>, %615, %cst_240 [1] : vector<6x6xf32> to vector<6xf32>
    %617 = vector.shape_cast %616 : vector<6xf32> to vector<6x1xf32>
    %618 = vector.broadcast %617 : vector<6x1xf32> to vector<6x6xf32>
    %619 = arith.subf %615, %618 : vector<6x6xf32>
    %620 = math.exp %619 : vector<6x6xf32>
    %cst_241 = arith.constant dense<0.000000e+00> : vector<6xf32>
    %621 = vector.multi_reduction <add>, %620, %cst_241 [1] : vector<6x6xf32> to vector<6xf32>
    %622 = vector.shape_cast %621 : vector<6xf32> to vector<6x1xf32>
    %623 = tpu.reciprocal %622 : vector<6x1xf32> -> vector<6x1xf32>
    %624 = vector.broadcast %623 : vector<6x1xf32> to vector<6x6xf32>
    %625 = arith.mulf %620, %624 : vector<6x6xf32>
    %626 = vector.extract_strided_slice %557 {offsets = [0, 24], sizes = [6, 8], strides = [1, 1]} : vector<6x32xf32> to vector<6x8xf32>
    %cst_242 = arith.constant dense<0.000000e+00> : vector<6x8xf32>
    %627 = tpu.matmul %625, %626, %cst_242 {dimension_numbers = #tpu.dot_dimension_numbers<[1], [0], [0], [1], [0, 0, 1, 1], [], []>} : vector<6x6xf32>, vector<6x8xf32>, vector<6x8xf32> -> vector<6x8xf32>
    %628 = vector.extract_strided_slice %559 {offsets = [24, 0], sizes = [8, 32], strides = [1, 1]} : vector<32x32xf32> to vector<8x32xf32>
    %cst_243 = arith.constant dense<0.000000e+00> : vector<6x32xf32>
    %629 = tpu.matmul %627, %628, %cst_243 {dimension_numbers = #tpu.dot_dimension_numbers<[1], [0], [0], [1], [0, 0, 1, 1], [], []>} : vector<6x8xf32>, vector<8x32xf32>, vector<6x32xf32> -> vector<6x32xf32>
    %630 = arith.addf %612, %629 : vector<6x32xf32>
    %631 = vector.extract_strided_slice %478 {offsets = [12, 0], sizes = [6, 32], strides = [1, 1]} : vector<18x96xf32> to vector<6x32xf32>
    %632 = vector.extract_strided_slice %478 {offsets = [12, 32], sizes = [6, 32], strides = [1, 1]} : vector<18x96xf32> to vector<6x32xf32>
    %633 = vector.extract_strided_slice %478 {offsets = [12, 64], sizes = [6, 32], strides = [1, 1]} : vector<18x96xf32> to vector<6x32xf32>
    %c1_244 = arith.constant 1 : index
    %c0_245 = arith.constant 0 : index
    %c0_246 = arith.constant 0 : index
    %634 = vector.load %arg11[%c1_244, %c0_245, %c0_246] : memref<2x32x32xf32, #tpu.memory_space<vmem>>, vector<1x32x32xf32>
    %635 = vector.shape_cast %634 : vector<1x32x32xf32> to vector<32x32xf32>
    %636 = vector.extract_strided_slice %631 {offsets = [0, 0], sizes = [6, 8], strides = [1, 1]} : vector<6x32xf32> to vector<6x8xf32>
    %637 = vector.extract_strided_slice %632 {offsets = [0, 0], sizes = [6, 8], strides = [1, 1]} : vector<6x32xf32> to vector<6x8xf32>
    %cst_247 = arith.constant dense<0.000000e+00> : vector<6x6xf32>
    %638 = tpu.matmul %636, %637, %cst_247 {dimension_numbers = #tpu.dot_dimension_numbers<[1], [1], [0], [0], [0, 0, 1, 0], [], []>} : vector<6x8xf32>, vector<6x8xf32>, vector<6x6xf32> -> vector<6x6xf32>
    %cst_248 = arith.constant dense<0xFF800000> : vector<6xf32>
    %639 = vector.multi_reduction <maximumf>, %638, %cst_248 [1] : vector<6x6xf32> to vector<6xf32>
    %640 = vector.shape_cast %639 : vector<6xf32> to vector<6x1xf32>
    %641 = vector.broadcast %640 : vector<6x1xf32> to vector<6x6xf32>
    %642 = arith.subf %638, %641 : vector<6x6xf32>
    %643 = math.exp %642 : vector<6x6xf32>
    %cst_249 = arith.constant dense<0.000000e+00> : vector<6xf32>
    %644 = vector.multi_reduction <add>, %643, %cst_249 [1] : vector<6x6xf32> to vector<6xf32>
    %645 = vector.shape_cast %644 : vector<6xf32> to vector<6x1xf32>
    %646 = tpu.reciprocal %645 : vector<6x1xf32> -> vector<6x1xf32>
    %647 = vector.broadcast %646 : vector<6x1xf32> to vector<6x6xf32>
    %648 = arith.mulf %643, %647 : vector<6x6xf32>
    %649 = vector.extract_strided_slice %633 {offsets = [0, 0], sizes = [6, 8], strides = [1, 1]} : vector<6x32xf32> to vector<6x8xf32>
    %cst_250 = arith.constant dense<0.000000e+00> : vector<6x8xf32>
    %650 = tpu.matmul %648, %649, %cst_250 {dimension_numbers = #tpu.dot_dimension_numbers<[1], [0], [0], [1], [0, 0, 1, 1], [], []>} : vector<6x6xf32>, vector<6x8xf32>, vector<6x8xf32> -> vector<6x8xf32>
    %651 = vector.extract_strided_slice %635 {offsets = [0, 0], sizes = [8, 32], strides = [1, 1]} : vector<32x32xf32> to vector<8x32xf32>
    %cst_251 = arith.constant dense<0.000000e+00> : vector<6x32xf32>
    %652 = tpu.matmul %650, %651, %cst_251 {dimension_numbers = #tpu.dot_dimension_numbers<[1], [0], [0], [1], [0, 0, 1, 1], [], []>} : vector<6x8xf32>, vector<8x32xf32>, vector<6x32xf32> -> vector<6x32xf32>
    %653 = vector.extract_strided_slice %631 {offsets = [0, 8], sizes = [6, 8], strides = [1, 1]} : vector<6x32xf32> to vector<6x8xf32>
    %654 = vector.extract_strided_slice %632 {offsets = [0, 8], sizes = [6, 8], strides = [1, 1]} : vector<6x32xf32> to vector<6x8xf32>
    %cst_252 = arith.constant dense<0.000000e+00> : vector<6x6xf32>
    %655 = tpu.matmul %653, %654, %cst_252 {dimension_numbers = #tpu.dot_dimension_numbers<[1], [1], [0], [0], [0, 0, 1, 0], [], []>} : vector<6x8xf32>, vector<6x8xf32>, vector<6x6xf32> -> vector<6x6xf32>
    %cst_253 = arith.constant dense<0xFF800000> : vector<6xf32>
    %656 = vector.multi_reduction <maximumf>, %655, %cst_253 [1] : vector<6x6xf32> to vector<6xf32>
    %657 = vector.shape_cast %656 : vector<6xf32> to vector<6x1xf32>
    %658 = vector.broadcast %657 : vector<6x1xf32> to vector<6x6xf32>
    %659 = arith.subf %655, %658 : vector<6x6xf32>
    %660 = math.exp %659 : vector<6x6xf32>
    %cst_254 = arith.constant dense<0.000000e+00> : vector<6xf32>
    %661 = vector.multi_reduction <add>, %660, %cst_254 [1] : vector<6x6xf32> to vector<6xf32>
    %662 = vector.shape_cast %661 : vector<6xf32> to vector<6x1xf32>
    %663 = tpu.reciprocal %662 : vector<6x1xf32> -> vector<6x1xf32>
    %664 = vector.broadcast %663 : vector<6x1xf32> to vector<6x6xf32>
    %665 = arith.mulf %660, %664 : vector<6x6xf32>
    %666 = vector.extract_strided_slice %633 {offsets = [0, 8], sizes = [6, 8], strides = [1, 1]} : vector<6x32xf32> to vector<6x8xf32>
    %cst_255 = arith.constant dense<0.000000e+00> : vector<6x8xf32>
    %667 = tpu.matmul %665, %666, %cst_255 {dimension_numbers = #tpu.dot_dimension_numbers<[1], [0], [0], [1], [0, 0, 1, 1], [], []>} : vector<6x6xf32>, vector<6x8xf32>, vector<6x8xf32> -> vector<6x8xf32>
    %668 = vector.extract_strided_slice %635 {offsets = [8, 0], sizes = [8, 32], strides = [1, 1]} : vector<32x32xf32> to vector<8x32xf32>
    %cst_256 = arith.constant dense<0.000000e+00> : vector<6x32xf32>
    %669 = tpu.matmul %667, %668, %cst_256 {dimension_numbers = #tpu.dot_dimension_numbers<[1], [0], [0], [1], [0, 0, 1, 1], [], []>} : vector<6x8xf32>, vector<8x32xf32>, vector<6x32xf32> -> vector<6x32xf32>
    %670 = arith.addf %652, %669 : vector<6x32xf32>
    %671 = vector.extract_strided_slice %631 {offsets = [0, 16], sizes = [6, 8], strides = [1, 1]} : vector<6x32xf32> to vector<6x8xf32>
    %672 = vector.extract_strided_slice %632 {offsets = [0, 16], sizes = [6, 8], strides = [1, 1]} : vector<6x32xf32> to vector<6x8xf32>
    %cst_257 = arith.constant dense<0.000000e+00> : vector<6x6xf32>
    %673 = tpu.matmul %671, %672, %cst_257 {dimension_numbers = #tpu.dot_dimension_numbers<[1], [1], [0], [0], [0, 0, 1, 0], [], []>} : vector<6x8xf32>, vector<6x8xf32>, vector<6x6xf32> -> vector<6x6xf32>
    %cst_258 = arith.constant dense<0xFF800000> : vector<6xf32>
    %674 = vector.multi_reduction <maximumf>, %673, %cst_258 [1] : vector<6x6xf32> to vector<6xf32>
    %675 = vector.shape_cast %674 : vector<6xf32> to vector<6x1xf32>
    %676 = vector.broadcast %675 : vector<6x1xf32> to vector<6x6xf32>
    %677 = arith.subf %673, %676 : vector<6x6xf32>
    %678 = math.exp %677 : vector<6x6xf32>
    %cst_259 = arith.constant dense<0.000000e+00> : vector<6xf32>
    %679 = vector.multi_reduction <add>, %678, %cst_259 [1] : vector<6x6xf32> to vector<6xf32>
    %680 = vector.shape_cast %679 : vector<6xf32> to vector<6x1xf32>
    %681 = tpu.reciprocal %680 : vector<6x1xf32> -> vector<6x1xf32>
    %682 = vector.broadcast %681 : vector<6x1xf32> to vector<6x6xf32>
    %683 = arith.mulf %678, %682 : vector<6x6xf32>
    %684 = vector.extract_strided_slice %633 {offsets = [0, 16], sizes = [6, 8], strides = [1, 1]} : vector<6x32xf32> to vector<6x8xf32>
    %cst_260 = arith.constant dense<0.000000e+00> : vector<6x8xf32>
    %685 = tpu.matmul %683, %684, %cst_260 {dimension_numbers = #tpu.dot_dimension_numbers<[1], [0], [0], [1], [0, 0, 1, 1], [], []>} : vector<6x6xf32>, vector<6x8xf32>, vector<6x8xf32> -> vector<6x8xf32>
    %686 = vector.extract_strided_slice %635 {offsets = [16, 0], sizes = [8, 32], strides = [1, 1]} : vector<32x32xf32> to vector<8x32xf32>
    %cst_261 = arith.constant dense<0.000000e+00> : vector<6x32xf32>
    %687 = tpu.matmul %685, %686, %cst_261 {dimension_numbers = #tpu.dot_dimension_numbers<[1], [0], [0], [1], [0, 0, 1, 1], [], []>} : vector<6x8xf32>, vector<8x32xf32>, vector<6x32xf32> -> vector<6x32xf32>
    %688 = arith.addf %670, %687 : vector<6x32xf32>
    %689 = vector.extract_strided_slice %631 {offsets = [0, 24], sizes = [6, 8], strides = [1, 1]} : vector<6x32xf32> to vector<6x8xf32>
    %690 = vector.extract_strided_slice %632 {offsets = [0, 24], sizes = [6, 8], strides = [1, 1]} : vector<6x32xf32> to vector<6x8xf32>
    %cst_262 = arith.constant dense<0.000000e+00> : vector<6x6xf32>
    %691 = tpu.matmul %689, %690, %cst_262 {dimension_numbers = #tpu.dot_dimension_numbers<[1], [1], [0], [0], [0, 0, 1, 0], [], []>} : vector<6x8xf32>, vector<6x8xf32>, vector<6x6xf32> -> vector<6x6xf32>
    %cst_263 = arith.constant dense<0xFF800000> : vector<6xf32>
    %692 = vector.multi_reduction <maximumf>, %691, %cst_263 [1] : vector<6x6xf32> to vector<6xf32>
    %693 = vector.shape_cast %692 : vector<6xf32> to vector<6x1xf32>
    %694 = vector.broadcast %693 : vector<6x1xf32> to vector<6x6xf32>
    %695 = arith.subf %691, %694 : vector<6x6xf32>
    %696 = math.exp %695 : vector<6x6xf32>
    %cst_264 = arith.constant dense<0.000000e+00> : vector<6xf32>
    %697 = vector.multi_reduction <add>, %696, %cst_264 [1] : vector<6x6xf32> to vector<6xf32>
    %698 = vector.shape_cast %697 : vector<6xf32> to vector<6x1xf32>
    %699 = tpu.reciprocal %698 : vector<6x1xf32> -> vector<6x1xf32>
    %700 = vector.broadcast %699 : vector<6x1xf32> to vector<6x6xf32>
    %701 = arith.mulf %696, %700 : vector<6x6xf32>
    %702 = vector.extract_strided_slice %633 {offsets = [0, 24], sizes = [6, 8], strides = [1, 1]} : vector<6x32xf32> to vector<6x8xf32>
    %cst_265 = arith.constant dense<0.000000e+00> : vector<6x8xf32>
    %703 = tpu.matmul %701, %702, %cst_265 {dimension_numbers = #tpu.dot_dimension_numbers<[1], [0], [0], [1], [0, 0, 1, 1], [], []>} : vector<6x6xf32>, vector<6x8xf32>, vector<6x8xf32> -> vector<6x8xf32>
    %704 = vector.extract_strided_slice %635 {offsets = [24, 0], sizes = [8, 32], strides = [1, 1]} : vector<32x32xf32> to vector<8x32xf32>
    %cst_266 = arith.constant dense<0.000000e+00> : vector<6x32xf32>
    %705 = tpu.matmul %703, %704, %cst_266 {dimension_numbers = #tpu.dot_dimension_numbers<[1], [0], [0], [1], [0, 0, 1, 1], [], []>} : vector<6x8xf32>, vector<8x32xf32>, vector<6x32xf32> -> vector<6x32xf32>
    %706 = arith.addf %688, %705 : vector<6x32xf32>
    %707 = tpu.concatenate %554, %630, %706 in 0 : vector<6x32xf32>, vector<6x32xf32>, vector<6x32xf32> -> vector<18x32xf32>
    %c1_267 = arith.constant 1 : index
    %c0_268 = arith.constant 0 : index
    %c0_269 = arith.constant 0 : index
    %708 = vector.load %arg12[%c1_267, %c0_268, %c0_269] : memref<2x1x32xf32, #tpu.memory_space<vmem>>, vector<1x1x32xf32>
    %709 = vector.shape_cast %708 : vector<1x1x32xf32> to vector<1x32xf32>
    %710 = vector.broadcast %709 : vector<1x32xf32> to vector<18x32xf32>
    %711 = arith.addf %707, %710 : vector<18x32xf32>
    %712 = arith.addf %711, %467 : vector<18x32xf32>
    %713 = vector.extract_strided_slice %469 {offsets = [0, 0], sizes = [1, 32], strides = [1, 1]} : vector<3x32xf32> to vector<1x32xf32>
    %714 = vector.extract_strided_slice %471 {offsets = [0, 0], sizes = [1, 32], strides = [1, 1]} : vector<3x32xf32> to vector<1x32xf32>
    %cst_270 = arith.constant dense<0.000000e+00> : vector<18xf32>
    %715 = vector.multi_reduction <add>, %712, %cst_270 [1] : vector<18x32xf32> to vector<18xf32>
    %716 = vector.shape_cast %715 : vector<18xf32> to vector<18x1xf32>
    %cst_271 = arith.constant 3.200000e+01 : f32
    %717 = vector.broadcast %cst_271 : f32 to vector<18x1xf32>
    %718 = arith.divf %716, %717 : vector<18x1xf32>
    %719 = vector.broadcast %718 : vector<18x1xf32> to vector<18x32xf32>
    %720 = arith.subf %712, %719 : vector<18x32xf32>
    %721 = arith.mulf %720, %720 : vector<18x32xf32>
    %cst_272 = arith.constant dense<0.000000e+00> : vector<18xf32>
    %722 = vector.multi_reduction <add>, %721, %cst_272 [1] : vector<18x32xf32> to vector<18xf32>
    %723 = vector.shape_cast %722 : vector<18xf32> to vector<18x1xf32>
    %cst_273 = arith.constant 3.200000e+01 : f32
    %724 = vector.broadcast %cst_273 : f32 to vector<18x1xf32>
    %725 = arith.divf %723, %724 : vector<18x1xf32>
    %726 = vector.broadcast %718 : vector<18x1xf32> to vector<18x32xf32>
    %727 = arith.subf %712, %726 : vector<18x32xf32>
    %cst_274 = arith.constant 9.99999974E-6 : f32
    %728 = vector.broadcast %cst_274 : f32 to vector<18x1xf32>
    %729 = arith.addf %725, %728 : vector<18x1xf32>
    %730 = math.rsqrt %729 : vector<18x1xf32>
    %731 = vector.broadcast %730 : vector<18x1xf32> to vector<18x32xf32>
    %732 = arith.mulf %727, %731 : vector<18x32xf32>
    %733 = vector.broadcast %713 : vector<1x32xf32> to vector<18x32xf32>
    %734 = arith.mulf %732, %733 : vector<18x32xf32>
    %735 = vector.broadcast %714 : vector<1x32xf32> to vector<18x32xf32>
    %736 = arith.addf %734, %735 : vector<18x32xf32>
    %c1_275 = arith.constant 1 : index
    %c0_276 = arith.constant 0 : index
    %c0_277 = arith.constant 0 : index
    %737 = vector.load %arg13[%c1_275, %c0_276, %c0_277] : memref<2x32x32xf32, #tpu.memory_space<vmem>>, vector<1x32x32xf32>
    %738 = vector.shape_cast %737 : vector<1x32x32xf32> to vector<32x32xf32>
    %cst_278 = arith.constant dense<0.000000e+00> : vector<18x32xf32>
    %739 = tpu.matmul %736, %738, %cst_278 {dimension_numbers = #tpu.dot_dimension_numbers<[1], [0], [0], [1], [0, 0, 1, 1], [], []>} : vector<18x32xf32>, vector<32x32xf32>, vector<18x32xf32> -> vector<18x32xf32>
    %c1_279 = arith.constant 1 : index
    %c0_280 = arith.constant 0 : index
    %c0_281 = arith.constant 0 : index
    %740 = vector.load %arg14[%c1_279, %c0_280, %c0_281] : memref<2x1x32xf32, #tpu.memory_space<vmem>>, vector<1x1x32xf32>
    %741 = vector.shape_cast %740 : vector<1x1x32xf32> to vector<1x32xf32>
    %742 = vector.broadcast %741 : vector<1x32xf32> to vector<18x32xf32>
    %743 = arith.addf %739, %742 : vector<18x32xf32>
    %c1_282 = arith.constant 1 : index
    %c0_283 = arith.constant 0 : index
    %c0_284 = arith.constant 0 : index
    %744 = vector.load %arg15[%c1_282, %c0_283, %c0_284] : memref<2x32x64xf32, #tpu.memory_space<vmem>>, vector<1x32x64xf32>
    %745 = vector.shape_cast %744 : vector<1x32x64xf32> to vector<32x64xf32>
    %cst_285 = arith.constant dense<0.000000e+00> : vector<24x64xf32>
    %746 = tpu.matmul %32, %745, %cst_285 {dimension_numbers = #tpu.dot_dimension_numbers<[1], [0], [0], [1], [0, 0, 1, 1], [], []>} : vector<24x32xf32>, vector<32x64xf32>, vector<24x64xf32> -> vector<24x64xf32>
    %c1_286 = arith.constant 1 : index
    %c0_287 = arith.constant 0 : index
    %c0_288 = arith.constant 0 : index
    %747 = vector.load %arg16[%c1_286, %c0_287, %c0_288] : memref<2x1x64xf32, #tpu.memory_space<vmem>>, vector<1x1x64xf32>
    %748 = vector.shape_cast %747 : vector<1x1x64xf32> to vector<1x64xf32>
    %749 = vector.broadcast %748 : vector<1x64xf32> to vector<24x64xf32>
    %750 = arith.addf %746, %749 : vector<24x64xf32>
    %751 = vector.extract_strided_slice %743 {offsets = [0, 0], sizes = [6, 32], strides = [1, 1]} : vector<18x32xf32> to vector<6x32xf32>
    %752 = vector.extract_strided_slice %750 {offsets = [0, 0], sizes = [8, 32], strides = [1, 1]} : vector<24x64xf32> to vector<8x32xf32>
    %753 = vector.extract_strided_slice %750 {offsets = [0, 32], sizes = [8, 32], strides = [1, 1]} : vector<24x64xf32> to vector<8x32xf32>
    %c1_289 = arith.constant 1 : index
    %c0_290 = arith.constant 0 : index
    %c0_291 = arith.constant 0 : index
    %754 = vector.load %arg17[%c1_289, %c0_290, %c0_291] : memref<2x32x32xf32, #tpu.memory_space<vmem>>, vector<1x32x32xf32>
    %755 = vector.shape_cast %754 : vector<1x32x32xf32> to vector<32x32xf32>
    %756 = vector.extract_strided_slice %751 {offsets = [0, 0], sizes = [6, 8], strides = [1, 1]} : vector<6x32xf32> to vector<6x8xf32>
    %757 = vector.extract_strided_slice %752 {offsets = [0, 0], sizes = [8, 8], strides = [1, 1]} : vector<8x32xf32> to vector<8x8xf32>
    %cst_292 = arith.constant dense<0.000000e+00> : vector<6x8xf32>
    %758 = tpu.matmul %756, %757, %cst_292 {dimension_numbers = #tpu.dot_dimension_numbers<[1], [1], [0], [0], [0, 0, 1, 0], [], []>} : vector<6x8xf32>, vector<8x8xf32>, vector<6x8xf32> -> vector<6x8xf32>
    %cst_293 = arith.constant dense<0xFF800000> : vector<6xf32>
    %759 = vector.multi_reduction <maximumf>, %758, %cst_293 [1] : vector<6x8xf32> to vector<6xf32>
    %760 = vector.shape_cast %759 : vector<6xf32> to vector<6x1xf32>
    %761 = vector.broadcast %760 : vector<6x1xf32> to vector<6x8xf32>
    %762 = arith.subf %758, %761 : vector<6x8xf32>
    %763 = math.exp %762 : vector<6x8xf32>
    %cst_294 = arith.constant dense<0.000000e+00> : vector<6xf32>
    %764 = vector.multi_reduction <add>, %763, %cst_294 [1] : vector<6x8xf32> to vector<6xf32>
    %765 = vector.shape_cast %764 : vector<6xf32> to vector<6x1xf32>
    %766 = tpu.reciprocal %765 : vector<6x1xf32> -> vector<6x1xf32>
    %767 = vector.broadcast %766 : vector<6x1xf32> to vector<6x8xf32>
    %768 = arith.mulf %763, %767 : vector<6x8xf32>
    %769 = vector.extract_strided_slice %753 {offsets = [0, 0], sizes = [8, 8], strides = [1, 1]} : vector<8x32xf32> to vector<8x8xf32>
    %cst_295 = arith.constant dense<0.000000e+00> : vector<6x8xf32>
    %770 = tpu.matmul %768, %769, %cst_295 {dimension_numbers = #tpu.dot_dimension_numbers<[1], [0], [0], [1], [0, 0, 1, 1], [], []>} : vector<6x8xf32>, vector<8x8xf32>, vector<6x8xf32> -> vector<6x8xf32>
    %771 = vector.extract_strided_slice %755 {offsets = [0, 0], sizes = [8, 32], strides = [1, 1]} : vector<32x32xf32> to vector<8x32xf32>
    %cst_296 = arith.constant dense<0.000000e+00> : vector<6x32xf32>
    %772 = tpu.matmul %770, %771, %cst_296 {dimension_numbers = #tpu.dot_dimension_numbers<[1], [0], [0], [1], [0, 0, 1, 1], [], []>} : vector<6x8xf32>, vector<8x32xf32>, vector<6x32xf32> -> vector<6x32xf32>
    %773 = vector.extract_strided_slice %751 {offsets = [0, 8], sizes = [6, 8], strides = [1, 1]} : vector<6x32xf32> to vector<6x8xf32>
    %774 = vector.extract_strided_slice %752 {offsets = [0, 8], sizes = [8, 8], strides = [1, 1]} : vector<8x32xf32> to vector<8x8xf32>
    %cst_297 = arith.constant dense<0.000000e+00> : vector<6x8xf32>
    %775 = tpu.matmul %773, %774, %cst_297 {dimension_numbers = #tpu.dot_dimension_numbers<[1], [1], [0], [0], [0, 0, 1, 0], [], []>} : vector<6x8xf32>, vector<8x8xf32>, vector<6x8xf32> -> vector<6x8xf32>
    %cst_298 = arith.constant dense<0xFF800000> : vector<6xf32>
    %776 = vector.multi_reduction <maximumf>, %775, %cst_298 [1] : vector<6x8xf32> to vector<6xf32>
    %777 = vector.shape_cast %776 : vector<6xf32> to vector<6x1xf32>
    %778 = vector.broadcast %777 : vector<6x1xf32> to vector<6x8xf32>
    %779 = arith.subf %775, %778 : vector<6x8xf32>
    %780 = math.exp %779 : vector<6x8xf32>
    %cst_299 = arith.constant dense<0.000000e+00> : vector<6xf32>
    %781 = vector.multi_reduction <add>, %780, %cst_299 [1] : vector<6x8xf32> to vector<6xf32>
    %782 = vector.shape_cast %781 : vector<6xf32> to vector<6x1xf32>
    %783 = tpu.reciprocal %782 : vector<6x1xf32> -> vector<6x1xf32>
    %784 = vector.broadcast %783 : vector<6x1xf32> to vector<6x8xf32>
    %785 = arith.mulf %780, %784 : vector<6x8xf32>
    %786 = vector.extract_strided_slice %753 {offsets = [0, 8], sizes = [8, 8], strides = [1, 1]} : vector<8x32xf32> to vector<8x8xf32>
    %cst_300 = arith.constant dense<0.000000e+00> : vector<6x8xf32>
    %787 = tpu.matmul %785, %786, %cst_300 {dimension_numbers = #tpu.dot_dimension_numbers<[1], [0], [0], [1], [0, 0, 1, 1], [], []>} : vector<6x8xf32>, vector<8x8xf32>, vector<6x8xf32> -> vector<6x8xf32>
    %788 = vector.extract_strided_slice %755 {offsets = [8, 0], sizes = [8, 32], strides = [1, 1]} : vector<32x32xf32> to vector<8x32xf32>
    %cst_301 = arith.constant dense<0.000000e+00> : vector<6x32xf32>
    %789 = tpu.matmul %787, %788, %cst_301 {dimension_numbers = #tpu.dot_dimension_numbers<[1], [0], [0], [1], [0, 0, 1, 1], [], []>} : vector<6x8xf32>, vector<8x32xf32>, vector<6x32xf32> -> vector<6x32xf32>
    %790 = arith.addf %772, %789 : vector<6x32xf32>
    %791 = vector.extract_strided_slice %751 {offsets = [0, 16], sizes = [6, 8], strides = [1, 1]} : vector<6x32xf32> to vector<6x8xf32>
    %792 = vector.extract_strided_slice %752 {offsets = [0, 16], sizes = [8, 8], strides = [1, 1]} : vector<8x32xf32> to vector<8x8xf32>
    %cst_302 = arith.constant dense<0.000000e+00> : vector<6x8xf32>
    %793 = tpu.matmul %791, %792, %cst_302 {dimension_numbers = #tpu.dot_dimension_numbers<[1], [1], [0], [0], [0, 0, 1, 0], [], []>} : vector<6x8xf32>, vector<8x8xf32>, vector<6x8xf32> -> vector<6x8xf32>
    %cst_303 = arith.constant dense<0xFF800000> : vector<6xf32>
    %794 = vector.multi_reduction <maximumf>, %793, %cst_303 [1] : vector<6x8xf32> to vector<6xf32>
    %795 = vector.shape_cast %794 : vector<6xf32> to vector<6x1xf32>
    %796 = vector.broadcast %795 : vector<6x1xf32> to vector<6x8xf32>
    %797 = arith.subf %793, %796 : vector<6x8xf32>
    %798 = math.exp %797 : vector<6x8xf32>
    %cst_304 = arith.constant dense<0.000000e+00> : vector<6xf32>
    %799 = vector.multi_reduction <add>, %798, %cst_304 [1] : vector<6x8xf32> to vector<6xf32>
    %800 = vector.shape_cast %799 : vector<6xf32> to vector<6x1xf32>
    %801 = tpu.reciprocal %800 : vector<6x1xf32> -> vector<6x1xf32>
    %802 = vector.broadcast %801 : vector<6x1xf32> to vector<6x8xf32>
    %803 = arith.mulf %798, %802 : vector<6x8xf32>
    %804 = vector.extract_strided_slice %753 {offsets = [0, 16], sizes = [8, 8], strides = [1, 1]} : vector<8x32xf32> to vector<8x8xf32>
    %cst_305 = arith.constant dense<0.000000e+00> : vector<6x8xf32>
    %805 = tpu.matmul %803, %804, %cst_305 {dimension_numbers = #tpu.dot_dimension_numbers<[1], [0], [0], [1], [0, 0, 1, 1], [], []>} : vector<6x8xf32>, vector<8x8xf32>, vector<6x8xf32> -> vector<6x8xf32>
    %806 = vector.extract_strided_slice %755 {offsets = [16, 0], sizes = [8, 32], strides = [1, 1]} : vector<32x32xf32> to vector<8x32xf32>
    %cst_306 = arith.constant dense<0.000000e+00> : vector<6x32xf32>
    %807 = tpu.matmul %805, %806, %cst_306 {dimension_numbers = #tpu.dot_dimension_numbers<[1], [0], [0], [1], [0, 0, 1, 1], [], []>} : vector<6x8xf32>, vector<8x32xf32>, vector<6x32xf32> -> vector<6x32xf32>
    %808 = arith.addf %790, %807 : vector<6x32xf32>
    %809 = vector.extract_strided_slice %751 {offsets = [0, 24], sizes = [6, 8], strides = [1, 1]} : vector<6x32xf32> to vector<6x8xf32>
    %810 = vector.extract_strided_slice %752 {offsets = [0, 24], sizes = [8, 8], strides = [1, 1]} : vector<8x32xf32> to vector<8x8xf32>
    %cst_307 = arith.constant dense<0.000000e+00> : vector<6x8xf32>
    %811 = tpu.matmul %809, %810, %cst_307 {dimension_numbers = #tpu.dot_dimension_numbers<[1], [1], [0], [0], [0, 0, 1, 0], [], []>} : vector<6x8xf32>, vector<8x8xf32>, vector<6x8xf32> -> vector<6x8xf32>
    %cst_308 = arith.constant dense<0xFF800000> : vector<6xf32>
    %812 = vector.multi_reduction <maximumf>, %811, %cst_308 [1] : vector<6x8xf32> to vector<6xf32>
    %813 = vector.shape_cast %812 : vector<6xf32> to vector<6x1xf32>
    %814 = vector.broadcast %813 : vector<6x1xf32> to vector<6x8xf32>
    %815 = arith.subf %811, %814 : vector<6x8xf32>
    %816 = math.exp %815 : vector<6x8xf32>
    %cst_309 = arith.constant dense<0.000000e+00> : vector<6xf32>
    %817 = vector.multi_reduction <add>, %816, %cst_309 [1] : vector<6x8xf32> to vector<6xf32>
    %818 = vector.shape_cast %817 : vector<6xf32> to vector<6x1xf32>
    %819 = tpu.reciprocal %818 : vector<6x1xf32> -> vector<6x1xf32>
    %820 = vector.broadcast %819 : vector<6x1xf32> to vector<6x8xf32>
    %821 = arith.mulf %816, %820 : vector<6x8xf32>
    %822 = vector.extract_strided_slice %753 {offsets = [0, 24], sizes = [8, 8], strides = [1, 1]} : vector<8x32xf32> to vector<8x8xf32>
    %cst_310 = arith.constant dense<0.000000e+00> : vector<6x8xf32>
    %823 = tpu.matmul %821, %822, %cst_310 {dimension_numbers = #tpu.dot_dimension_numbers<[1], [0], [0], [1], [0, 0, 1, 1], [], []>} : vector<6x8xf32>, vector<8x8xf32>, vector<6x8xf32> -> vector<6x8xf32>
    %824 = vector.extract_strided_slice %755 {offsets = [24, 0], sizes = [8, 32], strides = [1, 1]} : vector<32x32xf32> to vector<8x32xf32>
    %cst_311 = arith.constant dense<0.000000e+00> : vector<6x32xf32>
    %825 = tpu.matmul %823, %824, %cst_311 {dimension_numbers = #tpu.dot_dimension_numbers<[1], [0], [0], [1], [0, 0, 1, 1], [], []>} : vector<6x8xf32>, vector<8x32xf32>, vector<6x32xf32> -> vector<6x32xf32>
    %826 = arith.addf %808, %825 : vector<6x32xf32>
    %827 = vector.extract_strided_slice %743 {offsets = [6, 0], sizes = [6, 32], strides = [1, 1]} : vector<18x32xf32> to vector<6x32xf32>
    %828 = vector.extract_strided_slice %750 {offsets = [8, 0], sizes = [8, 32], strides = [1, 1]} : vector<24x64xf32> to vector<8x32xf32>
    %829 = vector.extract_strided_slice %750 {offsets = [8, 32], sizes = [8, 32], strides = [1, 1]} : vector<24x64xf32> to vector<8x32xf32>
    %c1_312 = arith.constant 1 : index
    %c0_313 = arith.constant 0 : index
    %c0_314 = arith.constant 0 : index
    %830 = vector.load %arg17[%c1_312, %c0_313, %c0_314] : memref<2x32x32xf32, #tpu.memory_space<vmem>>, vector<1x32x32xf32>
    %831 = vector.shape_cast %830 : vector<1x32x32xf32> to vector<32x32xf32>
    %832 = vector.extract_strided_slice %827 {offsets = [0, 0], sizes = [6, 8], strides = [1, 1]} : vector<6x32xf32> to vector<6x8xf32>
    %833 = vector.extract_strided_slice %828 {offsets = [0, 0], sizes = [8, 8], strides = [1, 1]} : vector<8x32xf32> to vector<8x8xf32>
    %cst_315 = arith.constant dense<0.000000e+00> : vector<6x8xf32>
    %834 = tpu.matmul %832, %833, %cst_315 {dimension_numbers = #tpu.dot_dimension_numbers<[1], [1], [0], [0], [0, 0, 1, 0], [], []>} : vector<6x8xf32>, vector<8x8xf32>, vector<6x8xf32> -> vector<6x8xf32>
    %cst_316 = arith.constant dense<0xFF800000> : vector<6xf32>
    %835 = vector.multi_reduction <maximumf>, %834, %cst_316 [1] : vector<6x8xf32> to vector<6xf32>
    %836 = vector.shape_cast %835 : vector<6xf32> to vector<6x1xf32>
    %837 = vector.broadcast %836 : vector<6x1xf32> to vector<6x8xf32>
    %838 = arith.subf %834, %837 : vector<6x8xf32>
    %839 = math.exp %838 : vector<6x8xf32>
    %cst_317 = arith.constant dense<0.000000e+00> : vector<6xf32>
    %840 = vector.multi_reduction <add>, %839, %cst_317 [1] : vector<6x8xf32> to vector<6xf32>
    %841 = vector.shape_cast %840 : vector<6xf32> to vector<6x1xf32>
    %842 = tpu.reciprocal %841 : vector<6x1xf32> -> vector<6x1xf32>
    %843 = vector.broadcast %842 : vector<6x1xf32> to vector<6x8xf32>
    %844 = arith.mulf %839, %843 : vector<6x8xf32>
    %845 = vector.extract_strided_slice %829 {offsets = [0, 0], sizes = [8, 8], strides = [1, 1]} : vector<8x32xf32> to vector<8x8xf32>
    %cst_318 = arith.constant dense<0.000000e+00> : vector<6x8xf32>
    %846 = tpu.matmul %844, %845, %cst_318 {dimension_numbers = #tpu.dot_dimension_numbers<[1], [0], [0], [1], [0, 0, 1, 1], [], []>} : vector<6x8xf32>, vector<8x8xf32>, vector<6x8xf32> -> vector<6x8xf32>
    %847 = vector.extract_strided_slice %831 {offsets = [0, 0], sizes = [8, 32], strides = [1, 1]} : vector<32x32xf32> to vector<8x32xf32>
    %cst_319 = arith.constant dense<0.000000e+00> : vector<6x32xf32>
    %848 = tpu.matmul %846, %847, %cst_319 {dimension_numbers = #tpu.dot_dimension_numbers<[1], [0], [0], [1], [0, 0, 1, 1], [], []>} : vector<6x8xf32>, vector<8x32xf32>, vector<6x32xf32> -> vector<6x32xf32>
    %849 = vector.extract_strided_slice %827 {offsets = [0, 8], sizes = [6, 8], strides = [1, 1]} : vector<6x32xf32> to vector<6x8xf32>
    %850 = vector.extract_strided_slice %828 {offsets = [0, 8], sizes = [8, 8], strides = [1, 1]} : vector<8x32xf32> to vector<8x8xf32>
    %cst_320 = arith.constant dense<0.000000e+00> : vector<6x8xf32>
    %851 = tpu.matmul %849, %850, %cst_320 {dimension_numbers = #tpu.dot_dimension_numbers<[1], [1], [0], [0], [0, 0, 1, 0], [], []>} : vector<6x8xf32>, vector<8x8xf32>, vector<6x8xf32> -> vector<6x8xf32>
    %cst_321 = arith.constant dense<0xFF800000> : vector<6xf32>
    %852 = vector.multi_reduction <maximumf>, %851, %cst_321 [1] : vector<6x8xf32> to vector<6xf32>
    %853 = vector.shape_cast %852 : vector<6xf32> to vector<6x1xf32>
    %854 = vector.broadcast %853 : vector<6x1xf32> to vector<6x8xf32>
    %855 = arith.subf %851, %854 : vector<6x8xf32>
    %856 = math.exp %855 : vector<6x8xf32>
    %cst_322 = arith.constant dense<0.000000e+00> : vector<6xf32>
    %857 = vector.multi_reduction <add>, %856, %cst_322 [1] : vector<6x8xf32> to vector<6xf32>
    %858 = vector.shape_cast %857 : vector<6xf32> to vector<6x1xf32>
    %859 = tpu.reciprocal %858 : vector<6x1xf32> -> vector<6x1xf32>
    %860 = vector.broadcast %859 : vector<6x1xf32> to vector<6x8xf32>
    %861 = arith.mulf %856, %860 : vector<6x8xf32>
    %862 = vector.extract_strided_slice %829 {offsets = [0, 8], sizes = [8, 8], strides = [1, 1]} : vector<8x32xf32> to vector<8x8xf32>
    %cst_323 = arith.constant dense<0.000000e+00> : vector<6x8xf32>
    %863 = tpu.matmul %861, %862, %cst_323 {dimension_numbers = #tpu.dot_dimension_numbers<[1], [0], [0], [1], [0, 0, 1, 1], [], []>} : vector<6x8xf32>, vector<8x8xf32>, vector<6x8xf32> -> vector<6x8xf32>
    %864 = vector.extract_strided_slice %831 {offsets = [8, 0], sizes = [8, 32], strides = [1, 1]} : vector<32x32xf32> to vector<8x32xf32>
    %cst_324 = arith.constant dense<0.000000e+00> : vector<6x32xf32>
    %865 = tpu.matmul %863, %864, %cst_324 {dimension_numbers = #tpu.dot_dimension_numbers<[1], [0], [0], [1], [0, 0, 1, 1], [], []>} : vector<6x8xf32>, vector<8x32xf32>, vector<6x32xf32> -> vector<6x32xf32>
    %866 = arith.addf %848, %865 : vector<6x32xf32>
    %867 = vector.extract_strided_slice %827 {offsets = [0, 16], sizes = [6, 8], strides = [1, 1]} : vector<6x32xf32> to vector<6x8xf32>
    %868 = vector.extract_strided_slice %828 {offsets = [0, 16], sizes = [8, 8], strides = [1, 1]} : vector<8x32xf32> to vector<8x8xf32>
    %cst_325 = arith.constant dense<0.000000e+00> : vector<6x8xf32>
    %869 = tpu.matmul %867, %868, %cst_325 {dimension_numbers = #tpu.dot_dimension_numbers<[1], [1], [0], [0], [0, 0, 1, 0], [], []>} : vector<6x8xf32>, vector<8x8xf32>, vector<6x8xf32> -> vector<6x8xf32>
    %cst_326 = arith.constant dense<0xFF800000> : vector<6xf32>
    %870 = vector.multi_reduction <maximumf>, %869, %cst_326 [1] : vector<6x8xf32> to vector<6xf32>
    %871 = vector.shape_cast %870 : vector<6xf32> to vector<6x1xf32>
    %872 = vector.broadcast %871 : vector<6x1xf32> to vector<6x8xf32>
    %873 = arith.subf %869, %872 : vector<6x8xf32>
    %874 = math.exp %873 : vector<6x8xf32>
    %cst_327 = arith.constant dense<0.000000e+00> : vector<6xf32>
    %875 = vector.multi_reduction <add>, %874, %cst_327 [1] : vector<6x8xf32> to vector<6xf32>
    %876 = vector.shape_cast %875 : vector<6xf32> to vector<6x1xf32>
    %877 = tpu.reciprocal %876 : vector<6x1xf32> -> vector<6x1xf32>
    %878 = vector.broadcast %877 : vector<6x1xf32> to vector<6x8xf32>
    %879 = arith.mulf %874, %878 : vector<6x8xf32>
    %880 = vector.extract_strided_slice %829 {offsets = [0, 16], sizes = [8, 8], strides = [1, 1]} : vector<8x32xf32> to vector<8x8xf32>
    %cst_328 = arith.constant dense<0.000000e+00> : vector<6x8xf32>
    %881 = tpu.matmul %879, %880, %cst_328 {dimension_numbers = #tpu.dot_dimension_numbers<[1], [0], [0], [1], [0, 0, 1, 1], [], []>} : vector<6x8xf32>, vector<8x8xf32>, vector<6x8xf32> -> vector<6x8xf32>
    %882 = vector.extract_strided_slice %831 {offsets = [16, 0], sizes = [8, 32], strides = [1, 1]} : vector<32x32xf32> to vector<8x32xf32>
    %cst_329 = arith.constant dense<0.000000e+00> : vector<6x32xf32>
    %883 = tpu.matmul %881, %882, %cst_329 {dimension_numbers = #tpu.dot_dimension_numbers<[1], [0], [0], [1], [0, 0, 1, 1], [], []>} : vector<6x8xf32>, vector<8x32xf32>, vector<6x32xf32> -> vector<6x32xf32>
    %884 = arith.addf %866, %883 : vector<6x32xf32>
    %885 = vector.extract_strided_slice %827 {offsets = [0, 24], sizes = [6, 8], strides = [1, 1]} : vector<6x32xf32> to vector<6x8xf32>
    %886 = vector.extract_strided_slice %828 {offsets = [0, 24], sizes = [8, 8], strides = [1, 1]} : vector<8x32xf32> to vector<8x8xf32>
    %cst_330 = arith.constant dense<0.000000e+00> : vector<6x8xf32>
    %887 = tpu.matmul %885, %886, %cst_330 {dimension_numbers = #tpu.dot_dimension_numbers<[1], [1], [0], [0], [0, 0, 1, 0], [], []>} : vector<6x8xf32>, vector<8x8xf32>, vector<6x8xf32> -> vector<6x8xf32>
    %cst_331 = arith.constant dense<0xFF800000> : vector<6xf32>
    %888 = vector.multi_reduction <maximumf>, %887, %cst_331 [1] : vector<6x8xf32> to vector<6xf32>
    %889 = vector.shape_cast %888 : vector<6xf32> to vector<6x1xf32>
    %890 = vector.broadcast %889 : vector<6x1xf32> to vector<6x8xf32>
    %891 = arith.subf %887, %890 : vector<6x8xf32>
    %892 = math.exp %891 : vector<6x8xf32>
    %cst_332 = arith.constant dense<0.000000e+00> : vector<6xf32>
    %893 = vector.multi_reduction <add>, %892, %cst_332 [1] : vector<6x8xf32> to vector<6xf32>
    %894 = vector.shape_cast %893 : vector<6xf32> to vector<6x1xf32>
    %895 = tpu.reciprocal %894 : vector<6x1xf32> -> vector<6x1xf32>
    %896 = vector.broadcast %895 : vector<6x1xf32> to vector<6x8xf32>
    %897 = arith.mulf %892, %896 : vector<6x8xf32>
    %898 = vector.extract_strided_slice %829 {offsets = [0, 24], sizes = [8, 8], strides = [1, 1]} : vector<8x32xf32> to vector<8x8xf32>
    %cst_333 = arith.constant dense<0.000000e+00> : vector<6x8xf32>
    %899 = tpu.matmul %897, %898, %cst_333 {dimension_numbers = #tpu.dot_dimension_numbers<[1], [0], [0], [1], [0, 0, 1, 1], [], []>} : vector<6x8xf32>, vector<8x8xf32>, vector<6x8xf32> -> vector<6x8xf32>
    %900 = vector.extract_strided_slice %831 {offsets = [24, 0], sizes = [8, 32], strides = [1, 1]} : vector<32x32xf32> to vector<8x32xf32>
    %cst_334 = arith.constant dense<0.000000e+00> : vector<6x32xf32>
    %901 = tpu.matmul %899, %900, %cst_334 {dimension_numbers = #tpu.dot_dimension_numbers<[1], [0], [0], [1], [0, 0, 1, 1], [], []>} : vector<6x8xf32>, vector<8x32xf32>, vector<6x32xf32> -> vector<6x32xf32>
    %902 = arith.addf %884, %901 : vector<6x32xf32>
    %903 = vector.extract_strided_slice %743 {offsets = [12, 0], sizes = [6, 32], strides = [1, 1]} : vector<18x32xf32> to vector<6x32xf32>
    %904 = vector.extract_strided_slice %750 {offsets = [16, 0], sizes = [8, 32], strides = [1, 1]} : vector<24x64xf32> to vector<8x32xf32>
    %905 = vector.extract_strided_slice %750 {offsets = [16, 32], sizes = [8, 32], strides = [1, 1]} : vector<24x64xf32> to vector<8x32xf32>
    %c1_335 = arith.constant 1 : index
    %c0_336 = arith.constant 0 : index
    %c0_337 = arith.constant 0 : index
    %906 = vector.load %arg17[%c1_335, %c0_336, %c0_337] : memref<2x32x32xf32, #tpu.memory_space<vmem>>, vector<1x32x32xf32>
    %907 = vector.shape_cast %906 : vector<1x32x32xf32> to vector<32x32xf32>
    %908 = vector.extract_strided_slice %903 {offsets = [0, 0], sizes = [6, 8], strides = [1, 1]} : vector<6x32xf32> to vector<6x8xf32>
    %909 = vector.extract_strided_slice %904 {offsets = [0, 0], sizes = [8, 8], strides = [1, 1]} : vector<8x32xf32> to vector<8x8xf32>
    %cst_338 = arith.constant dense<0.000000e+00> : vector<6x8xf32>
    %910 = tpu.matmul %908, %909, %cst_338 {dimension_numbers = #tpu.dot_dimension_numbers<[1], [1], [0], [0], [0, 0, 1, 0], [], []>} : vector<6x8xf32>, vector<8x8xf32>, vector<6x8xf32> -> vector<6x8xf32>
    %cst_339 = arith.constant dense<0xFF800000> : vector<6xf32>
    %911 = vector.multi_reduction <maximumf>, %910, %cst_339 [1] : vector<6x8xf32> to vector<6xf32>
    %912 = vector.shape_cast %911 : vector<6xf32> to vector<6x1xf32>
    %913 = vector.broadcast %912 : vector<6x1xf32> to vector<6x8xf32>
    %914 = arith.subf %910, %913 : vector<6x8xf32>
    %915 = math.exp %914 : vector<6x8xf32>
    %cst_340 = arith.constant dense<0.000000e+00> : vector<6xf32>
    %916 = vector.multi_reduction <add>, %915, %cst_340 [1] : vector<6x8xf32> to vector<6xf32>
    %917 = vector.shape_cast %916 : vector<6xf32> to vector<6x1xf32>
    %918 = tpu.reciprocal %917 : vector<6x1xf32> -> vector<6x1xf32>
    %919 = vector.broadcast %918 : vector<6x1xf32> to vector<6x8xf32>
    %920 = arith.mulf %915, %919 : vector<6x8xf32>
    %921 = vector.extract_strided_slice %905 {offsets = [0, 0], sizes = [8, 8], strides = [1, 1]} : vector<8x32xf32> to vector<8x8xf32>
    %cst_341 = arith.constant dense<0.000000e+00> : vector<6x8xf32>
    %922 = tpu.matmul %920, %921, %cst_341 {dimension_numbers = #tpu.dot_dimension_numbers<[1], [0], [0], [1], [0, 0, 1, 1], [], []>} : vector<6x8xf32>, vector<8x8xf32>, vector<6x8xf32> -> vector<6x8xf32>
    %923 = vector.extract_strided_slice %907 {offsets = [0, 0], sizes = [8, 32], strides = [1, 1]} : vector<32x32xf32> to vector<8x32xf32>
    %cst_342 = arith.constant dense<0.000000e+00> : vector<6x32xf32>
    %924 = tpu.matmul %922, %923, %cst_342 {dimension_numbers = #tpu.dot_dimension_numbers<[1], [0], [0], [1], [0, 0, 1, 1], [], []>} : vector<6x8xf32>, vector<8x32xf32>, vector<6x32xf32> -> vector<6x32xf32>
    %925 = vector.extract_strided_slice %903 {offsets = [0, 8], sizes = [6, 8], strides = [1, 1]} : vector<6x32xf32> to vector<6x8xf32>
    %926 = vector.extract_strided_slice %904 {offsets = [0, 8], sizes = [8, 8], strides = [1, 1]} : vector<8x32xf32> to vector<8x8xf32>
    %cst_343 = arith.constant dense<0.000000e+00> : vector<6x8xf32>
    %927 = tpu.matmul %925, %926, %cst_343 {dimension_numbers = #tpu.dot_dimension_numbers<[1], [1], [0], [0], [0, 0, 1, 0], [], []>} : vector<6x8xf32>, vector<8x8xf32>, vector<6x8xf32> -> vector<6x8xf32>
    %cst_344 = arith.constant dense<0xFF800000> : vector<6xf32>
    %928 = vector.multi_reduction <maximumf>, %927, %cst_344 [1] : vector<6x8xf32> to vector<6xf32>
    %929 = vector.shape_cast %928 : vector<6xf32> to vector<6x1xf32>
    %930 = vector.broadcast %929 : vector<6x1xf32> to vector<6x8xf32>
    %931 = arith.subf %927, %930 : vector<6x8xf32>
    %932 = math.exp %931 : vector<6x8xf32>
    %cst_345 = arith.constant dense<0.000000e+00> : vector<6xf32>
    %933 = vector.multi_reduction <add>, %932, %cst_345 [1] : vector<6x8xf32> to vector<6xf32>
    %934 = vector.shape_cast %933 : vector<6xf32> to vector<6x1xf32>
    %935 = tpu.reciprocal %934 : vector<6x1xf32> -> vector<6x1xf32>
    %936 = vector.broadcast %935 : vector<6x1xf32> to vector<6x8xf32>
    %937 = arith.mulf %932, %936 : vector<6x8xf32>
    %938 = vector.extract_strided_slice %905 {offsets = [0, 8], sizes = [8, 8], strides = [1, 1]} : vector<8x32xf32> to vector<8x8xf32>
    %cst_346 = arith.constant dense<0.000000e+00> : vector<6x8xf32>
    %939 = tpu.matmul %937, %938, %cst_346 {dimension_numbers = #tpu.dot_dimension_numbers<[1], [0], [0], [1], [0, 0, 1, 1], [], []>} : vector<6x8xf32>, vector<8x8xf32>, vector<6x8xf32> -> vector<6x8xf32>
    %940 = vector.extract_strided_slice %907 {offsets = [8, 0], sizes = [8, 32], strides = [1, 1]} : vector<32x32xf32> to vector<8x32xf32>
    %cst_347 = arith.constant dense<0.000000e+00> : vector<6x32xf32>
    %941 = tpu.matmul %939, %940, %cst_347 {dimension_numbers = #tpu.dot_dimension_numbers<[1], [0], [0], [1], [0, 0, 1, 1], [], []>} : vector<6x8xf32>, vector<8x32xf32>, vector<6x32xf32> -> vector<6x32xf32>
    %942 = arith.addf %924, %941 : vector<6x32xf32>
    %943 = vector.extract_strided_slice %903 {offsets = [0, 16], sizes = [6, 8], strides = [1, 1]} : vector<6x32xf32> to vector<6x8xf32>
    %944 = vector.extract_strided_slice %904 {offsets = [0, 16], sizes = [8, 8], strides = [1, 1]} : vector<8x32xf32> to vector<8x8xf32>
    %cst_348 = arith.constant dense<0.000000e+00> : vector<6x8xf32>
    %945 = tpu.matmul %943, %944, %cst_348 {dimension_numbers = #tpu.dot_dimension_numbers<[1], [1], [0], [0], [0, 0, 1, 0], [], []>} : vector<6x8xf32>, vector<8x8xf32>, vector<6x8xf32> -> vector<6x8xf32>
    %cst_349 = arith.constant dense<0xFF800000> : vector<6xf32>
    %946 = vector.multi_reduction <maximumf>, %945, %cst_349 [1] : vector<6x8xf32> to vector<6xf32>
    %947 = vector.shape_cast %946 : vector<6xf32> to vector<6x1xf32>
    %948 = vector.broadcast %947 : vector<6x1xf32> to vector<6x8xf32>
    %949 = arith.subf %945, %948 : vector<6x8xf32>
    %950 = math.exp %949 : vector<6x8xf32>
    %cst_350 = arith.constant dense<0.000000e+00> : vector<6xf32>
    %951 = vector.multi_reduction <add>, %950, %cst_350 [1] : vector<6x8xf32> to vector<6xf32>
    %952 = vector.shape_cast %951 : vector<6xf32> to vector<6x1xf32>
    %953 = tpu.reciprocal %952 : vector<6x1xf32> -> vector<6x1xf32>
    %954 = vector.broadcast %953 : vector<6x1xf32> to vector<6x8xf32>
    %955 = arith.mulf %950, %954 : vector<6x8xf32>
    %956 = vector.extract_strided_slice %905 {offsets = [0, 16], sizes = [8, 8], strides = [1, 1]} : vector<8x32xf32> to vector<8x8xf32>
    %cst_351 = arith.constant dense<0.000000e+00> : vector<6x8xf32>
    %957 = tpu.matmul %955, %956, %cst_351 {dimension_numbers = #tpu.dot_dimension_numbers<[1], [0], [0], [1], [0, 0, 1, 1], [], []>} : vector<6x8xf32>, vector<8x8xf32>, vector<6x8xf32> -> vector<6x8xf32>
    %958 = vector.extract_strided_slice %907 {offsets = [16, 0], sizes = [8, 32], strides = [1, 1]} : vector<32x32xf32> to vector<8x32xf32>
    %cst_352 = arith.constant dense<0.000000e+00> : vector<6x32xf32>
    %959 = tpu.matmul %957, %958, %cst_352 {dimension_numbers = #tpu.dot_dimension_numbers<[1], [0], [0], [1], [0, 0, 1, 1], [], []>} : vector<6x8xf32>, vector<8x32xf32>, vector<6x32xf32> -> vector<6x32xf32>
    %960 = arith.addf %942, %959 : vector<6x32xf32>
    %961 = vector.extract_strided_slice %903 {offsets = [0, 24], sizes = [6, 8], strides = [1, 1]} : vector<6x32xf32> to vector<6x8xf32>
    %962 = vector.extract_strided_slice %904 {offsets = [0, 24], sizes = [8, 8], strides = [1, 1]} : vector<8x32xf32> to vector<8x8xf32>
    %cst_353 = arith.constant dense<0.000000e+00> : vector<6x8xf32>
    %963 = tpu.matmul %961, %962, %cst_353 {dimension_numbers = #tpu.dot_dimension_numbers<[1], [1], [0], [0], [0, 0, 1, 0], [], []>} : vector<6x8xf32>, vector<8x8xf32>, vector<6x8xf32> -> vector<6x8xf32>
    %cst_354 = arith.constant dense<0xFF800000> : vector<6xf32>
    %964 = vector.multi_reduction <maximumf>, %963, %cst_354 [1] : vector<6x8xf32> to vector<6xf32>
    %965 = vector.shape_cast %964 : vector<6xf32> to vector<6x1xf32>
    %966 = vector.broadcast %965 : vector<6x1xf32> to vector<6x8xf32>
    %967 = arith.subf %963, %966 : vector<6x8xf32>
    %968 = math.exp %967 : vector<6x8xf32>
    %cst_355 = arith.constant dense<0.000000e+00> : vector<6xf32>
    %969 = vector.multi_reduction <add>, %968, %cst_355 [1] : vector<6x8xf32> to vector<6xf32>
    %970 = vector.shape_cast %969 : vector<6xf32> to vector<6x1xf32>
    %971 = tpu.reciprocal %970 : vector<6x1xf32> -> vector<6x1xf32>
    %972 = vector.broadcast %971 : vector<6x1xf32> to vector<6x8xf32>
    %973 = arith.mulf %968, %972 : vector<6x8xf32>
    %974 = vector.extract_strided_slice %905 {offsets = [0, 24], sizes = [8, 8], strides = [1, 1]} : vector<8x32xf32> to vector<8x8xf32>
    %cst_356 = arith.constant dense<0.000000e+00> : vector<6x8xf32>
    %975 = tpu.matmul %973, %974, %cst_356 {dimension_numbers = #tpu.dot_dimension_numbers<[1], [0], [0], [1], [0, 0, 1, 1], [], []>} : vector<6x8xf32>, vector<8x8xf32>, vector<6x8xf32> -> vector<6x8xf32>
    %976 = vector.extract_strided_slice %907 {offsets = [24, 0], sizes = [8, 32], strides = [1, 1]} : vector<32x32xf32> to vector<8x32xf32>
    %cst_357 = arith.constant dense<0.000000e+00> : vector<6x32xf32>
    %977 = tpu.matmul %975, %976, %cst_357 {dimension_numbers = #tpu.dot_dimension_numbers<[1], [0], [0], [1], [0, 0, 1, 1], [], []>} : vector<6x8xf32>, vector<8x32xf32>, vector<6x32xf32> -> vector<6x32xf32>
    %978 = arith.addf %960, %977 : vector<6x32xf32>
    %979 = tpu.concatenate %826, %902, %978 in 0 : vector<6x32xf32>, vector<6x32xf32>, vector<6x32xf32> -> vector<18x32xf32>
    %c1_358 = arith.constant 1 : index
    %c0_359 = arith.constant 0 : index
    %c0_360 = arith.constant 0 : index
    %980 = vector.load %arg18[%c1_358, %c0_359, %c0_360] : memref<2x1x32xf32, #tpu.memory_space<vmem>>, vector<1x1x32xf32>
    %981 = vector.shape_cast %980 : vector<1x1x32xf32> to vector<1x32xf32>
    %982 = vector.broadcast %981 : vector<1x32xf32> to vector<18x32xf32>
    %983 = arith.addf %979, %982 : vector<18x32xf32>
    %984 = arith.addf %983, %736 : vector<18x32xf32>
    %985 = vector.extract_strided_slice %469 {offsets = [1, 0], sizes = [1, 32], strides = [1, 1]} : vector<3x32xf32> to vector<1x32xf32>
    %986 = vector.extract_strided_slice %471 {offsets = [1, 0], sizes = [1, 32], strides = [1, 1]} : vector<3x32xf32> to vector<1x32xf32>
    %cst_361 = arith.constant dense<0.000000e+00> : vector<18xf32>
    %987 = vector.multi_reduction <add>, %984, %cst_361 [1] : vector<18x32xf32> to vector<18xf32>
    %988 = vector.shape_cast %987 : vector<18xf32> to vector<18x1xf32>
    %cst_362 = arith.constant 3.200000e+01 : f32
    %989 = vector.broadcast %cst_362 : f32 to vector<18x1xf32>
    %990 = arith.divf %988, %989 : vector<18x1xf32>
    %991 = vector.broadcast %990 : vector<18x1xf32> to vector<18x32xf32>
    %992 = arith.subf %984, %991 : vector<18x32xf32>
    %993 = arith.mulf %992, %992 : vector<18x32xf32>
    %cst_363 = arith.constant dense<0.000000e+00> : vector<18xf32>
    %994 = vector.multi_reduction <add>, %993, %cst_363 [1] : vector<18x32xf32> to vector<18xf32>
    %995 = vector.shape_cast %994 : vector<18xf32> to vector<18x1xf32>
    %cst_364 = arith.constant 3.200000e+01 : f32
    %996 = vector.broadcast %cst_364 : f32 to vector<18x1xf32>
    %997 = arith.divf %995, %996 : vector<18x1xf32>
    %998 = vector.broadcast %990 : vector<18x1xf32> to vector<18x32xf32>
    %999 = arith.subf %984, %998 : vector<18x32xf32>
    %cst_365 = arith.constant 9.99999974E-6 : f32
    %1000 = vector.broadcast %cst_365 : f32 to vector<18x1xf32>
    %1001 = arith.addf %997, %1000 : vector<18x1xf32>
    %1002 = math.rsqrt %1001 : vector<18x1xf32>
    %1003 = vector.broadcast %1002 : vector<18x1xf32> to vector<18x32xf32>
    %1004 = arith.mulf %999, %1003 : vector<18x32xf32>
    %1005 = vector.broadcast %985 : vector<1x32xf32> to vector<18x32xf32>
    %1006 = arith.mulf %1004, %1005 : vector<18x32xf32>
    %1007 = vector.broadcast %986 : vector<1x32xf32> to vector<18x32xf32>
    %1008 = arith.addf %1006, %1007 : vector<18x32xf32>
    %c1_366 = arith.constant 1 : index
    %c0_367 = arith.constant 0 : index
    %c0_368 = arith.constant 0 : index
    %1009 = vector.load %arg19[%c1_366, %c0_367, %c0_368] : memref<2x32x128xf32, #tpu.memory_space<vmem>>, vector<1x32x128xf32>
    %1010 = vector.shape_cast %1009 : vector<1x32x128xf32> to vector<32x128xf32>
    %cst_369 = arith.constant dense<0.000000e+00> : vector<18x128xf32>
    %1011 = tpu.matmul %1008, %1010, %cst_369 {dimension_numbers = #tpu.dot_dimension_numbers<[1], [0], [0], [1], [0, 0, 1, 1], [], []>} : vector<18x32xf32>, vector<32x128xf32>, vector<18x128xf32> -> vector<18x128xf32>
    %c1_370 = arith.constant 1 : index
    %c0_371 = arith.constant 0 : index
    %c0_372 = arith.constant 0 : index
    %1012 = vector.load %arg20[%c1_370, %c0_371, %c0_372] : memref<2x1x128xf32, #tpu.memory_space<vmem>>, vector<1x1x128xf32>
    %1013 = vector.shape_cast %1012 : vector<1x1x128xf32> to vector<1x128xf32>
    %1014 = vector.broadcast %1013 : vector<1x128xf32> to vector<18x128xf32>
    %1015 = arith.addf %1011, %1014 : vector<18x128xf32>
    %cst_373 = arith.constant 0.000000e+00 : f32
    %1016 = vector.broadcast %cst_373 : f32 to vector<18x128xf32>
    %1017 = arith.maximumf %1015, %1016 : vector<18x128xf32>
    %c1_374 = arith.constant 1 : index
    %c0_375 = arith.constant 0 : index
    %c0_376 = arith.constant 0 : index
    %1018 = vector.load %arg21[%c1_374, %c0_375, %c0_376] : memref<2x128x32xf32, #tpu.memory_space<vmem>>, vector<1x128x32xf32>
    %1019 = vector.shape_cast %1018 : vector<1x128x32xf32> to vector<128x32xf32>
    %cst_377 = arith.constant dense<0.000000e+00> : vector<18x32xf32>
    %1020 = tpu.matmul %1017, %1019, %cst_377 {dimension_numbers = #tpu.dot_dimension_numbers<[1], [0], [0], [1], [0, 0, 1, 1], [], []>} : vector<18x128xf32>, vector<128x32xf32>, vector<18x32xf32> -> vector<18x32xf32>
    %c1_378 = arith.constant 1 : index
    %c0_379 = arith.constant 0 : index
    %c0_380 = arith.constant 0 : index
    %1021 = vector.load %arg22[%c1_378, %c0_379, %c0_380] : memref<2x1x32xf32, #tpu.memory_space<vmem>>, vector<1x1x32xf32>
    %1022 = vector.shape_cast %1021 : vector<1x1x32xf32> to vector<1x32xf32>
    %1023 = vector.broadcast %1022 : vector<1x32xf32> to vector<18x32xf32>
    %1024 = arith.addf %1020, %1023 : vector<18x32xf32>
    %1025 = arith.addf %1024, %1008 : vector<18x32xf32>
    %1026 = vector.extract_strided_slice %469 {offsets = [2, 0], sizes = [1, 32], strides = [1, 1]} : vector<3x32xf32> to vector<1x32xf32>
    %1027 = vector.extract_strided_slice %471 {offsets = [2, 0], sizes = [1, 32], strides = [1, 1]} : vector<3x32xf32> to vector<1x32xf32>
    %cst_381 = arith.constant dense<0.000000e+00> : vector<18xf32>
    %1028 = vector.multi_reduction <add>, %1025, %cst_381 [1] : vector<18x32xf32> to vector<18xf32>
    %1029 = vector.shape_cast %1028 : vector<18xf32> to vector<18x1xf32>
    %cst_382 = arith.constant 3.200000e+01 : f32
    %1030 = vector.broadcast %cst_382 : f32 to vector<18x1xf32>
    %1031 = arith.divf %1029, %1030 : vector<18x1xf32>
    %1032 = vector.broadcast %1031 : vector<18x1xf32> to vector<18x32xf32>
    %1033 = arith.subf %1025, %1032 : vector<18x32xf32>
    %1034 = arith.mulf %1033, %1033 : vector<18x32xf32>
    %cst_383 = arith.constant dense<0.000000e+00> : vector<18xf32>
    %1035 = vector.multi_reduction <add>, %1034, %cst_383 [1] : vector<18x32xf32> to vector<18xf32>
    %1036 = vector.shape_cast %1035 : vector<18xf32> to vector<18x1xf32>
    %cst_384 = arith.constant 3.200000e+01 : f32
    %1037 = vector.broadcast %cst_384 : f32 to vector<18x1xf32>
    %1038 = arith.divf %1036, %1037 : vector<18x1xf32>
    %1039 = vector.broadcast %1031 : vector<18x1xf32> to vector<18x32xf32>
    %1040 = arith.subf %1025, %1039 : vector<18x32xf32>
    %cst_385 = arith.constant 9.99999974E-6 : f32
    %1041 = vector.broadcast %cst_385 : f32 to vector<18x1xf32>
    %1042 = arith.addf %1038, %1041 : vector<18x1xf32>
    %1043 = math.rsqrt %1042 : vector<18x1xf32>
    %1044 = vector.broadcast %1043 : vector<18x1xf32> to vector<18x32xf32>
    %1045 = arith.mulf %1040, %1044 : vector<18x32xf32>
    %1046 = vector.broadcast %1026 : vector<1x32xf32> to vector<18x32xf32>
    %1047 = arith.mulf %1045, %1046 : vector<18x32xf32>
    %1048 = vector.broadcast %1027 : vector<1x32xf32> to vector<18x32xf32>
    %1049 = arith.addf %1047, %1048 : vector<18x32xf32>
    %1050 = vector.extract_strided_slice %1049 {offsets = [0, 0], sizes = [6, 32], strides = [1, 1]} : vector<18x32xf32> to vector<6x32xf32>
    %1051 = vector.extract_strided_slice %1049 {offsets = [6, 0], sizes = [6, 32], strides = [1, 1]} : vector<18x32xf32> to vector<6x32xf32>
    %1052 = vector.extract_strided_slice %1049 {offsets = [12, 0], sizes = [6, 32], strides = [1, 1]} : vector<18x32xf32> to vector<6x32xf32>
    %1053 = vector.shape_cast %1050 : vector<6x32xf32> to vector<6x1x32xf32>
    %1054 = vector.shape_cast %1051 : vector<6x32xf32> to vector<6x1x32xf32>
    %1055 = vector.shape_cast %1052 : vector<6x32xf32> to vector<6x1x32xf32>
    %1056 = tpu.concatenate %1053, %1054, %1055 in 1 : vector<6x1x32xf32>, vector<6x1x32xf32>, vector<6x1x32xf32> -> vector<6x3x32xf32>
    %c0_386 = arith.constant 0 : index
    %c0_387 = arith.constant 0 : index
    %c0_388 = arith.constant 0 : index
    %c0_389 = arith.constant 0 : index
    %1057 = vector.load %arg25[%c0_386, %c0_387, %c0_388, %c0_389] : memref<1x6x3x32xf32, #tpu.memory_space<vmem>>, vector<1x6x3x32xf32>
    %1058 = vector.shape_cast %1057 : vector<1x6x3x32xf32> to vector<6x3x32xf32>
    %1059 = vector.shape_cast %1056 : vector<6x3x32xf32> to vector<1x6x3x32xf32>
    tpu.vector_store %arg25[%c0_386, %c0_387, %c0_388, %c0_389], %1059 {strides = array<i32>} : memref<1x6x3x32xf32, #tpu.memory_space<vmem>>, vector<1x6x3x32xf32>,
    return
  }
  func.func @transform_0(%arg0: i32) -> (i32, i32, i32) {
    %c0_i32 = arith.constant 0 : i32
    %c0_i32_0 = arith.constant 0 : i32
    %c0_i32_1 = arith.constant 0 : i32
    return %arg0, %c0_i32, %c0_i32_0 : i32, i32, i32
  }
  func.func @transform_1(%arg0: i32) -> (i32, i32, i32, i32) {
    %c0_i32 = arith.constant 0 : i32
    %c0_i32_0 = arith.constant 0 : i32
    %c0_i32_1 = arith.constant 0 : i32
    %c0_i32_2 = arith.constant 0 : i32
    return %arg0, %c0_i32, %c0_i32_0, %c0_i32_1 : i32, i32, i32, i32
  }
  func.func @transform_2(%arg0: i32) -> (i32, i32, i32) {
    %c0_i32 = arith.constant 0 : i32
    %c0_i32_0 = arith.constant 0 : i32
    %c0_i32_1 = arith.constant 0 : i32
    return %arg0, %c0_i32, %c0_i32_0 : i32, i32, i32
  }
  func.func @transform_3(%arg0: i32) -> (i32, i32) {
    %c0_i32 = arith.constant 0 : i32
    %c0_i32_0 = arith.constant 0 : i32
    %c0_i32_1 = arith.constant 0 : i32
    return %c0_i32, %c0_i32_0 : i32, i32
  }
  func.func @transform_4(%arg0: i32) -> (i32, i32) {
    %c0_i32 = arith.constant 0 : i32
    %c0_i32_0 = arith.constant 0 : i32
    %c0_i32_1 = arith.constant 0 : i32
    return %c0_i32, %c0_i32_0 : i32, i32
  }
  func.func @transform_5(%arg0: i32) -> (i32, i32) {
    %c0_i32 = arith.constant 0 : i32
    %c0_i32_0 = arith.constant 0 : i32
    %c0_i32_1 = arith.constant 0 : i32
    return %c0_i32, %c0_i32_0 : i32, i32
  }
  func.func @transform_6(%arg0: i32) -> (i32, i32) {
    %c0_i32 = arith.constant 0 : i32
    %c0_i32_0 = arith.constant 0 : i32
    %c0_i32_1 = arith.constant 0 : i32
    return %c0_i32, %c0_i32_0 : i32, i32
  }
  func.func @transform_7(%arg0: i32) -> (i32, i32) {
    %c0_i32 = arith.constant 0 : i32
    %c0_i32_0 = arith.constant 0 : i32
    %c0_i32_1 = arith.constant 0 : i32
    return %c0_i32, %c0_i32_0 : i32, i32
  }
  func.func @transform_8(%arg0: i32) -> (i32, i32, i32) {
    %c0_i32 = arith.constant 0 : i32
    %c0_i32_0 = arith.constant 0 : i32
    %c0_i32_1 = arith.constant 0 : i32
    %c0_i32_2 = arith.constant 0 : i32
    return %c0_i32, %c0_i32_0, %c0_i32_1 : i32, i32, i32
  }
  func.func @transform_9(%arg0: i32) -> (i32, i32, i32) {
    %c0_i32 = arith.constant 0 : i32
    %c0_i32_0 = arith.constant 0 : i32
    %c0_i32_1 = arith.constant 0 : i32
    %c0_i32_2 = arith.constant 0 : i32
    return %c0_i32, %c0_i32_0, %c0_i32_1 : i32, i32, i32
  }
  func.func @transform_10(%arg0: i32) -> (i32, i32, i32) {
    %c0_i32 = arith.constant 0 : i32
    %c0_i32_0 = arith.constant 0 : i32
    %c0_i32_1 = arith.constant 0 : i32
    %c0_i32_2 = arith.constant 0 : i32
    return %c0_i32, %c0_i32_0, %c0_i32_1 : i32, i32, i32
  }
  func.func @transform_11(%arg0: i32) -> (i32, i32, i32) {
    %c0_i32 = arith.constant 0 : i32
    %c0_i32_0 = arith.constant 0 : i32
    %c0_i32_1 = arith.constant 0 : i32
    %c0_i32_2 = arith.constant 0 : i32
    return %c0_i32, %c0_i32_0, %c0_i32_1 : i32, i32, i32
  }
  func.func @transform_12(%arg0: i32) -> (i32, i32, i32) {
    %c0_i32 = arith.constant 0 : i32
    %c0_i32_0 = arith.constant 0 : i32
    %c0_i32_1 = arith.constant 0 : i32
    %c0_i32_2 = arith.constant 0 : i32
    return %c0_i32, %c0_i32_0, %c0_i32_1 : i32, i32, i32
  }
  func.func @transform_13(%arg0: i32) -> (i32, i32, i32) {
    %c0_i32 = arith.constant 0 : i32
    %c0_i32_0 = arith.constant 0 : i32
    %c0_i32_1 = arith.constant 0 : i32
    %c0_i32_2 = arith.constant 0 : i32
    return %c0_i32, %c0_i32_0, %c0_i32_1 : i32, i32, i32
  }
  func.func @transform_14(%arg0: i32) -> (i32, i32, i32) {
    %c0_i32 = arith.constant 0 : i32
    %c0_i32_0 = arith.constant 0 : i32
    %c0_i32_1 = arith.constant 0 : i32
    %c0_i32_2 = arith.constant 0 : i32
    return %c0_i32, %c0_i32_0, %c0_i32_1 : i32, i32, i32
  }
  func.func @transform_15(%arg0: i32) -> (i32, i32, i32) {
    %c0_i32 = arith.constant 0 : i32
    %c0_i32_0 = arith.constant 0 : i32
    %c0_i32_1 = arith.constant 0 : i32
    %c0_i32_2 = arith.constant 0 : i32
    return %c0_i32, %c0_i32_0, %c0_i32_1 : i32, i32, i32
  }
  func.func @transform_16(%arg0: i32) -> (i32, i32, i32) {
    %c0_i32 = arith.constant 0 : i32
    %c0_i32_0 = arith.constant 0 : i32
    %c0_i32_1 = arith.constant 0 : i32
    %c0_i32_2 = arith.constant 0 : i32
    return %c0_i32, %c0_i32_0, %c0_i32_1 : i32, i32, i32
  }
  func.func @transform_17(%arg0: i32) -> (i32, i32, i32) {
    %c0_i32 = arith.constant 0 : i32
    %c0_i32_0 = arith.constant 0 : i32
    %c0_i32_1 = arith.constant 0 : i32
    %c0_i32_2 = arith.constant 0 : i32
    return %c0_i32, %c0_i32_0, %c0_i32_1 : i32, i32, i32
  }
  func.func @transform_18(%arg0: i32) -> (i32, i32, i32) {
    %c0_i32 = arith.constant 0 : i32
    %c0_i32_0 = arith.constant 0 : i32
    %c0_i32_1 = arith.constant 0 : i32
    %c0_i32_2 = arith.constant 0 : i32
    return %c0_i32, %c0_i32_0, %c0_i32_1 : i32, i32, i32
  }
  func.func @transform_19(%arg0: i32) -> (i32, i32, i32) {
    %c0_i32 = arith.constant 0 : i32
    %c0_i32_0 = arith.constant 0 : i32
    %c0_i32_1 = arith.constant 0 : i32
    %c0_i32_2 = arith.constant 0 : i32
    return %c0_i32, %c0_i32_0, %c0_i32_1 : i32, i32, i32
  }
  func.func @transform_20(%arg0: i32) -> (i32, i32, i32) {
    %c0_i32 = arith.constant 0 : i32
    %c0_i32_0 = arith.constant 0 : i32
    %c0_i32_1 = arith.constant 0 : i32
    %c0_i32_2 = arith.constant 0 : i32
    return %c0_i32, %c0_i32_0, %c0_i32_1 : i32, i32, i32
  }
  func.func @transform_21(%arg0: i32) -> (i32, i32, i32) {
    %c0_i32 = arith.constant 0 : i32
    %c0_i32_0 = arith.constant 0 : i32
    %c0_i32_1 = arith.constant 0 : i32
    %c0_i32_2 = arith.constant 0 : i32
    return %c0_i32, %c0_i32_0, %c0_i32_1 : i32, i32, i32
  }
  func.func @transform_22(%arg0: i32) -> (i32, i32, i32) {
    %c0_i32 = arith.constant 0 : i32
    %c0_i32_0 = arith.constant 0 : i32
    %c0_i32_1 = arith.constant 0 : i32
    %c0_i32_2 = arith.constant 0 : i32
    return %c0_i32, %c0_i32_0, %c0_i32_1 : i32, i32, i32
  }
  func.func @transform_23(%arg0: i32) -> (i32, i32, i32) {
    %c0_i32 = arith.constant 0 : i32
    %c0_i32_0 = arith.constant 0 : i32
    %c0_i32_1 = arith.constant 0 : i32
    %c0_i32_2 = arith.constant 0 : i32
    return %c0_i32, %c0_i32_0, %c0_i32_1 : i32, i32, i32
  }
  func.func @transform_24(%arg0: i32) -> (i32, i32, i32, i32) {
    %c0_i32 = arith.constant 0 : i32
    %c0_i32_0 = arith.constant 0 : i32
    %c0_i32_1 = arith.constant 0 : i32
    %c0_i32_2 = arith.constant 0 : i32
    return %arg0, %c0_i32, %c0_i32_0, %c0_i32_1 : i32, i32, i32, i32
  }
}

</mosaic_0001>

<bundles_post_ra>
// kernel: panel_encoder_forward.1
= control target key start
LH: loop header
LB: loop body
LE: loop exit
PB: predicated region body
PF: predicated region fallthrough
CT: control target
= control target key end

     0   :  { %s17096_s0 = inlined_call_operand.vmem [shape: f32[2,8,4], index: 0, kind: input, shape index: {}]   ;;  %s17097_s1 = inlined_call_operand.vmem [shape: f32[2,8,3,32], index: 1, kind: input, shape index: {}]   ;;  %s17098_s2 = inlined_call_operand.vmem [shape: f32[2,6,4], index: 2, kind: input, shape index: {}]   ;;  %s17099_s3 = inlined_call_operand.hbm [shape: f32[4,32], index: 3, kind: input, shape index: {}]   ;;  %s17100_s4 = inlined_call_operand.vmem [shape: f32[32,32], index: 4, kind: input, shape index: {}]   ;;  %s17101_s5 = inlined_call_operand.vmem [shape: f32[1,32], index: 5, kind: input, shape index: {}]   ;;  %s17102_s6 = inlined_call_operand.vmem [shape: f32[4,32], index: 6, kind: input, shape index: {}]   ;;  %s17103_s7 = inlined_call_operand.hbm [shape: f32[1,32], index: 7, kind: input, shape index: {}]   ;;  %s17104_s8 = inlined_call_operand.vmem [shape: f32[2,32,96], index: 8, kind: input, shape index: {}]   ;;  %s17105_s9 = inlined_call_operand.hbm [shape: f32[2,1,96], index: 9, kind: input, shape index: {}]   ;;  %s17106_s10 = inlined_call_operand.vmem [shape: f32[2,32,32], index: 10, kind: input, shape index: {}]   ;;  %s17107_s11 = inlined_call_operand.hbm [shape: f32[2,1,32], index: 11, kind: input, shape index: {}]   ;;  %s17108_s12 = inlined_call_operand.vmem [shape: f32[2,32,32], index: 12, kind: input, shape index: {}]   ;;  %s17109_s13 = inlined_call_operand.hbm [shape: f32[2,1,32], index: 13, kind: input, shape index: {}]   ;;  %s17110_s14 = inlined_call_operand.vmem [shape: f32[2,32,64], index: 14, kind: input, shape index: {}]   ;;  %s17111_s15 = inlined_call_operand.hbm [shape: f32[2,1,64], index: 15, kind: input, shape index: {}]   ;;  %s17112_s16 = inlined_call_operand.vmem [shape: f32[2,32,32], index: 16, kind: input, shape index: {}]   ;;  %s17113_s17 = inlined_call_operand.hbm [shape: f32[2,1,32], index: 17, kind: input, shape index: {}]   ;;  %s17114_s18 = inlined_call_operand.vmem [shape: f32[2,32,128], index: 18, kind: input, shape index: {}]   ;;  %s17115_s19 = inlined_call_operand.hbm [shape: f32[2,1,128], index: 19, kind: input, shape index: {}]   ;;  %s17116_s20 = inlined_call_operand.vmem [shape: f32[2,128,32], index: 20, kind: input, shape index: {}]   ;;  %s17117_s21 = inlined_call_operand.hbm [shape: f32[2,1,32], index: 21, kind: input, shape index: {}]   ;;  %s17118_s22 = inlined_call_operand.vmem [shape: f32[2,3,32], index: 22, kind: input, shape index: {}]   ;;  %s17119_s23 = inlined_call_operand.vmem [shape: f32[2,3,32], index: 23, kind: input, shape index: {}]   ;;  %s17120_s24 = inlined_call_operand.vmem [shape: f32[2,6,3,32], index: 24, kind: output, shape index: {}]  }
   0x1   :  { %17147 = sst [smem:[#allocation22_spill]] %s17096_s0 }
   0x2   :  { %17148 = sst [smem:[#allocation23_spill]] %s17097_s1 }
   0x3   :  { %17149 = sst [smem:[#allocation24_spill]] %s17098_s2 }
   0x4   :  { %17150 = sst [smem:[#allocation25_spill]] %s17099_s3 }
   0x5   :  { %17151 = sst [smem:[#allocation26_spill]] %s17100_s4 }
   0x6   :  { %17152 = sst [smem:[#allocation27_spill]] %s17101_s5 }
   0x7   :  { %17153 = sst [smem:[#allocation28_spill]] %s17102_s6 }
   0x8   :  { %17154 = sst [smem:[#allocation29_spill]] %s17103_s7 }
   0x9   :  { %17155 = sst [smem:[#allocation30_spill]] %s17104_s8 }
   0xa   :  { %17156 = sst [smem:[#allocation31_spill]] %s17107_s11 }
   0xb   :  { %17157 = sst [smem:[#allocation32_spill]] %s17111_s15 }
   0xc   :  { %17158 = sst [smem:[#allocation33_spill]] %s17114_s18 }
   0xd   :  { %17159 = sst [smem:[#allocation34_spill]] %s17116_s20 }
   0xe   :  { %17160 = sst [smem:[#allocation35_spill]] %s17120_s24 }
   0xf   :  { %29 = vsyncpa [#allocation3], 0 }
  0x10   :  { %30 = vsyncpa [#allocation5], 0 }
  0x11   :  { %31 = vsyncpa [#allocation8], 0 }
  0x12   :  { %32 = vsyncpa [#allocation11], 0 }
  0x13   :  { %33 = vsyncpa [#allocation14], 0  ;;  %s15113_s5 = smov 0  }
  0x14 LB: > { %17161 = sst [smem:[#allocation21_spill]] %s14960_s5  ;;  %s14962_s26 = smov [#allocation4]   ;;  %s14960_s5 = sphi %s15113_s5, %s39_s5  }
  0x15   : > { %s622_s27 = sshll.u32 %s14962_s26, 4  ;;  %s15119_s28 = sadd.s32 4294967295, %s14960_s5   ;;  %s15124_s27 = int_to_ptr.vmem [resolvable:$true] %s622_s27 }
  0x16   : > { %p12703_p0 = scmp.ge.s32.totalorder %s14960_s5, 1  ;;  %p589_p1 = scmp.lt.s32.totalorder %s14960_s5, 3 }
  0x17   : > { %p17129_p2 = scmp.eq.s32.totalorder %s15119_s28, 0  ;;  %s14963_s2 = smov [#allocation7]  }
  0x18   : > { %p15126_p3 = pnand %p12703_p0, %p589_p1  ;;  %s651_s29 = sshll.u32 %s14963_s2, 4  ;;  %s15132_s29 = int_to_ptr.vmem [resolvable:$true] %s651_s29 }
  0x19   : > { %s14964_s7 = smov [#allocation10]   ;;  %s14965_s3 = smov [#allocation13]  }
  0x1a   : > { %s17162_s6 = scalar_select %p15126_p3, 1, 0 }
  0x1b   : > { %p14406_p4 = pneg %p15126_p3  ;;  %s683_s30 = sshll.u32 %s14964_s7, 4  ;;  %s15140_s30 = int_to_ptr.vmem [resolvable:$true] %s683_s30 }
  0x1c   : > { %s15142_s25 = sshll.u32 %s14965_s3, 4  ;;  %s17164_s1 = sld [smem:[#allocation29_spill]]  ;;  %s716_s25 = int_to_ptr.vmem [resolvable:$true] %s15142_s25 }
  0x1d   : > { %p15136_p5 = pnand %p17129_p2, %p14406_p4 }
  0x1f   : > { %p15152_p7 = pneg %p15136_p5 }
  0x22   : > { %s14682_s26 = scalar_lea.hbm %s17164_s1, 16 }
  0x23   : > { %p14683_p6 = scmp.ne.s32.totalorder %s17164_s1, %s14682_s26  ;;  %p14689_p10 = scmp.lt.u32.totalorder %s14682_s26, %s17164_s1 }
  0x25   : > { %p14685_p8 = pnand %p15152_p7, %p14683_p6 }
  0x27   : > { %p14686_p9 = pneg %p14685_p8 }
  0x29   : > { %p14691_p11 = pnand %p14689_p10, %p14686_p9 }
  0x2b   : > { %14694 = shalt.err (!%p14691_p11)
}
  0x2c   : > { %s14695_s5 = scalar_lea.vmem %s15124_s27, 16  ;;  %s14702_s8 = scalar_lea.vmem %s15124_s27, 32 }
  0x2d   : > { %p14696_p12 = scmp.ne.s32.totalorder %s15124_s27, %s14695_s5  ;;  %p14703_p1 = scmp.lt.s32.totalorder %s15124_s27, %s15124_s27 }
  0x2e   : > { %p14704_p4 = scmp.lt.s32.totalorder %s14702_s8, %s14695_s5 }
  0x2f   : > { %p14698_p13 = pnand %p14696_p12, %p15152_p7 }
  0x30   : > { %p14705_p6 = por %p14704_p4, %p14703_p1 }
  0x31   : > { %p14699_p0 = pneg %p14698_p13 }
  0x33   : > { %p14706_p8 = pnand %p14705_p6, %p14699_p0 }
  0x35   : > { %14709 = shalt.err (!%p14706_p8)
}
  0x36   : > { %14412 = dma.hbm_to_vmem [thread:$0]  (!%p15136_p5), %s17164_s1, 16, %s15124_s27, [#allocation5]  }
  0x37   : > { %s17166_s11 = sld [smem:[#allocation31_spill]] }
  0x3d   : > { %s14710_s3 = scalar_lea.hbm %s17166_s11, 32 }
  0x3e   : > { %p14711_p9 = scmp.ne.s32.totalorder %s17166_s11, %s14710_s3  ;;  %p14717_p12 = scmp.lt.u32.totalorder %s14710_s3, %s17166_s11 }
  0x40   : > { %p14713_p10 = pnand %p14711_p9, %p15152_p7 }
  0x42   : > { %p14714_p11 = pneg %p14713_p10 }
  0x44   : > { %p14719_p13 = pnand %p14717_p12, %p14714_p11 }
  0x46   : > { %14722 = shalt.err (!%p14719_p13)
}
  0x47   : > { %s14723_s27 = scalar_lea.vmem %s15132_s29, 32  ;;  %p14731_p6 = scmp.lt.s32.totalorder %s15132_s29, %s15132_s29 }
  0x48   : > { %p14724_p0 = scmp.ne.s32.totalorder %s15132_s29, %s14723_s27  ;;  %p14732_p8 = scmp.lt.s32.totalorder %s14723_s27, %s14723_s27 }
  0x4a   : > { %p14726_p1 = pnand %p14724_p0, %p15152_p7  ;;  %p14733_p9 = por %p14732_p8, %p14731_p6 }
  0x4c   : > { %p14727_p4 = pneg %p14726_p1 }
  0x4e   : > { %p14734_p10 = pnand %p14733_p9, %p14727_p4 }
  0x50   : > { %14737 = shalt.err (!%p14734_p10)
}
  0x51   : > { %s14966_s18 = smov 16   ;;  %s14967_s20 = smov 1  }
  0x52   : > { %14418 = dma.hbm_to_vmem [thread:$0]  (!%p15136_p5), %s17166_s11, 32, %s15132_s29, [#allocation8], %s14966_s18, %s14966_s18, %s14967_s20  }
  0x53   : > { %s17167_s15 = sld [smem:[#allocation32_spill]] }
  0x59   : > { %s14738_s3 = scalar_lea.hbm %s17167_s15, 32 }
  0x5a   : > { %p14739_p11 = scmp.ne.s32.totalorder %s17167_s15, %s14738_s3  ;;  %p14745_p0 = scmp.lt.u32.totalorder %s14738_s3, %s17167_s15 }
  0x5c   : > { %p14741_p12 = pnand %p14739_p11, %p15152_p7 }
  0x5e   : > { %p14742_p13 = pneg %p14741_p12 }
  0x60   : > { %p14747_p1 = pnand %p14745_p0, %p14742_p13 }
  0x62   : > { %14750 = shalt.err (!%p14747_p1)
}
  0x63   : > { %s14751_s29 = scalar_lea.vmem %s15140_s30, 32  ;;  %p14759_p9 = scmp.lt.s32.totalorder %s15140_s30, %s15140_s30 }
  0x64   : > { %p14752_p4 = scmp.ne.s32.totalorder %s15140_s30, %s14751_s29  ;;  %p14760_p10 = scmp.lt.s32.totalorder %s14751_s29, %s14751_s29 }
  0x66   : > { %p14754_p6 = pnand %p14752_p4, %p15152_p7  ;;  %p14761_p11 = por %p14760_p10, %p14759_p9 }
  0x68   : > { %p14755_p8 = pneg %p14754_p6 }
  0x6a   : > { %p14762_p12 = pnand %p14761_p11, %p14755_p8 }
  0x6c   : > { %14765 = shalt.err (!%p14762_p12)
}
  0x6d   : > { %14424 = dma.hbm_to_vmem [thread:$0]  (!%p15136_p5), %s17167_s15, 32, %s15140_s30, [#allocation11], %s14966_s18, %s14966_s18, %s14967_s20  }
  0x6e   : > { %s14766_s7 = scalar_lea.hbm %s17115_s19, 32 }
  0x6f   : > { %p14767_p13 = scmp.ne.s32.totalorder %s17115_s19, %s14766_s7  ;;  %p14773_p4 = scmp.lt.u32.totalorder %s14766_s7, %s17115_s19 }
  0x71   : > { %p14769_p0 = pnand %p14767_p13, %p15152_p7 }
  0x73   : > { %p14770_p1 = pneg %p14769_p0 }
  0x75   : > { %p14775_p6 = pnand %p14773_p4, %p14770_p1 }
  0x77   : > { %14778 = shalt.err (!%p14775_p6)
}
  0x78   : > { %s14779_s29 = scalar_lea.vmem %s716_s25, 32  ;;  %p14787_p11 = scmp.lt.s32.totalorder %s716_s25, %s716_s25 }
  0x79   : > { %p14780_p8 = scmp.ne.s32.totalorder %s716_s25, %s14779_s29  ;;  %p14788_p12 = scmp.lt.s32.totalorder %s14779_s29, %s14779_s29 }
  0x7b   : > { %p14782_p9 = pnand %p14780_p8, %p15152_p7  ;;  %p14789_p2 = por %p14788_p12, %p14787_p11 }
  0x7d   : > { %p14783_p10 = pneg %p14782_p9 }
  0x7f   : > { %p14790_p3 = pnand %p14789_p2, %p14783_p10 }
  0x81   : > { %14793 = shalt.err (!%p14790_p3)
}
  0x82   : > { %14430 = dma.hbm_to_vmem [thread:$0]  (!%p15136_p5), %s17115_s19, 32, %s716_s25, [#allocation14], %s14966_s18, %s14966_s18, %s14967_s20  }
  0x83   : > { %s14968_s4 = smov [#allocation2]   ;;  %s14969_s2 = smov [#allocation6]  }
  0x84   : > { %s602_s26 = sshll.u32 %s14968_s4, 4  ;;  %s635_s7 = sshll.u32 %s14969_s2, 4  ;;  %s603_s26 = int_to_ptr.vmem [resolvable:$true] %s602_s26  ;;  %s636_s7 = int_to_ptr.vmem [resolvable:$true] %s635_s7 }
  0x85   : > { %s17168_s8 = sld [smem:[#allocation25_spill]] }
  0x8b   : > { %s14794_s27 = scalar_lea.hbm %s17168_s8, 64 }
  0x8c   : > { %p14795_p2 = scmp.ne.s32.totalorder %s17168_s8, %s14794_s27  ;;  %p14801_p0 = scmp.lt.u32.totalorder %s14794_s27, %s17168_s8 }
  0x8e   : > { %p14797_p3 = pnand %p14795_p2, %p15152_p7 }
  0x90   : > { %p14798_p13 = pneg %p14797_p3 }
  0x92   : > { %p14803_p1 = pnand %p14801_p0, %p14798_p13 }
  0x94   : > { %14806 = shalt.err (!%p14803_p1)
}
  0x95   : > { %s14807_s25 = scalar_lea.vmem %s603_s26, 64  ;;  %p14815_p9 = scmp.lt.s32.totalorder %s603_s26, %s603_s26 }
  0x96   : > { %p14808_p4 = scmp.ne.s32.totalorder %s603_s26, %s14807_s25  ;;  %p14816_p10 = scmp.lt.s32.totalorder %s14807_s25, %s14807_s25 }
  0x98   : > { %p14810_p6 = pnand %p14808_p4, %p15152_p7  ;;  %p14817_p11 = por %p14816_p10, %p14815_p9 }
  0x9a   : > { %p14811_p8 = pneg %p14810_p6 }
  0x9c   : > { %p14818_p12 = pnand %p14817_p11, %p14811_p8 }
  0x9e   : > { %14821 = shalt.err (!%p14818_p12)
}
  0x9f   : > { %14409 = dma.hbm_to_vmem [thread:$0]  (!%p15136_p5), %s17168_s8, 64, %s603_s26, [#allocation3]  }
  0xa0   : > { %s14822_s2 = scalar_lea.hbm %s17105_s9, 32 }
  0xa1   : > { %p14823_p2 = scmp.ne.s32.totalorder %s17105_s9, %s14822_s2  ;;  %p14829_p0 = scmp.lt.u32.totalorder %s14822_s2, %s17105_s9 }
  0xa3   : > { %p14825_p3 = pnand %p14823_p2, %p15152_p7 }
  0xa5   : > { %p14826_p13 = pneg %p14825_p3 }
  0xa7   : > { %p14831_p1 = pnand %p14829_p0, %p14826_p13 }
  0xa9   : > { %14834 = shalt.err (!%p14831_p1)
}
  0xaa   : > { %s14835_s30 = scalar_lea.vmem %s636_s7, 32  ;;  %p14843_p9 = scmp.lt.s32.totalorder %s636_s7, %s636_s7 }
  0xab   : > { %p14836_p4 = scmp.ne.s32.totalorder %s636_s7, %s14835_s30  ;;  %p14844_p10 = scmp.lt.s32.totalorder %s14835_s30, %s14835_s30 }
  0xad   : > { %p14838_p6 = pnand %p14836_p4, %p15152_p7  ;;  %p14845_p11 = por %p14844_p10, %p14843_p9 }
  0xaf   : > { %p14839_p8 = pneg %p14838_p6 }
  0xb1   : > { %p14846_p12 = pnand %p14845_p11, %p14839_p8 }
  0xb3   : > { %14849 = shalt.err (!%p14846_p12)
}
  0xb4   : > { %14415 = dma.hbm_to_vmem [thread:$0]  (!%p15136_p5), %s17105_s9, 32, %s636_s7, [#allocation5], %s14966_s18, %s14966_s18, %s14967_s20  }
  0xb5   : > { %s14970_s11 = smov [#allocation9]   ;;  %s14971_s15 = smov [#allocation12]  }
  0xb6   : > { %s667_s1 = sshll.u32 %s14970_s11, 4  ;;  %s699_s4 = sshll.u32 %s14971_s15, 4  ;;  %s668_s1 = int_to_ptr.vmem [resolvable:$true] %s667_s1  ;;  %s700_s4 = int_to_ptr.vmem [resolvable:$true] %s699_s4 }
  0xb7   : > { %s14850_s5 = scalar_lea.hbm %s17109_s13, 32 }
  0xb8   : > { %p14851_p2 = scmp.ne.s32.totalorder %s17109_s13, %s14850_s5  ;;  %p14857_p0 = scmp.lt.u32.totalorder %s14850_s5, %s17109_s13 }
  0xba   : > { %p14853_p3 = pnand %p14851_p2, %p15152_p7 }
  0xbc   : > { %p14854_p13 = pneg %p14853_p3 }
  0xbe   : > { %p14859_p1 = pnand %p14857_p0, %p14854_p13 }
  0xc0   : > { %14862 = shalt.err (!%p14859_p1)
}
  0xc1   : > { %s14863_s7 = scalar_lea.vmem %s668_s1, 32  ;;  %p14871_p9 = scmp.lt.s32.totalorder %s668_s1, %s668_s1 }
  0xc2   : > { %p14864_p4 = scmp.ne.s32.totalorder %s668_s1, %s14863_s7  ;;  %p14872_p10 = scmp.lt.s32.totalorder %s14863_s7, %s14863_s7 }
  0xc4   : > { %p14866_p6 = pnand %p14864_p4, %p15152_p7  ;;  %p14873_p11 = por %p14872_p10, %p14871_p9 }
  0xc6   : > { %p14867_p8 = pneg %p14866_p6 }
  0xc8   : > { %p14874_p12 = pnand %p14873_p11, %p14867_p8 }
  0xca   : > { %14877 = shalt.err (!%p14874_p12)
}
  0xcb   : > { %14421 = dma.hbm_to_vmem [thread:$0]  (!%p15136_p5), %s17109_s13, 32, %s668_s1, [#allocation8], %s14966_s18, %s14966_s18, %s14967_s20  }
  0xcc   : > { %s14878_s3 = scalar_lea.hbm %s17113_s17, 32 }
  0xcd   : > { %p14879_p2 = scmp.ne.s32.totalorder %s17113_s17, %s14878_s3  ;;  %p14885_p0 = scmp.lt.u32.totalorder %s14878_s3, %s17113_s17 }
  0xcf   : > { %p14881_p3 = pnand %p14879_p2, %p15152_p7 }
  0xd1   : > { %p14882_p13 = pneg %p14881_p3 }
  0xd3   : > { %p14887_p1 = pnand %p14885_p0, %p14882_p13 }
  0xd5   : > { %14890 = shalt.err (!%p14887_p1)
}
  0xd6   : > { %s14891_s26 = scalar_lea.vmem %s700_s4, 32  ;;  %p14899_p9 = scmp.lt.s32.totalorder %s700_s4, %s700_s4 }
  0xd7   : > { %p14892_p4 = scmp.ne.s32.totalorder %s700_s4, %s14891_s26  ;;  %p14900_p10 = scmp.lt.s32.totalorder %s14891_s26, %s14891_s26 }
  0xd9   : > { %p14894_p6 = pnand %p14892_p4, %p15152_p7  ;;  %p14901_p11 = por %p14900_p10, %p14899_p9 }
  0xdb   : > { %p14895_p8 = pneg %p14894_p6 }
  0xdd   : > { %p14902_p12 = pnand %p14901_p11, %p14895_p8 }
  0xdf   : > { %14905 = shalt.err (!%p14902_p12)
}
  0xe0   : > { %14427 = dma.hbm_to_vmem [thread:$0]  (!%p15136_p5), %s17113_s17, 32, %s700_s4, [#allocation11], %s14966_s18, %s14966_s18, %s14967_s20  }
  0xe1   : > { %s14972_s25 = smov [#allocation15]   ;;  %s14906_s3 = scalar_lea.hbm %s17117_s21, 32 }
  0xe2   : > { %s731_s11 = sshll.u32 %s14972_s25, 4  ;;  %p14907_p2 = scmp.ne.s32.totalorder %s17117_s21, %s14906_s3  ;;  %s732_s11 = int_to_ptr.vmem [resolvable:$true] %s731_s11 }
  0xe3   : > { %p14913_p0 = scmp.lt.u32.totalorder %s14906_s3, %s17117_s21 }
  0xe4   : > { %p14909_p3 = pnand %p14907_p2, %p15152_p7 }
  0xe6   : > { %p14910_p13 = pneg %p14909_p3 }
  0xe8   : > { %p14915_p1 = pnand %p14913_p0, %p14910_p13 }
  0xea   : > { %14918 = shalt.err (!%p14915_p1)
}
  0xeb   : > { %s14919_s4 = scalar_lea.vmem %s732_s11, 32  ;;  %p14927_p9 = scmp.lt.s32.totalorder %s732_s11, %s732_s11 }
  0xec   : > { %p14920_p4 = scmp.ne.s32.totalorder %s732_s11, %s14919_s4  ;;  %p14928_p10 = scmp.lt.s32.totalorder %s14919_s4, %s14919_s4 }
  0xee   : > { %p14922_p6 = pnand %p14920_p4, %p15152_p7  ;;  %p14929_p11 = por %p14928_p10, %p14927_p9 }
  0xf0   : > { %p14923_p8 = pneg %p14922_p6 }
  0xf2   : > { %p14930_p12 = pnand %p14929_p11, %p14923_p8 }
  0xf4   : > { %14933 = shalt.err (!%p14930_p12)
}
  0xf5   : > { %14433 = dma.hbm_to_vmem [thread:$0]  (!%p15136_p5), %s17117_s21, 32, %s732_s11, [#allocation14], %s14966_s18, %s14966_s18, %s14967_s20  }
  0xf6   : > { %p17169_p2 = scmp.ne.s32.totalorder %s17162_s6, 0 }
  0xf7   : > { %p17170_p7 = scmp.eq.s32.totalorder (!%p17169_p2), %s15119_s28, 0 }
  0xf8   : > { %775 = sbr.rel (%p17169_p2) target bundleno = 22767 (0x58ef), region = 116 }
  0xff   : > { %14939 = dma.done.wait (%p17170_p7), [#allocation3], 64   ;;  %p17171_p3 = pmov %p17170_p7 }
 0x101   : > { %14941 = vsyncadd (%p17171_p3), [#allocation3], 4294967232  ;;  %p17172_p13 = pmov %p17171_p3 }
 0x102   : > { %p17173_p0 = pmov %p17171_p3 }
 0x103   : > { %14943 = dma.done.wait (%p17172_p13), [#allocation5], 48  }
 0x104   : > { %14945 = vsyncadd (%p17173_p0), [#allocation5], 4294967248  ;;  %p17174_p1 = pmov %p17173_p0 }
 0x105   : > { %p17175_p5 = pmov %p17173_p0 }
 0x106   : > { %14947 = dma.done.wait (%p17174_p1), [#allocation8], 64  }
 0x107   : > { %14949 = vsyncadd (%p17175_p5), [#allocation8], 4294967232  ;;  %p17176_p4 = pmov %p17173_p0 }
 0x108   : > { %p17177_p6 = pmov %p17173_p0 }
 0x109   : > { %14951 = dma.done.wait (%p17176_p4), [#allocation11], 64  }
 0x10a   : > { %14953 = vsyncadd (%p17177_p6), [#allocation11], 4294967232  ;;  %p17178_p8 = pmov %p17173_p0 }
 0x10b   : > { %p17179_p9 = pmov %p17173_p0 }
 0x10c   : > { %14955 = dma.done.wait (%p17178_p8), [#allocation14], 64  }
 0x10d   : > { %14957 = vsyncadd (%p17179_p9), [#allocation14], 4294967232  ;;  %p881_p10 = scmp.lt.s32.totalorder %s15119_s28, 1  ;;  %v14973_v0 = vmov 0.0   ;;  %vm14974_vm0 = vmmov 0   ;;  %v14975_v1 = vmov 0.0|0.0  }
 0x10e   : > { %13346 = vmatprep.subr.mxu0 %v14973_v0  ;;  %13348 = vmatprep.mubr.msk.f32.mxu0 %vm14974_vm0, %v14973_v0  ;;  %vm914_vm1 = vcmask 1043456   ;;  %s17180_s20 = sld [smem:[#allocation22_spill]]  ;;  %s17181_s15 = sld [smem:[#allocation23_spill]]  ;;  %vm910_vm2 = vcmask 31744   ;;  %vm1001_vm3 = vcmask 1041409   ;;  %vm1004_vm4 = vcmask 1042434  }
 0x10f   : > { %s17200_s28 = smov (!%p881_p10, %s15119_s28), 1  ;;  %14201 = vmatprep.subr.bf16.mxu1 %v14975_v1  ;;  %13359 = vmatprep.mubr.msk.f32.mxu1 %vm14974_vm0, %v14973_v0  ;;  %v909_v2 = vld [vmem:[#allocation2] sm:$0xf]  ;;  %s17182_s27 = sld [smem:[#allocation26_spill]]  ;;  %vm1007_vm5 = vcmask 1043459   ;;  %vm1010_vm6 = vcmask 1044484  }
 0x110   : > { %s12724_s24 = sshll.u32 %s17200_s28, 3  ;;  %s12994_s6 = sshll.u32 %s17200_s28, 5  ;;  %13347 = vmatpush3.msk.msra.mxu0 %vm914_vm1, %v909_v2  ;;  %vm1013_vm7 = vcmask 1045509   ;;  %vm1016_vm8 = vcmask 1046534   ;;  %vm1019_vm9 = vcmask 1047559   ;;  %vm1021_vm10 = vcmask 261120  }
 0x111   : > { %14207 = vmatprep.subr.bf16.mxu0 %v14975_v1  ;;  %s17185_s3 = sld [smem:[#allocation30_spill]]  ;;  %s14977_s0 = smov 96   ;;  %vm1456_vm11 = vcmask 64512   ;;  %vm1531_vm12 = vcmask 46080   ;;  %vm1549_vm13 = vcmask 1045504   ;;  %vm1545_vm14 = vcmask 48128  }
 0x112   : > { %s14978_s18 = smov 88   ;;  %s17145_s25 = smov 80   ;;  %vm2423_vm15 = vcmask 259072  }
 0x113   : > { %s17141_s11 = smov 112   ;;  %s17143_s29 = smov 72  }
 0x114   : > { %s884_s7 = scalar_lea.vmem %s17180_s20, %s12724_s24  ;;  %s15392_s2 = scalar_lea.vmem %s17181_s15, %s12994_s6 }
 0x115   : > { %v899_v3 = vld [vmem:[%s884_s7] sm:$0xff]  ;;  %v989_v5 = vld [vmem:[%s17182_s27 + $0x8] sm:$0xff]  ;;  %v990_v6 = vld [vmem:[%s17182_s27 + $0x10] sm:$0xff]  ;;  %s17183_s20 = sld [smem:[#allocation24_spill]]  ;;  %s17184_s15 = sld [smem:[#allocation28_spill]] }
 0x116   : > { %v988_v4 = vld [vmem:[%s17182_s27] sm:$0xff]  ;;  %v991_v7 = vld [vmem:[%s17182_s27 + $0x18] sm:$0xff]  ;;  %13349 = vmatmul.mubr.msk.f32.vlgmr.msra.gmra.mrb[0].mxu0 %vm910_vm2, %v899_v3  ;;  %v902_v11 = vld [vmem:[%s15392_s2 + $0x8] sm:$0x7]  ;;  %s14976_s6 = smov 120   ;;  %s17139_s30 = smov 104  }
 0x117   : > { %v14202_v8 = vpack.c.bf16 %v989_v5, %v988_v4  ;;  %v900_v9 = vld [vmem:[%s15392_s2] sm:$0x7]  ;;  %v901_v10 = vld [vmem:[%s15392_s2 + $0x4] sm:$0x7]  ;;  %13370 = vmatprep.mubr.msk.f32.mxu0 %vm14974_vm0, %v14973_v0  ;;  %v903_v12 = vld [vmem:[%s15392_s2 + $0xc] sm:$0x7]  ;;  %v14205_v15 = vpack.c.bf16 %v991_v7, %v990_v6 }
 0x118   : > { %v904_v13 = vld [vmem:[%s15392_s2 + $0x10] sm:$0x7]  ;;  %v905_v14 = vld [vmem:[%s15392_s2 + $0x14] sm:$0x7]  ;;  %v906_v16 = vld [vmem:[%s15392_s2 + $0x18] sm:$0x7] }
 0x119   : > { %14203 = vmatpush3.bf16.msra.mxu1 %v14202_v8  ;;  %14209 = vmatpush3.bf16.msra.mxu0 %v14202_v8  ;;  %v907_v17 = vld [vmem:[%s15392_s2 + $0x1c] sm:$0x7]  ;;  %v1000_v18 = vrot.slane %v901_v10, 7  ;;  %v1003_v19 = vrot.slane %v902_v11, 6  ;;  %v1006_v20 = vrot.slane %v903_v12, 5  ;;  %v1009_v21 = vrot.slane %v904_v13, 4 }
 0x11a   : > { %14204 = vmatprep.subr.bf16.mxu1 %v14975_v1  ;;  %14210 = vmatprep.subr.bf16.mxu0 %v14975_v1  ;;  %v1012_v22 = vrot.slane %v905_v14, 3  ;;  %v1015_v23 = vrot.slane %v906_v16, 2  ;;  %v1018_v25 = vrot.slane %v907_v17, 1  ;;  %v1103_v26 = vrot.slane %v900_v9, 1  ;;  %v1365_v62 = vld [vmem:[%s17185_s3] sm:$0xff]  ;;  %v1366_v63 = vld [vmem:[%s17185_s3 + $0x8] sm:$0xff] }
 0x11b   : > { %v1002_v24 = vsel %vm1001_vm3, %v1000_v18, %v900_v9  ;;  %v1191_v27 = vrot.slane %v900_v9, 2  ;;  %v1105_v29 = vrot.slane %v902_v11, 7  ;;  %v1107_v30 = vrot.slane %v903_v12, 6  ;;  %s893_s7 = scalar_lea.vmem %s17183_s20, %s12724_s24  ;;  %v1279_v53 = vld [vmem:[%s17184_s15] sm:$0xf]  ;;  %v1367_v3 = vld [vmem:[%s17185_s3 + $0x10] sm:$0xff] }
 0x11c   : > { %v1005_v28 = vsel %vm1004_vm4, %v1003_v19, %v1002_v24  ;;  %v1109_v31 = vrot.slane %v904_v13, 5  ;;  %v1104_v33 = vsel %vm1001_vm3, %v901_v10, %v1103_v26  ;;  %v1111_v34 = vrot.slane %v905_v14, 4  ;;  %v908_v59 = vld [vmem:[%s893_s7] sm:$0x3f]  ;;  %v1368_v4 = vld [vmem:[%s17185_s3 + $0x18] sm:$0xff]  ;;  %s17133_s20 = smov 56  }
 0x11d   : > { %14206 = vmatpush3.bf16.msra.mxu1 %v14205_v15  ;;  %14212 = vmatpush3.bf16.msra.mxu0 %v14205_v15  ;;  %v1008_v32 = vsel %vm1007_vm5, %v1006_v20, %v1005_v28  ;;  %v1113_v35 = vrot.slane %v906_v16, 3  ;;  %v1106_v37 = vsel %vm1004_vm4, %v1105_v29, %v1104_v33  ;;  %v1115_v38 = vrot.slane %v907_v17, 2  ;;  %s17137_s7 = smov 64   ;;  %s17135_s4 = smov 48  }
 0x11e   : > { %v1011_v36 = vsel %vm1010_vm6, %v1009_v21, %v1008_v32  ;;  %14213 = vmatprep.subr.bf16.mxu1 %v14975_v1  ;;  %13384 = vmatprep.subr.mxu0 %v14973_v0  ;;  %v1192_v39 = vrot.slane %v901_v10, 1  ;;  %v1108_v41 = vsel %vm1007_vm5, %v1107_v30, %v1106_v37  ;;  %v1195_v42 = vrot.slane %v903_v12, 7  ;;  %v12738_v21 = vld [vmem:[#allocation6] ss:$0 sm:$0xff]  ;;  %s17131_s15 = smov 40   ;;  %s17186_s24 = sld [smem:[#allocation27_spill]] }
 0x11f   : > { %v1014_v40 = vsel %vm1013_vm7, %v1012_v22, %v1011_v36  ;;  %v1197_v43 = vrot.slane %v904_v13, 6  ;;  %v1110_v45 = vsel %vm1010_vm6, %v1109_v31, %v1108_v41  ;;  %v1199_v47 = vrot.slane %v905_v14, 5  ;;  %v12735_v14 = vld [vmem:[#allocation4] ss:$0 sm:$0xff]  ;;  %s17190_s26 = smov 64   ;;  %s17191_s1 = smov 48  }
 0x120   : > { %v1017_v44 = vsel %vm1016_vm8, %v1015_v23, %v1014_v40  ;;  %v1193_v46 = vsel %vm1001_vm3, %v1192_v39, %v1191_v27  ;;  %v1112_v49 = vsel %vm1013_vm7, %v1111_v34, %v1110_v45  ;;  %v1201_v51 = vrot.slane %v906_v16, 4  ;;  %s17194_s2 = smov 112  }
 0x121   : > { %v1020_v48 = vsel %vm1019_vm9, %v1018_v25, %v1017_v44  ;;  %v1194_v50 = vsel %vm1004_vm4, %v902_v11, %v1193_v46  ;;  %v1114_v52 = vsel %vm1016_vm8, %v1113_v35, %v1112_v49  ;;  %v1203_v57 = vrot.slane %v907_v17, 3  ;;  %v1450_v44 = vld [vmem:[%s17106_s10 + $0x8] sm:$0xff] }
 0x122   : > { %13360 = vmatmul.mubr.msk.f32.vlgmr.msra.gmra.mrb[0].mxu1 %vm1021_vm10, %v1020_v48  ;;  %v1196_v54 = vsel %vm1007_vm5, %v1195_v42, %v1194_v50  ;;  %v1116_v55 = vsel %vm1019_vm9, %v1115_v38, %v1114_v52  ;;  %v14220_v2 = vpack.c.bf16 %v1366_v63, %v1365_v62  ;;  %v14223_v5 = vpack.c.bf16 %v1368_v4, %v1367_v3 }
 0x123   : > { %14215 = vmatpush3.bf16.msra.mxu1 %v14202_v8  ;;  %13381 = vmatprep.mubr.msk.f32.mxu1 %vm14974_vm0, %v14973_v0  ;;  %v1198_v56 = vsel %vm1010_vm6, %v1197_v43, %v1196_v54  ;;  %vm3612_vm3 = vcmask 1041408   ;;  %vm5549_vm4 = vcmask 254976  }
 0x124   : > { %13371 = vmatmul.mubr.msk.f32.vlgmr.msra.gmra.mrb[2].mxu0 %vm1021_vm10, %v1116_v55  ;;  %14216 = vmatprep.subr.bf16.mxu1 %v14975_v1  ;;  %v1200_v58 = vsel %vm1013_vm7, %v1199_v47, %v1198_v56 }
 0x125   : > { %13385 = vmatpush3.msk.msra.mxu0 %vm914_vm1, %v1279_v53  ;;  %13386 = vmatprep.mubr.msk.f32.mxu0 %vm14974_vm0, %v14973_v0  ;;  %v1202_v60 = vsel %vm1016_vm8, %v1201_v51, %v1200_v58  ;;  %v1449_v53 = vld [vmem:[%s17106_s10] sm:$0xff] }
 0x126   : > { %14219 = vmatprep.subr.bf16.mxu0 %v14975_v1  ;;  %v1204_v61 = vsel %vm1019_vm9, %v1203_v57, %v1202_v60 }
 0x127   : > { %14218 = vmatpush3.bf16.msra.mxu1 %v14205_v15 }
 0x128   : > { %13387 = vmatmul.mubr.msk.f32.vlgmr.msra.gmra.mrb[4].mxu0 %vm910_vm2, %v908_v59  ;;  %13400 = vmatprep.subr.mxu1 %v14973_v0  ;;  %vm2734_vm2 = vcmask 62464  }
 0x129   : > { %13397 = vmatprep.mubr.msk.f32.mxu0 %vm14974_vm0, %v14973_v0  ;;  %14221 = vmatpush3.bf16.msra.mxu0 %v14220_v2 }
 0x12a   : > { %13382 = vmatmul.mubr.msk.f32.vlgmr.msra.gmra.mrb[2].mxu1 %vm1021_vm10, %v1204_v61  ;;  %14222 = vmatprep.subr.bf16.mxu0 %v14975_v1 }
 0x12b   : > { %13402 = vmatprep.mubr.msk.f32.mxu1 %vm14974_vm0, %v14973_v0 }
 0x12d   : > { %14224 = vmatpush3.bf16.msra.mxu0 %v14223_v5 }
 0x12e   : > { %13410 = vmatprep.subr.mxu0 %v14973_v0 }
 0x1e9   : > { %v984_v6 = vpop.f32.mrb[0].mxu0 }
 0x1ea   : > { %v13350_v7 = vpop.f32.mrb[1].mxu0 }
 0x1f5   : > { %v1090_v8 = vpop.f32.mrb[0].mxu1 }
 0x1f6   : > { %v15482_v9 = vadd.f32 %v1090_v8, %v984_v6  ;;  %v13361_v10 = vpop.f32.mrb[1].mxu1 }
 0x1f7   : > { %v1185_v11 = vpop.f32.mrb[2].mxu0 }
 0x1f8   : > { %v15484_v12 = vadd.f32 %v1185_v11, %v984_v6  ;;  %v13372_v13 = vpop.f32.mrb[3].mxu0 }
 0x1fb   : > { %v1359_v15 = vpop.f32.mrb[4].mxu0 }
 0x1fc   : > { %v15486_v16 = vadd.f32 %v12735_v14, %v1359_v15  ;;  %v13388_v17 = vpop.f32.mrb[5].mxu0 }
 0x1fd   : > { %v1273_v18 = vpop.f32.mrb[2].mxu1 }
 0x1fe   : > { %13398 = vmatmul.mubr.msk.f32.vlgmr.msra.gmra.mrb[6].mxu0 %vm1021_vm10, %v15486_v16  ;;  %v15490_v19 = vadd.f32 %v1273_v18, %v984_v6  ;;  %v13383_v20 = vpop.f32.mrb[3].mxu1 }
 0x1ff   : > { %13412 = vmatprep.mubr.msk.f32.mxu0 %vm14974_vm0, %v14973_v0 }
 0x2d1   : > { %v1445_v22 = vpop.f32.mrb[6].mxu0 }
 0x2d2   : > { %v15494_v23 = vadd.f32 %v12738_v21, %v1445_v22  ;;  %v13399_v24 = vpop.f32.mrb[7].mxu0  ;;  %v1451_v21 = vld [vmem:[%s17106_s10 + $0x10] sm:$0xff] }
 0x2d4   : > { %1622 = vrot.lane.b32.xlu1 %v15494_v23, %s14976_s6  ;;  %1454 = vrot.lane.b32.xlu0 %v15494_v23, %s14977_s0 }
 0x2d8   : > { %1624 = vrot.lane.b32.xlu0 %v15494_v23, %s14978_s18 }
 0x346   : > { %v1455_v25 = vpop.permute.xlu0 %1454  ;;  %v1623_v27 = vpop.permute.xlu1 %1622 }
 0x347   : > { %13401 = vmatpush3.xpose.msk.msra.mxu1 %vm1456_vm11, %v1455_v25 }
 0x348   : > { %13405 = vmatprep.subr.mxu1 %v14973_v0 }
 0x34a   : > { %13403 = vmatmul.mubr.msk.f32.vlgmr.msra.gmra.mrb[4].mxu1 %vm1456_vm11, %v15494_v23  ;;  %v1625_v26 = vpop.permute.xlu0 %1624 }
 0x34b   : > { %13411 = vmatpush3.xpose.msk.msra.mxu0 %vm1456_vm11, %v1625_v26  ;;  %13407 = vmatprep.mubr.msk.f32.mxu1 %vm14974_vm0, %v14973_v0 }
 0x34c   : > { %13420 = vmatprep.subr.mxu0 %v14973_v0 }
 0x34e   : > { %13413 = vmatmul.mubr.msk.f32.vlgmr.msra.gmra.mrb[8].mxu0 %vm1456_vm11, %v1623_v27 }
 0x34f   : > { %13422 = vmatprep.mubr.msk.f32.mxu0 %vm14974_vm0, %v14973_v0  ;;  %13421 = vmatpush3.msra.mxu0 %v1450_v44 }
 0x350   : > { %13430 = vmatprep.subr.mxu0 %v14973_v0 }
 0x41d   : > { %v1527_v28 = vpop.f32.mrb[4].mxu1 }
 0x41e   : > { %v13404_v29 = vpop.f32.mrb[5].mxu1  ;;  %v1532_v30 = vsel %vm1531_vm12, %v1527_v28, -inf }
 0x41f   : > { %1533 = vmax.xlane.f32.xlu1 %v1532_v30 }
 0x421   : > { %v1696_v31 = vpop.f32.mrb[8].mxu0 }
 0x422   : > { %v13414_v32 = vpop.f32.mrb[9].mxu0  ;;  %v1700_v33 = vsel %vm1531_vm12, %v1696_v31, -inf }
 0x423   : > { %1701 = vmax.xlane.f32.xlu0 %v1700_v33 }
 0x4ac   : > { %v1534_v34 = vpop.xlane.xlu1 %1533 }
 0x4ad   : > { %v1535_v35 = vsub.f32 %v1527_v28, %v1534_v34  ;;  %v1452_v34 = vld [vmem:[%s17106_s10 + $0x18] sm:$0xff] }
 0x4af   : > { %v1536_v36 = vmul.f32 1.442695, %v1535_v35 }
 0x4b0   : > { %v1702_v37 = vpop.xlane.xlu0 %1701 }
 0x4b1   : > { %14486 = vpow2.f32 %v1536_v36  ;;  %v1703_v38 = vsub.f32 %v1696_v31, %v1702_v37 }
 0x4b3   : > { %v1704_v39 = vmul.f32 1.442695, %v1703_v38 }
 0x4b5   : > { %14488 = vpow2.f32 %v1704_v39 }
 0x4bb   : > { %v14487_v40 = vpop.eup %14486 }
 0x4bc   : > { %v1538_v41 = vsel %vm1531_vm12, %v14487_v40, 0.0 }
 0x4bd   : > { %1539 = vadd.xlane.f32.xlu0 %v1538_v41 }
 0x4bf   : > { %v14489_v42 = vpop.eup %14488 }
 0x4c0   : > { %v1706_v43 = vsel %vm1531_vm12, %v14489_v42, 0.0 }
 0x4c1   : > { %1707 = vadd.xlane.f32.xlu1 %v1706_v43  ;;  %v12760_v43 = vld [vmem:[#allocation7] ss:$0 sm:$0xff] }
 0x4d2   : > { %1711 = vrot.lane.b32.xlu1 %v15494_v23, %s17133_s20  ;;  %s17187_s20 = sld [smem:[#allocation33_spill]] }
 0x4d3   : > { %1543 = vrot.lane.b32.xlu0 %v15494_v23, %s17137_s7  ;;  %s17193_s7 = smov 40  }
 0x4d6   : > { %1936 = vrot.lane.b32.xlu1 %v15494_v23, %s17145_s25 }
 0x4d7   : > { %1934 = vrot.lane.b32.xlu0 %v15494_v23, %s17141_s11 }
 0x54a   : > { %v1540_v45 = vpop.xlane.xlu0 %1539 }
 0x54b   : > { %14490 = vrcp.f32 %v1540_v45 }
 0x54e   : > { %v1708_v46 = vpop.xlane.xlu1 %1707  ;;  %v1544_v47 = vpop.permute.xlu0 %1543 }
 0x54f   : > { %14492 = vrcp.f32 %v1708_v46  ;;  %13406 = vmatpush3.msk.msra.mxu1 %vm1549_vm13, %v1544_v47 }
 0x550   : > { %13415 = vmatprep.subr.mxu1 %v14973_v0 }
 0x552   : > { %v1712_v50 = vpop.permute.xlu1 %1711  ;;  %v1935_v59 = vpop.permute.xlu0 %1934 }
 0x555   : > { %v14491_v48 = vpop.eup %14490 }
 0x556   : > { %v1542_v49 = vmul.f32 %v14491_v48, %v14487_v40  ;;  %v1937_v57 = vpop.permute.xlu1 %1936 }
 0x558   : > { %13408 = vmatmul.mubr.msk.f32.vlgmr.msra.gmra.mrb[6].mxu1 %vm1545_vm14, %v1542_v49 }
 0x559   : > { %v14493_v51 = vpop.eup %14492  ;;  %13416 = vmatpush3.msk.msra.mxu1 %vm1549_vm13, %v1712_v50  ;;  %13417 = vmatprep.mubr.msk.f32.mxu1 %vm14974_vm0, %v14973_v0 }
 0x55a   : > { %v1710_v52 = vmul.f32 %v14493_v51, %v14489_v42  ;;  %13425 = vmatprep.subr.mxu1 %v14973_v0 }
 0x55c   : > { %13418 = vmatmul.mubr.msk.f32.vlgmr.msra.gmra.mrb[8].mxu1 %vm1545_vm14, %v1710_v52 }
 0x55d   : > { %13427 = vmatprep.mubr.msk.f32.mxu1 %vm14974_vm0, %v14973_v0  ;;  %13426 = vmatpush3.msra.mxu1 %v1449_v53 }
 0x55e   : > { %13435 = vmatprep.subr.mxu1 %v14973_v0 }
 0x62b   : > { %v1618_v54 = vpop.f32.mrb[6].mxu1 }
 0x62c   : > { %v13409_v55 = vpop.f32.mrb[7].mxu1  ;;  %13428 = vmatmul.mubr.msk.f32.vlgmr.msra.gmra.mrb[10].mxu1 %vm1456_vm11, %v1618_v54  ;;  %v2455_v54 = vld [vmem:[%s17108_s12] sm:$0xff] }
 0x62d   : > { %13437 = vmatprep.mubr.msk.f32.mxu1 %vm14974_vm0, %v14973_v0  ;;  %v2456_v55 = vld [vmem:[%s17108_s12 + $0x8] sm:$0xff] }
 0x62f   : > { %v1784_v56 = vpop.f32.mrb[8].mxu1 }
 0x630   : > { %v13419_v58 = vpop.f32.mrb[9].mxu1  ;;  %13423 = vmatmul.mubr.msk.f32.vlgmr.msra.gmra.mrb[10].mxu0 %vm1456_vm11, %v1784_v56  ;;  %v14226_v56 = vpack.c.bf16 %v2456_v55, %v2455_v54 }
 0x631   : > { %13431 = vmatpush3.xpose.msk.msra.mxu0 %vm1456_vm11, %v1937_v57  ;;  %13432 = vmatprep.mubr.msk.f32.mxu0 %vm14974_vm0, %v14973_v0  ;;  %v2458_v57 = vld [vmem:[%s17108_s12 + $0x18] sm:$0xff] }
 0x632   : > { %13440 = vmatprep.subr.mxu0 %v14973_v0 }
 0x634   : > { %13433 = vmatmul.mubr.msk.f32.vlgmr.msra.gmra.mrb[12].mxu0 %vm1456_vm11, %v1935_v59 }
 0x635   : > { %13442 = vmatprep.mubr.msk.f32.mxu0 %vm14974_vm0, %v14973_v0  ;;  %13441 = vmatpush3.msra.mxu0 %v1451_v21 }
 0x636   : > { %13450 = vmatprep.subr.mxu0 %v14973_v0 }
 0x6ff   : > { %v1930_v60 = vpop.f32.mrb[10].mxu1 }
 0x700   : > { %v13429_v61 = vpop.f32.mrb[11].mxu1 }
 0x701   : > { %v2438_v61 = vlaneseq }
 0x703   : > { %v1857_v62 = vpop.f32.mrb[10].mxu0 }
 0x704   : > { %v1931_v63 = vadd.f32 %v1930_v60, %v1857_v62  ;;  %v13424_v2 = vpop.f32.mrb[11].mxu0 }
 0x707   : > { %v2008_v3 = vpop.f32.mrb[12].mxu0 }
 0x708   : > { %v13434_v4 = vpop.f32.mrb[13].mxu0  ;;  %v2012_v5 = vsel %vm1531_vm12, %v2008_v3, -inf }
 0x709   : > { %2013 = vmax.xlane.f32.xlu1 %v2012_v5  ;;  %v15623_v4 = vld [vmem:[%s17119_s23] sm:$0x7] }
 0x71a   : > { %2176 = vrot.lane.b32.xlu1 %v15494_v23, %s17143_s29 }
 0x71e   : > { %2174 = vrot.lane.b32.xlu1 %v15494_v23, %s17139_s30 }
 0x796   : > { %v2014_v6 = vpop.xlane.xlu1 %2013 }
 0x797   : > { %v2015_v7 = vsub.f32 %v2008_v3, %v2014_v6  ;;  %v15618_v3 = vld [vmem:[%s17118_s22] sm:$0x7] }
 0x799   : > { %v2016_v8 = vmul.f32 1.442695, %v2015_v7 }
 0x79a   : > { %v2177_v17 = vpop.permute.xlu1 %2176 }
 0x79b   : > { %14494 = vpow2.f32 %v2016_v8 }
 0x79e   : > { %v2175_v20 = vpop.permute.xlu1 %2174 }
 0x7a5   : > { %v14495_v10 = vpop.eup %14494 }
 0x7a6   : > { %v2018_v11 = vsel %vm1531_vm12, %v14495_v10, 0.0 }
 0x7a7   : > { %2019 = vadd.xlane.f32.xlu0 %v2018_v11  ;;  %v2554_v11 = vld [vmem:[%s17110_s14] sm:$0xff] }
 0x7bd   : > { %2023 = vrot.lane.b32.xlu0 %v15494_v23, %s17135_s4 }
 0x834   : > { %v2020_v13 = vpop.xlane.xlu0 %2019 }
 0x835   : > { %14496 = vrcp.f32 %v2020_v13  ;;  %v2555_v13 = vld [vmem:[%s17110_s14 + $0x8] sm:$0xff] }
 0x838   : > { %v2024_v14 = vpop.permute.xlu0 %2023 }
 0x839   : > { %13436 = vmatpush3.msk.msra.mxu1 %vm1549_vm13, %v2024_v14 }
 0x83a   : > { %13445 = vmatprep.subr.mxu1 %v14973_v0 }
 0x83f   : > { %v14497_v15 = vpop.eup %14496 }
 0x840   : > { %v2022_v18 = vmul.f32 %v14497_v15, %v14495_v10 }
 0x842   : > { %13438 = vmatmul.mubr.msk.f32.vlgmr.msra.gmra.mrb[12].mxu1 %vm1545_vm14, %v2022_v18  ;;  %v2556_v18 = vld [vmem:[%s17110_s14 + $0x10] sm:$0xff] }
 0x843   : > { %13446 = vmatpush3.xpose.msk.msra.mxu1 %vm1456_vm11, %v2177_v17  ;;  %13447 = vmatprep.mubr.msk.f32.mxu1 %vm14974_vm0, %v14973_v0  ;;  %v14232_v17 = vpack.c.bf16 %v2555_v13, %v2554_v11 }
 0x844   : > { %13455 = vmatprep.subr.mxu1 %v14973_v0 }
 0x846   : > { %13448 = vmatmul.mubr.msk.f32.vlgmr.msra.gmra.mrb[14].mxu1 %vm1456_vm11, %v2175_v20  ;;  %v2557_v20 = vld [vmem:[%s17110_s14 + $0x18] sm:$0xff] }
 0x847   : > { %13457 = vmatprep.mubr.msk.f32.mxu1 %vm14974_vm0, %v14973_v0  ;;  %13456 = vmatpush3.msra.mxu1 %v1452_v34 }
 0x848   : > { %13499 = vmatprep.subr.mxu1 %v14973_v0 }
 0x915   : > { %v2096_v22 = vpop.f32.mrb[12].mxu1 }
 0x916   : > { %v13439_v24 = vpop.f32.mrb[13].mxu1  ;;  %13443 = vmatmul.mubr.msk.f32.vlgmr.msra.gmra.mrb[14].mxu0 %vm1456_vm11, %v2096_v22 }
 0x917   : > { %13452 = vmatprep.mubr.msk.f32.mxu0 %vm14974_vm0, %v14973_v0  ;;  %v14235_v24 = vpack.c.bf16 %v2557_v20, %v2556_v18 }
 0x919   : > { %v2248_v25 = vpop.f32.mrb[14].mxu1 }
 0x91a   : > { %v13449_v26 = vpop.f32.mrb[15].mxu1  ;;  %v2252_v27 = vsel %vm1531_vm12, %v2248_v25, -inf }
 0x91b   : > { %2253 = vmax.xlane.f32.xlu0 %v2252_v27  ;;  %v12732_v26 = vld [vmem:[%s17186_s24] ss:$0 sm:$0xff]  ;;  %s17192_s24 = smov 56  }
 0x91c   : > { %v15668_v27 = vadd.f32 %v12732_v26, %v15482_v9  ;;  %v12761_v9 = vld [vmem:[#allocation9] ss:$0 sm:$0xff] }
 0x931   : > { %2263 = vrot.lane.b32.xlu0 %v15494_v23, %s17131_s15  ;;  %s17188_s15 = sld [smem:[#allocation34_spill]] }
 0x9a8   : > { %v2254_v28 = vpop.xlane.xlu0 %2253 }
 0x9a9   : > { %v2255_v29 = vsub.f32 %v2248_v25, %v2254_v28  ;;  %v15675_v28 = vadd.f32 %v12732_v26, %v15484_v12 }
 0x9ab   : > { %v2256_v30 = vmul.f32 1.442695, %v2255_v29  ;;  %v15682_v29 = vadd.f32 %v12732_v26, %v15490_v19  ;;  %v15746_v26 = vld [vmem:[%s17112_s16 + $0x8] sm:$0xff] }
 0x9ac   : > { %v2264_v31 = vpop.permute.xlu0 %2263 }
 0x9ad   : > { %14498 = vpow2.f32 %v2256_v30  ;;  %13451 = vmatpush3.msk.msra.mxu0 %vm1549_vm13, %v2264_v31 }
 0x9ae   : > { %14225 = vmatprep.subr.bf16.mxu0 %v14975_v1 }
 0x9b7   : > { %v14499_v32 = vpop.eup %14498 }
 0x9b8   : > { %v2258_v33 = vsel %vm1531_vm12, %v14499_v32, 0.0 }
 0x9b9   : > { %2259 = vadd.xlane.f32.xlu1 %v2258_v33 }
 0x9e9   : > { %v2169_v23 = vpop.f32.mrb[14].mxu0 }
 0x9ea   : > { %v2173_v35 = vadd.f32 %v2169_v23, %v1931_v63  ;;  %v13444_v36 = vpop.f32.mrb[15].mxu0  ;;  %v15610_v63 = vshrl.u32 %v2438_v61, 7 }
 0x9eb   : > { %v12765_v36 = vld [vmem:[#allocation10] ss:$0 sm:$0xff] }
 0x9ec   : > { %v15613_v2 = vsub.s32 0, %v15610_v63 }
 0x9ee   : > { %v2441_v5 = vrot.slane %v15618_v3, %v15613_v2  ;;  %v2446_v8 = vrot.slane %v15623_v4, %v15613_v2 }
 0xa46   : > { %v2260_v37 = vpop.xlane.xlu1 %2259 }
 0xa47   : > { %14500 = vrcp.f32 %v2260_v37 }
 0xa51   : > { %v14501_v38 = vpop.eup %14500 }
 0xa52   : > { %v2262_v39 = vmul.f32 %v14501_v38, %v14499_v32 }
 0xa54   : > { %13453 = vmatmul.mubr.msk.f32.vlgmr.msra.gmra.mrb[16].mxu0 %vm1545_vm14, %v2262_v39 }
 0xa55   : > { %13468 = vmatprep.mubr.msk.f32.mxu0 %vm14974_vm0, %v14973_v0  ;;  %14227 = vmatpush3.bf16.msra.mxu0 %v14226_v56 }
 0xa56   : > { %14228 = vmatprep.subr.bf16.mxu0 %v14975_v1 }
 0xb27   : > { %v2336_v40 = vpop.f32.mrb[16].mxu0 }
 0xb28   : > { %v13454_v41 = vpop.f32.mrb[17].mxu0  ;;  %13458 = vmatmul.mubr.msk.f32.vlgmr.msra.gmra.mrb[16].mxu1 %vm1456_vm11, %v2336_v40 }
 0xb29   : > { %13501 = vmatprep.mubr.msk.f32.mxu1 %vm14974_vm0, %v14973_v0 }
 0xbfb   : > { %v2409_v42 = vpop.f32.mrb[16].mxu1 }
 0xbfc   : > { %v2413_v44 = vadd.f32 %v2409_v42, %v2173_v35  ;;  %v13459_v45 = vpop.f32.mrb[17].mxu1 }
 0xbfe   : > { %v2421_v46 = vadd.f32 %v12760_v43, %v2413_v44 }
 0xc00   : > { %v2422_v47 = vadd.f32 %v2421_v46, %v15486_v16  ;;  %v2457_v16 = vld [vmem:[%s17108_s12 + $0x10] sm:$0xff] }
 0xc01   : > { %v14229_v58 = vpack.c.bf16 %v2458_v57, %v2457_v16 }
 0xc02   : > { %v2424_v48 = vsel %vm2423_vm15, %v2422_v47, 0.0 }
 0xc03   : > { %2425 = vadd.xlane.f32.xlu1 %v2424_v48  ;;  %14230 = vmatpush3.bf16.msra.mxu0 %v14229_v58 }
 0xc04   : > { %14231 = vmatprep.subr.bf16.mxu0 %v14975_v1 }
 0xc90   : > { %v2426_v49 = vpop.xlane.xlu1 %2425 }
 0xc91   : > { %v2428_v50 = vmul.f32 0.03125, %v2426_v49 }
 0xc93   : > { %v2429_v51 = vsub.f32 %v2422_v47, %v2428_v50 }
 0xc95   : > { %v2430_v52 = vmul.f32 %v2429_v51, %v2429_v51 }
 0xc97   : > { %v2431_v53 = vsel %vm2423_vm15, %v2430_v52, 0.0 }
 0xc98   : > { %2432 = vadd.xlane.f32.xlu1 %v2431_v53 }
 0xd25   : > { %v2433_v59 = vpop.xlane.xlu1 %2432 }
 0xd26   : > { %v2434_v60 = vmul.f32 0.03125, %v2433_v59 }
 0xd28   : > { %v2435_v62 = vadd.f32 1e-05, %v2434_v60 }
 0xd2a   : > { %14502 = vrsqrt.f32 %v2435_v62 }
 0xd34   : > { %v14503_v6 = vpop.eup %14502 }
 0xd35   : > { %v2437_v7 = vmul.f32 %v14503_v6, %v2429_v51 }
 0xd37   : > { %v2442_v10 = vmul.f32 %v2441_v5, %v2437_v7 }
 0xd39   : > { %v2447_v14 = vadd.f32 %v2446_v8, %v2442_v10 }
 0xd3b   : > { %v2449_v15 = vrot.slane %v2447_v14, 2  ;;  %v15644_v22 = vrot.slane %v2447_v14, 4 }
 0xd3d   : > { %v15642_v21 = vsel %vm1549_vm13, %v2447_v14, %v2449_v15  ;;  %v15653_v25 = vsel %vm914_vm1, %v2449_v15, %v15644_v22 }
 0xd3e   : > { %13469 = vmatmul.mubr.msk.f32.vlgmr.msra.gmra.mrb[18].mxu0 %vm1021_vm10, %v15642_v21 }
 0xd3f   : > { %14233 = vmatpush3.bf16.msra.mxu0 %v14232_v17  ;;  %13471 = vmatprep.mubr.msk.f32.mxu0 %vm14974_vm0, %v14973_v0 }
 0xd40   : > { %14234 = vmatprep.subr.bf16.mxu0 %v14975_v1 }
 0xd42   : > { %13472 = vmatmul.mubr.msk.f32.gmra.mrb[20].mxu0 %vm1021_vm10, %v15653_v25 }
 0xd43   : > { %13474 = vmatprep.mubr.msk.f32.mxu0 %vm14974_vm0, %v14973_v0  ;;  %14236 = vmatpush3.bf16.msra.mxu0 %v14235_v24 }
 0xd44   : > { %13494 = vmatprep.subr.mxu0 %v14973_v0 }
 0xd46   : > { %13475 = vmatmul.mubr.msk.f32.gmra.mrb[22].mxu0 %vm1021_vm10, %v15644_v22 }
 0xd47   : > { %13485 = vmatprep.mubr.msk.f32.mxu0 %vm14974_vm0, %v14973_v0 }
 0xd4a   : > { %13486 = vmatmul.mubr.msk.f32.vlgmr.msra.gmra.mrb[24].mxu0 %vm1021_vm10, %v15668_v27 }
 0xd4b   : > { %13488 = vmatprep.mubr.msk.f32.mxu0 %vm14974_vm0, %v14973_v0 }
 0xd4e   : > { %13489 = vmatmul.mubr.msk.f32.gmra.mrb[26].mxu0 %vm1021_vm10, %v15675_v28 }
 0xd4f   : > { %13491 = vmatprep.mubr.msk.f32.mxu0 %vm14974_vm0, %v14973_v0 }
 0xd52   : > { %13492 = vmatmul.mubr.msk.f32.gmra.mrb[28].mxu0 %vm1021_vm10, %v15682_v29 }
 0xd53   : > { %13496 = vmatprep.mubr.msk.f32.mxu0 %vm14974_vm0, %v14973_v0 }
 0xe11   : > { %v2540_v30 = vpop.f32.mrb[18].mxu0 }
 0xe12   : > { %v15688_v31 = vadd.f32 %v12761_v9, %v2540_v30  ;;  %v13470_v12 = vpop.f32.mrb[19].mxu0 }
 0xe13   : > { %v15753_v12 = vld [vmem:[%s17112_s16] sm:$0xff] }
 0xe14   : > { %2822 = vrot.lane.b32.xlu0 %v15688_v31, %s14976_s6 }
 0xe15   : > { %v2545_v32 = vpop.f32.mrb[20].mxu0 }
 0xe16   : > { %v15692_v33 = vadd.f32 %v12761_v9, %v2545_v32  ;;  %v13473_v34 = vpop.f32.mrb[21].mxu0 }
 0xe18   : > { %v4568_v37 = vrot.slane %v15692_v33, 4 }
 0xe19   : > { %v2550_v19 = vpop.f32.mrb[22].mxu0 }
 0xe1a   : > { %v2551_v23 = vadd.f32 %v12761_v9, %v2550_v19  ;;  %v13476_v35 = vpop.f32.mrb[23].mxu0 }
 0xe1c   : > { %v4569_v38 = vrot.slane %v2551_v23, 4 }
 0xe1d   : > { %v2640_v39 = vpop.f32.mrb[24].mxu0 }
 0xe1e   : > { %v15696_v40 = vsel %vm914_vm1, %v4568_v37, %v4569_v38  ;;  %v15698_v41 = vadd.f32 %v12765_v36, %v2640_v39  ;;  %v13487_v42 = vpop.f32.mrb[25].mxu0 }
 0xe20   : > { %2824 = vrot.lane.b32.xlu1 %v15698_v41, %s14976_s6  ;;  %13495 = vmatpush3.xpose.msk.msra.mxu0 %vm1456_vm11, %v15698_v41 }
 0xe21   : > { %v2645_v43 = vpop.f32.mrb[26].mxu0  ;;  %13504 = vmatprep.subr.mxu0 %v14973_v0 }
 0xe22   : > { %v15705_v44 = vadd.f32 %v12765_v36, %v2645_v43  ;;  %v13490_v45 = vpop.f32.mrb[27].mxu0 }
 0xe23   : > { %13497 = vmatmul.mubr.msk.f32.vlgmr.msra.gmra.mrb[30].mxu0 %vm1456_vm11, %v15688_v31 }
 0xe24   : > { %13506 = vmatprep.mubr.msk.f32.mxu0 %vm14974_vm0, %v14973_v0 }
 0xe25   : > { %v2650_v46 = vpop.f32.mrb[28].mxu0 }
 0xe26   : > { %v15711_v47 = vadd.f32 %v12765_v36, %v2650_v46  ;;  %v13493_v48 = vpop.f32.mrb[29].mxu0 }
 0xe86   : > { %v2823_v50 = vpop.permute.xlu0 %2822 }
 0xe92   : > { %v2825_v49 = vpop.permute.xlu1 %2824 }
 0xe93   : > { %13505 = vmatpush3.xpose.msk.msra.mxu0 %vm1456_vm11, %v2825_v49 }
 0xe94   : > { %13514 = vmatprep.subr.mxu0 %v14973_v0 }
 0xe96   : > { %13507 = vmatmul.mubr.msk.f32.vlgmr.msra.gmra.mrb[32].mxu0 %vm1456_vm11, %v2823_v50  ;;  %v3614_v50 = vrot.slane %v15692_v33, 6  ;;  %v15795_v33 = vld [vmem:[%s17112_s16 + $0x10] sm:$0xff] }
 0xe97   : > { %13516 = vmatprep.mubr.msk.f32.mxu0 %vm14974_vm0, %v14973_v0  ;;  %13515 = vmatpush3.msra.mxu0 %v15746_v26 }
 0xe98   : > { %13519 = vmatprep.subr.mxu0 %v14973_v0 }
 0xef6   : > { %v2730_v51 = vpop.f32.mrb[30].mxu0 }
 0xef7   : > { %v13498_v52 = vpop.f32.mrb[31].mxu0  ;;  %v2735_v53 = vsel %vm2734_vm2, %v2730_v51, -inf }
 0xef8   : > { %2736 = vmax.xlane.f32.xlu0 %v2735_v53  ;;  %v3613_v52 = vrot.slane %v15688_v31, 6 }
 0xefa   : > { %v15786_v53 = vsel %vm3612_vm3, %v3613_v52, %v3614_v50 }
 0xf69   : > { %v2896_v54 = vpop.f32.mrb[32].mxu0 }
 0xf6a   : > { %v13508_v55 = vpop.f32.mrb[33].mxu0  ;;  %v2900_v16 = vsel %vm2734_vm2, %v2896_v54, -inf }
 0xf6b   : > { %2901 = vmax.xlane.f32.xlu1 %v2900_v16 }
 0xf7c   : > { %2911 = vrot.lane.b32.xlu1 %v15698_v41, %s14978_s18 }
 0xf80   : > { %3135 = vrot.lane.b32.xlu1 %v15698_v41, %s17141_s11 }
 0xf85   : > { %v2737_v56 = vpop.xlane.xlu0 %2736 }
 0xf86   : > { %v2738_v57 = vsub.f32 %v2730_v51, %v2737_v56 }
 0xf88   : > { %v2739_v58 = vmul.f32 1.442695, %v2738_v57 }
 0xf8a   : > { %14504 = vpow2.f32 %v2739_v58 }
 0xf94   : > { %v14505_v59 = vpop.eup %14504 }
 0xf95   : > { %v2741_v60 = vsel %vm2734_vm2, %v14505_v59, 0.0 }
 0xf96   : > { %2742 = vadd.xlane.f32.xlu0 %v2741_v60 }
 0xfac   : > { %2746 = vrot.lane.b32.xlu0 %v15698_v41, %s14977_s0 }
 0xff8   : > { %v2902_v61 = vpop.xlane.xlu1 %2901 }
 0xff9   : > { %v2903_v62 = vsub.f32 %v2896_v54, %v2902_v61 }
 0xffb   : > { %v2904_v5 = vmul.f32 1.442695, %v2903_v62 }
 0xffc   : > { %v2912_v14 = vpop.permute.xlu1 %2911 }
 0xffd   : > { %14506 = vpow2.f32 %v2904_v5 }
0x1000   : > { %v3136_v20 = vpop.permute.xlu1 %3135 }
0x1007   : > { %v14507_v6 = vpop.eup %14506 }
0x1008   : > { %v2906_v7 = vsel %vm2734_vm2, %v14507_v6, 0.0 }
0x1009   : > { %2907 = vadd.xlane.f32.xlu0 %v2906_v7 }
0x101f   : > { %3133 = vrot.lane.b32.xlu0 %v15688_v31, %s17141_s11 }
0x1023   : > { %v2743_v8 = vpop.xlane.xlu0 %2742 }
0x1024   : > { %14508 = vrcp.f32 %v2743_v8 }
0x1027   : > { %v2747_v10 = vpop.permute.xlu0 %2746 }
0x1028   : > { %13500 = vmatpush3.msra.mxu1 %v2747_v10 }
0x1029   : > { %13509 = vmatprep.subr.mxu1 %v14973_v0 }
0x102e   : > { %v14509_v11 = vpop.eup %14508 }
0x102f   : > { %v2745_v13 = vmul.f32 %v14509_v11, %v14505_v59  ;;  %v15817_v11 = vld [vmem:[%s17112_s16 + $0x18] sm:$0xff] }
0x1031   : > { %13502 = vmatmul.mubr.msk.f32.vlgmr.msra.gmra.mrb[18].mxu1 %vm1456_vm11, %v2745_v13 }
0x1032   : > { %13510 = vmatpush3.msra.mxu1 %v2912_v14  ;;  %13511 = vmatprep.mubr.msk.f32.mxu1 %vm14974_vm0, %v14973_v0 }
0x1033   : > { %13524 = vmatprep.subr.mxu1 %v14973_v0 }
0x1096   : > { %v2908_v15 = vpop.xlane.xlu0 %2907 }
0x1097   : > { %14510 = vrcp.f32 %v2908_v15 }
0x109a   : > { %v3134_v24 = vpop.permute.xlu0 %3133 }
0x10a1   : > { %v14511_v17 = vpop.eup %14510 }
0x10a2   : > { %v2910_v18 = vmul.f32 %v14511_v17, %v14507_v6 }
0x10a4   : > { %13512 = vmatmul.mubr.msk.f32.vlgmr.msra.gmra.mrb[20].mxu1 %vm1456_vm11, %v2910_v18 }
0x10a5   : > { %13525 = vmatpush3.xpose.msk.msra.mxu1 %vm1456_vm11, %v3136_v20  ;;  %13526 = vmatprep.mubr.msk.f32.mxu1 %vm14974_vm0, %v14973_v0 }
0x10a6   : > { %13529 = vmatprep.subr.mxu1 %v14973_v0 }
0x10a8   : > { %13527 = vmatmul.mubr.msk.f32.vlgmr.msra.gmra.mrb[22].mxu1 %vm1456_vm11, %v3134_v24 }
0x10a9   : > { %13531 = vmatprep.mubr.msk.f32.mxu1 %vm14974_vm0, %v14973_v0 }
0x1104   : > { %v2818_v9 = vpop.f32.mrb[18].mxu1 }
0x1105   : > { %v13503_v30 = vpop.f32.mrb[19].mxu1 }
0x1177   : > { %v2983_v32 = vpop.f32.mrb[20].mxu1 }
0x1178   : > { %v13513_v34 = vpop.f32.mrb[21].mxu1  ;;  %13517 = vmatmul.mubr.msk.f32.vlgmr.msra.gmra.mrb[34].mxu0 %vm1456_vm11, %v2983_v32 }
0x1179   : > { %13520 = vmatpush3.msra.mxu0 %v15753_v12  ;;  %13521 = vmatprep.mubr.msk.f32.mxu0 %vm14974_vm0, %v14973_v0 }
0x117a   : > { %13534 = vmatprep.subr.mxu0 %v14973_v0 }
0x117b   : > { %v3207_v19 = vpop.f32.mrb[22].mxu1 }
0x117c   : > { %v13528_v23 = vpop.f32.mrb[23].mxu1  ;;  %v3211_v35 = vsel %vm2734_vm2, %v3207_v19, -inf }
0x117d   : > { %3212 = vmax.xlane.f32.xlu1 %v3211_v35 }
0x1180   : > { %13522 = vmatmul.mubr.msk.f32.vlgmr.msra.gmra.mrb[34].mxu0 %vm1456_vm11, %v2818_v9 }
0x1181   : > { %13536 = vmatprep.mubr.msk.f32.mxu0 %vm14974_vm0, %v14973_v0  ;;  %13535 = vmatpush3.msra.mxu0 %v15795_v33 }
0x1182   : > { %13544 = vmatprep.subr.mxu0 %v14973_v0 }
0x118e   : > { %3374 = vrot.lane.b32.xlu1 %v15698_v41, %s17139_s30 }
0x1192   : > { %3372 = vrot.lane.b32.xlu1 %v15688_v31, %s17139_s30 }
0x120a   : > { %v3213_v36 = vpop.xlane.xlu1 %3212 }
0x120b   : > { %v3214_v37 = vsub.f32 %v3207_v19, %v3213_v36 }
0x120d   : > { %v3215_v38 = vmul.f32 1.442695, %v3214_v37 }
0x120e   : > { %v3375_v48 = vpop.permute.xlu1 %3374 }
0x120f   : > { %14512 = vpow2.f32 %v3215_v38 }
0x1212   : > { %v3373_v51 = vpop.permute.xlu1 %3372 }
0x1219   : > { %v14513_v39 = vpop.eup %14512 }
0x121a   : > { %v3217_v42 = vsel %vm2734_vm2, %v14513_v39, 0.0 }
0x121b   : > { %3218 = vadd.xlane.f32.xlu0 %v3217_v42 }
0x1231   : > { %3222 = vrot.lane.b32.xlu0 %v15698_v41, %s17145_s25 }
0x12a8   : > { %v3219_v43 = vpop.xlane.xlu0 %3218 }
0x12a9   : > { %14514 = vrcp.f32 %v3219_v43 }
0x12ac   : > { %v3223_v45 = vpop.permute.xlu0 %3222 }
0x12ad   : > { %13530 = vmatpush3.msra.mxu1 %v3223_v45 }
0x12ae   : > { %13539 = vmatprep.subr.mxu1 %v14973_v0 }
0x12b3   : > { %v14515_v46 = vpop.eup %14514 }
0x12b4   : > { %v3221_v49 = vmul.f32 %v14515_v46, %v14513_v39 }
0x12b6   : > { %13532 = vmatmul.mubr.msk.f32.vlgmr.msra.gmra.mrb[24].mxu1 %vm1456_vm11, %v3221_v49 }
0x12b7   : > { %13540 = vmatpush3.xpose.msk.msra.mxu1 %vm1456_vm11, %v3375_v48  ;;  %13541 = vmatprep.mubr.msk.f32.mxu1 %vm14974_vm0, %v14973_v0 }
0x12b8   : > { %13554 = vmatprep.subr.mxu1 %v14973_v0 }
0x12ba   : > { %13542 = vmatmul.mubr.msk.f32.vlgmr.msra.gmra.mrb[26].mxu1 %vm1456_vm11, %v3373_v51 }
0x12bb   : > { %13555 = vmatpush3.xpose.msk.msra.mxu1 %vm1456_vm11, %v15705_v44  ;;  %13556 = vmatprep.mubr.msk.f32.mxu1 %vm14974_vm0, %v14973_v0 }
0x12bc   : > { %13559 = vmatprep.subr.mxu1 %v14973_v0 }
0x12be   : > { %13557 = vmatmul.mubr.msk.f32.vlgmr.msra.gmra.mrb[28].mxu1 %vm1456_vm11, %v15786_v53 }
0x12bf   : > { %13561 = vmatprep.mubr.msk.f32.mxu1 %vm14974_vm0, %v14973_v0 }
0x1389   : > { %v3294_v31 = vpop.f32.mrb[24].mxu1 }
0x138a   : > { %v13533_v54 = vpop.f32.mrb[25].mxu1  ;;  %13537 = vmatmul.mubr.msk.f32.vlgmr.msra.gmra.mrb[34].mxu0 %vm1456_vm11, %v3294_v31 }
0x138b   : > { %13546 = vmatprep.mubr.msk.f32.mxu0 %vm14974_vm0, %v14973_v0 }
0x138d   : > { %v3446_v55 = vpop.f32.mrb[26].mxu1 }
0x138e   : > { %v13543_v16 = vpop.f32.mrb[27].mxu1  ;;  %v3450_v56 = vsel %vm2734_vm2, %v3446_v55, -inf }
0x138f   : > { %3451 = vmax.xlane.f32.xlu0 %v3450_v56 }
0x1391   : > { %v3687_v57 = vpop.f32.mrb[28].mxu1 }
0x1392   : > { %v13558_v58 = vpop.f32.mrb[29].mxu1 }
0x13a5   : > { %3461 = vrot.lane.b32.xlu0 %v15698_v41, %s17143_s29  ;;  %v3691_v41 = vsel %vm2734_vm2, %v3687_v57, -inf }
0x13a9   : > { %3778 = vrot.lane.b32.xlu0 %v15786_v53, %s14976_s6 }
0x141c   : > { %v3452_v59 = vpop.xlane.xlu0 %3451 }
0x141d   : > { %v3453_v60 = vsub.f32 %v3446_v55, %v3452_v59 }
0x141f   : > { %v3454_v61 = vmul.f32 1.442695, %v3453_v60 }
0x1420   : > { %v3462_v62 = vpop.permute.xlu0 %3461 }
0x1421   : > { %14516 = vpow2.f32 %v3454_v61  ;;  %13545 = vmatpush3.msra.mxu0 %v3462_v62 }
0x1422   : > { %13549 = vmatprep.subr.mxu0 %v14973_v0 }
0x1424   : > { %v3779_v17 = vpop.permute.xlu0 %3778 }
0x142b   : > { %v14517_v5 = vpop.eup %14516 }
0x142c   : > { %v3456_v6 = vsel %vm2734_vm2, %v14517_v5, 0.0 }
0x142d   : > { %3457 = vadd.xlane.f32.xlu1 %v3456_v6 }
0x143e   : > { %3780 = vrot.lane.b32.xlu1 %v15705_v44, %s14976_s6 }
0x1462   : > { %3692 = vmax.xlane.f32.xlu1 %v3691_v41 }
0x1473   : > { %3867 = vrot.lane.b32.xlu1 %v15705_v44, %s14978_s18 }
0x14ba   : > { %v3458_v7 = vpop.xlane.xlu1 %3457 }
0x14bb   : > { %14518 = vrcp.f32 %v3458_v7 }
0x14be   : > { %v3781_v14 = vpop.permute.xlu1 %3780 }
0x14c5   : > { %v14519_v8 = vpop.eup %14518 }
0x14c6   : > { %v3460_v10 = vmul.f32 %v14519_v8, %v14517_v5 }
0x14c8   : > { %13547 = vmatmul.mubr.msk.f32.vlgmr.msra.gmra.mrb[36].mxu0 %vm1456_vm11, %v3460_v10 }
0x14c9   : > { %13550 = vmatpush3.msra.mxu0 %v15817_v11  ;;  %13551 = vmatprep.mubr.msk.f32.mxu0 %vm14974_vm0, %v14973_v0 }
0x14ca   : > { %13564 = vmatprep.subr.mxu0 %v14973_v0 }
0x14ef   : > { %v3693_v18 = vpop.xlane.xlu1 %3692 }
0x14f0   : > { %v3694_v20 = vsub.f32 %v3687_v57, %v3693_v18 }
0x14f2   : > { %v3695_v24 = vmul.f32 1.442695, %v3694_v20 }
0x14f3   : > { %v3868_v49 = vpop.permute.xlu1 %3867 }
0x14f4   : > { %14520 = vpow2.f32 %v3695_v24 }
0x14fe   : > { %v14521_v23 = vpop.eup %14520 }
0x14ff   : > { %v3697_v35 = vsel %vm2734_vm2, %v14521_v23, 0.0 }
0x159b   : > { %v3533_v13 = vpop.f32.mrb[36].mxu0 }
0x159c   : > { %v13548_v15 = vpop.f32.mrb[37].mxu0  ;;  %13552 = vmatmul.mubr.msk.f32.vlgmr.msra.gmra.mrb[34].mxu0 %vm1456_vm11, %v3533_v13 }
0x159d   : > { %13565 = vmatpush3.xpose.msk.msra.mxu0 %vm1456_vm11, %v3781_v14  ;;  %13566 = vmatprep.mubr.msk.f32.mxu0 %vm14974_vm0, %v14973_v0 }
0x159e   : > { %13574 = vmatprep.subr.mxu0 %v14973_v0 }
0x15a0   : > { %13567 = vmatmul.mubr.msk.f32.vlgmr.msra.gmra.mrb[38].mxu0 %vm1456_vm11, %v3779_v17 }
0x15a1   : > { %13575 = vmatpush3.msra.mxu0 %v15746_v26  ;;  %13576 = vmatprep.mubr.msk.f32.mxu0 %vm14974_vm0, %v14973_v0 }
0x15a2   : > { %13579 = vmatprep.subr.mxu0 %v14973_v0 }
0x166f   : > { %v15834_v9 = vpop.f32.mrb[34].mxu0 }
0x1670   : > { %v13553_v30 = vpop.f32.mrb[35].mxu0 }
0x1673   : > { %v3852_v32 = vpop.f32.mrb[38].mxu0 }
0x1674   : > { %v13568_v34 = vpop.f32.mrb[39].mxu0  ;;  %v3856_v19 = vsel %vm2734_vm2, %v3852_v32, -inf }
0x1675   : > { %3857 = vmax.xlane.f32.xlu0 %v3856_v19 }
0x1679   : > { %3698 = vadd.xlane.f32.xlu0 %v3697_v35 }
0x168f   : > { %3702 = vrot.lane.b32.xlu0 %v15705_v44, %s14977_s0 }
0x1693   : > { %4089 = vrot.lane.b32.xlu0 %v15786_v53, %s17141_s11 }
0x1702   : > { %v3858_v36 = vpop.xlane.xlu0 %3857 }
0x1703   : > { %v3859_v37 = vsub.f32 %v3852_v32, %v3858_v36 }
0x1705   : > { %v3860_v38 = vmul.f32 1.442695, %v3859_v37 }
0x1706   : > { %v3699_v39 = vpop.xlane.xlu0 %3698 }
0x1707   : > { %14522 = vpow2.f32 %v3860_v38 }
0x1708   : > { %14524 = vrcp.f32 %v3699_v39 }
0x170a   : > { %v3703_v42 = vpop.permute.xlu0 %3702 }
0x170b   : > { %13560 = vmatpush3.msra.mxu1 %v3703_v42 }
0x170c   : > { %13569 = vmatprep.subr.mxu1 %v14973_v0 }
0x170e   : > { %v4090_v54 = vpop.permute.xlu0 %4089 }
0x1711   : > { %v14523_v43 = vpop.eup %14522 }
0x1712   : > { %v14525_v45 = vpop.eup %14524  ;;  %v3862_v46 = vsel %vm2734_vm2, %v14523_v43, 0.0 }
0x1713   : > { %3863 = vadd.xlane.f32.xlu1 %v3862_v46  ;;  %v3701_v48 = vmul.f32 %v14525_v45, %v14521_v23 }
0x1715   : > { %13562 = vmatmul.mubr.msk.f32.vlgmr.msra.gmra.mrb[30].mxu1 %vm1456_vm11, %v3701_v48 }
0x1716   : > { %13570 = vmatpush3.msra.mxu1 %v3868_v49  ;;  %13571 = vmatprep.mubr.msk.f32.mxu1 %vm14974_vm0, %v14973_v0 }
0x1717   : > { %13584 = vmatprep.subr.mxu1 %v14973_v0 }
0x1724   : > { %4091 = vrot.lane.b32.xlu1 %v15705_v44, %s17141_s11 }
0x17a0   : > { %v3864_v50 = vpop.xlane.xlu1 %3863 }
0x17a1   : > { %14526 = vrcp.f32 %v3864_v50 }
0x17a4   : > { %v4092_v31 = vpop.permute.xlu1 %4091 }
0x17ab   : > { %v14527_v51 = vpop.eup %14526 }
0x17ac   : > { %v3866_v52 = vmul.f32 %v14527_v51, %v14523_v43 }
0x17ae   : > { %13572 = vmatmul.mubr.msk.f32.vlgmr.msra.gmra.mrb[32].mxu1 %vm1456_vm11, %v3866_v52 }
0x17af   : > { %13585 = vmatpush3.xpose.msk.msra.mxu1 %vm1456_vm11, %v4092_v31  ;;  %13586 = vmatprep.mubr.msk.f32.mxu1 %vm14974_vm0, %v14973_v0 }
0x17b0   : > { %13589 = vmatprep.subr.mxu1 %v14973_v0 }
0x17b2   : > { %13587 = vmatmul.mubr.msk.f32.vlgmr.msra.gmra.mrb[34].mxu1 %vm1456_vm11, %v4090_v54 }
0x17b3   : > { %13591 = vmatprep.mubr.msk.f32.mxu1 %vm14974_vm0, %v14973_v0 }
0x17e8   : > { %v3774_v55 = vpop.f32.mrb[30].mxu1 }
0x17e9   : > { %v13563_v16 = vpop.f32.mrb[31].mxu1 }
0x1881   : > { %v3939_v56 = vpop.f32.mrb[32].mxu1 }
0x1882   : > { %v13573_v57 = vpop.f32.mrb[33].mxu1  ;;  %13577 = vmatmul.mubr.msk.f32.vlgmr.msra.gmra.mrb[40].mxu0 %vm1456_vm11, %v3939_v56 }
0x1883   : > { %13580 = vmatpush3.msra.mxu0 %v15753_v12  ;;  %13581 = vmatprep.mubr.msk.f32.mxu0 %vm14974_vm0, %v14973_v0 }
0x1884   : > { %13594 = vmatprep.subr.mxu0 %v14973_v0 }
0x1885   : > { %v4163_v58 = vpop.f32.mrb[34].mxu1 }
0x1886   : > { %v13588_v59 = vpop.f32.mrb[35].mxu1  ;;  %v4167_v60 = vsel %vm2734_vm2, %v4163_v58, -inf }
0x1887   : > { %4168 = vmax.xlane.f32.xlu1 %v4167_v60 }
0x188a   : > { %13582 = vmatmul.mubr.msk.f32.vlgmr.msra.gmra.mrb[40].mxu0 %vm1456_vm11, %v3774_v55 }
0x188b   : > { %13595 = vmatpush3.msra.mxu0 %v15795_v33  ;;  %13596 = vmatprep.mubr.msk.f32.mxu0 %vm14974_vm0, %v14973_v0 }
0x188c   : > { %13604 = vmatprep.subr.mxu0 %v14973_v0 }
0x1898   : > { %4330 = vrot.lane.b32.xlu1 %v15705_v44, %s17139_s30 }
0x189c   : > { %4328 = vrot.lane.b32.xlu1 %v15786_v53, %s17139_s30 }
0x1914   : > { %v4169_v61 = vpop.xlane.xlu1 %4168 }
0x1915   : > { %v4170_v62 = vsub.f32 %v4163_v58, %v4169_v61 }
0x1917   : > { %v4171_v5 = vmul.f32 1.442695, %v4170_v62 }
0x1918   : > { %v4331_v13 = vpop.permute.xlu1 %4330 }
0x1919   : > { %14528 = vpow2.f32 %v4171_v5 }
0x191c   : > { %v4329_v14 = vpop.permute.xlu1 %4328 }
0x1923   : > { %v14529_v6 = vpop.eup %14528 }
0x1924   : > { %v4173_v41 = vsel %vm2734_vm2, %v14529_v6, 0.0 }
0x1925   : > { %4174 = vadd.xlane.f32.xlu0 %v4173_v41 }
0x193b   : > { %4178 = vrot.lane.b32.xlu0 %v15705_v44, %s17145_s25 }
0x19b2   : > { %v4175_v7 = vpop.xlane.xlu0 %4174 }
0x19b3   : > { %14530 = vrcp.f32 %v4175_v7 }
0x19b6   : > { %v4179_v8 = vpop.permute.xlu0 %4178 }
0x19b7   : > { %13590 = vmatpush3.msra.mxu1 %v4179_v8 }
0x19b8   : > { %13599 = vmatprep.subr.mxu1 %v14973_v0 }
0x19bd   : > { %v14531_v10 = vpop.eup %14530 }
0x19be   : > { %v4177_v53 = vmul.f32 %v14531_v10, %v14529_v6 }
0x19c0   : > { %13592 = vmatmul.mubr.msk.f32.vlgmr.msra.gmra.mrb[36].mxu1 %vm1456_vm11, %v4177_v53 }
0x19c1   : > { %13600 = vmatpush3.xpose.msk.msra.mxu1 %vm1456_vm11, %v4331_v13  ;;  %13601 = vmatprep.mubr.msk.f32.mxu1 %vm14974_vm0, %v14973_v0 }
0x19c2   : > { %13614 = vmatprep.subr.mxu1 %v14973_v0 }
0x19c4   : > { %13602 = vmatmul.mubr.msk.f32.vlgmr.msra.gmra.mrb[38].mxu1 %vm1456_vm11, %v4329_v14 }
0x19c5   : > { %13615 = vmatpush3.xpose.msk.msra.mxu1 %vm1456_vm11, %v15711_v47  ;;  %13616 = vmatprep.mubr.msk.f32.mxu1 %vm14974_vm0, %v14973_v0 }
0x19c6   : > { %13619 = vmatprep.subr.mxu1 %v14973_v0 }
0x19c8   : > { %13617 = vmatmul.mubr.msk.f32.vlgmr.msra.gmra.mrb[40].mxu1 %vm1456_vm11, %v15696_v40 }
0x19c9   : > { %13621 = vmatprep.mubr.msk.f32.mxu1 %vm14974_vm0, %v14973_v0 }
0x1a93   : > { %v4250_v15 = vpop.f32.mrb[36].mxu1 }
0x1a94   : > { %v13593_v17 = vpop.f32.mrb[37].mxu1  ;;  %13597 = vmatmul.mubr.msk.f32.vlgmr.msra.gmra.mrb[40].mxu0 %vm1456_vm11, %v4250_v15 }
0x1a95   : > { %13606 = vmatprep.mubr.msk.f32.mxu0 %vm14974_vm0, %v14973_v0 }
0x1a97   : > { %v4402_v18 = vpop.f32.mrb[38].mxu1 }
0x1a98   : > { %v13603_v20 = vpop.f32.mrb[39].mxu1  ;;  %v4406_v24 = vsel %vm2734_vm2, %v4402_v18, -inf }
0x1a99   : > { %4407 = vmax.xlane.f32.xlu0 %v4406_v24 }
0x1a9b   : > { %v4642_v30 = vpop.f32.mrb[40].mxu1 }
0x1a9c   : > { %v13618_v32 = vpop.f32.mrb[41].mxu1 }
0x1aaf   : > { %4417 = vrot.lane.b32.xlu0 %v15705_v44, %s17143_s29  ;;  %v4646_v44 = vsel %vm2734_vm2, %v4642_v30, -inf }
0x1ab3   : > { %4733 = vrot.lane.b32.xlu0 %v15696_v40, %s14976_s6 }
0x1b26   : > { %v4408_v34 = vpop.xlane.xlu0 %4407 }
0x1b27   : > { %v4409_v19 = vsub.f32 %v4402_v18, %v4408_v34 }
0x1b29   : > { %v4410_v23 = vmul.f32 1.442695, %v4409_v19 }
0x1b2a   : > { %v4418_v35 = vpop.permute.xlu0 %4417 }
0x1b2b   : > { %14532 = vpow2.f32 %v4410_v23  ;;  %13605 = vmatpush3.msra.mxu0 %v4418_v35 }
0x1b2c   : > { %13609 = vmatprep.subr.mxu0 %v14973_v0 }
0x1b2e   : > { %v4734_v48 = vpop.permute.xlu0 %4733 }
0x1b35   : > { %v14533_v36 = vpop.eup %14532 }
0x1b36   : > { %v4412_v37 = vsel %vm2734_vm2, %v14533_v36, 0.0 }
0x1b37   : > { %4413 = vadd.xlane.f32.xlu1 %v4412_v37 }
0x1b48   : > { %4735 = vrot.lane.b32.xlu1 %v15711_v47, %s14976_s6 }
0x1b6c   : > { %4647 = vmax.xlane.f32.xlu1 %v4646_v44 }
0x1b7d   : > { %4822 = vrot.lane.b32.xlu1 %v15711_v47, %s14978_s18 }
0x1bc4   : > { %v4414_v38 = vpop.xlane.xlu1 %4413 }
0x1bc5   : > { %14534 = vrcp.f32 %v4414_v38 }
0x1bc8   : > { %v4736_v45 = vpop.permute.xlu1 %4735 }
0x1bcf   : > { %v14535_v39 = vpop.eup %14534 }
0x1bd0   : > { %v4416_v42 = vmul.f32 %v14535_v39, %v14533_v36 }
0x1bd2   : > { %13607 = vmatmul.mubr.msk.f32.vlgmr.msra.gmra.mrb[42].mxu0 %vm1456_vm11, %v4416_v42 }
0x1bd3   : > { %13610 = vmatpush3.msra.mxu0 %v15817_v11  ;;  %13611 = vmatprep.mubr.msk.f32.mxu0 %vm14974_vm0, %v14973_v0 }
0x1bd4   : > { %13624 = vmatprep.subr.mxu0 %v14973_v0 }
0x1bf9   : > { %v4648_v49 = vpop.xlane.xlu1 %4647 }
0x1bfa   : > { %v4649_v50 = vsub.f32 %v4642_v30, %v4648_v49 }
0x1bfc   : > { %v4650_v51 = vmul.f32 1.442695, %v4649_v50 }
0x1bfd   : > { %v4823_v7 = vpop.permute.xlu1 %4822 }
0x1bfe   : > { %14536 = vpow2.f32 %v4650_v51 }
0x1c08   : > { %v14537_v56 = vpop.eup %14536 }
0x1ca5   : > { %v4489_v43 = vpop.f32.mrb[42].mxu0 }
0x1ca6   : > { %v13608_v46 = vpop.f32.mrb[43].mxu0  ;;  %13612 = vmatmul.mubr.msk.f32.vlgmr.msra.gmra.mrb[40].mxu0 %vm1456_vm11, %v4489_v43 }
0x1ca7   : > { %13625 = vmatpush3.xpose.msk.msra.mxu0 %vm1456_vm11, %v4736_v45  ;;  %13626 = vmatprep.mubr.msk.f32.mxu0 %vm14974_vm0, %v14973_v0 }
0x1ca8   : > { %13634 = vmatprep.subr.mxu0 %v14973_v0 }
0x1caa   : > { %13627 = vmatmul.mubr.msk.f32.vlgmr.msra.gmra.mrb[44].mxu0 %vm1456_vm11, %v4734_v48 }
0x1cab   : > { %13635 = vmatpush3.msra.mxu0 %v15746_v26  ;;  %13636 = vmatprep.mubr.msk.f32.mxu0 %vm14974_vm0, %v14973_v0  ;;  %v4652_v26 = vsel %vm2734_vm2, %v14537_v56, 0.0 }
0x1cac   : > { %13639 = vmatprep.subr.mxu0 %v14973_v0 }
0x1d79   : > { %v15922_v52 = vpop.f32.mrb[40].mxu0 }
0x1d7a   : > { %v13613_v31 = vpop.f32.mrb[41].mxu0 }
0x1d7b   : > { %v5523_v31 = vrot.slane %v15922_v52, 2 }
0x1d7d   : > { %v4807_v54 = vpop.f32.mrb[44].mxu0 }
0x1d7e   : > { %v13628_v55 = vpop.f32.mrb[45].mxu0  ;;  %v4811_v16 = vsel %vm2734_vm2, %v4807_v54, -inf }
0x1d7f   : > { %4812 = vmax.xlane.f32.xlu0 %v4811_v16  ;;  %v15985_v55 = vld [vmem:[#allocation12] ss:$0 sm:$0xff] }
0x1d83   : > { %4653 = vadd.xlane.f32.xlu0 %v4652_v26 }
0x1d99   : > { %4657 = vrot.lane.b32.xlu0 %v15711_v47, %s14977_s0 }
0x1d9d   : > { %5044 = vrot.lane.b32.xlu0 %v15696_v40, %s17141_s11 }
0x1e0c   : > { %v4813_v57 = vpop.xlane.xlu0 %4812 }
0x1e0d   : > { %v4814_v58 = vsub.f32 %v4807_v54, %v4813_v57  ;;  %v5528_v54 = vsel %vm1549_vm13, %v15834_v9, %v5523_v31 }
0x1e0e   : > { %v5537_v16 = vadd.f32 %v15985_v55, %v5528_v54 }
0x1e0f   : > { %v4815_v59 = vmul.f32 1.442695, %v4814_v58 }
0x1e10   : > { %v4654_v60 = vpop.xlane.xlu0 %4653  ;;  %v5540_v26 = vadd.f32 %v5537_v16, %v15642_v21  ;;  %v5597_v21 = vld [vmem:[%s17187_s20] sm:$0xff]  ;;  %v5714_v16 = vld [vmem:[%s17188_s15 + $0x70] sm:$0xff] }
0x1e11   : > { %14538 = vpow2.f32 %v4815_v59 }
0x1e12   : > { %14540 = vrcp.f32 %v4654_v60  ;;  %v5543_v57 = vsel %vm1021_vm10, %v5540_v26, 0.0 }
0x1e14   : > { %v4658_v61 = vpop.permute.xlu0 %4657 }
0x1e15   : > { %13620 = vmatpush3.msra.mxu1 %v4658_v61 }
0x1e16   : > { %13629 = vmatprep.subr.mxu1 %v14973_v0 }
0x1e18   : > { %v5045_v14 = vpop.permute.xlu0 %5044 }
0x1e1b   : > { %v14539_v62 = vpop.eup %14538 }
0x1e1c   : > { %v14541_v5 = vpop.eup %14540  ;;  %v4817_v6 = vsel %vm2734_vm2, %v14539_v62, 0.0 }
0x1e1d   : > { %4818 = vadd.xlane.f32.xlu1 %v4817_v6  ;;  %v4656_v41 = vmul.f32 %v14541_v5, %v14537_v56 }
0x1e1f   : > { %13622 = vmatmul.mubr.msk.f32.vlgmr.msra.gmra.mrb[42].mxu1 %vm1456_vm11, %v4656_v41  ;;  %v5598_v41 = vld [vmem:[%s17187_s20 + $0x8] sm:$0xff] }
0x1e20   : > { %13630 = vmatpush3.msra.mxu1 %v4823_v7  ;;  %13631 = vmatprep.mubr.msk.f32.mxu1 %vm14974_vm0, %v14973_v0  ;;  %v14238_v7 = vpack.c.bf16 %v5598_v41, %v5597_v21 }
0x1e21   : > { %13644 = vmatprep.subr.mxu1 %v14973_v0 }
0x1e2e   : > { %5046 = vrot.lane.b32.xlu1 %v15711_v47, %s17141_s11 }
0x1eaa   : > { %v4819_v8 = vpop.xlane.xlu1 %4818 }
0x1eab   : > { %14542 = vrcp.f32 %v4819_v8  ;;  %v5599_v8 = vld [vmem:[%s17187_s20 + $0x10] sm:$0xff] }
0x1eae   : > { %v5047_v53 = vpop.permute.xlu1 %5046 }
0x1eb5   : > { %v14543_v10 = vpop.eup %14542 }
0x1eb6   : > { %v4821_v13 = vmul.f32 %v14543_v10, %v14539_v62 }
0x1eb8   : > { %13632 = vmatmul.mubr.msk.f32.vlgmr.msra.gmra.mrb[44].mxu1 %vm1456_vm11, %v4821_v13 }
0x1eb9   : > { %13645 = vmatpush3.xpose.msk.msra.mxu1 %vm1456_vm11, %v5047_v53  ;;  %13646 = vmatprep.mubr.msk.f32.mxu1 %vm14974_vm0, %v14973_v0 }
0x1eba   : > { %13649 = vmatprep.subr.mxu1 %v14973_v0 }
0x1ebc   : > { %13647 = vmatmul.mubr.msk.f32.vlgmr.msra.gmra.mrb[46].mxu1 %vm1456_vm11, %v5045_v14 }
0x1ebd   : > { %13651 = vmatprep.mubr.msk.f32.mxu1 %vm14974_vm0, %v14973_v0 }
0x1ef2   : > { %v4729_v15 = vpop.f32.mrb[42].mxu1 }
0x1ef3   : > { %v13623_v17 = vpop.f32.mrb[43].mxu1 }
0x1f8b   : > { %v4894_v18 = vpop.f32.mrb[44].mxu1 }
0x1f8c   : > { %v13633_v20 = vpop.f32.mrb[45].mxu1  ;;  %13637 = vmatmul.mubr.msk.f32.vlgmr.msra.gmra.mrb[46].mxu0 %vm1456_vm11, %v4894_v18 }
0x1f8d   : > { %13640 = vmatpush3.msra.mxu0 %v15753_v12  ;;  %13641 = vmatprep.mubr.msk.f32.mxu0 %vm14974_vm0, %v14973_v0 }
0x1f8e   : > { %13654 = vmatprep.subr.mxu0 %v14973_v0 }
0x1f8f   : > { %v5118_v24 = vpop.f32.mrb[46].mxu1 }
0x1f90   : > { %v13648_v30 = vpop.f32.mrb[47].mxu1  ;;  %v5122_v32 = vsel %vm2734_vm2, %v5118_v24, -inf }
0x1f91   : > { %5123 = vmax.xlane.f32.xlu1 %v5122_v32 }
0x1f94   : > { %13642 = vmatmul.mubr.msk.f32.vlgmr.msra.gmra.mrb[46].mxu0 %vm1456_vm11, %v4729_v15  ;;  %v16012_v15 = vsub.s32 1, %v15610_v63 }
0x1f95   : > { %13655 = vmatpush3.msra.mxu0 %v15795_v33  ;;  %13656 = vmatprep.mubr.msk.f32.mxu0 %vm14974_vm0, %v14973_v0 }
0x1f96   : > { %13664 = vmatprep.subr.mxu0 %v14973_v0  ;;  %v16016_v17 = vrot.slane %v15618_v3, %v16012_v15  ;;  %v5700_v3 = vld [vmem:[%s17188_s15] sm:$0xff] }
0x1fa2   : > { %5285 = vrot.lane.b32.xlu1 %v15711_v47, %s17139_s30 }
0x1fa6   : > { %5283 = vrot.lane.b32.xlu1 %v15696_v40, %s17139_s30  ;;  %s17189_s30 = smov 104  }
0x201e   : > { %v5124_v12 = vpop.xlane.xlu1 %5123 }
0x201f   : > { %v5125_v34 = vsub.f32 %v5118_v24, %v5124_v12  ;;  %v16020_v24 = vrot.slane %v15623_v4, %v16012_v15  ;;  %v5701_v4 = vld [vmem:[%s17188_s15 + $0x8] sm:$0xff] }
0x2020   : > { %v14244_v12 = vpack.c.bf16 %v5701_v4, %v5700_v3 }
0x2021   : > { %v5126_v19 = vmul.f32 1.442695, %v5125_v34  ;;  %v5702_v34 = vld [vmem:[%s17188_s15 + $0x10] sm:$0xff] }
0x2022   : > { %v5286_v44 = vpop.permute.xlu1 %5285 }
0x2023   : > { %14544 = vpow2.f32 %v5126_v19  ;;  %v5703_v19 = vld [vmem:[%s17188_s15 + $0x18] sm:$0xff] }
0x2026   : > { %v5284_v38 = vpop.permute.xlu1 %5283 }
0x202d   : > { %v14545_v23 = vpop.eup %14544 }
0x202e   : > { %v5128_v35 = vsel %vm2734_vm2, %v14545_v23, 0.0 }
0x202f   : > { %5129 = vadd.xlane.f32.xlu0 %v5128_v35 }
0x2045   : > { %5133 = vrot.lane.b32.xlu0 %v15711_v47, %s17145_s25 }
0x20bc   : > { %v5130_v33 = vpop.xlane.xlu0 %5129 }
0x20bd   : > { %14546 = vrcp.f32 %v5130_v33  ;;  %v14247_v33 = vpack.c.bf16 %v5703_v19, %v5702_v34 }
0x20c0   : > { %v5134_v36 = vpop.permute.xlu0 %5133 }
0x20c1   : > { %13650 = vmatpush3.msra.mxu1 %v5134_v36  ;;  %v5704_v36 = vld [vmem:[%s17188_s15 + $0x20] sm:$0xff] }
0x20c2   : > { %13659 = vmatprep.subr.mxu1 %v14973_v0 }
0x20c7   : > { %v14547_v37 = vpop.eup %14546 }
0x20c8   : > { %v5132_v40 = vmul.f32 %v14547_v37, %v14545_v23  ;;  %v5705_v37 = vld [vmem:[%s17188_s15 + $0x28] sm:$0xff] }
0x20ca   : > { %13652 = vmatmul.mubr.msk.f32.vlgmr.msra.gmra.mrb[48].mxu1 %vm1456_vm11, %v5132_v40  ;;  %v5706_v40 = vld [vmem:[%s17188_s15 + $0x30] sm:$0xff] }
0x20cb   : > { %13660 = vmatpush3.xpose.msk.msra.mxu1 %vm1456_vm11, %v5286_v44  ;;  %13661 = vmatprep.mubr.msk.f32.mxu1 %vm14974_vm0, %v14973_v0  ;;  %v14250_v44 = vpack.c.bf16 %v5705_v37, %v5704_v36 }
0x20cc   : > { %14237 = vmatprep.subr.bf16.mxu1 %v14975_v1 }
0x20ce   : > { %13662 = vmatmul.mubr.msk.f32.vlgmr.msra.gmra.mrb[50].mxu1 %vm1456_vm11, %v5284_v38  ;;  %v5707_v38 = vld [vmem:[%s17188_s15 + $0x38] sm:$0xff] }
0x20cf   : > { %13682 = vmatprep.mubr.msk.f32.mxu1 %vm14974_vm0, %v14973_v0  ;;  %14239 = vmatpush3.bf16.msra.mxu1 %v14238_v7 }
0x20d0   : > { %14240 = vmatprep.subr.bf16.mxu1 %v14975_v1 }
0x219d   : > { %v5205_v39 = vpop.f32.mrb[48].mxu1 }
0x219e   : > { %v13653_v42 = vpop.f32.mrb[49].mxu1  ;;  %13657 = vmatmul.mubr.msk.f32.vlgmr.msra.gmra.mrb[46].mxu0 %vm1456_vm11, %v5205_v39  ;;  %v14253_v39 = vpack.c.bf16 %v5707_v38, %v5706_v40 }
0x219f   : > { %13666 = vmatprep.mubr.msk.f32.mxu0 %vm14974_vm0, %v14973_v0  ;;  %v5708_v42 = vld [vmem:[%s17188_s15 + $0x40] sm:$0xff] }
0x21a1   : > { %v5357_v43 = vpop.f32.mrb[50].mxu1 }
0x21a2   : > { %v13663_v45 = vpop.f32.mrb[51].mxu1  ;;  %v5361_v46 = vsel %vm2734_vm2, %v5357_v43, -inf }
0x21a3   : > { %5362 = vmax.xlane.f32.xlu0 %v5361_v46  ;;  %v5710_v46 = vld [vmem:[%s17188_s15 + $0x50] sm:$0xff] }
0x21b9   : > { %5372 = vrot.lane.b32.xlu0 %v15711_v47, %s17143_s29 }
0x2230   : > { %v5363_v48 = vpop.xlane.xlu0 %5362 }
0x2231   : > { %v5364_v49 = vsub.f32 %v5357_v43, %v5363_v48  ;;  %v5709_v43 = vld [vmem:[%s17188_s15 + $0x48] sm:$0xff]  ;;  %v5711_v48 = vld [vmem:[%s17188_s15 + $0x58] sm:$0xff] }
0x2232   : > { %v14256_v45 = vpack.c.bf16 %v5709_v43, %v5708_v42 }
0x2233   : > { %v5365_v50 = vmul.f32 1.442695, %v5364_v49  ;;  %v14259_v49 = vpack.c.bf16 %v5711_v48, %v5710_v46 }
0x2234   : > { %v5373_v51 = vpop.permute.xlu0 %5372 }
0x2235   : > { %14548 = vpow2.f32 %v5365_v50  ;;  %13665 = vmatpush3.msra.mxu0 %v5373_v51  ;;  %v5712_v50 = vld [vmem:[%s17188_s15 + $0x60] sm:$0xff]  ;;  %v5713_v51 = vld [vmem:[%s17188_s15 + $0x68] sm:$0xff] }
0x2236   : > { %13669 = vmatprep.subr.mxu0 %v14973_v0  ;;  %v14262_v54 = vpack.c.bf16 %v5713_v51, %v5712_v50 }
0x223f   : > { %v14549_v47 = vpop.eup %14548 }
0x2240   : > { %v5367_v56 = vsel %vm2734_vm2, %v14549_v47, 0.0 }
0x2241   : > { %5368 = vadd.xlane.f32.xlu1 %v5367_v56 }
0x2245   : > { %5544 = vadd.xlane.f32.xlu1 %v5543_v57 }
0x22ce   : > { %v5369_v58 = vpop.xlane.xlu1 %5368 }
0x22cf   : > { %14550 = vrcp.f32 %v5369_v58 }
0x22d2   : > { %v5545_v59 = vpop.xlane.xlu1 %5544 }
0x22d3   : > { %v5553_v60 = vmul.f32 0.03125, %v5545_v59 }
0x22d5   : > { %v5556_v61 = vsub.f32 %v5540_v26, %v5553_v60  ;;  %v16089_v26 = vld [vmem:[#allocation13] ss:$0 sm:$0xff] }
0x22d7   : > { %v5559_v62 = vmul.f32 %v5556_v61, %v5556_v61 }
0x22d9   : > { %v14551_v9 = vpop.eup %14550  ;;  %v5562_v5 = vsel %vm1021_vm10, %v5559_v62, 0.0 }
0x22da   : > { %5563 = vadd.xlane.f32.xlu1 %v5562_v5  ;;  %v5371_v6 = vmul.f32 %v14551_v9, %v14549_v47  ;;  %v5715_v47 = vld [vmem:[%s17188_s15 + $0x78] sm:$0xff] }
0x22db   : > { %v14265_v56 = vpack.c.bf16 %v5715_v47, %v5714_v16  ;;  %v12826_v16 = vld [vmem:[%s17185_s3 + $0x28] sm:$0xff] }
0x22dc   : > { %13667 = vmatmul.mubr.msk.f32.vlgmr.msra.gmra.mrb[48].mxu0 %vm1456_vm11, %v5371_v6 }
0x22dd   : > { %13670 = vmatpush3.msra.mxu0 %v15817_v11  ;;  %13671 = vmatprep.mubr.msk.f32.mxu0 %vm14974_vm0, %v14973_v0  ;;  %v5600_v11 = vld [vmem:[%s17187_s20 + $0x18] sm:$0xff] }
0x22de   : > { %14243 = vmatprep.subr.bf16.mxu0 %v14975_v1  ;;  %v14241_v10 = vpack.c.bf16 %v5600_v11, %v5599_v8 }
0x22e0   : > { %14242 = vmatpush3.bf16.msra.mxu1 %v14241_v10 }
0x22e1   : > { %14267 = vmatprep.subr.bf16.mxu1 %v14975_v1 }
0x2367   : > { %v5564_v13 = vpop.xlane.xlu1 %5563 }
0x2368   : > { %v5571_v53 = vmul.f32 0.03125, %v5564_v13 }
0x236a   : > { %v5574_v14 = vadd.f32 1e-05, %v5571_v53 }
0x236c   : > { %14552 = vrsqrt.f32 %v5574_v14 }
0x2376   : > { %v14553_v18 = vpop.eup %14552 }
0x2377   : > { %v5580_v20 = vmul.f32 %v14553_v18, %v5556_v61 }
0x2379   : > { %v5587_v30 = vmul.f32 %v16016_v17, %v5580_v20 }
0x237b   : > { %v16024_v32 = vadd.f32 %v16020_v24, %v5587_v30 }
0x237d   : > { %13683 = vmatmul.mubr.msk.f32.vlgmr.msra.gmra.mrb[52].mxu1 %vm1021_vm10, %v16024_v32 }
0x237e   : > { %13685 = vmatprep.mubr.msk.f32.mxu1 %vm14974_vm0, %v14973_v0 }
0x23af   : > { %v5444_v23 = vpop.f32.mrb[48].mxu0 }
0x23b0   : > { %v13668_v35 = vpop.f32.mrb[49].mxu0  ;;  %13672 = vmatmul.mubr.msk.f32.vlgmr.msra.gmra.mrb[46].mxu0 %vm1456_vm11, %v5444_v23 }
0x23b1   : > { %14245 = vmatpush3.bf16.msra.mxu0 %v14244_v12  ;;  %13723 = vmatprep.mubr.msk.f32.mxu0 %vm14974_vm0, %v14973_v0 }
0x23b2   : > { %14246 = vmatprep.subr.bf16.mxu0 %v14975_v1 }
0x23b5   : > { %14248 = vmatpush3.bf16.msra.mxu0 %v14247_v33 }
0x23b6   : > { %14249 = vmatprep.subr.bf16.mxu0 %v14975_v1 }
0x23b9   : > { %14251 = vmatpush3.bf16.msra.mxu0 %v14250_v44 }
0x23ba   : > { %14252 = vmatprep.subr.bf16.mxu0 %v14975_v1 }
0x23bd   : > { %14254 = vmatpush3.bf16.msra.mxu0 %v14253_v39 }
0x23be   : > { %14255 = vmatprep.subr.bf16.mxu0 %v14975_v1 }
0x23c1   : > { %14257 = vmatpush3.bf16.msra.mxu0 %v14256_v45 }
0x23c2   : > { %14258 = vmatprep.subr.bf16.mxu0 %v14975_v1 }
0x23c5   : > { %14260 = vmatpush3.bf16.msra.mxu0 %v14259_v49 }
0x23c6   : > { %14261 = vmatprep.subr.bf16.mxu0 %v14975_v1 }
0x23c9   : > { %14263 = vmatpush3.bf16.msra.mxu0 %v14262_v54  ;;  %v12825_v54 = vld [vmem:[%s17185_s3 + $0x20] sm:$0xff] }
0x23ca   : > { %14264 = vmatprep.subr.bf16.mxu0 %v14975_v1  ;;  %v14268_v47 = vpack.c.bf16 %v12826_v16, %v12825_v54 }
0x23cc   : > { %14269 = vmatpush3.bf16.msra.mxu1 %v14268_v47 }
0x23cd   : > { %14266 = vmatpush3.bf16.msra.mxu0 %v14265_v56  ;;  %14270 = vmatprep.subr.bf16.mxu1 %v14975_v1 }
0x23ce   : > { %13779 = vmatprep.subr.mxu0 %v14973_v0 }
0x2450   : > { %v5683_v57 = vpop.f32.mrb[52].mxu1 }
0x2451   : > { %v5684_v58 = vadd.f32 %v16089_v26, %v5683_v57  ;;  %v13684_v59 = vpop.f32.mrb[53].mxu1 }
0x2453   : > { %v5697_v60 = vmax.f32 %v5684_v58, 0.0 }
0x2455   : > { %13724 = vmatmul.mubr.f32.vlgmr.msra.gmra.mrb[50].mxu0 %v5697_v60  ;;  %v16136_v60 = vsub.s32 2, %v15610_v63 }
0x2456   : > { %13726 = vmatprep.mubr.msk.f32.mxu0 %vm14974_vm0, %v14973_v0 }
0x2483   : > { %v5517_v61 = vpop.f32.mrb[46].mxu0 }
0x2484   : > { %v5526_v62 = vrot.slane %v5517_v61, 4  ;;  %v13673_v9 = vpop.f32.mrb[47].mxu0  ;;  %v14678_v61 = vld [vmem:[%s17118_s22] sm:$0x7] }
0x2486   : > { %v5529_v5 = vsel %vm914_vm1, %v5523_v31, %v5526_v62  ;;  %v5539_v6 = vadd.f32 %v15985_v55, %v5526_v62  ;;  %v16142_v62 = vrot.slane %v14678_v61, %v16136_v60 }
0x2487   : > { %v5538_v21 = vadd.f32 %v15985_v55, %v5529_v5  ;;  %v14679_v5 = vld [vmem:[%s17119_s23] sm:$0x7] }
0x2488   : > { %v5542_v8 = vadd.f32 %v5539_v6, %v15644_v22  ;;  %v16105_v22 = vld [vmem:[#allocation15] ss:$0 sm:$0xff]  ;;  %v16148_v6 = vrot.slane %v14679_v5, %v16136_v60 }
0x2489   : > { %v5541_v41 = vadd.f32 %v5538_v21, %v15653_v25 }
0x248a   : > { %v5550_v11 = vsel %vm5549_vm4, %v5542_v8, 0.0 }
0x248b   : > { %v5546_v7 = vsel %vm1021_vm10, %v5541_v41, 0.0 }
0x248c   : > { %5547 = vadd.xlane.f32.xlu1 %v5546_v7 }
0x2490   : > { %5551 = vadd.xlane.f32.xlu1 %v5550_v11 }
0x2519   : > { %v5548_v10 = vpop.xlane.xlu1 %5547 }
0x251a   : > { %v5554_v13 = vmul.f32 0.03125, %v5548_v10 }
0x251c   : > { %v5557_v52 = vsub.f32 %v5541_v41, %v5554_v13 }
0x251d   : > { %v5552_v53 = vpop.xlane.xlu1 %5551 }
0x251e   : > { %v5555_v31 = vmul.f32 0.03125, %v5552_v53  ;;  %v5560_v14 = vmul.f32 %v5557_v52, %v5557_v52 }
0x2520   : > { %v5558_v18 = vsub.f32 %v5542_v8, %v5555_v31  ;;  %v5565_v55 = vsel %vm1021_vm10, %v5560_v14, 0.0 }
0x2521   : > { %5566 = vadd.xlane.f32.xlu1 %v5565_v55 }
0x2522   : > { %v5561_v25 = vmul.f32 %v5558_v18, %v5558_v18 }
0x2524   : > { %v5568_v20 = vsel %vm5549_vm4, %v5561_v25, 0.0 }
0x2525   : > { %5569 = vadd.xlane.f32.xlu0 %v5568_v20 }
0x2528   : > { %v5789_v30 = vpop.f32.mrb[50].mxu0 }
0x2529   : > { %v5790_v3 = vadd.f32 %v16105_v22, %v5789_v30  ;;  %v13725_v4 = vpop.f32.mrb[51].mxu0 }
0x252b   : > { %v5803_v12 = vadd.f32 %v5790_v3, %v16024_v32 }
0x252d   : > { %v5806_v34 = vsel %vm1021_vm10, %v5803_v12, 0.0 }
0x252e   : > { %5807 = vadd.xlane.f32.xlu1 %v5806_v34 }
0x25ae   : > { %v5567_v19 = vpop.xlane.xlu1 %5566 }
0x25af   : > { %v5572_v23 = vmul.f32 0.03125, %v5567_v19 }
0x25b1   : > { %v5575_v35 = vadd.f32 1e-05, %v5572_v23 }
0x25b2   : > { %v5570_v33 = vpop.xlane.xlu0 %5569 }
0x25b3   : > { %14554 = vrsqrt.f32 %v5575_v35  ;;  %v5573_v36 = vmul.f32 0.03125, %v5570_v33 }
0x25b5   : > { %v5576_v37 = vadd.f32 1e-05, %v5573_v36 }
0x25b7   : > { %14556 = vrsqrt.f32 %v5576_v37 }
0x25bb   : > { %v5808_v44 = vpop.xlane.xlu1 %5807 }
0x25bc   : > { %v5815_v40 = vmul.f32 0.03125, %v5808_v44 }
0x25bd   : > { %v14555_v38 = vpop.eup %14554 }
0x25be   : > { %v5818_v39 = vsub.f32 %v5803_v12, %v5815_v40  ;;  %v5581_v42 = vmul.f32 %v14555_v38, %v5557_v52 }
0x25c0   : > { %v5821_v43 = vmul.f32 %v5818_v39, %v5818_v39  ;;  %v5588_v45 = vmul.f32 %v16016_v17, %v5581_v42 }
0x25c1   : > { %v14557_v32 = vpop.eup %14556 }
0x25c2   : > { %v5824_v46 = vsel %vm1021_vm10, %v5821_v43, 0.0  ;;  %v5595_v48 = vadd.f32 %v16020_v24, %v5588_v45  ;;  %v5582_v49 = vmul.f32 %v14557_v32, %v5558_v18  ;;  %v16164_v18 = vld [vmem:[#allocation6 + $0x1] ss:$0 sm:$0xff] }
0x25c3   : > { %5825 = vadd.xlane.f32.xlu1 %v5824_v46 }
0x25c4   : > { %13686 = vmatmul.mubr.msk.f32.gmra.mrb[54].mxu1 %vm1021_vm10, %v5595_v48  ;;  %v5589_v50 = vmul.f32 %v16016_v17, %v5582_v49  ;;  %v12827_v17 = vld [vmem:[%s17185_s3 + $0x30] sm:$0xff] }
0x25c5   : > { %13688 = vmatprep.mubr.msk.f32.mxu1 %vm14974_vm0, %v14973_v0 }
0x25c6   : > { %v5596_v51 = vadd.f32 %v16020_v24, %v5589_v50  ;;  %v12828_v24 = vld [vmem:[%s17185_s3 + $0x38] sm:$0xff] }
0x25c7   : > { %v14271_v56 = vpack.c.bf16 %v12828_v24, %v12827_v17 }
0x25c8   : > { %13689 = vmatmul.mubr.msk.f32.gmra.mrb[56].mxu1 %vm1021_vm10, %v5596_v51 }
0x25c9   : > { %13740 = vmatprep.mubr.msk.f32.mxu1 %vm14974_vm0, %v14973_v0  ;;  %14272 = vmatpush3.bf16.msra.mxu1 %v14271_v56 }
0x25ca   : > { %13749 = vmatprep.subr.mxu1 %v14973_v0 }
0x2650   : > { %v5826_v57 = vpop.xlane.xlu1 %5825 }
0x2651   : > { %v5833_v58 = vmul.f32 0.03125, %v5826_v57 }
0x2653   : > { %v5836_v59 = vadd.f32 1e-05, %v5833_v58 }
0x2655   : > { %14558 = vrsqrt.f32 %v5836_v59 }
0x265f   : > { %v14559_v9 = vpop.eup %14558 }
0x2660   : > { %v5842_v21 = vmul.f32 %v14559_v9, %v5818_v39 }
0x2662   : > { %v5849_v41 = vmul.f32 %v16142_v62, %v5842_v21 }
0x2664   : > { %v16152_v7 = vadd.f32 %v16148_v6, %v5849_v41 }
0x2666   : > { %13741 = vmatmul.mubr.msk.f32.vlgmr.msra.gmra.mrb[58].mxu1 %vm1021_vm10, %v16152_v7 }
0x2667   : > { %13743 = vmatprep.mubr.msk.f32.mxu1 %vm14974_vm0, %v14973_v0 }
0x2697   : > { %v5688_v8 = vpop.f32.mrb[54].mxu1 }
0x2698   : > { %v5689_v11 = vadd.f32 %v16089_v26, %v5688_v8  ;;  %v13687_v10 = vpop.f32.mrb[55].mxu1 }
0x269a   : > { %v5698_v13 = vmax.f32 %v5689_v11, 0.0 }
0x269b   : > { %v5693_v52 = vpop.f32.mrb[56].mxu1 }
0x269c   : > { %v5694_v53 = vadd.f32 %v16089_v26, %v5693_v52  ;;  %v13690_v31 = vpop.f32.mrb[57].mxu1  ;;  %13727 = vmatmul.mubr.f32.gmra.mrb[52].mxu0 %v5698_v13 }
0x269d   : > { %13729 = vmatprep.mubr.msk.f32.mxu0 %vm14974_vm0, %v14973_v0 }
0x269e   : > { %v5699_v14 = vmax.f32 %v5694_v53, 0.0 }
0x26a0   : > { %13730 = vmatmul.mubr.f32.gmra.mrb[54].mxu0 %v5699_v14 }
0x26a1   : > { %13781 = vmatprep.mubr.msk.f32.mxu0 %vm14974_vm0, %v14973_v0 }
0x2739   : > { %v5951_v55 = vpop.f32.mrb[58].mxu1 }
0x273a   : > { %v16167_v25 = vadd.f32 %v16164_v18, %v5951_v55  ;;  %v13742_v20 = vpop.f32.mrb[59].mxu1 }
0x273c   : > { %6449 = vrot.lane.b32.xlu0 %v16167_v25, %s17145_s25 }
0x276f   : > { %v5794_v26 = vpop.f32.mrb[52].mxu0 }
0x2770   : > { %v5795_v30 = vadd.f32 %v16105_v22, %v5794_v26  ;;  %v13728_v3 = vpop.f32.mrb[53].mxu0 }
0x2772   : > { %v5804_v4 = vadd.f32 %v5795_v30, %v5595_v48 }
0x2773   : > { %v5799_v12 = vpop.f32.mrb[54].mxu0 }
0x2774   : > { %v5800_v34 = vadd.f32 %v16105_v22, %v5799_v12  ;;  %v13731_v19 = vpop.f32.mrb[55].mxu0  ;;  %v5809_v23 = vsel %vm1021_vm10, %v5804_v4, 0.0 }
0x2775   : > { %5810 = vadd.xlane.f32.xlu1 %v5809_v23 }
0x2776   : > { %v5805_v35 = vadd.f32 %v5800_v34, %v5596_v51 }
0x2778   : > { %v5812_v33 = vsel %vm5549_vm4, %v5805_v35, 0.0 }
0x2779   : > { %5813 = vadd.xlane.f32.xlu1 %v5812_v33 }
0x27ae   : > { %v6450_v36 = vpop.permute.xlu0 %6449 }
0x27af   : > { %13780 = vmatpush3.xpose.msk.msra.mxu0 %vm1456_vm11, %v6450_v36 }
0x27b0   : > { %13784 = vmatprep.subr.mxu0 %v14973_v0 }
0x2802   : > { %v5811_v37 = vpop.xlane.xlu1 %5810 }
0x2803   : > { %v5816_v44 = vmul.f32 0.03125, %v5811_v37 }
0x2805   : > { %v5819_v40 = vsub.f32 %v5804_v4, %v5816_v44 }
0x2806   : > { %v5814_v38 = vpop.xlane.xlu1 %5813 }
0x2807   : > { %v5817_v39 = vmul.f32 0.03125, %v5814_v38  ;;  %v5822_v42 = vmul.f32 %v5819_v40, %v5819_v40 }
0x2809   : > { %v5820_v22 = vsub.f32 %v5805_v35, %v5817_v39  ;;  %v5827_v43 = vsel %vm1021_vm10, %v5822_v42, 0.0 }
0x280a   : > { %5828 = vadd.xlane.f32.xlu1 %v5827_v43 }
0x280b   : > { %v5823_v45 = vmul.f32 %v5820_v22, %v5820_v22 }
0x280d   : > { %v5830_v32 = vsel %vm5549_vm4, %v5823_v45, 0.0 }
0x280e   : > { %5831 = vadd.xlane.f32.xlu1 %v5830_v32 }
0x281f   : > { %5971 = vrot.lane.b32.xlu1 %v16167_v25, %s14977_s0 }
0x2823   : > { %6447 = vrot.lane.b32.xlu1 %v16167_v25, %s17141_s11 }
0x2897   : > { %v5829_v46 = vpop.xlane.xlu1 %5828 }
0x2898   : > { %v5834_v48 = vmul.f32 0.03125, %v5829_v46 }
0x289a   : > { %v5837_v49 = vadd.f32 1e-05, %v5834_v48 }
0x289b   : > { %v5832_v50 = vpop.xlane.xlu1 %5831 }
0x289c   : > { %14560 = vrsqrt.f32 %v5837_v49  ;;  %v5835_v51 = vmul.f32 0.03125, %v5832_v50 }
0x289e   : > { %v5838_v54 = vadd.f32 1e-05, %v5835_v51 }
0x289f   : > { %v5972_v16 = vpop.permute.xlu1 %5971 }
0x28a0   : > { %14562 = vrsqrt.f32 %v5838_v54  ;;  %13750 = vmatpush3.xpose.msk.msra.mxu1 %vm1456_vm11, %v5972_v16  ;;  %v6928_v16 = vrot.slane %v16167_v25, 6 }
0x28a1   : > { %13754 = vmatprep.subr.mxu1 %v14973_v0 }
0x28a3   : > { %v6448_v47 = vpop.permute.xlu1 %6447 }
0x28a4   : > { %13782 = vmatmul.mubr.msk.f32.vlgmr.msra.gmra.mrb[56].mxu0 %vm1456_vm11, %v6448_v47 }
0x28a5   : > { %13786 = vmatprep.mubr.msk.f32.mxu0 %vm14974_vm0, %v14973_v0 }
0x28a6   : > { %v14561_v17 = vpop.eup %14560 }
0x28a7   : > { %v5843_v24 = vmul.f32 %v14561_v17, %v5819_v40 }
0x28a9   : > { %v5850_v56 = vmul.f32 %v16142_v62, %v5843_v24 }
0x28aa   : > { %v14563_v57 = vpop.eup %14562 }
0x28ab   : > { %v16190_v58 = vadd.f32 %v16148_v6, %v5850_v56  ;;  %v5844_v59 = vmul.f32 %v14563_v57, %v5820_v22 }
0x28ad   : > { %13744 = vmatmul.mubr.msk.f32.gmra.mrb[60].mxu1 %vm1021_vm10, %v16190_v58  ;;  %v5851_v61 = vmul.f32 %v16142_v62, %v5844_v59 }
0x28ae   : > { %13746 = vmatprep.mubr.msk.f32.mxu1 %vm14974_vm0, %v14973_v0 }
0x28af   : > { %v16198_v9 = vadd.f32 %v16148_v6, %v5851_v61 }
0x28b1   : > { %13747 = vmatmul.mubr.msk.f32.gmra.mrb[62].mxu1 %vm1021_vm10, %v16198_v9 }
0x28b2   : > { %13751 = vmatprep.mubr.msk.f32.mxu1 %vm14974_vm0, %v14973_v0 }
0x28b5   : > { %13752 = vmatmul.mubr.msk.f32.vlgmr.msra.gmra.mrb[64].mxu1 %vm1456_vm11, %v16167_v25 }
0x28b6   : > { %13756 = vmatprep.mubr.msk.f32.mxu1 %vm14974_vm0, %v14973_v0 }
0x2977   : > { %v6521_v5 = vpop.f32.mrb[56].mxu0 }
0x2978   : > { %v13783_v62 = vpop.f32.mrb[57].mxu0 }
0x2980   : > { %v5956_v21 = vpop.f32.mrb[60].mxu1 }
0x2981   : > { %v13745_v41 = vpop.f32.mrb[61].mxu1  ;;  %v16209_v8 = vadd.f32 %v16164_v18, %v5956_v21 }
0x2983   : > { %v7888_v13 = vrot.slane %v16209_v8, 4  ;;  %v6929_v54 = vrot.slane %v16209_v8, 6 }
0x2984   : > { %v5961_v6 = vpop.f32.mrb[62].mxu1 }
0x2985   : > { %v5962_v11 = vadd.f32 %v16164_v18, %v5961_v6  ;;  %v13748_v10 = vpop.f32.mrb[63].mxu1  ;;  %v6525_v18 = vsel %vm1531_vm12, %v6521_v5, -inf  ;;  %v16260_v47 = vsel %vm3612_vm3, %v6928_v16, %v6929_v54 }
0x2987   : > { %v7889_v52 = vrot.slane %v5962_v11, 4 }
0x2988   : > { %v6043_v53 = vpop.f32.mrb[64].mxu1 }
0x2989   : > { %v16214_v31 = vsel %vm914_vm1, %v7888_v13, %v7889_v52  ;;  %v13753_v14 = vpop.f32.mrb[65].mxu1  ;;  %v6047_v55 = vsel %vm1531_vm12, %v6043_v53, -inf }
0x298a   : > { %6048 = vmax.xlane.f32.xlu1 %v6047_v55 }
0x299b   : > { %6137 = vrot.lane.b32.xlu1 %v16167_v25, %s14978_s18 }
0x299f   : > { %6135 = vrot.lane.b32.xlu1 %v16167_v25, %s14976_s6 }
0x29c3   : > { %6526 = vmax.xlane.f32.xlu1 %v6525_v18 }
0x29d4   : > { %6689 = vrot.lane.b32.xlu1 %v16167_v25, %s17143_s29 }
0x29d8   : > { %6687 = vrot.lane.b32.xlu1 %v16167_v25, %s17189_s30 }
0x2a17   : > { %v6049_v20 = vpop.xlane.xlu1 %6048 }
0x2a18   : > { %v6050_v26 = vsub.f32 %v6043_v53, %v6049_v20 }
0x2a1a   : > { %v6051_v30 = vmul.f32 1.442695, %v6050_v26 }
0x2a1b   : > { %v6138_v12 = vpop.permute.xlu1 %6137 }
0x2a1c   : > { %14564 = vpow2.f32 %v6051_v30 }
0x2a1f   : > { %v6136_v34 = vpop.permute.xlu1 %6135 }
0x2a26   : > { %v14565_v3 = vpop.eup %14564 }
0x2a27   : > { %v6053_v4 = vsel %vm1531_vm12, %v14565_v3, 0.0 }
0x2a28   : > { %6054 = vadd.xlane.f32.xlu0 %v6053_v4 }
0x2a3e   : > { %6058 = vrot.lane.b32.xlu0 %v16167_v25, %s17190_s26 }
0x2a50   : > { %v6527_v19 = vpop.xlane.xlu1 %6526 }
0x2a51   : > { %v6528_v23 = vsub.f32 %v6521_v5, %v6527_v19  ;;  %v16305_v19 = vld [vmem:[%s17106_s10 + $0x20] sm:$0xff] }
0x2a53   : > { %v6529_v35 = vmul.f32 1.442695, %v6528_v23 }
0x2a54   : > { %v6690_v43 = vpop.permute.xlu1 %6689 }
0x2a55   : > { %14566 = vpow2.f32 %v6529_v35 }
0x2a58   : > { %v6688_v32 = vpop.permute.xlu1 %6687 }
0x2a5f   : > { %v14567_v33 = vpop.eup %14566 }
0x2a60   : > { %v6531_v36 = vsel %vm1531_vm12, %v14567_v33, 0.0 }
0x2a61   : > { %6532 = vadd.xlane.f32.xlu0 %v6531_v36 }
0x2a77   : > { %6536 = vrot.lane.b32.xlu0 %v16167_v25, %s17191_s1 }
0x2ab5   : > { %v6055_v37 = vpop.xlane.xlu0 %6054 }
0x2ab6   : > { %14568 = vrcp.f32 %v6055_v37 }
0x2ab9   : > { %v6059_v44 = vpop.permute.xlu0 %6058 }
0x2aba   : > { %13755 = vmatpush3.msk.msra.mxu1 %vm1549_vm13, %v6059_v44  ;;  %v16332_v44 = vld [vmem:[%s17106_s10 + $0x38] sm:$0xff] }
0x2abb   : > { %13759 = vmatprep.subr.mxu1 %v14973_v0 }
0x2ac0   : > { %v14569_v40 = vpop.eup %14568 }
0x2ac1   : > { %v6057_v38 = vmul.f32 %v14569_v40, %v14565_v3  ;;  %v16292_v3 = vld [vmem:[%s17106_s10 + $0x28] sm:$0xff] }
0x2ac3   : > { %13757 = vmatmul.mubr.msk.f32.vlgmr.msra.gmra.mrb[66].mxu1 %vm1545_vm14, %v6057_v38 }
0x2ac4   : > { %13760 = vmatpush3.xpose.msk.msra.mxu1 %vm1456_vm11, %v6138_v12  ;;  %13761 = vmatprep.mubr.msk.f32.mxu1 %vm14974_vm0, %v14973_v0 }
0x2ac5   : > { %13764 = vmatprep.subr.mxu1 %v14973_v0 }
0x2ac7   : > { %13762 = vmatmul.mubr.msk.f32.vlgmr.msra.gmra.mrb[68].mxu1 %vm1456_vm11, %v6136_v34 }
0x2ac8   : > { %13766 = vmatprep.mubr.msk.f32.mxu1 %vm14974_vm0, %v14973_v0 }
0x2aee   : > { %v6533_v39 = vpop.xlane.xlu0 %6532 }
0x2aef   : > { %14570 = vrcp.f32 %v6533_v39 }
0x2af2   : > { %v6537_v42 = vpop.permute.xlu0 %6536 }
0x2af3   : > { %13785 = vmatpush3.msk.msra.mxu0 %vm1549_vm13, %v6537_v42 }
0x2af4   : > { %13794 = vmatprep.subr.mxu0 %v14973_v0 }
0x2af9   : > { %v14571_v22 = vpop.eup %14570 }
0x2afa   : > { %v6535_v45 = vmul.f32 %v14571_v22, %v14567_v33  ;;  %v16315_v33 = vld [vmem:[%s17106_s10 + $0x30] sm:$0xff] }
0x2afc   : > { %13787 = vmatmul.mubr.msk.f32.vlgmr.msra.gmra.mrb[58].mxu0 %vm1545_vm14, %v6535_v45 }
0x2afd   : > { %13795 = vmatpush3.xpose.msk.msra.mxu0 %vm1456_vm11, %v6690_v43  ;;  %13796 = vmatprep.mubr.msk.f32.mxu0 %vm14974_vm0, %v14973_v0 }
0x2afe   : > { %13809 = vmatprep.subr.mxu0 %v14973_v0 }
0x2b00   : > { %13797 = vmatmul.mubr.msk.f32.vlgmr.msra.gmra.mrb[60].mxu0 %vm1456_vm11, %v6688_v32 }
0x2b01   : > { %13811 = vmatprep.mubr.msk.f32.mxu0 %vm14974_vm0, %v14973_v0 }
0x2b96   : > { %v16252_v46 = vpop.f32.mrb[66].mxu1 }
0x2b97   : > { %v13758_v48 = vpop.f32.mrb[67].mxu1 }
0x2b9a   : > { %v6209_v49 = vpop.f32.mrb[68].mxu1 }
0x2b9b   : > { %v13763_v50 = vpop.f32.mrb[69].mxu1  ;;  %v6213_v51 = vsel %vm1531_vm12, %v6209_v49, -inf }
0x2b9c   : > { %6214 = vmax.xlane.f32.xlu0 %v6213_v51 }
0x2bb2   : > { %6224 = vrot.lane.b32.xlu0 %v16167_v25, %s17192_s24 }
0x2bb6   : > { %6931 = vrot.lane.b32.xlu0 %v16260_v47, %s14977_s0 }
0x2bba   : > { %7097 = vrot.lane.b32.xlu0 %v16260_v47, %s14978_s18 }
0x2bbe   : > { %7095 = vrot.lane.b32.xlu0 %v16260_v47, %s14976_s6 }
0x2bcf   : > { %v16268_v17 = vpop.f32.mrb[58].mxu0 }
0x2bd0   : > { %v13788_v24 = vpop.f32.mrb[59].mxu0 }
0x2bd3   : > { %v6761_v56 = vpop.f32.mrb[60].mxu0 }
0x2bd4   : > { %v13798_v57 = vpop.f32.mrb[61].mxu0  ;;  %v6765_v6 = vsel %vm1531_vm12, %v6761_v56, -inf }
0x2c29   : > { %v6215_v59 = vpop.xlane.xlu0 %6214 }
0x2c2a   : > { %v6216_v61 = vsub.f32 %v6209_v49, %v6215_v59 }
0x2c2c   : > { %v6217_v5 = vmul.f32 1.442695, %v6216_v61 }
0x2c2d   : > { %v6225_v62 = vpop.permute.xlu0 %6224 }
0x2c2e   : > { %14572 = vpow2.f32 %v6217_v5  ;;  %13765 = vmatpush3.msk.msra.mxu1 %vm1549_vm13, %v6225_v62 }
0x2c2f   : > { %13769 = vmatprep.subr.mxu1 %v14973_v0 }
0x2c31   : > { %v6932_v21 = vpop.permute.xlu0 %6931 }
0x2c32   : > { %13810 = vmatpush3.xpose.msk.msra.mxu0 %vm1456_vm11, %v6932_v21 }
0x2c33   : > { %13814 = vmatprep.subr.mxu0 %v14973_v0 }
0x2c35   : > { %13812 = vmatmul.mubr.msk.f32.vlgmr.msra.gmra.mrb[62].mxu0 %vm1456_vm11, %v16260_v47  ;;  %v7098_v40 = vpop.permute.xlu0 %7097 }
0x2c36   : > { %13816 = vmatprep.mubr.msk.f32.mxu0 %vm14974_vm0, %v14973_v0 }
0x2c38   : > { %v14573_v41 = vpop.eup %14572 }
0x2c39   : > { %v6219_v8 = vsel %vm1531_vm12, %v14573_v41, 0.0  ;;  %v7096_v42 = vpop.permute.xlu0 %7095 }
0x2c3a   : > { %6220 = vadd.xlane.f32.xlu1 %v6219_v8 }
0x2c3e   : > { %6766 = vmax.xlane.f32.xlu1 %v6765_v6 }
0x2cc7   : > { %v6221_v11 = vpop.xlane.xlu1 %6220 }
0x2cc8   : > { %14574 = vrcp.f32 %v6221_v11 }
0x2ccb   : > { %v6767_v10 = vpop.xlane.xlu1 %6766 }
0x2ccc   : > { %v6768_v13 = vsub.f32 %v6761_v56, %v6767_v10 }
0x2cce   : > { %v6769_v52 = vmul.f32 1.442695, %v6768_v13 }
0x2cd0   : > { %14576 = vpow2.f32 %v6769_v52 }
0x2cd2   : > { %v14575_v53 = vpop.eup %14574 }
0x2cd3   : > { %v6223_v14 = vmul.f32 %v14575_v53, %v14573_v41 }
0x2cd5   : > { %13767 = vmatmul.mubr.msk.f32.vlgmr.msra.gmra.mrb[70].mxu1 %vm1545_vm14, %v6223_v14 }
0x2cd6   : > { %13771 = vmatprep.mubr.msk.f32.mxu1 %vm14974_vm0, %v14973_v0  ;;  %13770 = vmatpush3.msra.mxu1 %v16292_v3 }
0x2cd7   : > { %13774 = vmatprep.subr.mxu1 %v14973_v0 }
0x2cda   : > { %v14577_v55 = vpop.eup %14576 }
0x2cdb   : > { %v6771_v18 = vsel %vm1531_vm12, %v14577_v55, 0.0 }
0x2cdc   : > { %6772 = vadd.xlane.f32.xlu1 %v6771_v18 }
0x2ced   : > { %6776 = vrot.lane.b32.xlu1 %v16167_v25, %s17193_s7 }
0x2d08   : > { %v7003_v20 = vpop.f32.mrb[62].mxu0 }
0x2d09   : > { %v13813_v26 = vpop.f32.mrb[63].mxu0  ;;  %v7007_v30 = vsel %vm1531_vm12, %v7003_v20, -inf }
0x2d11   : > { %7008 = vmax.xlane.f32.xlu1 %v7007_v30 }
0x2d22   : > { %7018 = vrot.lane.b32.xlu1 %v16260_v47, %s17190_s26 }
0x2d26   : > { %7409 = vrot.lane.b32.xlu1 %v16260_v47, %s17145_s25 }
0x2d2a   : > { %7407 = vrot.lane.b32.xlu1 %v16260_v47, %s17141_s11  ;;  %s17195_s11 = smov 80  }
0x2d69   : > { %v6773_v25 = vpop.xlane.xlu1 %6772 }
0x2d6a   : > { %14578 = vrcp.f32 %v6773_v25 }
0x2d6d   : > { %v6777_v4 = vpop.permute.xlu1 %6776 }
0x2d74   : > { %v14579_v36 = vpop.eup %14578 }
0x2d75   : > { %v6775_v37 = vmul.f32 %v14579_v36, %v14577_v55 }
0x2d9e   : > { %v7009_v12 = vpop.xlane.xlu1 %7008 }
0x2d9f   : > { %v7010_v22 = vsub.f32 %v7003_v20, %v7009_v12 }
0x2da1   : > { %v7011_v43 = vmul.f32 1.442695, %v7010_v22 }
0x2da2   : > { %v7019_v34 = vpop.permute.xlu1 %7018 }
0x2da3   : > { %13815 = vmatpush3.msk.msra.mxu0 %vm1549_vm13, %v7019_v34  ;;  %14580 = vpow2.f32 %v7011_v43 }
0x2da4   : > { %13824 = vmatprep.subr.mxu0 %v14973_v0 }
0x2da6   : > { %v7410_v41 = vpop.permute.xlu1 %7409 }
0x2da8   : > { %v6297_v23 = vpop.f32.mrb[70].mxu1 }
0x2da9   : > { %v13768_v35 = vpop.f32.mrb[71].mxu1  ;;  %13772 = vmatmul.mubr.msk.f32.vlgmr.msra.gmra.mrb[72].mxu1 %vm1456_vm11, %v6297_v23 }
0x2daa   : > { %13775 = vmatpush3.msra.mxu1 %v16305_v19  ;;  %13776 = vmatprep.mubr.msk.f32.mxu1 %vm14974_vm0, %v14973_v0  ;;  %v7408_v6 = vpop.permute.xlu1 %7407 }
0x2dab   : > { %13789 = vmatprep.subr.mxu1 %v14973_v0 }
0x2dad   : > { %v14581_v50 = vpop.eup %14580 }
0x2dae   : > { %v7013_v51 = vsel %vm1531_vm12, %v14581_v50, 0.0 }
0x2db1   : > { %13777 = vmatmul.mubr.msk.f32.vlgmr.msra.gmra.mrb[72].mxu1 %vm1456_vm11, %v16252_v46 }
0x2db2   : > { %13790 = vmatpush3.msra.mxu1 %v16315_v33  ;;  %13791 = vmatprep.mubr.msk.f32.mxu1 %vm14974_vm0, %v14973_v0 }
0x2db3   : > { %13799 = vmatprep.subr.mxu1 %v14973_v0 }
0x2db9   : > { %13792 = vmatmul.mubr.msk.f32.vlgmr.msra.gmra.mrb[72].mxu1 %vm1456_vm11, %v16268_v17 }
0x2dba   : > { %13800 = vmatpush3.msk.msra.mxu1 %vm1549_vm13, %v6777_v4  ;;  %13801 = vmatprep.mubr.msk.f32.mxu1 %vm14974_vm0, %v14973_v0 }
0x2dbb   : > { %13804 = vmatprep.subr.mxu1 %v14973_v0 }
0x2dbd   : > { %13802 = vmatmul.mubr.msk.f32.vlgmr.msra.gmra.mrb[74].mxu1 %vm1545_vm14, %v6775_v37 }
0x2dbe   : > { %13805 = vmatpush3.msra.mxu1 %v16332_v44  ;;  %13806 = vmatprep.mubr.msk.f32.mxu1 %vm14974_vm0, %v14973_v0 }
0x2dbf   : > { %13819 = vmatprep.subr.mxu1 %v14973_v0 }
0x2e90   : > { %v6849_v38 = vpop.f32.mrb[74].mxu1 }
0x2e91   : > { %v13803_v39 = vpop.f32.mrb[75].mxu1  ;;  %13807 = vmatmul.mubr.msk.f32.vlgmr.msra.gmra.mrb[72].mxu1 %vm1456_vm11, %v6849_v38 }
0x2e92   : > { %13820 = vmatpush3.xpose.msk.msra.mxu1 %vm1456_vm11, %v7098_v40  ;;  %13821 = vmatprep.mubr.msk.f32.mxu1 %vm14974_vm0, %v14973_v0 }
0x2e93   : > { %13829 = vmatprep.subr.mxu1 %v14973_v0 }
0x2e95   : > { %13822 = vmatmul.mubr.msk.f32.vlgmr.msra.gmra.mrb[76].mxu1 %vm1456_vm11, %v7096_v42 }
0x2e96   : > { %13830 = vmatpush3.msra.mxu1 %v16292_v3  ;;  %13831 = vmatprep.mubr.msk.f32.mxu1 %vm14974_vm0, %v14973_v0 }
0x2e97   : > { %13834 = vmatprep.subr.mxu1 %v14973_v0 }
0x2f64   : > { %v16349_v45 = vpop.f32.mrb[72].mxu1 }
0x2f65   : > { %v13808_v32 = vpop.f32.mrb[73].mxu1 }
0x2f68   : > { %v7169_v46 = vpop.f32.mrb[76].mxu1 }
0x2f69   : > { %v13823_v48 = vpop.f32.mrb[77].mxu1  ;;  %v7173_v49 = vsel %vm1531_vm12, %v7169_v46, -inf }
0x2f6a   : > { %7174 = vmax.xlane.f32.xlu0 %v7173_v49 }
0x2f6e   : > { %7014 = vadd.xlane.f32.xlu0 %v7013_v51 }
0x2ff7   : > { %v7175_v54 = vpop.xlane.xlu0 %7174 }
0x2ff8   : > { %v7176_v16 = vsub.f32 %v7169_v46, %v7175_v54 }
0x2ffa   : > { %v7177_v17 = vmul.f32 1.442695, %v7176_v16 }
0x2ffb   : > { %v7015_v24 = vpop.xlane.xlu0 %7014 }
0x2ffc   : > { %14582 = vpow2.f32 %v7177_v17 }
0x2ffd   : > { %14584 = vrcp.f32 %v7015_v24 }
0x3006   : > { %v14583_v56 = vpop.eup %14582 }
0x3007   : > { %v14585_v57 = vpop.eup %14584  ;;  %v7179_v59 = vsel %vm1531_vm12, %v14583_v56, 0.0 }
0x3008   : > { %v7017_v61 = vmul.f32 %v14585_v57, %v14581_v50  ;;  %7180 = vadd.xlane.f32.xlu0 %v7179_v59 }
0x300a   : > { %13817 = vmatmul.mubr.msk.f32.vlgmr.msra.gmra.mrb[64].mxu0 %vm1545_vm14, %v7017_v61 }
0x300b   : > { %13826 = vmatprep.mubr.msk.f32.mxu0 %vm14974_vm0, %v14973_v0 }
0x301e   : > { %7184 = vrot.lane.b32.xlu0 %v16260_v47, %s17192_s24 }
0x3095   : > { %v7181_v5 = vpop.xlane.xlu0 %7180 }
0x3096   : > { %14586 = vrcp.f32 %v7181_v5 }
0x3099   : > { %v7185_v62 = vpop.permute.xlu0 %7184 }
0x309a   : > { %13825 = vmatpush3.msk.msra.mxu0 %vm1549_vm13, %v7185_v62 }
0x309b   : > { %13839 = vmatprep.subr.mxu0 %v14973_v0 }
0x30a0   : > { %v14587_v21 = vpop.eup %14586 }
0x30a1   : > { %v7183_v8 = vmul.f32 %v14587_v21, %v14583_v56 }
0x30a3   : > { %13827 = vmatmul.mubr.msk.f32.vlgmr.msra.gmra.mrb[66].mxu0 %vm1545_vm14, %v7183_v8 }
0x30a4   : > { %13840 = vmatpush3.xpose.msk.msra.mxu0 %vm1456_vm11, %v7410_v41  ;;  %13841 = vmatprep.mubr.msk.f32.mxu0 %vm14974_vm0, %v14973_v0 }
0x30a5   : > { %13844 = vmatprep.subr.mxu0 %v14973_v0 }
0x30a7   : > { %13842 = vmatmul.mubr.msk.f32.vlgmr.msra.gmra.mrb[68].mxu0 %vm1456_vm11, %v7408_v6 }
0x30a8   : > { %13846 = vmatprep.mubr.msk.f32.mxu0 %vm14974_vm0, %v14973_v0 }
0x30dd   : > { %v7091_v11 = vpop.f32.mrb[64].mxu0 }
0x30de   : > { %v13818_v10 = vpop.f32.mrb[65].mxu0 }
0x3176   : > { %v7257_v13 = vpop.f32.mrb[66].mxu0 }
0x3177   : > { %v13828_v52 = vpop.f32.mrb[67].mxu0  ;;  %13832 = vmatmul.mubr.msk.f32.vlgmr.msra.gmra.mrb[78].mxu1 %vm1456_vm11, %v7257_v13 }
0x3178   : > { %13835 = vmatpush3.msra.mxu1 %v16305_v19  ;;  %13836 = vmatprep.mubr.msk.f32.mxu1 %vm14974_vm0, %v14973_v0 }
0x3179   : > { %13849 = vmatprep.subr.mxu1 %v14973_v0 }
0x317a   : > { %v7481_v53 = vpop.f32.mrb[68].mxu0 }
0x317b   : > { %v13843_v14 = vpop.f32.mrb[69].mxu0  ;;  %v7485_v55 = vsel %vm1531_vm12, %v7481_v53, -inf }
0x317c   : > { %7486 = vmax.xlane.f32.xlu1 %v7485_v55 }
0x317f   : > { %13837 = vmatmul.mubr.msk.f32.vlgmr.msra.gmra.mrb[78].mxu1 %vm1456_vm11, %v7091_v11 }
0x3180   : > { %13850 = vmatpush3.msra.mxu1 %v16315_v33  ;;  %13851 = vmatprep.mubr.msk.f32.mxu1 %vm14974_vm0, %v14973_v0 }
0x3181   : > { %13859 = vmatprep.subr.mxu1 %v14973_v0 }
0x318d   : > { %7649 = vrot.lane.b32.xlu1 %v16260_v47, %s17143_s29 }
0x3191   : > { %7647 = vrot.lane.b32.xlu1 %v16260_v47, %s17189_s30 }
0x3209   : > { %v7487_v18 = vpop.xlane.xlu1 %7486 }
0x320a   : > { %v7488_v20 = vsub.f32 %v7481_v53, %v7487_v18 }
0x320c   : > { %v7489_v26 = vmul.f32 1.442695, %v7488_v20 }
0x320d   : > { %v7650_v23 = vpop.permute.xlu1 %7649 }
0x320e   : > { %14588 = vpow2.f32 %v7489_v26 }
0x3211   : > { %v7648_v36 = vpop.permute.xlu1 %7647 }
0x3218   : > { %v14589_v30 = vpop.eup %14588 }
0x3219   : > { %v7491_v25 = vsel %vm1531_vm12, %v14589_v30, 0.0 }
0x321a   : > { %7492 = vadd.xlane.f32.xlu0 %v7491_v25 }
0x3230   : > { %7496 = vrot.lane.b32.xlu0 %v16260_v47, %s17191_s1 }
0x32a7   : > { %v7493_v4 = vpop.xlane.xlu0 %7492 }
0x32a8   : > { %14590 = vrcp.f32 %v7493_v4 }
0x32ab   : > { %v7497_v12 = vpop.permute.xlu0 %7496 }
0x32ac   : > { %13845 = vmatpush3.msk.msra.mxu0 %vm1549_vm13, %v7497_v12 }
0x32ad   : > { %13854 = vmatprep.subr.mxu0 %v14973_v0 }
0x32b2   : > { %v14591_v34 = vpop.eup %14590 }
0x32b3   : > { %v7495_v35 = vmul.f32 %v14591_v34, %v14589_v30 }
0x32b5   : > { %13847 = vmatmul.mubr.msk.f32.vlgmr.msra.gmra.mrb[70].mxu0 %vm1545_vm14, %v7495_v35 }
0x32b6   : > { %13855 = vmatpush3.xpose.msk.msra.mxu0 %vm1456_vm11, %v7650_v23  ;;  %13856 = vmatprep.mubr.msk.f32.mxu0 %vm14974_vm0, %v14973_v0 }
0x32b7   : > { %13869 = vmatprep.subr.mxu0 %v14973_v0 }
0x32b9   : > { %13857 = vmatmul.mubr.msk.f32.vlgmr.msra.gmra.mrb[72].mxu0 %vm1456_vm11, %v7648_v36 }
0x32ba   : > { %13871 = vmatprep.mubr.msk.f32.mxu0 %vm14974_vm0, %v14973_v0 }
0x3388   : > { %v7569_v37 = vpop.f32.mrb[70].mxu0 }
0x3389   : > { %v13848_v40 = vpop.f32.mrb[71].mxu0  ;;  %13852 = vmatmul.mubr.msk.f32.vlgmr.msra.gmra.mrb[78].mxu1 %vm1456_vm11, %v7569_v37 }
0x338a   : > { %13861 = vmatprep.mubr.msk.f32.mxu1 %vm14974_vm0, %v14973_v0 }
0x338c   : > { %v7721_v38 = vpop.f32.mrb[72].mxu0 }
0x338d   : > { %v13858_v39 = vpop.f32.mrb[73].mxu0  ;;  %v7725_v42 = vsel %vm1531_vm12, %v7721_v38, -inf }
0x338e   : > { %7726 = vmax.xlane.f32.xlu0 %v7725_v42 }
0x33a4   : > { %7736 = vrot.lane.b32.xlu0 %v16260_v47, %s17193_s7 }
0x33a8   : > { %8057 = vrot.lane.b32.xlu0 %v16214_v31, %s14978_s18 }
0x341b   : > { %v7727_v22 = vpop.xlane.xlu0 %7726 }
0x341c   : > { %v7728_v43 = vsub.f32 %v7721_v38, %v7727_v22 }
0x341e   : > { %v7729_v32 = vmul.f32 1.442695, %v7728_v43 }
0x341f   : > { %v7737_v46 = vpop.permute.xlu0 %7736 }
0x3420   : > { %14592 = vpow2.f32 %v7729_v32  ;;  %13860 = vmatpush3.msk.msra.mxu1 %vm1549_vm13, %v7737_v46 }
0x3421   : > { %13864 = vmatprep.subr.mxu1 %v14973_v0 }
0x3423   : > { %v8058_v57 = vpop.permute.xlu0 %8057 }
0x342a   : > { %v14593_v48 = vpop.eup %14592 }
0x342b   : > { %v7731_v49 = vsel %vm1531_vm12, %v14593_v48, 0.0 }
0x342c   : > { %7732 = vadd.xlane.f32.xlu1 %v7731_v49 }
0x343d   : > { %7891 = vrot.lane.b32.xlu1 %v16214_v31, %s14977_s0 }
0x3441   : > { %8055 = vrot.lane.b32.xlu1 %v16214_v31, %s14976_s6 }
0x34b9   : > { %v7733_v47 = vpop.xlane.xlu1 %7732 }
0x34ba   : > { %14594 = vrcp.f32 %v7733_v47 }
0x34bd   : > { %v7892_v50 = vpop.permute.xlu1 %7891 }
0x34be   : > { %13870 = vmatpush3.xpose.msk.msra.mxu0 %vm1456_vm11, %v7892_v50 }
0x34bf   : > { %13874 = vmatprep.subr.mxu0 %v14973_v0 }
0x34c1   : > { %13872 = vmatmul.mubr.msk.f32.vlgmr.msra.gmra.mrb[74].mxu0 %vm1456_vm11, %v16214_v31  ;;  %v8056_v61 = vpop.permute.xlu1 %8055 }
0x34c2   : > { %13876 = vmatprep.mubr.msk.f32.mxu0 %vm14974_vm0, %v14973_v0 }
0x34c4   : > { %v14595_v51 = vpop.eup %14594 }
0x34c5   : > { %v7735_v54 = vmul.f32 %v14595_v51, %v14593_v48 }
0x34c7   : > { %13862 = vmatmul.mubr.msk.f32.vlgmr.msra.gmra.mrb[80].mxu1 %vm1545_vm14, %v7735_v54 }
0x34c8   : > { %13865 = vmatpush3.msra.mxu1 %v16332_v44  ;;  %13866 = vmatprep.mubr.msk.f32.mxu1 %vm14974_vm0, %v14973_v0 }
0x34c9   : > { %13879 = vmatprep.subr.mxu1 %v14973_v0 }
0x3594   : > { %v7963_v16 = vpop.f32.mrb[74].mxu0 }
0x3595   : > { %v13873_v17 = vpop.f32.mrb[75].mxu0  ;;  %v7967_v24 = vsel %vm1531_vm12, %v7963_v16, -inf }
0x3596   : > { %7968 = vmax.xlane.f32.xlu0 %v7967_v24 }
0x359a   : > { %v7809_v56 = vpop.f32.mrb[80].mxu1 }
0x359b   : > { %v13863_v59 = vpop.f32.mrb[81].mxu1  ;;  %13867 = vmatmul.mubr.msk.f32.vlgmr.msra.gmra.mrb[78].mxu1 %vm1456_vm11, %v7809_v56  ;;  %v16495_v56 = vld [vmem:[#allocation7 + $0x1] ss:$0 sm:$0xff] }
0x359c   : > { %13880 = vmatpush3.xpose.msk.msra.mxu1 %vm1456_vm11, %v8058_v57  ;;  %13881 = vmatprep.mubr.msk.f32.mxu1 %vm14974_vm0, %v14973_v0 }
0x359d   : > { %13889 = vmatprep.subr.mxu1 %v14973_v0 }
0x359f   : > { %13882 = vmatmul.mubr.msk.f32.vlgmr.msra.gmra.mrb[82].mxu1 %vm1456_vm11, %v8056_v61 }
0x35a0   : > { %13890 = vmatpush3.msra.mxu1 %v16292_v3  ;;  %13891 = vmatprep.mubr.msk.f32.mxu1 %vm14974_vm0, %v14973_v0 }
0x35a1   : > { %13894 = vmatprep.subr.mxu1 %v14973_v0 }
0x3623   : > { %v7969_v5 = vpop.xlane.xlu0 %7968 }
0x3624   : > { %v7970_v62 = vsub.f32 %v7963_v16, %v7969_v5 }
0x3626   : > { %v7971_v21 = vmul.f32 1.442695, %v7970_v62 }
0x3628   : > { %14596 = vpow2.f32 %v7971_v21 }
0x3632   : > { %v14597_v41 = vpop.eup %14596 }
0x3633   : > { %v7973_v8 = vsel %vm1531_vm12, %v14597_v41, 0.0 }
0x3634   : > { %7974 = vadd.xlane.f32.xlu0 %v7973_v8 }
0x366e   : > { %v16435_v6 = vpop.f32.mrb[78].mxu1 }
0x366f   : > { %v13868_v11 = vpop.f32.mrb[79].mxu1  ;;  %v8848_v17 = vrot.slane %v16435_v6, 2 }
0x3671   : > { %v8853_v24 = vsel %vm1549_vm13, %v16349_v45, %v8848_v17 }
0x3672   : > { %v8129_v10 = vpop.f32.mrb[82].mxu1  ;;  %v8863_v61 = vadd.f32 %v16495_v56, %v8853_v24 }
0x3673   : > { %v13883_v13 = vpop.f32.mrb[83].mxu1  ;;  %v8133_v3 = vsel %vm1531_vm12, %v8129_v10, -inf }
0x3674   : > { %8134 = vmax.xlane.f32.xlu1 %v8133_v3 }
0x3685   : > { %8144 = vrot.lane.b32.xlu1 %v16214_v31, %s17192_s24 }
0x3689   : > { %8369 = vrot.lane.b32.xlu1 %v16214_v31, %s17145_s25 }
0x368d   : > { %8367 = vrot.lane.b32.xlu1 %v16214_v31, %s17194_s2 }
0x36c1   : > { %v7975_v20 = vpop.xlane.xlu0 %7974 }
0x3701   : > { %v8135_v52 = vpop.xlane.xlu1 %8134 }
0x3702   : > { %v8136_v53 = vsub.f32 %v8129_v10, %v8135_v52 }
0x3704   : > { %v8137_v14 = vmul.f32 1.442695, %v8136_v53 }
0x3705   : > { %v8145_v12 = vpop.permute.xlu1 %8144 }
0x3706   : > { %14598 = vpow2.f32 %v8137_v14 }
0x3707   : > { %14600 = vrcp.f32 %v7975_v20  ;;  %v12899_v20 = vld [vmem:[%s17108_s12 + $0x28] sm:$0xff] }
0x3709   : > { %v8370_v23 = vpop.permute.xlu1 %8369 }
0x370d   : > { %v8368_v36 = vpop.permute.xlu1 %8367 }
0x3710   : > { %v14599_v55 = vpop.eup %14598 }
0x3711   : > { %v8139_v18 = vsel %vm1531_vm12, %v14599_v55, 0.0  ;;  %v14601_v30 = vpop.eup %14600 }
0x3712   : > { %8140 = vadd.xlane.f32.xlu0 %v8139_v18  ;;  %v7977_v25 = vmul.f32 %v14601_v30, %v14597_v41  ;;  %v8866_v41 = vadd.f32 %v8863_v61, %v16152_v7  ;;  %v12898_v7 = vld [vmem:[%s17108_s12 + $0x20] sm:$0xff]  ;;  %v12900_v30 = vld [vmem:[%s17108_s12 + $0x30] sm:$0xff] }
0x3714   : > { %v8869_v45 = vsel %vm1021_vm10, %v8866_v41, 0.0 }
0x3728   : > { %7978 = vrot.lane.b32.xlu0 %v16214_v31, %s17190_s26  ;;  %s17196_s26 = smov 72  }
0x379f   : > { %v8141_v26 = vpop.xlane.xlu0 %8140 }
0x37a0   : > { %14602 = vrcp.f32 %v8141_v26  ;;  %v14274_v26 = vpack.c.bf16 %v12899_v20, %v12898_v7 }
0x37a3   : > { %v7979_v4 = vpop.permute.xlu0 %7978 }
0x37a4   : > { %13875 = vmatpush3.msk.msra.mxu0 %vm1549_vm13, %v7979_v4 }
0x37a5   : > { %13877 = vmatmul.mubr.msk.f32.vlgmr.msra.gmra.mrb[76].mxu0 %vm1545_vm14, %v7977_v25  ;;  %13884 = vmatprep.subr.mxu0 %v14973_v0 }
0x37a6   : > { %13885 = vmatpush3.msk.msra.mxu0 %vm1549_vm13, %v8145_v12  ;;  %13886 = vmatprep.mubr.msk.f32.mxu0 %vm14974_vm0, %v14973_v0 }
0x37a7   : > { %13899 = vmatprep.subr.mxu0 %v14973_v0 }
0x37aa   : > { %v14603_v34 = vpop.eup %14602 }
0x37ab   : > { %v8143_v35 = vmul.f32 %v14603_v34, %v14599_v55 }
0x37ad   : > { %13887 = vmatmul.mubr.msk.f32.vlgmr.msra.gmra.mrb[78].mxu0 %vm1545_vm14, %v8143_v35 }
0x37ae   : > { %13900 = vmatpush3.xpose.msk.msra.mxu0 %vm1456_vm11, %v8370_v23  ;;  %13901 = vmatprep.mubr.msk.f32.mxu0 %vm14974_vm0, %v14973_v0 }
0x37af   : > { %13904 = vmatprep.subr.mxu0 %v14973_v0 }
0x37b1   : > { %13902 = vmatmul.mubr.msk.f32.vlgmr.msra.gmra.mrb[80].mxu0 %vm1456_vm11, %v8368_v36  ;;  %v12823_v36 = vld [vmem:[%s17118_s22 + $0x4] sm:$0x7] }
0x37b2   : > { %13906 = vmatprep.mubr.msk.f32.mxu0 %vm14974_vm0, %v14973_v0 }
0x3878   : > { %v8051_v37 = vpop.f32.mrb[76].mxu0 }
0x3879   : > { %v13878_v40 = vpop.f32.mrb[77].mxu0 }
0x387a   : > { %v16531_v40 = vrot.slane %v12823_v36, %v15613_v2 }
0x3880   : > { %v8217_v38 = vpop.f32.mrb[78].mxu0 }
0x3881   : > { %v13888_v39 = vpop.f32.mrb[79].mxu0  ;;  %13892 = vmatmul.mubr.msk.f32.vlgmr.msra.gmra.mrb[84].mxu1 %vm1456_vm11, %v8217_v38 }
0x3882   : > { %13895 = vmatpush3.msra.mxu1 %v16305_v19  ;;  %13896 = vmatprep.mubr.msk.f32.mxu1 %vm14974_vm0, %v14973_v0 }
0x3883   : > { %13909 = vmatprep.subr.mxu1 %v14973_v0 }
0x3884   : > { %v8441_v42 = vpop.f32.mrb[80].mxu0 }
0x3885   : > { %v13903_v22 = vpop.f32.mrb[81].mxu0  ;;  %v8445_v43 = vsel %vm1531_vm12, %v8441_v42, -inf }
0x3886   : > { %8446 = vmax.xlane.f32.xlu0 %v8445_v43 }
0x3889   : > { %13897 = vmatmul.mubr.msk.f32.vlgmr.msra.gmra.mrb[84].mxu1 %vm1456_vm11, %v8051_v37  ;;  %v12824_v37 = vld [vmem:[%s17119_s23 + $0x4] sm:$0x7] }
0x388a   : > { %13910 = vmatpush3.msra.mxu1 %v16315_v33  ;;  %13911 = vmatprep.mubr.msk.f32.mxu1 %vm14974_vm0, %v14973_v0  ;;  %v16534_v22 = vrot.slane %v12824_v37, %v15613_v2 }
0x388b   : > { %13919 = vmatprep.subr.mxu1 %v14973_v0 }
0x389c   : > { %8456 = vrot.lane.b32.xlu0 %v16214_v31, %s17191_s1 }
0x38a0   : > { %8607 = vrot.lane.b32.xlu0 %v16214_v31, %s17189_s30 }
0x3913   : > { %v8447_v19 = vpop.xlane.xlu0 %8446 }
0x3914   : > { %v8448_v32 = vsub.f32 %v8441_v42, %v8447_v19 }
0x3916   : > { %v8449_v46 = vmul.f32 1.442695, %v8448_v32 }
0x3917   : > { %v8457_v48 = vpop.permute.xlu0 %8456 }
0x3918   : > { %14604 = vpow2.f32 %v8449_v46  ;;  %13905 = vmatpush3.msk.msra.mxu0 %vm1549_vm13, %v8457_v48  ;;  %v12906_v46 = vld [vmem:[%s17110_s14 + $0x20] sm:$0xff]  ;;  %v12907_v48 = vld [vmem:[%s17110_s14 + $0x28] sm:$0xff] }
0x3919   : > { %13914 = vmatprep.subr.mxu0 %v14973_v0 }
0x391b   : > { %v8608_v16 = vpop.permute.xlu0 %8607 }
0x3922   : > { %v14605_v33 = vpop.eup %14604 }
0x3923   : > { %v8451_v49 = vsel %vm1531_vm12, %v14605_v33, 0.0 }
0x3924   : > { %8452 = vadd.xlane.f32.xlu1 %v8451_v49  ;;  %v12909_v49 = vld [vmem:[%s17110_s14 + $0x38] sm:$0xff] }
0x3935   : > { %8609 = vrot.lane.b32.xlu1 %v16214_v31, %s17143_s29 }
0x39b1   : > { %v8453_v47 = vpop.xlane.xlu1 %8452 }
0x39b2   : > { %14606 = vrcp.f32 %v8453_v47 }
0x39b5   : > { %v8610_v54 = vpop.permute.xlu1 %8609 }
0x39bc   : > { %v14607_v50 = vpop.eup %14606 }
0x39bd   : > { %v8455_v51 = vmul.f32 %v14607_v50, %v14605_v33  ;;  %v12908_v33 = vld [vmem:[%s17110_s14 + $0x30] sm:$0xff] }
0x39bf   : > { %13907 = vmatmul.mubr.msk.f32.vlgmr.msra.gmra.mrb[82].mxu0 %vm1545_vm14, %v8455_v51  ;;  %v14283_v51 = vpack.c.bf16 %v12909_v49, %v12908_v33 }
0x39c0   : > { %13915 = vmatpush3.xpose.msk.msra.mxu0 %vm1456_vm11, %v8610_v54  ;;  %13916 = vmatprep.mubr.msk.f32.mxu0 %vm14974_vm0, %v14973_v0 }
0x39c1   : > { %14273 = vmatprep.subr.bf16.mxu0 %v14975_v1 }
0x39c3   : > { %13917 = vmatmul.mubr.msk.f32.vlgmr.msra.gmra.mrb[84].mxu0 %vm1456_vm11, %v8608_v16 }
0x39c4   : > { %13937 = vmatprep.mubr.msk.f32.mxu0 %vm14974_vm0, %v14973_v0  ;;  %14275 = vmatpush3.bf16.msra.mxu0 %v14274_v26 }
0x39c5   : > { %14276 = vmatprep.subr.bf16.mxu0 %v14975_v1 }
0x3a92   : > { %v8529_v57 = vpop.f32.mrb[82].mxu0 }
0x3a93   : > { %v13908_v59 = vpop.f32.mrb[83].mxu0  ;;  %13912 = vmatmul.mubr.msk.f32.vlgmr.msra.gmra.mrb[84].mxu1 %vm1456_vm11, %v8529_v57 }
0x3a94   : > { %13921 = vmatprep.mubr.msk.f32.mxu1 %vm14974_vm0, %v14973_v0 }
0x3a96   : > { %v8681_v5 = vpop.f32.mrb[84].mxu0 }
0x3a97   : > { %v13918_v62 = vpop.f32.mrb[85].mxu0  ;;  %v8685_v21 = vsel %vm1531_vm12, %v8681_v5, -inf }
0x3a98   : > { %8686 = vmax.xlane.f32.xlu1 %v8685_v21 }
0x3a9c   : > { %8870 = vadd.xlane.f32.xlu1 %v8869_v45 }
0x3b25   : > { %v8687_v8 = vpop.xlane.xlu1 %8686 }
0x3b26   : > { %v8688_v11 = vsub.f32 %v8681_v5, %v8687_v8  ;;  %v12910_v5 = vld [vmem:[#allocation10 + $0x1] ss:$0 sm:$0xff] }
0x3b28   : > { %v8689_v10 = vmul.f32 1.442695, %v8688_v11 }
0x3b29   : > { %v8871_v13 = vpop.xlane.xlu1 %8870 }
0x3b2a   : > { %14608 = vpow2.f32 %v8689_v10  ;;  %v8878_v3 = vmul.f32 0.03125, %v8871_v13 }
0x3b2c   : > { %v8881_v52 = vsub.f32 %v8866_v41, %v8878_v3 }
0x3b2e   : > { %v8884_v53 = vmul.f32 %v8881_v52, %v8881_v52 }
0x3b30   : > { %v8887_v14 = vsel %vm1021_vm10, %v8884_v53, 0.0 }
0x3b31   : > { %8888 = vadd.xlane.f32.xlu1 %v8887_v14 }
0x3b34   : > { %v14609_v55 = vpop.eup %14608 }
0x3b35   : > { %v8691_v18 = vsel %vm1531_vm12, %v14609_v55, 0.0 }
0x3b36   : > { %8692 = vadd.xlane.f32.xlu0 %v8691_v18 }
0x3b4c   : > { %8696 = vrot.lane.b32.xlu0 %v16214_v31, %s17193_s7  ;;  %v12901_v31 = vld [vmem:[%s17108_s12 + $0x38] sm:$0xff] }
0x3b4d   : > { %v14277_v25 = vpack.c.bf16 %v12901_v31, %v12900_v30  ;;  %v12902_v30 = vld [vmem:[#allocation9 + $0x1] ss:$0 sm:$0xff] }
0x3b4f   : > { %14278 = vmatpush3.bf16.msra.mxu0 %v14277_v25 }
0x3b50   : > { %13963 = vmatprep.subr.mxu0 %v14973_v0 }
0x3bbe   : > { %v8889_v4 = vpop.xlane.xlu1 %8888 }
0x3bbf   : > { %v8896_v12 = vmul.f32 0.03125, %v8889_v4 }
0x3bc1   : > { %v8899_v34 = vadd.f32 1e-05, %v8896_v12 }
0x3bc3   : > { %14610 = vrsqrt.f32 %v8899_v34  ;;  %v8693_v23 = vpop.xlane.xlu0 %8692 }
0x3bc4   : > { %14612 = vrcp.f32 %v8693_v23 }
0x3bc7   : > { %v8697_v35 = vpop.permute.xlu0 %8696 }
0x3bc8   : > { %13920 = vmatpush3.msk.msra.mxu1 %vm1549_vm13, %v8697_v35 }
0x3bc9   : > { %13924 = vmatprep.subr.mxu1 %v14973_v0 }
0x3bcd   : > { %v14611_v38 = vpop.eup %14610 }
0x3bce   : > { %v14613_v39 = vpop.eup %14612  ;;  %v8905_v42 = vmul.f32 %v14611_v38, %v8881_v52 }
0x3bcf   : > { %v8695_v43 = vmul.f32 %v14613_v39, %v14609_v55 }
0x3bd0   : > { %v8912_v19 = vmul.f32 %v16531_v40, %v8905_v42 }
0x3bd1   : > { %13922 = vmatmul.mubr.msk.f32.vlgmr.msra.gmra.mrb[86].mxu1 %vm1545_vm14, %v8695_v43 }
0x3bd2   : > { %v16539_v32 = vadd.f32 %v16534_v22, %v8912_v19  ;;  %13925 = vmatpush3.msra.mxu1 %v16332_v44  ;;  %13926 = vmatprep.mubr.msk.f32.mxu1 %vm14974_vm0, %v14973_v0  ;;  %v14280_v44 = vpack.c.bf16 %v12907_v48, %v12906_v46 }
0x3bd3   : > { %14279 = vmatprep.subr.bf16.mxu1 %v14975_v1 }
0x3bd4   : > { %13938 = vmatmul.mubr.msk.f32.vlgmr.msra.gmra.mrb[86].mxu0 %vm1021_vm10, %v16539_v32 }
0x3bd5   : > { %13940 = vmatprep.mubr.msk.f32.mxu0 %vm14974_vm0, %v14973_v0 }
0x3ca4   : > { %v8769_v47 = vpop.f32.mrb[86].mxu1 }
0x3ca5   : > { %v13923_v50 = vpop.f32.mrb[87].mxu1  ;;  %13927 = vmatmul.mubr.msk.f32.vlgmr.msra.gmra.mrb[84].mxu1 %vm1456_vm11, %v8769_v47 }
0x3ca6   : > { %14281 = vmatpush3.bf16.msra.mxu1 %v14280_v44  ;;  %13954 = vmatprep.mubr.msk.f32.mxu1 %vm14974_vm0, %v14973_v0 }
0x3ca7   : > { %v9010_v54 = vpop.f32.mrb[86].mxu0  ;;  %14282 = vmatprep.subr.bf16.mxu1 %v14975_v1 }
0x3ca8   : > { %v13939_v16 = vpop.f32.mrb[87].mxu0  ;;  %v16600_v31 = vadd.f32 %v12902_v30, %v9010_v54 }
0x3caa   : > { %14284 = vmatpush3.bf16.msra.mxu1 %v14283_v51 }
0x3cab   : > { %13973 = vmatprep.subr.mxu1 %v14973_v0 }
0x3cad   : > { %13955 = vmatmul.mubr.msk.f32.vlgmr.msra.gmra.mrb[88].mxu1 %vm1021_vm10, %v15668_v27 }
0x3cae   : > { %13957 = vmatprep.mubr.msk.f32.mxu1 %vm14974_vm0, %v14973_v0 }
0x3cb1   : > { %13958 = vmatmul.mubr.msk.f32.gmra.mrb[90].mxu1 %vm1021_vm10, %v15675_v28 }
0x3cb2   : > { %13960 = vmatprep.mubr.msk.f32.mxu1 %vm14974_vm0, %v14973_v0 }
0x3cb5   : > { %13961 = vmatmul.mubr.msk.f32.gmra.mrb[92].mxu1 %vm1021_vm10, %v15682_v29 }
0x3cb6   : > { %13975 = vmatprep.mubr.msk.f32.mxu1 %vm14974_vm0, %v14973_v0 }
0x3d78   : > { %v8842_v24 = vpop.f32.mrb[84].mxu1 }
0x3d79   : > { %v8851_v57 = vrot.slane %v8842_v24, 4  ;;  %v13928_v59 = vpop.f32.mrb[85].mxu1 }
0x3d7b   : > { %v8854_v27 = vsel %vm914_vm1, %v8848_v17, %v8851_v57  ;;  %v8865_v61 = vadd.f32 %v16495_v56, %v8851_v57 }
0x3d7c   : > { %v8864_v28 = vadd.f32 %v16495_v56, %v8854_v27 }
0x3d7d   : > { %v8868_v41 = vadd.f32 %v8865_v61, %v16198_v9 }
0x3d7e   : > { %v8867_v62 = vadd.f32 %v8864_v28, %v16190_v58 }
0x3d7f   : > { %v8875_v17 = vsel %vm5549_vm4, %v8868_v41, 0.0 }
0x3d80   : > { %v9103_v21 = vpop.f32.mrb[88].mxu1  ;;  %v8872_v29 = vsel %vm1021_vm10, %v8867_v62, 0.0 }
0x3d81   : > { %v16586_v45 = vadd.f32 %v12910_v5, %v9103_v21  ;;  %v13956_v8 = vpop.f32.mrb[89].mxu1  ;;  %8873 = vadd.xlane.f32.xlu1 %v8872_v29 }
0x3d83   : > { %13964 = vmatpush3.xpose.msk.msra.mxu0 %vm1456_vm11, %v16586_v45 }
0x3d84   : > { %v9108_v6 = vpop.f32.mrb[90].mxu1  ;;  %13968 = vmatprep.subr.mxu0 %v14973_v0 }
0x3d85   : > { %v16592_v56 = vadd.f32 %v12910_v5, %v9108_v6  ;;  %v13959_v58 = vpop.f32.mrb[91].mxu1  ;;  %8876 = vadd.xlane.f32.xlu1 %v8875_v17 }
0x3d88   : > { %v9113_v11 = vpop.f32.mrb[92].mxu1 }
0x3d89   : > { %v16594_v10 = vadd.f32 %v12910_v5, %v9113_v11  ;;  %v13962_v9 = vpop.f32.mrb[93].mxu1 }
0x3e0e   : > { %v8874_v13 = vpop.xlane.xlu1 %8873 }
0x3e0f   : > { %v8879_v3 = vmul.f32 0.03125, %v8874_v13 }
0x3e11   : > { %v8882_v52 = vsub.f32 %v8867_v62, %v8879_v3 }
0x3e12   : > { %v8877_v53 = vpop.xlane.xlu1 %8876 }
0x3e13   : > { %v8880_v14 = vmul.f32 0.03125, %v8877_v53  ;;  %v8885_v55 = vmul.f32 %v8882_v52, %v8882_v52 }
0x3e15   : > { %v8883_v18 = vsub.f32 %v8868_v41, %v8880_v14  ;;  %v8890_v7 = vsel %vm1021_vm10, %v8885_v55, 0.0 }
0x3e16   : > { %8891 = vadd.xlane.f32.xlu1 %v8890_v7 }
0x3e17   : > { %v8886_v20 = vmul.f32 %v8883_v18, %v8883_v18 }
0x3e19   : > { %v8893_v26 = vsel %vm5549_vm4, %v8886_v20, 0.0 }
0x3e1a   : > { %8894 = vadd.xlane.f32.xlu0 %v8893_v26  ;;  %v16663_v26 = vld [vmem:[%s17112_s16 + $0x28] sm:$0xff] }
0x3e27   : > { %9287 = vrot.lane.b32.xlu1 %v16586_v45, %s14976_s6 }
0x3e2b   : > { %9285 = vrot.lane.b32.xlu1 %v16600_v31, %s14976_s6 }
0x3ea3   : > { %v8892_v25 = vpop.xlane.xlu1 %8891 }
0x3ea4   : > { %v8897_v4 = vmul.f32 0.03125, %v8892_v25 }
0x3ea6   : > { %v8900_v12 = vadd.f32 1e-05, %v8897_v4  ;;  %v16670_v4 = vld [vmem:[%s17112_s16 + $0x20] sm:$0xff] }
0x3ea7   : > { %v8895_v34 = vpop.xlane.xlu0 %8894  ;;  %v9288_v23 = vpop.permute.xlu1 %9287 }
0x3ea8   : > { %14614 = vrsqrt.f32 %v8900_v12  ;;  %v8898_v35 = vmul.f32 0.03125, %v8895_v34  ;;  %13974 = vmatpush3.xpose.msk.msra.mxu1 %vm1456_vm11, %v9288_v23 }
0x3ea9   : > { %13983 = vmatprep.subr.mxu1 %v14973_v0 }
0x3eaa   : > { %v8901_v36 = vadd.f32 1e-05, %v8898_v35 }
0x3eab   : > { %v9286_v37 = vpop.permute.xlu1 %9285 }
0x3eac   : > { %14616 = vrsqrt.f32 %v8901_v36  ;;  %13976 = vmatmul.mubr.msk.f32.vlgmr.msra.gmra.mrb[94].mxu1 %vm1456_vm11, %v9286_v37 }
0x3ead   : > { %13985 = vmatprep.mubr.msk.f32.mxu1 %vm14974_vm0, %v14973_v0  ;;  %13984 = vmatpush3.msra.mxu1 %v16663_v26 }
0x3eae   : > { %13988 = vmatprep.subr.mxu1 %v14973_v0 }
0x3eb2   : > { %v14615_v38 = vpop.eup %14614 }
0x3eb3   : > { %v8906_v39 = vmul.f32 %v14615_v38, %v8882_v52 }
0x3eb5   : > { %v8913_v42 = vmul.f32 %v16531_v40, %v8906_v39 }
0x3eb6   : > { %v14617_v43 = vpop.eup %14616 }
0x3eb7   : > { %v16611_v19 = vadd.f32 %v16534_v22, %v8913_v42  ;;  %v8907_v46 = vmul.f32 %v14617_v43, %v8883_v18 }
0x3eb9   : > { %13941 = vmatmul.mubr.msk.f32.gmra.mrb[88].mxu0 %vm1021_vm10, %v16611_v19  ;;  %v8914_v48 = vmul.f32 %v16531_v40, %v8907_v46 }
0x3eba   : > { %13943 = vmatprep.mubr.msk.f32.mxu0 %vm14974_vm0, %v14973_v0 }
0x3ebb   : > { %v16619_v44 = vadd.f32 %v16534_v22, %v8914_v48 }
0x3ebd   : > { %13944 = vmatmul.mubr.msk.f32.gmra.mrb[90].mxu0 %vm1021_vm10, %v16619_v44 }
0x3ebe   : > { %13965 = vmatprep.mubr.msk.f32.mxu0 %vm14974_vm0, %v14973_v0 }
0x3ec1   : > { %13966 = vmatmul.mubr.msk.f32.vlgmr.msra.gmra.mrb[92].mxu0 %vm1456_vm11, %v16600_v31 }
0x3ec2   : > { %13970 = vmatprep.mubr.msk.f32.mxu0 %vm14974_vm0, %v14973_v0 }
0x3f7f   : > { %v9359_v33 = vpop.f32.mrb[94].mxu1 }
0x3f80   : > { %v13977_v40 = vpop.f32.mrb[95].mxu1  ;;  %v9363_v49 = vsel %vm2734_vm2, %v9359_v33, -inf }
0x3f81   : > { %9364 = vmax.xlane.f32.xlu0 %v9363_v49 }
0x3f8c   : > { %v9015_v47 = vpop.f32.mrb[88].mxu0 }
0x3f8d   : > { %v13942_v22 = vpop.f32.mrb[89].mxu0  ;;  %v16630_v50 = vadd.f32 %v12902_v30, %v9015_v47 }
0x3f8f   : > { %v11030_v24 = vrot.slane %v16630_v50, 4  ;;  %v10076_v47 = vrot.slane %v16630_v50, 6  ;;  %v16712_v50 = vld [vmem:[%s17112_s16 + $0x30] sm:$0xff] }
0x3f90   : > { %v9020_v51 = vpop.f32.mrb[90].mxu0 }
0x3f91   : > { %v9021_v54 = vadd.f32 %v12902_v30, %v9020_v51  ;;  %v13945_v16 = vpop.f32.mrb[91].mxu0  ;;  %v10075_v51 = vrot.slane %v16600_v31, 6 }
0x3f93   : > { %v11031_v57 = vrot.slane %v9021_v54, 4  ;;  %v16703_v54 = vsel %vm3612_vm3, %v10075_v51, %v10076_v47 }
0x3f94   : > { %v9194_v59 = vpop.f32.mrb[92].mxu0 }
0x3f95   : > { %v16634_v27 = vsel %vm914_vm1, %v11030_v24, %v11031_v57  ;;  %v13967_v61 = vpop.f32.mrb[93].mxu0  ;;  %v9198_v28 = vsel %vm2734_vm2, %v9194_v59, -inf }
0x3f96   : > { %9199 = vmax.xlane.f32.xlu1 %v9198_v28 }
0x3fa7   : > { %9374 = vrot.lane.b32.xlu1 %v16586_v45, %s14978_s18 }
0x400e   : > { %v9365_v5 = vpop.xlane.xlu0 %9364 }
0x400f   : > { %v9366_v62 = vsub.f32 %v9359_v33, %v9365_v5 }
0x4011   : > { %v9367_v21 = vmul.f32 1.442695, %v9366_v62 }
0x4013   : > { %14618 = vpow2.f32 %v9367_v21 }
0x401d   : > { %v14619_v29 = vpop.eup %14618 }
0x401e   : > { %v9369_v41 = vsel %vm2734_vm2, %v14619_v29, 0.0 }
0x401f   : > { %9370 = vadd.xlane.f32.xlu0 %v9369_v41 }
0x4023   : > { %v9200_v8 = vpop.xlane.xlu1 %9199 }
0x4024   : > { %v9201_v6 = vsub.f32 %v9194_v59, %v9200_v8 }
0x4026   : > { %v9202_v17 = vmul.f32 1.442695, %v9201_v6 }
0x4027   : > { %v9375_v55 = vpop.permute.xlu1 %9374 }
0x4028   : > { %14620 = vpow2.f32 %v9202_v17 }
0x4032   : > { %v14621_v58 = vpop.eup %14620 }
0x4033   : > { %v9204_v11 = vsel %vm2734_vm2, %v14621_v58, 0.0 }
0x4034   : > { %9205 = vadd.xlane.f32.xlu0 %v9204_v11 }
0x404a   : > { %9209 = vrot.lane.b32.xlu0 %v16586_v45, %s14977_s0 }
0x404e   : > { %9598 = vrot.lane.b32.xlu0 %v16586_v45, %s17194_s2 }
0x4052   : > { %9596 = vrot.lane.b32.xlu0 %v16600_v31, %s17194_s2 }
0x40ac   : > { %v9371_v9 = vpop.xlane.xlu0 %9370 }
0x40c1   : > { %v9206_v13 = vpop.xlane.xlu0 %9205 }
0x40c2   : > { %14622 = vrcp.f32 %v9206_v13 }
0x40c3   : > { %14624 = vrcp.f32 %v9371_v9 }
0x40c5   : > { %v9210_v3 = vpop.permute.xlu0 %9209 }
0x40c6   : > { %13969 = vmatpush3.msra.mxu0 %v9210_v3 }
0x40c7   : > { %13978 = vmatprep.subr.mxu0 %v14973_v0 }
0x40c9   : > { %v9599_v7 = vpop.permute.xlu0 %9598 }
0x40cc   : > { %v14623_v52 = vpop.eup %14622 }
0x40cd   : > { %v9208_v53 = vmul.f32 %v14623_v52, %v14621_v58  ;;  %v14625_v14 = vpop.eup %14624  ;;  %v9597_v20 = vpop.permute.xlu0 %9596 }
0x40ce   : > { %v9373_v18 = vmul.f32 %v14625_v14, %v14619_v29 }
0x40cf   : > { %13971 = vmatmul.mubr.msk.f32.vlgmr.msra.gmra.mrb[94].mxu0 %vm1456_vm11, %v9208_v53  ;;  %v16736_v53 = vld [vmem:[%s17112_s16 + $0x38] sm:$0xff] }
0x40d0   : > { %13979 = vmatpush3.msra.mxu0 %v9375_v55  ;;  %13980 = vmatprep.mubr.msk.f32.mxu0 %vm14974_vm0, %v14973_v0 }
0x40d1   : > { %13993 = vmatprep.subr.mxu0 %v14973_v0 }
0x40d3   : > { %13981 = vmatmul.mubr.msk.f32.vlgmr.msra.gmra.mrb[96].mxu0 %vm1456_vm11, %v9373_v18 }
0x40d4   : > { %13995 = vmatprep.mubr.msk.f32.mxu0 %vm14974_vm0, %v14973_v0 }
0x40d7   : > { %13994 = vmatpush3.xpose.msk.msra.mxu0 %vm1456_vm11, %v9599_v7 }
0x40d8   : > { %13998 = vmatprep.subr.mxu0 %v14973_v0 }
0x40da   : > { %13996 = vmatmul.mubr.msk.f32.vlgmr.msra.gmra.mrb[98].mxu0 %vm1456_vm11, %v9597_v20 }
0x40db   : > { %14000 = vmatprep.mubr.msk.f32.mxu0 %vm14974_vm0, %v14973_v0 }
0x41a2   : > { %v9281_v30 = vpop.f32.mrb[94].mxu0 }
0x41a3   : > { %v13972_v25 = vpop.f32.mrb[95].mxu0 }
0x41a6   : > { %v9446_v12 = vpop.f32.mrb[96].mxu0 }
0x41a7   : > { %v13982_v34 = vpop.f32.mrb[97].mxu0  ;;  %13986 = vmatmul.mubr.msk.f32.vlgmr.msra.gmra.mrb[96].mxu1 %vm1456_vm11, %v9446_v12 }
0x41a8   : > { %13989 = vmatpush3.msra.mxu1 %v16670_v4  ;;  %13990 = vmatprep.mubr.msk.f32.mxu1 %vm14974_vm0, %v14973_v0 }
0x41a9   : > { %14003 = vmatprep.subr.mxu1 %v14973_v0 }
0x41ad   : > { %v9670_v23 = vpop.f32.mrb[98].mxu0 }
0x41ae   : > { %v13997_v35 = vpop.f32.mrb[99].mxu0  ;;  %v9674_v36 = vsel %vm2734_vm2, %v9670_v23, -inf }
0x41af   : > { %9675 = vmax.xlane.f32.xlu0 %v9674_v36  ;;  %13991 = vmatmul.mubr.msk.f32.vlgmr.msra.gmra.mrb[96].mxu1 %vm1456_vm11, %v9281_v30 }
0x41b0   : > { %14005 = vmatprep.mubr.msk.f32.mxu1 %vm14974_vm0, %v14973_v0  ;;  %14004 = vmatpush3.msra.mxu1 %v16712_v50 }
0x41b1   : > { %14013 = vmatprep.subr.mxu1 %v14973_v0 }
0x41c5   : > { %9685 = vrot.lane.b32.xlu0 %v16586_v45, %s17195_s11 }
0x41c9   : > { %9835 = vrot.lane.b32.xlu0 %v16600_v31, %s17189_s30 }
0x423c   : > { %v9676_v37 = vpop.xlane.xlu0 %9675 }
0x423d   : > { %v9677_v38 = vsub.f32 %v9670_v23, %v9676_v37 }
0x423f   : > { %v9678_v39 = vmul.f32 1.442695, %v9677_v38 }
0x4240   : > { %v9686_v42 = vpop.permute.xlu0 %9685 }
0x4241   : > { %14626 = vpow2.f32 %v9678_v39  ;;  %13999 = vmatpush3.msra.mxu0 %v9686_v42 }
0x4242   : > { %14008 = vmatprep.subr.mxu0 %v14973_v0 }
0x4244   : > { %v9836_v22 = vpop.permute.xlu0 %9835 }
0x424b   : > { %v14627_v43 = vpop.eup %14626 }
0x424c   : > { %v9680_v46 = vsel %vm2734_vm2, %v14627_v43, 0.0 }
0x424d   : > { %9681 = vadd.xlane.f32.xlu1 %v9680_v46 }
0x425e   : > { %9837 = vrot.lane.b32.xlu1 %v16586_v45, %s17189_s30 }
0x42da   : > { %v9682_v48 = vpop.xlane.xlu1 %9681 }
0x42db   : > { %14628 = vrcp.f32 %v9682_v48 }
0x42de   : > { %v9838_v49 = vpop.permute.xlu1 %9837 }
0x42e5   : > { %v14629_v33 = vpop.eup %14628 }
0x42e6   : > { %v9684_v40 = vmul.f32 %v14629_v33, %v14627_v43 }
0x42e8   : > { %14001 = vmatmul.mubr.msk.f32.vlgmr.msra.gmra.mrb[100].mxu0 %vm1456_vm11, %v9684_v40 }
0x42e9   : > { %14009 = vmatpush3.xpose.msk.msra.mxu0 %vm1456_vm11, %v9838_v49  ;;  %14010 = vmatprep.mubr.msk.f32.mxu0 %vm14974_vm0, %v14973_v0 }
0x42ea   : > { %14023 = vmatprep.subr.mxu0 %v14973_v0 }
0x42ec   : > { %14011 = vmatmul.mubr.msk.f32.vlgmr.msra.gmra.mrb[102].mxu0 %vm1456_vm11, %v9836_v22 }
0x42ed   : > { %14024 = vmatpush3.xpose.msk.msra.mxu0 %vm1456_vm11, %v16592_v56  ;;  %14025 = vmatprep.mubr.msk.f32.mxu0 %vm14974_vm0, %v14973_v0 }
0x42ee   : > { %14028 = vmatprep.subr.mxu0 %v14973_v0 }
0x42f0   : > { %14026 = vmatmul.mubr.msk.f32.vlgmr.msra.gmra.mrb[104].mxu0 %vm1456_vm11, %v16703_v54 }
0x42f1   : > { %14030 = vmatprep.mubr.msk.f32.mxu0 %vm14974_vm0, %v14973_v0 }
0x43bb   : > { %v9757_v31 = vpop.f32.mrb[100].mxu0 }
0x43bc   : > { %v14002_v16 = vpop.f32.mrb[101].mxu0  ;;  %14006 = vmatmul.mubr.msk.f32.vlgmr.msra.gmra.mrb[96].mxu1 %vm1456_vm11, %v9757_v31 }
0x43bd   : > { %14015 = vmatprep.mubr.msk.f32.mxu1 %vm14974_vm0, %v14973_v0 }
0x43bf   : > { %v9909_v24 = vpop.f32.mrb[102].mxu0 }
0x43c0   : > { %v14012_v57 = vpop.f32.mrb[103].mxu0  ;;  %v9913_v59 = vsel %vm2734_vm2, %v9909_v24, -inf }
0x43c1   : > { %9914 = vmax.xlane.f32.xlu1 %v9913_v59 }
0x43c3   : > { %v10149_v61 = vpop.f32.mrb[104].mxu0 }
0x43c4   : > { %v14027_v28 = vpop.f32.mrb[105].mxu0  ;;  %v10153_v8 = vsel %vm2734_vm2, %v10149_v61, -inf }
0x43d2   : > { %10242 = vrot.lane.b32.xlu1 %v16592_v56, %s14976_s6 }
0x43d6   : > { %10240 = vrot.lane.b32.xlu1 %v16703_v54, %s14976_s6 }
0x444e   : > { %v9915_v5 = vpop.xlane.xlu1 %9914 }
0x444f   : > { %v9916_v62 = vsub.f32 %v9909_v24, %v9915_v5 }
0x4451   : > { %v9917_v21 = vmul.f32 1.442695, %v9916_v62 }
0x4452   : > { %v10243_v14 = vpop.permute.xlu1 %10242 }
0x4453   : > { %14630 = vpow2.f32 %v9917_v21 }
0x4456   : > { %v10241_v7 = vpop.permute.xlu1 %10240 }
0x445d   : > { %v14631_v29 = vpop.eup %14630 }
0x445e   : > { %v9919_v41 = vsel %vm2734_vm2, %v14631_v29, 0.0 }
0x445f   : > { %9920 = vadd.xlane.f32.xlu0 %v9919_v41 }
0x4475   : > { %9924 = vrot.lane.b32.xlu0 %v16586_v45, %s17196_s26 }
0x4494   : > { %10154 = vmax.xlane.f32.xlu0 %v10153_v8 }
0x44ec   : > { %v9921_v6 = vpop.xlane.xlu0 %9920 }
0x44ed   : > { %14632 = vrcp.f32 %v9921_v6 }
0x44f0   : > { %v9925_v17 = vpop.permute.xlu0 %9924 }
0x44f1   : > { %14014 = vmatpush3.msra.mxu1 %v9925_v17 }
0x44f2   : > { %14018 = vmatprep.subr.mxu1 %v14973_v0 }
0x44f7   : > { %v14633_v58 = vpop.eup %14632 }
0x44f8   : > { %v9923_v11 = vmul.f32 %v14633_v58, %v14631_v29 }
0x44fa   : > { %14016 = vmatmul.mubr.msk.f32.vlgmr.msra.gmra.mrb[98].mxu1 %vm1456_vm11, %v9923_v11 }
0x44fb   : > { %14020 = vmatprep.mubr.msk.f32.mxu1 %vm14974_vm0, %v14973_v0  ;;  %14019 = vmatpush3.msra.mxu1 %v16736_v53 }
0x44fc   : > { %14033 = vmatprep.subr.mxu1 %v14973_v0 }
0x4521   : > { %v10155_v9 = vpop.xlane.xlu0 %10154 }
0x4522   : > { %v10156_v13 = vsub.f32 %v10149_v61, %v10155_v9 }
0x4524   : > { %v10157_v3 = vmul.f32 1.442695, %v10156_v13 }
0x4526   : > { %14634 = vpow2.f32 %v10157_v3 }
0x4530   : > { %v14635_v45 = vpop.eup %14634 }
0x4531   : > { %v10159_v52 = vsel %vm2734_vm2, %v14635_v45, 0.0 }
0x4532   : > { %10160 = vadd.xlane.f32.xlu0 %v10159_v52 }
0x45bf   : > { %v10161_v39 = vpop.xlane.xlu0 %10160 }
0x45cd   : > { %v9996_v55 = vpop.f32.mrb[98].mxu1 }
0x45ce   : > { %v14017_v18 = vpop.f32.mrb[99].mxu1  ;;  %14021 = vmatmul.mubr.msk.f32.vlgmr.msra.gmra.mrb[96].mxu1 %vm1456_vm11, %v9996_v55 }
0x45cf   : > { %14034 = vmatpush3.xpose.msk.msra.mxu1 %vm1456_vm11, %v10243_v14  ;;  %14035 = vmatprep.mubr.msk.f32.mxu1 %vm14974_vm0, %v14973_v0 }
0x45d0   : > { %14043 = vmatprep.subr.mxu1 %v14973_v0 }
0x45d2   : > { %14036 = vmatmul.mubr.msk.f32.vlgmr.msra.gmra.mrb[100].mxu1 %vm1456_vm11, %v10241_v7 }
0x45d3   : > { %14044 = vmatpush3.msra.mxu1 %v16663_v26  ;;  %14045 = vmatprep.mubr.msk.f32.mxu1 %vm14974_vm0, %v14973_v0 }
0x45d4   : > { %14048 = vmatprep.subr.mxu1 %v14973_v0 }
0x46a1   : > { %v16750_v20 = vpop.f32.mrb[96].mxu1 }
0x46a2   : > { %v14022_v30 = vpop.f32.mrb[97].mxu1 }
0x46a5   : > { %v10314_v25 = vpop.f32.mrb[100].mxu1 }
0x46a6   : > { %v14037_v12 = vpop.f32.mrb[101].mxu1  ;;  %v10318_v34 = vsel %vm2734_vm2, %v10314_v25, -inf }
0x46a7   : > { %10319 = vmax.xlane.f32.xlu1 %v10318_v34 }
0x46b8   : > { %10329 = vrot.lane.b32.xlu1 %v16592_v56, %s14978_s18 }
0x46bc   : > { %10553 = vrot.lane.b32.xlu1 %v16592_v56, %s17194_s2 }
0x46c0   : > { %10551 = vrot.lane.b32.xlu1 %v16703_v54, %s17194_s2 }
0x4734   : > { %v10320_v23 = vpop.xlane.xlu1 %10319 }
0x4735   : > { %v10321_v35 = vsub.f32 %v10314_v25, %v10320_v23 }
0x4737   : > { %v10322_v36 = vmul.f32 1.442695, %v10321_v35 }
0x4738   : > { %v10330_v33 = vpop.permute.xlu1 %10329 }
0x4739   : > { %14636 = vpow2.f32 %v10322_v36 }
0x473a   : > { %14638 = vrcp.f32 %v10161_v39 }
0x473c   : > { %v10554_v49 = vpop.permute.xlu1 %10553 }
0x4740   : > { %v10552_v22 = vpop.permute.xlu1 %10551 }
0x4743   : > { %v14637_v37 = vpop.eup %14636 }
0x4744   : > { %v10324_v38 = vsel %vm2734_vm2, %v14637_v37, 0.0  ;;  %v14639_v43 = vpop.eup %14638 }
0x4745   : > { %10325 = vadd.xlane.f32.xlu0 %v10324_v38  ;;  %v10163_v46 = vmul.f32 %v14639_v43, %v14635_v45 }
0x475b   : > { %10164 = vrot.lane.b32.xlu0 %v16592_v56, %s14977_s0 }
0x47d2   : > { %v10326_v42 = vpop.xlane.xlu0 %10325 }
0x47d3   : > { %14640 = vrcp.f32 %v10326_v42 }
0x47d6   : > { %v10165_v48 = vpop.permute.xlu0 %10164 }
0x47d7   : > { %14029 = vmatpush3.msra.mxu0 %v10165_v48 }
0x47d8   : > { %14031 = vmatmul.mubr.msk.f32.vlgmr.msra.gmra.mrb[106].mxu0 %vm1456_vm11, %v10163_v46  ;;  %14038 = vmatprep.subr.mxu0 %v14973_v0 }
0x47d9   : > { %14039 = vmatpush3.msra.mxu0 %v10330_v33  ;;  %14040 = vmatprep.mubr.msk.f32.mxu0 %vm14974_vm0, %v14973_v0 }
0x47da   : > { %14053 = vmatprep.subr.mxu0 %v14973_v0 }
0x47dd   : > { %v14641_v40 = vpop.eup %14640 }
0x47de   : > { %v10328_v47 = vmul.f32 %v14641_v40, %v14637_v37 }
0x47e0   : > { %14041 = vmatmul.mubr.msk.f32.vlgmr.msra.gmra.mrb[108].mxu0 %vm1456_vm11, %v10328_v47 }
0x47e1   : > { %14054 = vmatpush3.xpose.msk.msra.mxu0 %vm1456_vm11, %v10554_v49  ;;  %14055 = vmatprep.mubr.msk.f32.mxu0 %vm14974_vm0, %v14973_v0 }
0x47e2   : > { %14058 = vmatprep.subr.mxu0 %v14973_v0 }
0x47e4   : > { %14056 = vmatmul.mubr.msk.f32.vlgmr.msra.gmra.mrb[110].mxu0 %vm1456_vm11, %v10552_v22 }
0x47e5   : > { %14060 = vmatprep.mubr.msk.f32.mxu0 %vm14974_vm0, %v14973_v0 }
0x48ab   : > { %v10236_v51 = vpop.f32.mrb[106].mxu0 }
0x48ac   : > { %v14032_v31 = vpop.f32.mrb[107].mxu0 }
0x48b3   : > { %v10401_v16 = vpop.f32.mrb[108].mxu0 }
0x48b4   : > { %v14042_v24 = vpop.f32.mrb[109].mxu0  ;;  %14046 = vmatmul.mubr.msk.f32.vlgmr.msra.gmra.mrb[102].mxu1 %vm1456_vm11, %v10401_v16 }
0x48b5   : > { %14049 = vmatpush3.msra.mxu1 %v16670_v4  ;;  %14050 = vmatprep.mubr.msk.f32.mxu1 %vm14974_vm0, %v14973_v0 }
0x48b6   : > { %14063 = vmatprep.subr.mxu1 %v14973_v0 }
0x48b7   : > { %v10625_v57 = vpop.f32.mrb[110].mxu0 }
0x48b8   : > { %v14057_v59 = vpop.f32.mrb[111].mxu0  ;;  %v10629_v61 = vsel %vm2734_vm2, %v10625_v57, -inf }
0x48b9   : > { %10630 = vmax.xlane.f32.xlu0 %v10629_v61 }
0x48bc   : > { %14051 = vmatmul.mubr.msk.f32.vlgmr.msra.gmra.mrb[102].mxu1 %vm1456_vm11, %v10236_v51 }
0x48bd   : > { %14064 = vmatpush3.msra.mxu1 %v16712_v50  ;;  %14065 = vmatprep.mubr.msk.f32.mxu1 %vm14974_vm0, %v14973_v0 }
0x48be   : > { %14073 = vmatprep.subr.mxu1 %v14973_v0 }
0x48cf   : > { %10640 = vrot.lane.b32.xlu0 %v16592_v56, %s17195_s11 }
0x48d3   : > { %10790 = vrot.lane.b32.xlu0 %v16703_v54, %s17189_s30 }
0x4946   : > { %v10631_v28 = vpop.xlane.xlu0 %10630 }
0x4947   : > { %v10632_v5 = vsub.f32 %v10625_v57, %v10631_v28 }
0x4949   : > { %v10633_v62 = vmul.f32 1.442695, %v10632_v5 }
0x494a   : > { %v10641_v21 = vpop.permute.xlu0 %10640 }
0x494b   : > { %14642 = vpow2.f32 %v10633_v62  ;;  %14059 = vmatpush3.msra.mxu0 %v10641_v21 }
0x494c   : > { %14068 = vmatprep.subr.mxu0 %v14973_v0 }
0x494e   : > { %v10791_v58 = vpop.permute.xlu0 %10790 }
0x4955   : > { %v14643_v29 = vpop.eup %14642 }
0x4956   : > { %v10635_v41 = vsel %vm2734_vm2, %v14643_v29, 0.0 }
0x4957   : > { %10636 = vadd.xlane.f32.xlu1 %v10635_v41 }
0x4968   : > { %10792 = vrot.lane.b32.xlu1 %v16592_v56, %s17189_s30 }
0x49e4   : > { %v10637_v8 = vpop.xlane.xlu1 %10636 }
0x49e5   : > { %14644 = vrcp.f32 %v10637_v8 }
0x49e8   : > { %v10793_v54 = vpop.permute.xlu1 %10792 }
0x49ef   : > { %v14645_v6 = vpop.eup %14644 }
0x49f0   : > { %v10639_v17 = vmul.f32 %v14645_v6, %v14643_v29 }
0x49f2   : > { %14061 = vmatmul.mubr.msk.f32.vlgmr.msra.gmra.mrb[112].mxu0 %vm1456_vm11, %v10639_v17 }
0x49f3   : > { %14069 = vmatpush3.xpose.msk.msra.mxu0 %vm1456_vm11, %v10793_v54  ;;  %14070 = vmatprep.mubr.msk.f32.mxu0 %vm14974_vm0, %v14973_v0 }
0x49f4   : > { %14083 = vmatprep.subr.mxu0 %v14973_v0 }
0x49f6   : > { %14071 = vmatmul.mubr.msk.f32.vlgmr.msra.gmra.mrb[114].mxu0 %vm1456_vm11, %v10791_v58 }
0x49f7   : > { %14084 = vmatpush3.xpose.msk.msra.mxu0 %vm1456_vm11, %v16594_v10  ;;  %14085 = vmatprep.mubr.msk.f32.mxu0 %vm14974_vm0, %v14973_v0 }
0x49f8   : > { %14088 = vmatprep.subr.mxu0 %v14973_v0 }
0x49fa   : > { %14086 = vmatmul.mubr.msk.f32.vlgmr.msra.gmra.mrb[116].mxu0 %vm1456_vm11, %v16634_v27 }
0x49fb   : > { %14090 = vmatprep.mubr.msk.f32.mxu0 %vm14974_vm0, %v14973_v0 }
0x4ac5   : > { %v10712_v11 = vpop.f32.mrb[112].mxu0 }
0x4ac6   : > { %v14062_v9 = vpop.f32.mrb[113].mxu0  ;;  %14066 = vmatmul.mubr.msk.f32.vlgmr.msra.gmra.mrb[102].mxu1 %vm1456_vm11, %v10712_v11 }
0x4ac7   : > { %14075 = vmatprep.mubr.msk.f32.mxu1 %vm14974_vm0, %v14973_v0 }
0x4ac9   : > { %v10864_v13 = vpop.f32.mrb[114].mxu0 }
0x4aca   : > { %v14072_v3 = vpop.f32.mrb[115].mxu0  ;;  %v10868_v45 = vsel %vm2734_vm2, %v10864_v13, -inf }
0x4acb   : > { %10869 = vmax.xlane.f32.xlu1 %v10868_v45 }
0x4acd   : > { %v11104_v52 = vpop.f32.mrb[116].mxu0 }
0x4ace   : > { %v14087_v14 = vpop.f32.mrb[117].mxu0  ;;  %v11108_v12 = vsel %vm2734_vm2, %v11104_v52, -inf }
0x4adc   : > { %11197 = vrot.lane.b32.xlu1 %v16594_v10, %s14976_s6 }
0x4ae0   : > { %11195 = vrot.lane.b32.xlu1 %v16634_v27, %s14976_s6 }
0x4b58   : > { %v10870_v55 = vpop.xlane.xlu1 %10869 }
0x4b59   : > { %v10871_v18 = vsub.f32 %v10864_v13, %v10870_v55 }
0x4b5b   : > { %v10872_v7 = vmul.f32 1.442695, %v10871_v18 }
0x4b5c   : > { %v11198_v43 = vpop.permute.xlu1 %11197 }
0x4b5d   : > { %14646 = vpow2.f32 %v10872_v7 }
0x4b60   : > { %v11196_v33 = vpop.permute.xlu1 %11195 }
0x4b67   : > { %v14647_v30 = vpop.eup %14646 }
0x4b68   : > { %v10874_v25 = vsel %vm2734_vm2, %v14647_v30, 0.0 }
0x4b69   : > { %10875 = vadd.xlane.f32.xlu0 %v10874_v25 }
0x4b7f   : > { %10879 = vrot.lane.b32.xlu0 %v16592_v56, %s17196_s26 }
0x4b9e   : > { %11109 = vmax.xlane.f32.xlu0 %v11108_v12 }
0x4bf6   : > { %v10876_v34 = vpop.xlane.xlu0 %10875 }
0x4bf7   : > { %14648 = vrcp.f32 %v10876_v34 }
0x4bfa   : > { %v10880_v23 = vpop.permute.xlu0 %10879 }
0x4bfb   : > { %14074 = vmatpush3.msra.mxu1 %v10880_v23  ;;  %v12966_v23 = vld [vmem:[#allocation12 + $0x1] ss:$0 sm:$0xff] }
0x4bfc   : > { %14078 = vmatprep.subr.mxu1 %v14973_v0 }
0x4c01   : > { %v14649_v35 = vpop.eup %14648 }
0x4c02   : > { %v10878_v36 = vmul.f32 %v14649_v35, %v14647_v30 }
0x4c04   : > { %14076 = vmatmul.mubr.msk.f32.vlgmr.msra.gmra.mrb[104].mxu1 %vm1456_vm11, %v10878_v36 }
0x4c05   : > { %14079 = vmatpush3.msra.mxu1 %v16736_v53  ;;  %14080 = vmatprep.mubr.msk.f32.mxu1 %vm14974_vm0, %v14973_v0 }
0x4c06   : > { %14093 = vmatprep.subr.mxu1 %v14973_v0 }
0x4c2b   : > { %v11110_v56 = vpop.xlane.xlu0 %11109 }
0x4c2c   : > { %v11111_v37 = vsub.f32 %v11104_v52, %v11110_v56 }
0x4c2e   : > { %v11112_v38 = vmul.f32 1.442695, %v11111_v37 }
0x4c30   : > { %14650 = vpow2.f32 %v11112_v38 }
0x4c3a   : > { %v14651_v39 = vpop.eup %14650 }
0x4c3b   : > { %v11114_v42 = vsel %vm2734_vm2, %v14651_v39, 0.0 }
0x4c3c   : > { %11115 = vadd.xlane.f32.xlu0 %v11114_v42 }
0x4cc9   : > { %v11116_v59 = vpop.xlane.xlu0 %11115 }
0x4cd7   : > { %v10951_v46 = vpop.f32.mrb[104].mxu1 }
0x4cd8   : > { %v14077_v48 = vpop.f32.mrb[105].mxu1  ;;  %14081 = vmatmul.mubr.msk.f32.vlgmr.msra.gmra.mrb[102].mxu1 %vm1456_vm11, %v10951_v46 }
0x4cd9   : > { %14094 = vmatpush3.xpose.msk.msra.mxu1 %vm1456_vm11, %v11198_v43  ;;  %14095 = vmatprep.mubr.msk.f32.mxu1 %vm14974_vm0, %v14973_v0 }
0x4cda   : > { %14103 = vmatprep.subr.mxu1 %v14973_v0 }
0x4cdc   : > { %14096 = vmatmul.mubr.msk.f32.vlgmr.msra.gmra.mrb[106].mxu1 %vm1456_vm11, %v11196_v33 }
0x4cdd   : > { %14104 = vmatpush3.msra.mxu1 %v16663_v26  ;;  %14105 = vmatprep.mubr.msk.f32.mxu1 %vm14974_vm0, %v14973_v0 }
0x4cde   : > { %14108 = vmatprep.subr.mxu1 %v14973_v0 }
0x4dab   : > { %v16838_v40 = vpop.f32.mrb[102].mxu1 }
0x4dac   : > { %v14082_v49 = vpop.f32.mrb[103].mxu1  ;;  %v11985_v12 = vrot.slane %v16838_v40, 2 }
0x4dae   : > { %v11990_v34 = vsel %vm1549_vm13, %v16750_v20, %v11985_v12 }
0x4daf   : > { %v11269_v47 = vpop.f32.mrb[106].mxu1  ;;  %v12000_v56 = vadd.f32 %v12966_v23, %v11990_v34 }
0x4db0   : > { %v14097_v22 = vpop.f32.mrb[107].mxu1  ;;  %v11273_v51 = vsel %vm2734_vm2, %v11269_v47, -inf }
0x4db1   : > { %11274 = vmax.xlane.f32.xlu1 %v11273_v51  ;;  %v12003_v42 = vadd.f32 %v12000_v56, %v16539_v32 }
0x4db3   : > { %v12006_v43 = vsel %vm1021_vm10, %v12003_v42, 0.0 }
0x4dc2   : > { %11284 = vrot.lane.b32.xlu1 %v16594_v10, %s14978_s18  ;;  %s14369_s18 = smul.u32 24, %s17200_s28 }
0x4dc6   : > { %11508 = vrot.lane.b32.xlu1 %v16594_v10, %s17194_s2 }
0x4dca   : > { %11506 = vrot.lane.b32.xlu1 %v16634_v27, %s17194_s2  ;;  %s17197_s2 = sld [smem:[#allocation35_spill]] }
0x4dd0   : > { %s898_s1 = scalar_lea.vmem %s17197_s2, %s14369_s18 }
0x4e3e   : > { %v11275_v26 = vpop.xlane.xlu1 %11274 }
0x4e3f   : > { %v11276_v31 = vsub.f32 %v11269_v47, %v11275_v26 }
0x4e41   : > { %v11277_v16 = vmul.f32 1.442695, %v11276_v31 }
0x4e42   : > { %v11285_v21 = vpop.permute.xlu1 %11284 }
0x4e43   : > { %14652 = vpow2.f32 %v11277_v16 }
0x4e44   : > { %14654 = vrcp.f32 %v11116_v59 }
0x4e46   : > { %v11509_v41 = vpop.permute.xlu1 %11508 }
0x4e4a   : > { %v11507_v6 = vpop.permute.xlu1 %11506 }
0x4e4d   : > { %v14653_v24 = vpop.eup %14652 }
0x4e4e   : > { %v11279_v57 = vsel %vm2734_vm2, %v14653_v24, 0.0  ;;  %v14655_v28 = vpop.eup %14654 }
0x4e4f   : > { %11280 = vadd.xlane.f32.xlu0 %v11279_v57  ;;  %v11118_v5 = vmul.f32 %v14655_v28, %v14651_v39 }
0x4e65   : > { %11119 = vrot.lane.b32.xlu0 %v16594_v10, %s14977_s0 }
0x4edc   : > { %v11281_v61 = vpop.xlane.xlu0 %11280 }
0x4edd   : > { %14656 = vrcp.f32 %v11281_v61 }
0x4ee0   : > { %v11120_v62 = vpop.permute.xlu0 %11119 }
0x4ee1   : > { %14089 = vmatpush3.msra.mxu0 %v11120_v62 }
0x4ee2   : > { %14091 = vmatmul.mubr.msk.f32.vlgmr.msra.gmra.mrb[118].mxu0 %vm1456_vm11, %v11118_v5  ;;  %14098 = vmatprep.subr.mxu0 %v14973_v0 }
0x4ee3   : > { %14099 = vmatpush3.msra.mxu0 %v11285_v21  ;;  %14100 = vmatprep.mubr.msk.f32.mxu0 %vm14974_vm0, %v14973_v0 }
0x4ee4   : > { %14113 = vmatprep.subr.mxu0 %v14973_v0 }
0x4ee7   : > { %v14657_v29 = vpop.eup %14656 }
0x4ee8   : > { %v11283_v8 = vmul.f32 %v14657_v29, %v14653_v24 }
0x4eea   : > { %14101 = vmatmul.mubr.msk.f32.vlgmr.msra.gmra.mrb[120].mxu0 %vm1456_vm11, %v11283_v8 }
0x4eeb   : > { %14114 = vmatpush3.xpose.msk.msra.mxu0 %vm1456_vm11, %v11509_v41  ;;  %14115 = vmatprep.mubr.msk.f32.mxu0 %vm14974_vm0, %v14973_v0 }
0x4eec   : > { %14118 = vmatprep.subr.mxu0 %v14973_v0 }
0x4eee   : > { %14116 = vmatmul.mubr.msk.f32.vlgmr.msra.gmra.mrb[122].mxu0 %vm1456_vm11, %v11507_v6  ;;  %v12967_v6 = vld [vmem:[%s17187_s20 + $0x20] sm:$0xff] }
0x4eef   : > { %14120 = vmatprep.mubr.msk.f32.mxu0 %vm14974_vm0, %v14973_v0 }
0x4fb5   : > { %v11191_v17 = vpop.f32.mrb[118].mxu0 }
0x4fb6   : > { %v14092_v54 = vpop.f32.mrb[119].mxu0 }
0x4fb7   : > { %v12970_v54 = vld [vmem:[%s17187_s20 + $0x38] sm:$0xff] }
0x4fbd   : > { %v11356_v58 = vpop.f32.mrb[120].mxu0 }
0x4fbe   : > { %v14102_v11 = vpop.f32.mrb[121].mxu0  ;;  %14106 = vmatmul.mubr.msk.f32.vlgmr.msra.gmra.mrb[108].mxu1 %vm1456_vm11, %v11356_v58 }
0x4fbf   : > { %14109 = vmatpush3.msra.mxu1 %v16670_v4  ;;  %14110 = vmatprep.mubr.msk.f32.mxu1 %vm14974_vm0, %v14973_v0 }
0x4fc0   : > { %14123 = vmatprep.subr.mxu1 %v14973_v0 }
0x4fc1   : > { %v11580_v9 = vpop.f32.mrb[122].mxu0 }
0x4fc2   : > { %v14117_v13 = vpop.f32.mrb[123].mxu0  ;;  %v11584_v3 = vsel %vm2734_vm2, %v11580_v9, -inf }
0x4fc3   : > { %11585 = vmax.xlane.f32.xlu0 %v11584_v3 }
0x4fc6   : > { %14111 = vmatmul.mubr.msk.f32.vlgmr.msra.gmra.mrb[108].mxu1 %vm1456_vm11, %v11191_v17 }
0x4fc7   : > { %14124 = vmatpush3.msra.mxu1 %v16712_v50  ;;  %14125 = vmatprep.mubr.msk.f32.mxu1 %vm14974_vm0, %v14973_v0 }
0x4fc8   : > { %14133 = vmatprep.subr.mxu1 %v14973_v0 }
0x4fd9   : > { %11595 = vrot.lane.b32.xlu0 %v16594_v10, %s17195_s11 }
0x4fdd   : > { %11745 = vrot.lane.b32.xlu0 %v16634_v27, %s17189_s30 }
0x5050   : > { %v11586_v4 = vpop.xlane.xlu0 %11585 }
0x5051   : > { %v11587_v45 = vsub.f32 %v11580_v9, %v11586_v4 }
0x5053   : > { %v11588_v52 = vmul.f32 1.442695, %v11587_v45 }
0x5054   : > { %v11596_v14 = vpop.permute.xlu0 %11595 }
0x5055   : > { %14658 = vpow2.f32 %v11588_v52  ;;  %14119 = vmatpush3.msra.mxu0 %v11596_v14 }
0x5056   : > { %14128 = vmatprep.subr.mxu0 %v14973_v0 }
0x5058   : > { %v11746_v25 = vpop.permute.xlu0 %11745 }
0x505f   : > { %v14659_v50 = vpop.eup %14658 }
0x5060   : > { %v11590_v55 = vsel %vm2734_vm2, %v14659_v50, 0.0 }
0x5061   : > { %11591 = vadd.xlane.f32.xlu1 %v11590_v55 }
0x5072   : > { %11747 = vrot.lane.b32.xlu1 %v16594_v10, %s17189_s30 }
0x50ee   : > { %v11592_v18 = vpop.xlane.xlu1 %11591 }
0x50ef   : > { %14660 = vrcp.f32 %v11592_v18 }
0x50f2   : > { %v11748_v27 = vpop.permute.xlu1 %11747 }
0x50f9   : > { %v14661_v7 = vpop.eup %14660 }
0x50fa   : > { %v11594_v30 = vmul.f32 %v14661_v7, %v14659_v50 }
0x50fc   : > { %14121 = vmatmul.mubr.msk.f32.vlgmr.msra.gmra.mrb[124].mxu0 %vm1456_vm11, %v11594_v30 }
0x50fd   : > { %14129 = vmatpush3.xpose.msk.msra.mxu0 %vm1456_vm11, %v11748_v27  ;;  %14130 = vmatprep.mubr.msk.f32.mxu0 %vm14974_vm0, %v14973_v0  ;;  %v16943_v27 = vld [vmem:[%s17118_s22 + $0x4] sm:$0x7] }
0x50fe   : > { %14285 = vmatprep.subr.bf16.mxu0 %v14975_v1 }
0x5100   : > { %14131 = vmatmul.mubr.msk.f32.vlgmr.msra.gmra.mrb[126].mxu0 %vm1456_vm11, %v11746_v25  ;;  %v16947_v25 = vrot.slane %v16943_v27, %v16012_v15 }
0x5101   : > { %14151 = vmatprep.mubr.msk.f32.mxu0 %vm14974_vm0, %v14973_v0 }
0x51cf   : > { %v11667_v35 = vpop.f32.mrb[124].mxu0 }
0x51d0   : > { %v14122_v36 = vpop.f32.mrb[125].mxu0  ;;  %14126 = vmatmul.mubr.msk.f32.vlgmr.msra.gmra.mrb[108].mxu1 %vm1456_vm11, %v11667_v35 }
0x51d1   : > { %14135 = vmatprep.mubr.msk.f32.mxu1 %vm14974_vm0, %v14973_v0 }
0x51d3   : > { %v11819_v37 = vpop.f32.mrb[126].mxu0 }
0x51d4   : > { %v14132_v38 = vpop.f32.mrb[127].mxu0  ;;  %v11823_v39 = vsel %vm2734_vm2, %v11819_v37, -inf }
0x51d5   : > { %11824 = vmax.xlane.f32.xlu1 %v11823_v39  ;;  %v12976_v38 = vld [vmem:[%s17188_s15 + $0x88] sm:$0xff] }
0x51d9   : > { %12007 = vadd.xlane.f32.xlu1 %v12006_v43 }
0x5262   : > { %v11825_v20 = vpop.xlane.xlu1 %11824 }
0x5263   : > { %v11826_v46 = vsub.f32 %v11819_v37, %v11825_v20  ;;  %v12975_v37 = vld [vmem:[%s17188_s15 + $0x80] sm:$0xff] }
0x5264   : > { %v14292_v39 = vpack.c.bf16 %v12976_v38, %v12975_v37  ;;  %v12979_v20 = vld [vmem:[%s17188_s15 + $0xa0] sm:$0xff] }
0x5265   : > { %v11827_v48 = vmul.f32 1.442695, %v11826_v46  ;;  %v12980_v46 = vld [vmem:[%s17188_s15 + $0xa8] sm:$0xff] }
0x5266   : > { %v12008_v31 = vpop.xlane.xlu1 %12007 }
0x5267   : > { %14662 = vpow2.f32 %v11827_v48  ;;  %v12015_v59 = vmul.f32 0.03125, %v12008_v31  ;;  %v14298_v48 = vpack.c.bf16 %v12980_v46, %v12979_v20  ;;  %v12987_v31 = vld [vmem:[%s17188_s15 + $0xe0] sm:$0xff] }
0x5269   : > { %v12018_v5 = vsub.f32 %v12003_v42, %v12015_v59  ;;  %v12978_v42 = vld [vmem:[%s17188_s15 + $0x98] sm:$0xff] }
0x526a   : > { %v12990_v59 = vld [vmem:[%s17188_s15 + $0xf8] sm:$0xff] }
0x526b   : > { %v12021_v41 = vmul.f32 %v12018_v5, %v12018_v5 }
0x526d   : > { %v12024_v8 = vsel %vm1021_vm10, %v12021_v41, 0.0 }
0x5271   : > { %v14663_v33 = vpop.eup %14662 }
0x5272   : > { %v11829_v40 = vsel %vm2734_vm2, %v14663_v33, 0.0 }
0x5273   : > { %11830 = vadd.xlane.f32.xlu0 %v11829_v40  ;;  %v12982_v40 = vld [vmem:[%s17188_s15 + $0xb8] sm:$0xff] }
0x5289   : > { %11834 = vrot.lane.b32.xlu0 %v16594_v10, %s17196_s26 }
0x5300   : > { %v11831_v49 = vpop.xlane.xlu0 %11830 }
0x5301   : > { %14664 = vrcp.f32 %v11831_v49 }
0x5304   : > { %v11835_v47 = vpop.permute.xlu0 %11834 }
0x5305   : > { %14134 = vmatpush3.msra.mxu1 %v11835_v47  ;;  %v12983_v47 = vld [vmem:[%s17188_s15 + $0xc0] sm:$0xff] }
0x5306   : > { %14138 = vmatprep.subr.mxu1 %v14973_v0 }
0x530b   : > { %v14665_v32 = vpop.eup %14664 }
0x530c   : > { %v11833_v22 = vmul.f32 %v14665_v32, %v14663_v33  ;;  %v12981_v33 = vld [vmem:[%s17188_s15 + $0xb0] sm:$0xff]  ;;  %v12984_v32 = vld [vmem:[%s17188_s15 + $0xc8] sm:$0xff] }
0x530d   : > { %v14301_v49 = vpack.c.bf16 %v12982_v40, %v12981_v33 }
0x530e   : > { %14136 = vmatmul.mubr.msk.f32.vlgmr.msra.gmra.mrb[110].mxu1 %vm1456_vm11, %v11833_v22  ;;  %v14304_v22 = vpack.c.bf16 %v12984_v32, %v12983_v47 }
0x530f   : > { %14139 = vmatpush3.msra.mxu1 %v16736_v53  ;;  %14140 = vmatprep.mubr.msk.f32.mxu1 %vm14974_vm0, %v14973_v0 }
0x5310   : > { %14291 = vmatprep.subr.bf16.mxu1 %v14975_v1 }
0x53e1   : > { %v11906_v51 = vpop.f32.mrb[110].mxu1 }
0x53e2   : > { %v14137_v26 = vpop.f32.mrb[111].mxu1  ;;  %14141 = vmatmul.mubr.msk.f32.vlgmr.msra.gmra.mrb[108].mxu1 %vm1456_vm11, %v11906_v51  ;;  %v12985_v51 = vld [vmem:[%s17188_s15 + $0xd0] sm:$0xff] }
0x53e3   : > { %14192 = vmatprep.mubr.msk.f32.mxu1 %vm14974_vm0, %v14973_v0  ;;  %14293 = vmatpush3.bf16.msra.mxu1 %v14292_v39  ;;  %v12986_v26 = vld [vmem:[%s17188_s15 + $0xd8] sm:$0xff] }
0x53e4   : > { %14294 = vmatprep.subr.bf16.mxu1 %v14975_v1 }
0x54b5   : > { %v11979_v10 = vpop.f32.mrb[108].mxu1 }
0x54b6   : > { %v11988_v16 = vrot.slane %v11979_v10, 4  ;;  %v14142_v24 = vpop.f32.mrb[109].mxu1  ;;  %v14307_v10 = vpack.c.bf16 %v12986_v26, %v12985_v51 }
0x54b8   : > { %v11991_v57 = vsel %vm914_vm1, %v11985_v12, %v11988_v16  ;;  %v12002_v53 = vadd.f32 %v12966_v23, %v11988_v16  ;;  %v12988_v16 = vld [vmem:[%s17188_s15 + $0xe8] sm:$0xff]  ;;  %vm12527_vm1 = vcmask 256000  }
0x54b9   : > { %v12001_v61 = vadd.f32 %v12966_v23, %v11991_v57  ;;  %v16952_v23 = vld [vmem:[%s17119_s23 + $0x4] sm:$0x7]  ;;  %v14310_v24 = vpack.c.bf16 %v12988_v16, %v12987_v31  ;;  %v12989_v57 = vld [vmem:[%s17188_s15 + $0xf0] sm:$0xff] }
0x54ba   : > { %v12005_v21 = vadd.f32 %v12002_v53, %v16619_v44  ;;  %v12969_v44 = vld [vmem:[%s17187_s20 + $0x30] sm:$0xff]  ;;  %v12055_v35 = vrot.slane %v16952_v23, %v16012_v15  ;;  %v14313_v53 = vpack.c.bf16 %v12990_v59, %v12989_v57 }
0x54bb   : > { %v12004_v28 = vadd.f32 %v12001_v61, %v16611_v19  ;;  %v12968_v19 = vld [vmem:[%s17187_s20 + $0x28] sm:$0xff]  ;;  %v14289_v58 = vpack.c.bf16 %v12970_v54, %v12969_v44  ;;  %v12977_v15 = vld [vmem:[%s17188_s15 + $0x90] sm:$0xff] }
0x54bc   : > { %v12012_v29 = vsel %vm5549_vm4, %v12005_v21, 0.0  ;;  %v14286_v17 = vpack.c.bf16 %v12968_v19, %v12967_v6  ;;  %v14295_v43 = vpack.c.bf16 %v12978_v42, %v12977_v15 }
0x54bd   : > { %v12009_v62 = vsel %vm1021_vm10, %v12004_v28, 0.0 }
0x54be   : > { %12010 = vadd.xlane.f32.xlu1 %v12009_v62  ;;  %14287 = vmatpush3.bf16.msra.mxu0 %v14286_v17 }
0x54bf   : > { %14288 = vmatprep.subr.bf16.mxu0 %v14975_v1  ;;  %14296 = vmatpush3.bf16.msra.mxu1 %v14295_v43 }
0x54c0   : > { %14297 = vmatprep.subr.bf16.mxu1 %v14975_v1 }
0x54c2   : > { %12013 = vadd.xlane.f32.xlu1 %v12012_v29  ;;  %14290 = vmatpush3.bf16.msra.mxu0 %v14289_v58  ;;  %v12971_v58 = vld [vmem:[#allocation13 + $0x1] ss:$0 sm:$0xff] }
0x54c3   : > { %14299 = vmatpush3.bf16.msra.mxu1 %v14298_v48 }
0x54c4   : > { %14300 = vmatprep.subr.bf16.mxu1 %v14975_v1 }
0x54c6   : > { %12025 = vadd.xlane.f32.xlu1 %v12024_v8 }
0x54c7   : > { %14302 = vmatpush3.bf16.msra.mxu1 %v14301_v49 }
0x54c8   : > { %14303 = vmatprep.subr.bf16.mxu1 %v14975_v1 }
0x54cb   : > { %14305 = vmatpush3.bf16.msra.mxu1 %v14304_v22 }
0x54cc   : > { %14306 = vmatprep.subr.bf16.mxu1 %v14975_v1 }
0x54cf   : > { %14308 = vmatpush3.bf16.msra.mxu1 %v14307_v10 }
0x54d0   : > { %14309 = vmatprep.subr.bf16.mxu1 %v14975_v1 }
0x54d3   : > { %14311 = vmatpush3.bf16.msra.mxu1 %v14310_v24 }
0x54d4   : > { %14312 = vmatprep.subr.bf16.mxu1 %v14975_v1 }
0x54d7   : > { %14314 = vmatpush3.bf16.msra.mxu1 %v14313_v53 }
0x554b   : > { %v12011_v11 = vpop.xlane.xlu1 %12010 }
0x554c   : > { %v12016_v9 = vmul.f32 0.03125, %v12011_v11 }
0x554e   : > { %v16930_v13 = vsub.f32 %v12004_v28, %v12016_v9 }
0x554f   : > { %v12014_v3 = vpop.xlane.xlu1 %12013 }
0x5550   : > { %v12017_v4 = vmul.f32 0.03125, %v12014_v3  ;;  %v12022_v45 = vmul.f32 %v16930_v13, %v16930_v13 }
0x5552   : > { %v16934_v52 = vsub.f32 %v12005_v21, %v12017_v4  ;;  %v12027_v14 = vsel %vm1021_vm10, %v12022_v45, 0.0 }
0x5553   : > { %12028 = vadd.xlane.f32.xlu1 %v12027_v14  ;;  %v12026_v50 = vpop.xlane.xlu1 %12025 }
0x5554   : > { %v12033_v55 = vmul.f32 0.03125, %v12026_v50  ;;  %v12023_v18 = vmul.f32 %v16934_v52, %v16934_v52 }
0x5556   : > { %v12036_v7 = vadd.f32 1e-05, %v12033_v55  ;;  %v12030_v30 = vsel %vm5549_vm4, %v12023_v18, 0.0 }
0x5557   : > { %12031 = vadd.xlane.f32.xlu0 %v12030_v30  ;;  %v12991_v30 = vld [vmem:[#allocation15 + $0x1] ss:$0 sm:$0xff] }
0x5558   : > { %14666 = vrsqrt.f32 %v12036_v7 }
0x5562   : > { %v14667_v12 = vpop.eup %14666 }
0x5563   : > { %v12042_v34 = vmul.f32 %v14667_v12, %v12018_v5 }
0x5565   : > { %v12049_v36 = vmul.f32 %v16947_v25, %v12042_v34 }
0x5567   : > { %v16957_v56 = vadd.f32 %v12055_v35, %v12049_v36 }
0x5569   : > { %14152 = vmatmul.mubr.msk.f32.vlgmr.msra.gmra.mrb[128].mxu0 %vm1021_vm10, %v16957_v56 }
0x556a   : > { %14154 = vmatprep.mubr.msk.f32.mxu0 %vm14974_vm0, %v14973_v0 }
0x55e0   : > { %v12029_v61 = vpop.xlane.xlu1 %12028 }
0x55e1   : > { %v12034_v28 = vmul.f32 0.03125, %v12029_v61 }
0x55e3   : > { %v12037_v5 = vadd.f32 1e-05, %v12034_v28 }
0x55e4   : > { %v12032_v62 = vpop.xlane.xlu0 %12031 }
0x55e5   : > { %14668 = vrsqrt.f32 %v12037_v5  ;;  %v12035_v21 = vmul.f32 0.03125, %v12032_v62  ;;  %v12314_v62 = vrot.slane %v16943_v27, %v16136_v60 }
0x55e7   : > { %v12038_v29 = vadd.f32 1e-05, %v12035_v21 }
0x55e9   : > { %14670 = vrsqrt.f32 %v12038_v29  ;;  %v12321_v29 = vrot.slane %v16952_v23, %v16136_v60 }
0x55ef   : > { %v14669_v41 = vpop.eup %14668 }
0x55f0   : > { %v12043_v1 = vmul.f32 %v14669_v41, %v16930_v13 }
0x55f2   : > { %v12050_v8 = vmul.f32 %v16947_v25, %v12043_v1 }
0x55f3   : > { %v14671_v6 = vpop.eup %14670 }
0x55f4   : > { %v12057_v19 = vadd.f32 %v12055_v35, %v12050_v8  ;;  %v12044_v17 = vmul.f32 %v14671_v6, %v16934_v52  ;;  %v14987_v8 = vmov 1966171168  }
0x55f5   : > { %v12328_v6 = vunpack.c.l.s4 %v14987_v8 }
0x55f6   : > { %14155 = vmatmul.mubr.msk.f32.gmra.mrb[130].mxu0 %vm1021_vm10, %v12057_v19  ;;  %v12051_v44 = vmul.f32 %v16947_v25, %v12044_v17 }
0x55f7   : > { %14157 = vmatprep.mubr.msk.f32.mxu0 %vm14974_vm0, %v14973_v0 }
0x55f8   : > { %v12058_v54 = vadd.f32 %v12055_v35, %v12051_v44 }
0x55fa   : > { %14158 = vmatmul.mubr.msk.f32.gmra.mrb[132].mxu0 %vm1021_vm10, %v12058_v54 }
0x563c   : > { %v12147_v11 = vpop.f32.mrb[128].mxu0 }
0x563d   : > { %v12148_v9 = vadd.f32 %v12971_v58, %v12147_v11  ;;  %v14153_v13 = vpop.f32.mrb[129].mxu0 }
0x563f   : > { %v12161_v3 = vmax.f32 %v12148_v9, 0.0 }
0x5641   : > { %14193 = vmatmul.mubr.f32.vlgmr.msra.gmra.mrb[112].mxu1 %v12161_v3 }
0x5642   : > { %14195 = vmatprep.mubr.msk.f32.mxu1 %vm14974_vm0, %v14973_v0 }
0x56c9   : > { %v12152_v4 = vpop.f32.mrb[130].mxu0 }
0x56ca   : > { %v12153_v45 = vadd.f32 %v12971_v58, %v12152_v4  ;;  %v14156_v52 = vpop.f32.mrb[131].mxu0 }
0x56cc   : > { %v12162_v14 = vmax.f32 %v12153_v45, 0.0 }
0x56cd   : > { %v12157_v50 = vpop.f32.mrb[132].mxu0 }
0x56ce   : > { %v12158_v55 = vadd.f32 %v12971_v58, %v12157_v50  ;;  %v14159_v18 = vpop.f32.mrb[133].mxu0  ;;  %14196 = vmatmul.mubr.f32.gmra.mrb[114].mxu1 %v12162_v14  ;;  %v12329_v58 = vunpack.c.0.s8 %v12328_v6 }
0x56cf   : > { %14198 = vmatprep.mubr.msk.f32.mxu1 %vm14974_vm0, %v14973_v0  ;;  %vm12514_vm0 = vcmask 1040384  }
0x56d0   : > { %v12163_v7 = vmax.f32 %v12158_v55, 0.0  ;;  %v17042_v3 = vsub.s32 %v12329_v58, %v15610_v63 }
0x56d2   : > { %14199 = vmatmul.mubr.f32.gmra.mrb[116].mxu1 %v12163_v7 }
0x5714   : > { %v12255_v25 = vpop.f32.mrb[112].mxu1 }
0x5715   : > { %v12256_v12 = vadd.f32 %v12991_v30, %v12255_v25  ;;  %v14194_v34 = vpop.f32.mrb[113].mxu1 }
0x5717   : > { %v12269_v35 = vadd.f32 %v12256_v12, %v16957_v56 }
0x5719   : > { %v12272_v36 = vsel %vm1021_vm10, %v12269_v35, 0.0 }
0x571a   : > { %12273 = vadd.xlane.f32.xlu1 %v12272_v36 }
0x57a1   : > { %v12260_v37 = vpop.f32.mrb[114].mxu1 }
0x57a2   : > { %v12261_v38 = vadd.f32 %v12991_v30, %v12260_v37  ;;  %v14197_v15 = vpop.f32.mrb[115].mxu1 }
0x57a4   : > { %v12270_v39 = vadd.f32 %v12261_v38, %v12057_v19 }
0x57a5   : > { %v12265_v42 = vpop.f32.mrb[116].mxu1 }
0x57a6   : > { %v12266_v43 = vadd.f32 %v12991_v30, %v12265_v42  ;;  %v14200_v20 = vpop.f32.mrb[117].mxu1  ;;  %v12275_v0 = vsel %vm1021_vm10, %v12270_v39, 0.0 }
0x57a7   : > { %v12274_v46 = vpop.xlane.xlu1 %12273  ;;  %12276 = vadd.xlane.f32.xlu1 %v12275_v0 }
0x57a8   : > { %v12271_v48 = vadd.f32 %v12266_v43, %v12058_v54  ;;  %v12281_v33 = vmul.f32 0.03125, %v12274_v46 }
0x57aa   : > { %v12284_v40 = vsub.f32 %v12269_v35, %v12281_v33  ;;  %v12278_v49 = vsel %vm5549_vm4, %v12271_v48, 0.0 }
0x57ab   : > { %12279 = vadd.xlane.f32.xlu1 %v12278_v49 }
0x57ac   : > { %v12287_v56 = vmul.f32 %v12284_v40, %v12284_v40 }
0x57ae   : > { %v12290_v47 = vsel %vm1021_vm10, %v12287_v56, 0.0 }
0x57af   : > { %12291 = vadd.xlane.f32.xlu1 %v12290_v47 }
0x5834   : > { %v12277_v32 = vpop.xlane.xlu1 %12276 }
0x5835   : > { %v12282_v22 = vmul.f32 0.03125, %v12277_v32 }
0x5837   : > { %v12285_v51 = vsub.f32 %v12270_v39, %v12282_v22 }
0x5838   : > { %v12280_v26 = vpop.xlane.xlu1 %12279 }
0x5839   : > { %v12283_v10 = vmul.f32 0.03125, %v12280_v26  ;;  %v12288_v31 = vmul.f32 %v12285_v51, %v12285_v51 }
0x583b   : > { %v12286_v16 = vsub.f32 %v12271_v48, %v12283_v10  ;;  %v12293_v24 = vsel %vm1021_vm10, %v12288_v31, 0.0 }
0x583c   : > { %12294 = vadd.xlane.f32.xlu1 %v12293_v24  ;;  %v12292_v53 = vpop.xlane.xlu1 %12291 }
0x583d   : > { %v12289_v57 = vmul.f32 %v12286_v16, %v12286_v16  ;;  %v12299_v61 = vmul.f32 0.03125, %v12292_v53 }
0x583f   : > { %v12296_v59 = vsel %vm5549_vm4, %v12289_v57, 0.0  ;;  %v12302_v28 = vadd.f32 1e-05, %v12299_v61 }
0x5840   : > { %12297 = vadd.xlane.f32.xlu1 %v12296_v59 }
0x5841   : > { %14672 = vrsqrt.f32 %v12302_v28 }
0x584b   : > { %v14673_v5 = vpop.eup %14672 }
0x584c   : > { %v12308_v21 = vmul.f32 %v14673_v5, %v12284_v40 }
0x584e   : > { %v12315_v41 = vmul.f32 %v12314_v62, %v12308_v21 }
0x5850   : > { %v12322_v17 = vadd.f32 %v12321_v29, %v12315_v41 }
0x5852   : > { %v12326_v9 = vcombine.high %v12322_v17, %v12322_v17  ;;  %v12333_v23 = vrot.slane %v12322_v17, %v17042_v3 }
0x5854   : > { %v12340_v27 = vrot.slane %v12326_v9, %v17042_v3  ;;  %v12341_v55 = vcombine.high %v12333_v23, %v12333_v23  ;;  %v12349_v25 = vrot.slane %v12333_v23, %v17042_v3 }
0x5856   : > { %v12342_v4 = vcombine.high %v12340_v27, %v12340_v27  ;;  %v12356_v45 = vrot.slane %v12340_v27, %v17042_v3  ;;  %v12363_v36 = vrot.slane %v12341_v55, %v17042_v3  ;;  %v12371_v20 = vcombine.high %v12349_v25, %v12349_v25 }
0x5858   : > { %v12370_v18 = vrot.slane %v12342_v4, %v17042_v3  ;;  %v12380_v7 = vcombine.high %v12356_v45, %v12356_v45  ;;  %v12372_v40 = vcombine.high %v12363_v36, %v12363_v36 }
0x585a   : > { %v12381_v37 = vcombine.high %v12370_v18, %v12370_v18  ;;  %v12457_v38 = vrot.slane %v12380_v7, %v15613_v2 }
0x585c   : > { %v12461_v49 = vrot.slane %v12381_v37, %v15613_v2  ;;  %v12515_v32 = vsel %vm12514_vm0, %v12349_v25, %v12457_v38 }
0x585e   : > { %v12516_v28 = vsel %vm12514_vm0, %v12363_v36, %v12461_v49 }
0x58c9   : > { %v12295_v1 = vpop.xlane.xlu1 %12294 }
0x58ca   : > { %v12300_v19 = vmul.f32 0.03125, %v12295_v1 }
0x58cc   : > { %v12303_v44 = vadd.f32 1e-05, %v12300_v19 }
0x58cd   : > { %v12298_v54 = vpop.xlane.xlu1 %12297 }
0x58ce   : > { %14674 = vrsqrt.f32 %v12303_v44  ;;  %v12301_v11 = vmul.f32 0.03125, %v12298_v54 }
0x58d0   : > { %v12304_v13 = vadd.f32 1e-05, %v12301_v11 }
0x58d2   : > { %14676 = vrsqrt.f32 %v12304_v13 }
0x58d8   : > { %v14675_v60 = vpop.eup %14674 }
0x58d9   : > { %v12309_v52 = vmul.f32 %v14675_v60, %v12285_v51 }
0x58db   : > { %v12316_v14 = vmul.f32 %v12314_v62, %v12309_v52 }
0x58dc   : > { %v14677_v50 = vpop.eup %14676 }
0x58dd   : > { %v12323_v30 = vadd.f32 %v12321_v29, %v12316_v14  ;;  %v12310_v63 = vmul.f32 %v14677_v50, %v12286_v16 }
0x58df   : > { %v12388_v12 = vrot.slane %v12323_v30, %v17042_v3  ;;  %v12407_v34 = vcombine.high %v12323_v30, %v12323_v30  ;;  %v12317_v35 = vmul.f32 %v12314_v62, %v12310_v63 }
0x58e1   : > { %v12389_v15 = vcombine.high %v12388_v12, %v12388_v12  ;;  %v12396_v39 = vrot.slane %v12388_v12, %v17042_v3  ;;  %v12414_v42 = vrot.slane %v12407_v34, %v17042_v3  ;;  %v12324_v43 = vadd.f32 %v12321_v29, %v12317_v35 }
0x58e3   : > { %v12403_v0 = vrot.slane %v12389_v15, %v17042_v3  ;;  %v12404_v46 = vcombine.high %v12396_v39, %v12396_v39  ;;  %v12415_v48 = vcombine.high %v12414_v42, %v12414_v42  ;;  %v12422_v33 = vrot.slane %v12414_v42, %v17042_v3 }
0x58e4   : > { %v12465_v56 = vrot.slane %v12396_v39, %v15613_v2  ;;  %v12438_v47 = vrot.slane %v12324_v43, %v17042_v3 }
0x58e5   : > { %v12405_v22 = vcombine.high %v12403_v0, %v12403_v0  ;;  %v12429_v51 = vrot.slane %v12415_v48, %v17042_v3  ;;  %v12430_v26 = vcombine.high %v12422_v33, %v12422_v33  ;;  %v12469_v10 = vrot.slane %v12403_v0, %v15613_v2 }
0x58e6   : > { %v12473_v31 = vrot.slane %v12404_v46, %v15613_v2  ;;  %v12487_v16 = vrot.slane %v12422_v33, %v15613_v2  ;;  %v12439_v24 = vcombine.high %v12438_v47, %v12438_v47  ;;  %v12517_v5 = vsel %vm12514_vm0, %v12371_v20, %v12465_v56 }
0x58e7   : > { %v12431_v57 = vcombine.high %v12429_v51, %v12429_v51  ;;  %v12477_v59 = vrot.slane %v12405_v22, %v15613_v2  ;;  %v12491_v53 = vrot.slane %v12429_v51, %v15613_v2  ;;  %v12495_v61 = vrot.slane %v12430_v26, %v15613_v2 }
0x58e8   : > { %v12521_v62 = vsel %vm3612_vm3, %v12515_v32, %v12487_v16  ;;  %v12446_v21 = vrot.slane %v12438_v47, %v17042_v3  ;;  %v12519_v8 = vsel %vm12514_vm0, %v12356_v45, %v12473_v31  ;;  %v12518_v6 = vsel %vm12514_vm0, %v12372_v40, %v12469_v10 }
0x58e9   : > { %v12499_v29 = vrot.slane %v12431_v57, %v15613_v2  ;;  %v12522_v41 = vsel %vm3612_vm3, %v12516_v28, %v12491_v53  ;;  %v12523_v1 = vsel %vm3612_vm3, %v12517_v5, %v12495_v61  ;;  %12528 = vst.msk [vmem:[%s898_s1] sm:$0x7] %vm12527_vm1, %v12521_v62  ;;  %v12453_v19 = vrot.slane %v12439_v24, %v17042_v3 }
0x58ea   : > { %12529 = vst.msk [vmem:[%s898_s1 + $0x4] sm:$0x7] %vm12527_vm1, %v12522_v41  ;;  %12530 = vst.msk [vmem:[%s898_s1 + $0x8] sm:$0x7] %vm12527_vm1, %v12523_v1  ;;  %v12503_v17 = vrot.slane %v12446_v21, %v15613_v2  ;;  %v12520_v54 = vsel %vm12514_vm0, %v12370_v18, %v12477_v59 }
0x58eb   : > { %v12524_v44 = vsel %vm3612_vm3, %v12518_v6, %v12499_v29  ;;  %v12507_v58 = vrot.slane %v12453_v19, %v15613_v2 }
0x58ec   : > { %12531 = vst.msk [vmem:[%s898_s1 + $0xc] sm:$0x7] %vm12527_vm1, %v12524_v44  ;;  %v12525_v11 = vsel %vm3612_vm3, %v12519_v8, %v12503_v17 }
0x58ed   : > { %12532 = vst.msk [vmem:[%s898_s1 + $0x10] sm:$0x7] %vm12527_vm1, %v12525_v11  ;;  %v12526_v9 = vsel %vm3612_vm3, %v12520_v54, %v12507_v58 }
0x58ee   : > { %12533 = vst.msk [vmem:[%s898_s1 + $0x14] sm:$0x7] %vm12527_vm1, %v12526_v9 }
0x58ef PF: > { %s17198_s24 = sld [smem:[#allocation21_spill]] }
0x58f5   : > { %s39_s5 = sadd.s32 1, %s17198_s24  }
0x58f6   : > { %p36_p11 = scmp.ge.s32.totalorder %s39_s5, 4  }
0x58f8   :  { %38 = sbr.rel (!%p36_p11) target bundleno = 20 (0x14), region = 205 }
0x58ff   :  { %12555 = vsyncpa [#allocation3], 1 }
0x5900   :  { %12557 = vsyncpa [#allocation3 + $0x1], 1 }
0x5901   :  { %12558 = vsyncpa [#allocation5], 1 }
0x5902   :  { %12559 = vsyncpa [#allocation8], 1 }
0x5903   :  { %12560 = vsyncpa [#allocation11], 1 }
0x5904   :  { %12561 = vsyncpa [#allocation14], 1 }

</bundles_post_ra>
